<compile_context>
chip_gen: v7x
topology: tpu7x:2x2x1
jax: 0.10.0
libtpu: 0.0.40
codegen_flags: <defaults>
</compile_context>

<pallas_src>
import functools

import jax
import jax.numpy as jnp
from jax import lax
from jax.experimental import pallas as pl
from jax.experimental.pallas import tpu as pltpu

LN_EPS = 1e-5            # nn.LayerNorm default
VEC_ROWS = 16            # packed per-layer E-vectors (padded to sublane multiple)
L1V_ROWS = 8             # packed per-layer H-vectors (l1 bias + l1 scale)

# row layout inside the packed per-layer (VEC_ROWS, E) block (all f32)
ROW_SA_B, ROW_CA_B, ROW_L2_B = 0, 1, 2
ROW_N1_W, ROW_N1_B, ROW_N2_W, ROW_N2_B, ROW_N3_W, ROW_N3_B = 3, 4, 5, 6, 7, 8
ROW_SA_S, ROW_CA_S, ROW_L2_S = 9, 10, 11
# rows inside the (L1V_ROWS, H) block
ROW_L1_B, ROW_L1_S = 0, 1
# rows inside the (8, E) grid-invariant block
ROW_QUERY, ROW_FLN_W, ROW_FLN_B, ROW_OP_B = 0, 1, 2, 3


def _layernorm(v, w, b):
    mu = jnp.mean(v, axis=-1, keepdims=True)
    var = jnp.mean((v - mu) ** 2, axis=-1, keepdims=True)
    return (v - mu) * lax.rsqrt(var + LN_EPS) * w + b


def _dequant_bf16(w_i8):
    # int8 -> f32 -> bf16 (both converts are unambiguously supported by Mosaic;
    # integers <= 127 are exactly representable in bf16, so this is lossless).
    return w_i8.astype(jnp.float32).astype(jnp.bfloat16)


def prior_kernel(mem_ref, saca_ref, l1w_ref, l1v_ref, l2w_ref, vec_ref,
                 fin_ref, opw_ref, out_ref, *, layers_per_step):
    """Grid axis 0 = block of `layers_per_step` layers; out_ref carries x."""
    g = pl.program_id(0)
    E = mem_ref.shape[1]

    @pl.when(g == 0)
    def _():
        # learned query token broadcast over the batch
        out_ref[...] = jnp.broadcast_to(fin_ref[ROW_QUERY:ROW_QUERY + 1],
                                        out_ref.shape)

    x = out_ref[...]                                   # f32 (B, E), carried across grid
    mem_bf = mem_ref[...].astype(jnp.bfloat16)         # (B, E)

    # TODO(synk): if bundle dumps ever show vreg spills at very large E, switch
    # this static unroll to lax.fori_loop(..., unroll=True) with dynamic k.
    for k in range(layers_per_step):                   # static unroll over K layers
        vec = vec_ref[k]                               # (VEC_ROWS, E) f32
        sa_b = vec[ROW_SA_B:ROW_SA_B + 1]
        ca_b = vec[ROW_CA_B:ROW_CA_B + 1]
        l2_b = vec[ROW_L2_B:ROW_L2_B + 1]
        n1_w, n1_b = vec[ROW_N1_W:ROW_N1_W + 1], vec[ROW_N1_B:ROW_N1_B + 1]
        n2_w, n2_b = vec[ROW_N2_W:ROW_N2_W + 1], vec[ROW_N2_B:ROW_N2_B + 1]
        n3_w, n3_b = vec[ROW_N3_W:ROW_N3_W + 1], vec[ROW_N3_B:ROW_N3_B + 1]
        sa_s = vec[ROW_SA_S:ROW_SA_S + 1]
        ca_s = vec[ROW_CA_S:ROW_CA_S + 1]
        l2_s = vec[ROW_L2_S:ROW_L2_S + 1]
        l1v = l1v_ref[k]                               # (L1V_ROWS, H) f32
        l1_b = l1v[ROW_L1_B:ROW_L1_B + 1]
        l1_s = l1v[ROW_L1_S:ROW_L1_S + 1]

        # --- self-attention (post-norm). seq_len==1 -> softmax==1, so
        #     MHA(x,x,x) == x @ (Wv.Wo) + (bv.Wo + bo); weight is int8/channel.
        sa_w = _dequant_bf16(saca_ref[k, :, 0:E])
        sa = jnp.dot(x.astype(jnp.bfloat16), sa_w,
                     preferred_element_type=jnp.float32) * sa_s + sa_b
        x = _layernorm(x + sa, n1_w, n1_b)

        # --- cross-attention (memory seq_len==1, same collapse) --------------
        ca_w = _dequant_bf16(saca_ref[k, :, E:2 * E])
        ca = jnp.dot(mem_bf, ca_w,
                     preferred_element_type=jnp.float32) * ca_s + ca_b
        x = _layernorm(x + ca, n2_w, n2_b)

        # --- feed-forward (ReLU, dim_feedforward = 4E) ------------------------
        # TODO(synk): for very large E on v7x (64 MiB VMEM) add an inner
        # emit_pipeline over H-chunks for l1_w/l2_w instead of whole-H blocks.
        h = jnp.dot(x.astype(jnp.bfloat16), _dequant_bf16(l1w_ref[k]),
                    preferred_element_type=jnp.float32) * l1_s + l1_b
        h = jnp.maximum(h, 0.0)
        ff = jnp.dot(h.astype(jnp.bfloat16), _dequant_bf16(l2w_ref[k]),
                     preferred_element_type=jnp.float32) * l2_s + l2_b
        x = _layernorm(x + ff, n3_w, n3_b)

    out_ref[...] = x                                   # carry to the next grid step

    # --- final LayerNorm + output projection, only on the last grid step -----
    @pl.when(g == pl.num_programs(0) - 1)
    def _():
        def final(op_buf, sem):
            # op_w lives in HBM (pl.ANY) - single manual DMA, no resident
            # double-buffer for the whole run.
            cp = pltpu.make_async_copy(opw_ref, op_buf, sem)
            cp.start()
            y = _layernorm(x, fin_ref[ROW_FLN_W:ROW_FLN_W + 1],
                           fin_ref[ROW_FLN_B:ROW_FLN_B + 1])
            cp.wait()
            out_ref[...] = (jnp.dot(y.astype(jnp.bfloat16), op_buf[...],
                                    preferred_element_type=jnp.float32)
                            + fin_ref[ROW_OP_B:ROW_OP_B + 1]).astype(out_ref.dtype)

        pl.run_scoped(final,
                      pltpu.VMEM((E, E), jnp.bfloat16),
                      pltpu.SemaphoreType.DMA(()))


# ----------------------------------------------------------------------------
# offline parameter preparation (fusion, int8 quantization, packing)
# ----------------------------------------------------------------------------
def _quantize_per_out_channel(w):
    """Symmetric int8, per-output-channel (last axis). w: (L, In, Out)."""
    amax = jnp.max(jnp.abs(w), axis=1, keepdims=True)
    scale = jnp.maximum(amax, 1e-12) / 127.0                     # (L, 1, Out)
    q = jnp.clip(jnp.round(w / scale), -127.0, 127.0).astype(jnp.int8)
    return q, scale.astype(jnp.float32)


def prepare_kernel_params(p):
    """One-time (per-model) fusion / quantization / packing."""
    L, _, E = p["sa_v_w"].shape

    # seq_len == 1 collapse: out_proj(v_proj(z)) == z @ (Wv Wo) + (bv Wo + bo)
    sa_w = jnp.einsum("lij,ljk->lik", p["sa_v_w"], p["sa_o_w"])
    sa_b = jnp.einsum("lij,ljk->lik", p["sa_v_b"], p["sa_o_w"]) + p["sa_o_b"]
    ca_w = jnp.einsum("lij,ljk->lik", p["ca_v_w"], p["ca_o_w"])
    ca_b = jnp.einsum("lij,ljk->lik", p["ca_v_b"], p["ca_o_w"]) + p["ca_o_b"]

    sa_q, sa_s = _quantize_per_out_channel(sa_w)
    ca_q, ca_s = _quantize_per_out_channel(ca_w)
    l1_q, l1_s = _quantize_per_out_channel(p["l1_w"])
    l2_q, l2_s = _quantize_per_out_channel(p["l2_w"])

    saca = jnp.concatenate([sa_q, ca_q], axis=2)                 # (L, E, 2E) int8

    vec = jnp.concatenate(
        [sa_b, ca_b, p["l2_b"],
         p["n1_w"], p["n1_b"], p["n2_w"], p["n2_b"], p["n3_w"], p["n3_b"],
         sa_s, ca_s, l2_s], axis=1).astype(jnp.float32)          # (L, 12, E)
    vec = jnp.pad(vec, ((0, 0), (0, VEC_ROWS - vec.shape[1]), (0, 0)))

    l1v = jnp.concatenate([p["l1_b"], l1_s], axis=1).astype(jnp.float32)
    l1v = jnp.pad(l1v, ((0, 0), (0, L1V_ROWS - l1v.shape[1]), (0, 0)))

    fin = jnp.concatenate(
        [p["query"].reshape(1, E), p["fln_w"], p["fln_b"], p["op_b"],
         jnp.zeros((4, E), jnp.float32)], axis=0).astype(jnp.float32)   # (8, E)

    return {
        "saca_w": saca,
        "l1_w": l1_q,
        "l1v": l1v,
        "l2_w": l2_q,
        "vec": vec,
        "fin": fin,
        "op_w": p["op_w"].astype(jnp.bfloat16),
    }


# ----------------------------------------------------------------------------
# VMEM budgeting (generation-aware) and launch wrapper
# ----------------------------------------------------------------------------
def _physical_vmem_bytes():
    try:
        return int(pltpu.get_tpu_info().vmem_capacity_bytes)
    except Exception:
        return 64 << 20        # conservative fallback (v7x per-core VMEM)


def _stream_bytes_per_layer(E, H):
    # int8 weights + f32 packed vectors DMA'd per layer
    return (2 * E * E + 2 * E * H) + (VEC_ROWS * E + L1V_ROWS * H) * 4


def _fixed_bytes(E, H, Bp):
    invariants = 2 * (Bp * E + 8 * E) * 4          # double-buffered mem + fin
    out_buf = Bp * E * 4                           # carried activation block
    opw_buf = E * E * 2                            # run_scoped out-proj buffer
    dequant_tmp = 2 * E * H * (4 + 2)              # f32 + bf16 dequant temporaries
    acts = 2 * (Bp * E + Bp * H) * 4               # x / h intermediates
    return invariants + out_buf + opw_buf + dequant_tmp + acts + (2 << 20)


def _pick_layers_per_step(L, E, H, Bp, budget_bytes):
    stream = _stream_bytes_per_layer(E, H)
    fixed = _fixed_bytes(E, H, Bp)
    for k in (8, 6, 4, 3, 2, 1):
        if L % k == 0 and 2 * k * stream + fixed <= budget_bytes:
            return k
    # TODO(synk): for very large E on v7x even K=1 may exceed VMEM; add the
    # H-chunked FFN-weight pipeline noted in the kernel instead of failing.
    return 1


def prior_forward(text_emb, kp):
    B, E = text_emb.shape
    L = kp["saca_w"].shape[0]
    H = kp["l1_w"].shape[-1]
    Bp = ((B + 7) // 8) * 8                        # full sublane tiles

    cap = _physical_vmem_bytes()
    K = _pick_layers_per_step(L, E, H, Bp, budget_bytes=int(0.45 * cap))
    n_steps = L // K

    mem = text_emb.astype(jnp.float32)
    if Bp != B:
        mem = jnp.pad(mem, ((0, Bp - B), (0, 0)))

    needed = 2 * K * _stream_bytes_per_layer(E, H) + _fixed_bytes(E, H, Bp)
    vmem_limit = int(min(max(needed + (8 << 20), 16 << 20), int(0.8 * cap)))

    lw = lambda g: (g, 0, 0)       # per-layer-block tensors
    c2 = lambda g: (0, 0)          # grid-invariant tensors
    in_specs = [
        pl.BlockSpec((Bp, E), c2),                 # memory (text_emb), f32
        pl.BlockSpec((K, E, 2 * E), lw),           # fused self+cross attn weights, int8
        pl.BlockSpec((K, E, H), lw),               # ffn linear1 weight, int8
        pl.BlockSpec((K, L1V_ROWS, H), lw),        # ffn linear1 bias + scale, f32
        pl.BlockSpec((K, H, E), lw),               # ffn linear2 weight, int8
        pl.BlockSpec((K, VEC_ROWS, E), lw),        # packed per-layer E-vectors, f32
        pl.BlockSpec((8, E), c2),                  # query / final-ln / out-proj bias
        pl.BlockSpec(memory_space=pl.ANY),         # out-proj weight stays in HBM
    ]

    out = pl.pallas_call(
        functools.partial(prior_kernel, layers_per_step=K),
        out_shape=jax.ShapeDtypeStruct((Bp, E), jnp.float32),
        grid_spec=pltpu.PrefetchScalarGridSpec(
            num_scalar_prefetch=0,
            grid=(n_steps,),
            in_specs=in_specs,
            out_specs=pl.BlockSpec((Bp, E), c2),
        ),
        compiler_params=pltpu.CompilerParams(
            dimension_semantics=("arbitrary",),
            vmem_limit_bytes=vmem_limit),
    )(mem, kp["saca_w"], kp["l1_w"], kp["l1v"], kp["l2_w"], kp["vec"],
      kp["fin"], kp["op_w"])
    return out[:B]


# ----------------------------------------------------------------------------
# synthetic init + full-fidelity pure-JAX reference
# ----------------------------------------------------------------------------
def init_params(key, embed_dim, num_layers):
    """Deterministic synthetic init (shapes follow nn.TransformerDecoderLayer)."""
    E, H, L = embed_dim, 4 * embed_dim, num_layers
    keys = iter(jax.random.split(key, 32))

    def w(shape, scale=0.02):
        return (scale * jax.random.normal(next(keys), shape)).astype(jnp.float32)

    ones_E = jnp.ones((L, 1, E), jnp.float32)
    zeros_E = jnp.zeros((L, 1, E), jnp.float32)
    return {
        "query": w((1, 1, E), 1.0),                      # torch.randn(1, 1, E)
        # q/k projections only matter when seq_len > 1; kept for the
        # full-fidelity reference (the kernel provably does not need them).
        "sa_q_w": w((L, E, E)), "sa_q_b": w((L, 1, E)),
        "sa_k_w": w((L, E, E)), "sa_k_b": w((L, 1, E)),
        "sa_v_w": w((L, E, E)), "sa_v_b": w((L, 1, E)),
        "sa_o_w": w((L, E, E)), "sa_o_b": w((L, 1, E)),
        "ca_q_w": w((L, E, E)), "ca_q_b": w((L, 1, E)),
        "ca_k_w": w((L, E, E)), "ca_k_b": w((L, 1, E)),
        "ca_v_w": w((L, E, E)), "ca_v_b": w((L, 1, E)),
        "ca_o_w": w((L, E, E)), "ca_o_b": w((L, 1, E)),
        "l1_w": w((L, E, H)), "l1_b": w((L, 1, H)),
        "l2_w": w((L, H, E)), "l2_b": w((L, 1, E)),
        "n1_w": ones_E, "n1_b": zeros_E,
        "n2_w": ones_E, "n2_b": zeros_E,
        "n3_w": ones_E, "n3_b": zeros_E,
        "fln_w": jnp.ones((1, E), jnp.float32), "fln_b": jnp.zeros((1, E), jnp.float32),
        "op_w": w((E, E)), "op_b": w((1, E)),
    }


def prior_reference(text_emb, p, nhead=8):
    """Pure-JAX f32 reference with the *full* multi-head attention path."""
    B, E = text_emb.shape
    L = p["sa_v_w"].shape[0]
    hd = E // nhead
    mem = text_emb
    x = jnp.broadcast_to(p["query"].reshape(1, E), (B, E))

    def ln(v, w, b):
        mu = v.mean(-1, keepdims=True)
        var = ((v - mu) ** 2).mean(-1, keepdims=True)
        return (v - mu) / jnp.sqrt(var + LN_EPS) * w + b

    def mha(q_in, kv_in, qw, qb, kw, kb, vw, vb, ow, ob):
        q = (q_in @ qw + qb).reshape(B, nhead, hd)
        k = (kv_in @ kw + kb).reshape(B, nhead, hd)
        v = (kv_in @ vw + vb).reshape(B, nhead, hd)
        s = jnp.sum(q * k, axis=-1, keepdims=True) / jnp.sqrt(float(hd))
        a = jax.nn.softmax(s, axis=-1)          # single key -> exactly 1
        return (a * v).reshape(B, E) @ ow + ob

    for l in range(L):
        sa = mha(x, x,
                 p["sa_q_w"][l], p["sa_q_b"][l, 0], p["sa_k_w"][l], p["sa_k_b"][l, 0],
                 p["sa_v_w"][l], p["sa_v_b"][l, 0], p["sa_o_w"][l], p["sa_o_b"][l, 0])
        x = ln(x + sa, p["n1_w"][l, 0], p["n1_b"][l, 0])
        ca = mha(x, mem,
                 p["ca_q_w"][l], p["ca_q_b"][l, 0], p["ca_k_w"][l], p["ca_k_b"][l, 0],
                 p["ca_v_w"][l], p["ca_v_b"][l, 0], p["ca_o_w"][l], p["ca_o_b"][l, 0])
        x = ln(x + ca, p["n2_w"][l, 0], p["n2_b"][l, 0])
        h = jnp.maximum(x @ p["l1_w"][l] + p["l1_b"][l, 0], 0.0)
        ff = h @ p["l2_w"][l] + p["l2_b"][l, 0]
        x = ln(x + ff, p["n3_w"][l, 0], p["n3_b"][l, 0])

    y = ln(x, p["fln_w"][0], p["fln_b"][0])
    return y @ p["op_w"] + p["op_b"][0]


if __name__ == "__main__":
    # small shapes: batch=4 (padded to 8 inside), embed_dim=128, 16 layers
    # (module default is 24).  L=16 -> K=8 layers per grid step, 2 grid steps:
    # exercises both the init path and the carried-activation path.
    B, E, L = 4, 128, 16
    key = jax.random.PRNGKey(0)
    pkey, xkey = jax.random.split(key)
    params = init_params(pkey, E, L)
    kparams = prepare_kernel_params(params)       # one-time offline fusion/packing
    text_emb = jax.random.normal(xkey, (B, E), dtype=jnp.float32)

    out = jax.block_until_ready(prior_forward(text_emb, kparams))
    ref = prior_reference(text_emb, params)

    assert out.shape == (B, E), out.shape
    max_err = float(jnp.max(jnp.abs(out - ref)))
    # int8 per-channel weights + bf16 activation streaming -> loosened tolerance
    # vs the exact f32 reference.
    assert jnp.allclose(out, ref, atol=5e-2, rtol=5e-2), f"max abs err {max_err}"
    print("KERNEL_OK")
</pallas_src>

<mosaic_0001>
module attributes {stable_mosaic.version = 11 : i64} {
  func.func @prior_kernel(%arg0: i32, %arg1: memref<8x128xf32, #tpu.memory_space<vmem>>, %arg2: memref<8x128x256xi8, #tpu.memory_space<vmem>>, %arg3: memref<8x128x512xi8, #tpu.memory_space<vmem>>, %arg4: memref<8x8x512xf32, #tpu.memory_space<vmem>>, %arg5: memref<8x512x128xi8, #tpu.memory_space<vmem>>, %arg6: memref<8x16x128xf32, #tpu.memory_space<vmem>>, %arg7: memref<8x128xf32, #tpu.memory_space<vmem>>, %arg8: memref<128x128xbf16, #tpu.memory_space<any>>, %arg9: memref<8x128xf32, #tpu.memory_space<vmem>>) attributes {dimension_semantics = [#tpu.dimension_semantics<arbitrary>], iteration_bounds = array<i64: 2>, scalar_prefetch = 0 : i64, scratch_operands = 0 : i64, tpu.core_type = #tpu.core_type<tc>, window_params = [{pipeline_mode = #tpu.pipeline_mode<synchronous>, transform_indices = @transform_0, window_bounds = array<i64: 8, 128>}, {transform_indices = @transform_1, window_bounds = array<i64: 8, 128, 256>}, {transform_indices = @transform_2, window_bounds = array<i64: 8, 128, 512>}, {transform_indices = @transform_3, window_bounds = array<i64: 8, 8, 512>}, {transform_indices = @transform_4, window_bounds = array<i64: 8, 512, 128>}, {transform_indices = @transform_5, window_bounds = array<i64: 8, 16, 128>}, {pipeline_mode = #tpu.pipeline_mode<synchronous>, transform_indices = @transform_6, window_bounds = array<i64: 8, 128>}, {}, {pipeline_mode = #tpu.pipeline_mode<synchronous>, transform_indices = @transform_8, window_bounds = array<i64: 8, 128>}]} {
    %c0_i32 = arith.constant 0 : i32
    %0 = arith.cmpi eq, %arg0, %c0_i32 : i32
    %1 = arith.extui %0 : i1 to i32
    %c0_i32_0 = arith.constant 0 : i32
    %2 = arith.cmpi ne, %1, %c0_i32_0 : i32
    scf.if %2 {
      %c0_302 = arith.constant 0 : index
      %c0_303 = arith.constant 0 : index
      %1034 = vector.load %arg7[%c0_302, %c0_303] : memref<8x128xf32, #tpu.memory_space<vmem>>, vector<1x128xf32>
      %1035 = vector.shape_cast %1034 : vector<1x128xf32> to vector<1x128xf32>
      %1036 = vector.broadcast %1035 : vector<1x128xf32> to vector<8x128xf32>
      %c0_304 = arith.constant 0 : index
      %c0_305 = arith.constant 0 : index
      %1037 = vector.load %arg9[%c0_304, %c0_305] : memref<8x128xf32, #tpu.memory_space<vmem>>, vector<8x128xf32>
      tpu.vector_store %arg9[%c0_304, %c0_305], %1036 {strides = array<i32>} : memref<8x128xf32, #tpu.memory_space<vmem>>, vector<8x128xf32>,
    } else {
    }
    %c0 = arith.constant 0 : index
    %c0_1 = arith.constant 0 : index
    %3 = vector.load %arg9[%c0, %c0_1] : memref<8x128xf32, #tpu.memory_space<vmem>>, vector<8x128xf32>
    %c0_2 = arith.constant 0 : index
    %c0_3 = arith.constant 0 : index
    %4 = vector.load %arg1[%c0_2, %c0_3] : memref<8x128xf32, #tpu.memory_space<vmem>>, vector<8x128xf32>
    %5 = arith.truncf %4 : vector<8x128xf32> to vector<8x128xbf16>
    %c0_4 = arith.constant 0 : index
    %c0_5 = arith.constant 0 : index
    %c0_6 = arith.constant 0 : index
    %6 = vector.load %arg6[%c0_4, %c0_5, %c0_6] : memref<8x16x128xf32, #tpu.memory_space<vmem>>, vector<1x16x128xf32>
    %7 = vector.shape_cast %6 : vector<1x16x128xf32> to vector<16x128xf32>
    %8 = vector.extract_strided_slice %7 {offsets = [0, 0], sizes = [1, 128], strides = [1, 1]} : vector<16x128xf32> to vector<1x128xf32>
    %9 = vector.extract_strided_slice %7 {offsets = [1, 0], sizes = [1, 128], strides = [1, 1]} : vector<16x128xf32> to vector<1x128xf32>
    %10 = vector.extract_strided_slice %7 {offsets = [2, 0], sizes = [1, 128], strides = [1, 1]} : vector<16x128xf32> to vector<1x128xf32>
    %11 = vector.extract_strided_slice %7 {offsets = [3, 0], sizes = [1, 128], strides = [1, 1]} : vector<16x128xf32> to vector<1x128xf32>
    %12 = vector.extract_strided_slice %7 {offsets = [4, 0], sizes = [1, 128], strides = [1, 1]} : vector<16x128xf32> to vector<1x128xf32>
    %13 = vector.extract_strided_slice %7 {offsets = [5, 0], sizes = [1, 128], strides = [1, 1]} : vector<16x128xf32> to vector<1x128xf32>
    %14 = vector.extract_strided_slice %7 {offsets = [6, 0], sizes = [1, 128], strides = [1, 1]} : vector<16x128xf32> to vector<1x128xf32>
    %15 = vector.extract_strided_slice %7 {offsets = [7, 0], sizes = [1, 128], strides = [1, 1]} : vector<16x128xf32> to vector<1x128xf32>
    %16 = vector.extract_strided_slice %7 {offsets = [8, 0], sizes = [1, 128], strides = [1, 1]} : vector<16x128xf32> to vector<1x128xf32>
    %17 = vector.extract_strided_slice %7 {offsets = [9, 0], sizes = [1, 128], strides = [1, 1]} : vector<16x128xf32> to vector<1x128xf32>
    %18 = vector.extract_strided_slice %7 {offsets = [10, 0], sizes = [1, 128], strides = [1, 1]} : vector<16x128xf32> to vector<1x128xf32>
    %19 = vector.extract_strided_slice %7 {offsets = [11, 0], sizes = [1, 128], strides = [1, 1]} : vector<16x128xf32> to vector<1x128xf32>
    %c0_7 = arith.constant 0 : index
    %c0_8 = arith.constant 0 : index
    %c0_9 = arith.constant 0 : index
    %20 = vector.load %arg4[%c0_7, %c0_8, %c0_9] : memref<8x8x512xf32, #tpu.memory_space<vmem>>, vector<1x8x512xf32>
    %21 = vector.shape_cast %20 : vector<1x8x512xf32> to vector<8x512xf32>
    %22 = vector.extract_strided_slice %21 {offsets = [0, 0], sizes = [1, 512], strides = [1, 1]} : vector<8x512xf32> to vector<1x512xf32>
    %23 = vector.extract_strided_slice %21 {offsets = [1, 0], sizes = [1, 512], strides = [1, 1]} : vector<8x512xf32> to vector<1x512xf32>
    %c0_10 = arith.constant 0 : index
    %c0_11 = arith.constant 0 : index
    %c0_12 = arith.constant 0 : index
    %24 = vector.load %arg2[%c0_10, %c0_11, %c0_12] : memref<8x128x256xi8, #tpu.memory_space<vmem>>, vector<1x128x128xi8>
    %25 = vector.shape_cast %24 : vector<1x128x128xi8> to vector<128x128xi8>
    %26 = arith.sitofp %25 : vector<128x128xi8> to vector<128x128xf32>
    %27 = arith.truncf %26 : vector<128x128xf32> to vector<128x128xbf16>
    %28 = arith.truncf %3 : vector<8x128xf32> to vector<8x128xbf16>
    %cst = arith.constant dense<0.000000e+00> : vector<8x128xf32>
    %29 = tpu.matmul %28, %27, %cst {dimension_numbers = #tpu.dot_dimension_numbers<[1], [0], [0], [1], [0, 0, 1, 1], [], []>} : vector<8x128xbf16>, vector<128x128xbf16>, vector<8x128xf32> -> vector<8x128xf32>
    %30 = vector.broadcast %17 : vector<1x128xf32> to vector<8x128xf32>
    %31 = arith.mulf %29, %30 : vector<8x128xf32>
    %32 = vector.broadcast %8 : vector<1x128xf32> to vector<8x128xf32>
    %33 = arith.addf %31, %32 : vector<8x128xf32>
    %34 = arith.addf %3, %33 : vector<8x128xf32>
    %cst_13 = arith.constant dense<0.000000e+00> : vector<8xf32>
    %35 = vector.multi_reduction <add>, %34, %cst_13 [1] : vector<8x128xf32> to vector<8xf32>
    %36 = vector.shape_cast %35 : vector<8xf32> to vector<8x1xf32>
    %cst_14 = arith.constant 1.280000e+02 : f32
    %37 = vector.broadcast %cst_14 : f32 to vector<8x1xf32>
    %38 = arith.divf %36, %37 : vector<8x1xf32>
    %39 = vector.broadcast %38 : vector<8x1xf32> to vector<8x128xf32>
    %40 = arith.subf %34, %39 : vector<8x128xf32>
    %41 = arith.mulf %40, %40 : vector<8x128xf32>
    %cst_15 = arith.constant dense<0.000000e+00> : vector<8xf32>
    %42 = vector.multi_reduction <add>, %41, %cst_15 [1] : vector<8x128xf32> to vector<8xf32>
    %43 = vector.shape_cast %42 : vector<8xf32> to vector<8x1xf32>
    %cst_16 = arith.constant 1.280000e+02 : f32
    %44 = vector.broadcast %cst_16 : f32 to vector<8x1xf32>
    %45 = arith.divf %43, %44 : vector<8x1xf32>
    %46 = vector.broadcast %38 : vector<8x1xf32> to vector<8x128xf32>
    %47 = arith.subf %34, %46 : vector<8x128xf32>
    %cst_17 = arith.constant 9.99999974E-6 : f32
    %48 = vector.broadcast %cst_17 : f32 to vector<8x1xf32>
    %49 = arith.addf %45, %48 : vector<8x1xf32>
    %50 = math.rsqrt %49 : vector<8x1xf32>
    %51 = vector.broadcast %50 : vector<8x1xf32> to vector<8x128xf32>
    %52 = arith.mulf %47, %51 : vector<8x128xf32>
    %53 = vector.broadcast %11 : vector<1x128xf32> to vector<8x128xf32>
    %54 = arith.mulf %52, %53 : vector<8x128xf32>
    %55 = vector.broadcast %12 : vector<1x128xf32> to vector<8x128xf32>
    %56 = arith.addf %54, %55 : vector<8x128xf32>
    %c0_18 = arith.constant 0 : index
    %c0_19 = arith.constant 0 : index
    %c128 = arith.constant 128 : index
    %57 = vector.load %arg2[%c0_18, %c0_19, %c128] : memref<8x128x256xi8, #tpu.memory_space<vmem>>, vector<1x128x128xi8>
    %58 = vector.shape_cast %57 : vector<1x128x128xi8> to vector<128x128xi8>
    %59 = arith.sitofp %58 : vector<128x128xi8> to vector<128x128xf32>
    %60 = arith.truncf %59 : vector<128x128xf32> to vector<128x128xbf16>
    %cst_20 = arith.constant dense<0.000000e+00> : vector<8x128xf32>
    %61 = tpu.matmul %5, %60, %cst_20 {dimension_numbers = #tpu.dot_dimension_numbers<[1], [0], [0], [1], [0, 0, 1, 1], [], []>} : vector<8x128xbf16>, vector<128x128xbf16>, vector<8x128xf32> -> vector<8x128xf32>
    %62 = vector.broadcast %18 : vector<1x128xf32> to vector<8x128xf32>
    %63 = arith.mulf %61, %62 : vector<8x128xf32>
    %64 = vector.broadcast %9 : vector<1x128xf32> to vector<8x128xf32>
    %65 = arith.addf %63, %64 : vector<8x128xf32>
    %66 = arith.addf %56, %65 : vector<8x128xf32>
    %cst_21 = arith.constant dense<0.000000e+00> : vector<8xf32>
    %67 = vector.multi_reduction <add>, %66, %cst_21 [1] : vector<8x128xf32> to vector<8xf32>
    %68 = vector.shape_cast %67 : vector<8xf32> to vector<8x1xf32>
    %cst_22 = arith.constant 1.280000e+02 : f32
    %69 = vector.broadcast %cst_22 : f32 to vector<8x1xf32>
    %70 = arith.divf %68, %69 : vector<8x1xf32>
    %71 = vector.broadcast %70 : vector<8x1xf32> to vector<8x128xf32>
    %72 = arith.subf %66, %71 : vector<8x128xf32>
    %73 = arith.mulf %72, %72 : vector<8x128xf32>
    %cst_23 = arith.constant dense<0.000000e+00> : vector<8xf32>
    %74 = vector.multi_reduction <add>, %73, %cst_23 [1] : vector<8x128xf32> to vector<8xf32>
    %75 = vector.shape_cast %74 : vector<8xf32> to vector<8x1xf32>
    %cst_24 = arith.constant 1.280000e+02 : f32
    %76 = vector.broadcast %cst_24 : f32 to vector<8x1xf32>
    %77 = arith.divf %75, %76 : vector<8x1xf32>
    %78 = vector.broadcast %70 : vector<8x1xf32> to vector<8x128xf32>
    %79 = arith.subf %66, %78 : vector<8x128xf32>
    %cst_25 = arith.constant 9.99999974E-6 : f32
    %80 = vector.broadcast %cst_25 : f32 to vector<8x1xf32>
    %81 = arith.addf %77, %80 : vector<8x1xf32>
    %82 = math.rsqrt %81 : vector<8x1xf32>
    %83 = vector.broadcast %82 : vector<8x1xf32> to vector<8x128xf32>
    %84 = arith.mulf %79, %83 : vector<8x128xf32>
    %85 = vector.broadcast %13 : vector<1x128xf32> to vector<8x128xf32>
    %86 = arith.mulf %84, %85 : vector<8x128xf32>
    %87 = vector.broadcast %14 : vector<1x128xf32> to vector<8x128xf32>
    %88 = arith.addf %86, %87 : vector<8x128xf32>
    %89 = arith.truncf %88 : vector<8x128xf32> to vector<8x128xbf16>
    %c0_26 = arith.constant 0 : index
    %c0_27 = arith.constant 0 : index
    %c0_28 = arith.constant 0 : index
    %90 = vector.load %arg3[%c0_26, %c0_27, %c0_28] : memref<8x128x512xi8, #tpu.memory_space<vmem>>, vector<1x128x512xi8>
    %91 = vector.shape_cast %90 : vector<1x128x512xi8> to vector<128x512xi8>
    %92 = arith.sitofp %91 : vector<128x512xi8> to vector<128x512xf32>
    %93 = arith.truncf %92 : vector<128x512xf32> to vector<128x512xbf16>
    %cst_29 = arith.constant dense<0.000000e+00> : vector<8x512xf32>
    %94 = tpu.matmul %89, %93, %cst_29 {dimension_numbers = #tpu.dot_dimension_numbers<[1], [0], [0], [1], [0, 0, 1, 1], [], []>} : vector<8x128xbf16>, vector<128x512xbf16>, vector<8x512xf32> -> vector<8x512xf32>
    %95 = vector.broadcast %23 : vector<1x512xf32> to vector<8x512xf32>
    %96 = arith.mulf %94, %95 : vector<8x512xf32>
    %97 = vector.broadcast %22 : vector<1x512xf32> to vector<8x512xf32>
    %98 = arith.addf %96, %97 : vector<8x512xf32>
    %cst_30 = arith.constant 0.000000e+00 : f32
    %99 = vector.broadcast %cst_30 : f32 to vector<8x512xf32>
    %100 = arith.maximumf %98, %99 : vector<8x512xf32>
    %101 = arith.truncf %100 : vector<8x512xf32> to vector<8x512xbf16>
    %c0_31 = arith.constant 0 : index
    %c0_32 = arith.constant 0 : index
    %c0_33 = arith.constant 0 : index
    %102 = vector.load %arg5[%c0_31, %c0_32, %c0_33] : memref<8x512x128xi8, #tpu.memory_space<vmem>>, vector<1x512x128xi8>
    %103 = vector.shape_cast %102 : vector<1x512x128xi8> to vector<512x128xi8>
    %104 = arith.sitofp %103 : vector<512x128xi8> to vector<512x128xf32>
    %105 = arith.truncf %104 : vector<512x128xf32> to vector<512x128xbf16>
    %cst_34 = arith.constant dense<0.000000e+00> : vector<8x128xf32>
    %106 = tpu.matmul %101, %105, %cst_34 {dimension_numbers = #tpu.dot_dimension_numbers<[1], [0], [0], [1], [0, 0, 1, 1], [], []>} : vector<8x512xbf16>, vector<512x128xbf16>, vector<8x128xf32> -> vector<8x128xf32>
    %107 = vector.broadcast %19 : vector<1x128xf32> to vector<8x128xf32>
    %108 = arith.mulf %106, %107 : vector<8x128xf32>
    %109 = vector.broadcast %10 : vector<1x128xf32> to vector<8x128xf32>
    %110 = arith.addf %108, %109 : vector<8x128xf32>
    %111 = arith.addf %88, %110 : vector<8x128xf32>
    %cst_35 = arith.constant dense<0.000000e+00> : vector<8xf32>
    %112 = vector.multi_reduction <add>, %111, %cst_35 [1] : vector<8x128xf32> to vector<8xf32>
    %113 = vector.shape_cast %112 : vector<8xf32> to vector<8x1xf32>
    %cst_36 = arith.constant 1.280000e+02 : f32
    %114 = vector.broadcast %cst_36 : f32 to vector<8x1xf32>
    %115 = arith.divf %113, %114 : vector<8x1xf32>
    %116 = vector.broadcast %115 : vector<8x1xf32> to vector<8x128xf32>
    %117 = arith.subf %111, %116 : vector<8x128xf32>
    %118 = arith.mulf %117, %117 : vector<8x128xf32>
    %cst_37 = arith.constant dense<0.000000e+00> : vector<8xf32>
    %119 = vector.multi_reduction <add>, %118, %cst_37 [1] : vector<8x128xf32> to vector<8xf32>
    %120 = vector.shape_cast %119 : vector<8xf32> to vector<8x1xf32>
    %cst_38 = arith.constant 1.280000e+02 : f32
    %121 = vector.broadcast %cst_38 : f32 to vector<8x1xf32>
    %122 = arith.divf %120, %121 : vector<8x1xf32>
    %123 = vector.broadcast %115 : vector<8x1xf32> to vector<8x128xf32>
    %124 = arith.subf %111, %123 : vector<8x128xf32>
    %cst_39 = arith.constant 9.99999974E-6 : f32
    %125 = vector.broadcast %cst_39 : f32 to vector<8x1xf32>
    %126 = arith.addf %122, %125 : vector<8x1xf32>
    %127 = math.rsqrt %126 : vector<8x1xf32>
    %128 = vector.broadcast %127 : vector<8x1xf32> to vector<8x128xf32>
    %129 = arith.mulf %124, %128 : vector<8x128xf32>
    %130 = vector.broadcast %15 : vector<1x128xf32> to vector<8x128xf32>
    %131 = arith.mulf %129, %130 : vector<8x128xf32>
    %132 = vector.broadcast %16 : vector<1x128xf32> to vector<8x128xf32>
    %133 = arith.addf %131, %132 : vector<8x128xf32>
    %c1 = arith.constant 1 : index
    %c0_40 = arith.constant 0 : index
    %c0_41 = arith.constant 0 : index
    %134 = vector.load %arg6[%c1, %c0_40, %c0_41] : memref<8x16x128xf32, #tpu.memory_space<vmem>>, vector<1x16x128xf32>
    %135 = vector.shape_cast %134 : vector<1x16x128xf32> to vector<16x128xf32>
    %136 = vector.extract_strided_slice %135 {offsets = [0, 0], sizes = [1, 128], strides = [1, 1]} : vector<16x128xf32> to vector<1x128xf32>
    %137 = vector.extract_strided_slice %135 {offsets = [1, 0], sizes = [1, 128], strides = [1, 1]} : vector<16x128xf32> to vector<1x128xf32>
    %138 = vector.extract_strided_slice %135 {offsets = [2, 0], sizes = [1, 128], strides = [1, 1]} : vector<16x128xf32> to vector<1x128xf32>
    %139 = vector.extract_strided_slice %135 {offsets = [3, 0], sizes = [1, 128], strides = [1, 1]} : vector<16x128xf32> to vector<1x128xf32>
    %140 = vector.extract_strided_slice %135 {offsets = [4, 0], sizes = [1, 128], strides = [1, 1]} : vector<16x128xf32> to vector<1x128xf32>
    %141 = vector.extract_strided_slice %135 {offsets = [5, 0], sizes = [1, 128], strides = [1, 1]} : vector<16x128xf32> to vector<1x128xf32>
    %142 = vector.extract_strided_slice %135 {offsets = [6, 0], sizes = [1, 128], strides = [1, 1]} : vector<16x128xf32> to vector<1x128xf32>
    %143 = vector.extract_strided_slice %135 {offsets = [7, 0], sizes = [1, 128], strides = [1, 1]} : vector<16x128xf32> to vector<1x128xf32>
    %144 = vector.extract_strided_slice %135 {offsets = [8, 0], sizes = [1, 128], strides = [1, 1]} : vector<16x128xf32> to vector<1x128xf32>
    %145 = vector.extract_strided_slice %135 {offsets = [9, 0], sizes = [1, 128], strides = [1, 1]} : vector<16x128xf32> to vector<1x128xf32>
    %146 = vector.extract_strided_slice %135 {offsets = [10, 0], sizes = [1, 128], strides = [1, 1]} : vector<16x128xf32> to vector<1x128xf32>
    %147 = vector.extract_strided_slice %135 {offsets = [11, 0], sizes = [1, 128], strides = [1, 1]} : vector<16x128xf32> to vector<1x128xf32>
    %c1_42 = arith.constant 1 : index
    %c0_43 = arith.constant 0 : index
    %c0_44 = arith.constant 0 : index
    %148 = vector.load %arg4[%c1_42, %c0_43, %c0_44] : memref<8x8x512xf32, #tpu.memory_space<vmem>>, vector<1x8x512xf32>
    %149 = vector.shape_cast %148 : vector<1x8x512xf32> to vector<8x512xf32>
    %150 = vector.extract_strided_slice %149 {offsets = [0, 0], sizes = [1, 512], strides = [1, 1]} : vector<8x512xf32> to vector<1x512xf32>
    %151 = vector.extract_strided_slice %149 {offsets = [1, 0], sizes = [1, 512], strides = [1, 1]} : vector<8x512xf32> to vector<1x512xf32>
    %c1_45 = arith.constant 1 : index
    %c0_46 = arith.constant 0 : index
    %c0_47 = arith.constant 0 : index
    %152 = vector.load %arg2[%c1_45, %c0_46, %c0_47] : memref<8x128x256xi8, #tpu.memory_space<vmem>>, vector<1x128x128xi8>
    %153 = vector.shape_cast %152 : vector<1x128x128xi8> to vector<128x128xi8>
    %154 = arith.sitofp %153 : vector<128x128xi8> to vector<128x128xf32>
    %155 = arith.truncf %154 : vector<128x128xf32> to vector<128x128xbf16>
    %156 = arith.truncf %133 : vector<8x128xf32> to vector<8x128xbf16>
    %cst_48 = arith.constant dense<0.000000e+00> : vector<8x128xf32>
    %157 = tpu.matmul %156, %155, %cst_48 {dimension_numbers = #tpu.dot_dimension_numbers<[1], [0], [0], [1], [0, 0, 1, 1], [], []>} : vector<8x128xbf16>, vector<128x128xbf16>, vector<8x128xf32> -> vector<8x128xf32>
    %158 = vector.broadcast %145 : vector<1x128xf32> to vector<8x128xf32>
    %159 = arith.mulf %157, %158 : vector<8x128xf32>
    %160 = vector.broadcast %136 : vector<1x128xf32> to vector<8x128xf32>
    %161 = arith.addf %159, %160 : vector<8x128xf32>
    %162 = arith.addf %133, %161 : vector<8x128xf32>
    %cst_49 = arith.constant dense<0.000000e+00> : vector<8xf32>
    %163 = vector.multi_reduction <add>, %162, %cst_49 [1] : vector<8x128xf32> to vector<8xf32>
    %164 = vector.shape_cast %163 : vector<8xf32> to vector<8x1xf32>
    %cst_50 = arith.constant 1.280000e+02 : f32
    %165 = vector.broadcast %cst_50 : f32 to vector<8x1xf32>
    %166 = arith.divf %164, %165 : vector<8x1xf32>
    %167 = vector.broadcast %166 : vector<8x1xf32> to vector<8x128xf32>
    %168 = arith.subf %162, %167 : vector<8x128xf32>
    %169 = arith.mulf %168, %168 : vector<8x128xf32>
    %cst_51 = arith.constant dense<0.000000e+00> : vector<8xf32>
    %170 = vector.multi_reduction <add>, %169, %cst_51 [1] : vector<8x128xf32> to vector<8xf32>
    %171 = vector.shape_cast %170 : vector<8xf32> to vector<8x1xf32>
    %cst_52 = arith.constant 1.280000e+02 : f32
    %172 = vector.broadcast %cst_52 : f32 to vector<8x1xf32>
    %173 = arith.divf %171, %172 : vector<8x1xf32>
    %174 = vector.broadcast %166 : vector<8x1xf32> to vector<8x128xf32>
    %175 = arith.subf %162, %174 : vector<8x128xf32>
    %cst_53 = arith.constant 9.99999974E-6 : f32
    %176 = vector.broadcast %cst_53 : f32 to vector<8x1xf32>
    %177 = arith.addf %173, %176 : vector<8x1xf32>
    %178 = math.rsqrt %177 : vector<8x1xf32>
    %179 = vector.broadcast %178 : vector<8x1xf32> to vector<8x128xf32>
    %180 = arith.mulf %175, %179 : vector<8x128xf32>
    %181 = vector.broadcast %139 : vector<1x128xf32> to vector<8x128xf32>
    %182 = arith.mulf %180, %181 : vector<8x128xf32>
    %183 = vector.broadcast %140 : vector<1x128xf32> to vector<8x128xf32>
    %184 = arith.addf %182, %183 : vector<8x128xf32>
    %c1_54 = arith.constant 1 : index
    %c0_55 = arith.constant 0 : index
    %c128_56 = arith.constant 128 : index
    %185 = vector.load %arg2[%c1_54, %c0_55, %c128_56] : memref<8x128x256xi8, #tpu.memory_space<vmem>>, vector<1x128x128xi8>
    %186 = vector.shape_cast %185 : vector<1x128x128xi8> to vector<128x128xi8>
    %187 = arith.sitofp %186 : vector<128x128xi8> to vector<128x128xf32>
    %188 = arith.truncf %187 : vector<128x128xf32> to vector<128x128xbf16>
    %cst_57 = arith.constant dense<0.000000e+00> : vector<8x128xf32>
    %189 = tpu.matmul %5, %188, %cst_57 {dimension_numbers = #tpu.dot_dimension_numbers<[1], [0], [0], [1], [0, 0, 1, 1], [], []>} : vector<8x128xbf16>, vector<128x128xbf16>, vector<8x128xf32> -> vector<8x128xf32>
    %190 = vector.broadcast %146 : vector<1x128xf32> to vector<8x128xf32>
    %191 = arith.mulf %189, %190 : vector<8x128xf32>
    %192 = vector.broadcast %137 : vector<1x128xf32> to vector<8x128xf32>
    %193 = arith.addf %191, %192 : vector<8x128xf32>
    %194 = arith.addf %184, %193 : vector<8x128xf32>
    %cst_58 = arith.constant dense<0.000000e+00> : vector<8xf32>
    %195 = vector.multi_reduction <add>, %194, %cst_58 [1] : vector<8x128xf32> to vector<8xf32>
    %196 = vector.shape_cast %195 : vector<8xf32> to vector<8x1xf32>
    %cst_59 = arith.constant 1.280000e+02 : f32
    %197 = vector.broadcast %cst_59 : f32 to vector<8x1xf32>
    %198 = arith.divf %196, %197 : vector<8x1xf32>
    %199 = vector.broadcast %198 : vector<8x1xf32> to vector<8x128xf32>
    %200 = arith.subf %194, %199 : vector<8x128xf32>
    %201 = arith.mulf %200, %200 : vector<8x128xf32>
    %cst_60 = arith.constant dense<0.000000e+00> : vector<8xf32>
    %202 = vector.multi_reduction <add>, %201, %cst_60 [1] : vector<8x128xf32> to vector<8xf32>
    %203 = vector.shape_cast %202 : vector<8xf32> to vector<8x1xf32>
    %cst_61 = arith.constant 1.280000e+02 : f32
    %204 = vector.broadcast %cst_61 : f32 to vector<8x1xf32>
    %205 = arith.divf %203, %204 : vector<8x1xf32>
    %206 = vector.broadcast %198 : vector<8x1xf32> to vector<8x128xf32>
    %207 = arith.subf %194, %206 : vector<8x128xf32>
    %cst_62 = arith.constant 9.99999974E-6 : f32
    %208 = vector.broadcast %cst_62 : f32 to vector<8x1xf32>
    %209 = arith.addf %205, %208 : vector<8x1xf32>
    %210 = math.rsqrt %209 : vector<8x1xf32>
    %211 = vector.broadcast %210 : vector<8x1xf32> to vector<8x128xf32>
    %212 = arith.mulf %207, %211 : vector<8x128xf32>
    %213 = vector.broadcast %141 : vector<1x128xf32> to vector<8x128xf32>
    %214 = arith.mulf %212, %213 : vector<8x128xf32>
    %215 = vector.broadcast %142 : vector<1x128xf32> to vector<8x128xf32>
    %216 = arith.addf %214, %215 : vector<8x128xf32>
    %217 = arith.truncf %216 : vector<8x128xf32> to vector<8x128xbf16>
    %c1_63 = arith.constant 1 : index
    %c0_64 = arith.constant 0 : index
    %c0_65 = arith.constant 0 : index
    %218 = vector.load %arg3[%c1_63, %c0_64, %c0_65] : memref<8x128x512xi8, #tpu.memory_space<vmem>>, vector<1x128x512xi8>
    %219 = vector.shape_cast %218 : vector<1x128x512xi8> to vector<128x512xi8>
    %220 = arith.sitofp %219 : vector<128x512xi8> to vector<128x512xf32>
    %221 = arith.truncf %220 : vector<128x512xf32> to vector<128x512xbf16>
    %cst_66 = arith.constant dense<0.000000e+00> : vector<8x512xf32>
    %222 = tpu.matmul %217, %221, %cst_66 {dimension_numbers = #tpu.dot_dimension_numbers<[1], [0], [0], [1], [0, 0, 1, 1], [], []>} : vector<8x128xbf16>, vector<128x512xbf16>, vector<8x512xf32> -> vector<8x512xf32>
    %223 = vector.broadcast %151 : vector<1x512xf32> to vector<8x512xf32>
    %224 = arith.mulf %222, %223 : vector<8x512xf32>
    %225 = vector.broadcast %150 : vector<1x512xf32> to vector<8x512xf32>
    %226 = arith.addf %224, %225 : vector<8x512xf32>
    %cst_67 = arith.constant 0.000000e+00 : f32
    %227 = vector.broadcast %cst_67 : f32 to vector<8x512xf32>
    %228 = arith.maximumf %226, %227 : vector<8x512xf32>
    %229 = arith.truncf %228 : vector<8x512xf32> to vector<8x512xbf16>
    %c1_68 = arith.constant 1 : index
    %c0_69 = arith.constant 0 : index
    %c0_70 = arith.constant 0 : index
    %230 = vector.load %arg5[%c1_68, %c0_69, %c0_70] : memref<8x512x128xi8, #tpu.memory_space<vmem>>, vector<1x512x128xi8>
    %231 = vector.shape_cast %230 : vector<1x512x128xi8> to vector<512x128xi8>
    %232 = arith.sitofp %231 : vector<512x128xi8> to vector<512x128xf32>
    %233 = arith.truncf %232 : vector<512x128xf32> to vector<512x128xbf16>
    %cst_71 = arith.constant dense<0.000000e+00> : vector<8x128xf32>
    %234 = tpu.matmul %229, %233, %cst_71 {dimension_numbers = #tpu.dot_dimension_numbers<[1], [0], [0], [1], [0, 0, 1, 1], [], []>} : vector<8x512xbf16>, vector<512x128xbf16>, vector<8x128xf32> -> vector<8x128xf32>
    %235 = vector.broadcast %147 : vector<1x128xf32> to vector<8x128xf32>
    %236 = arith.mulf %234, %235 : vector<8x128xf32>
    %237 = vector.broadcast %138 : vector<1x128xf32> to vector<8x128xf32>
    %238 = arith.addf %236, %237 : vector<8x128xf32>
    %239 = arith.addf %216, %238 : vector<8x128xf32>
    %cst_72 = arith.constant dense<0.000000e+00> : vector<8xf32>
    %240 = vector.multi_reduction <add>, %239, %cst_72 [1] : vector<8x128xf32> to vector<8xf32>
    %241 = vector.shape_cast %240 : vector<8xf32> to vector<8x1xf32>
    %cst_73 = arith.constant 1.280000e+02 : f32
    %242 = vector.broadcast %cst_73 : f32 to vector<8x1xf32>
    %243 = arith.divf %241, %242 : vector<8x1xf32>
    %244 = vector.broadcast %243 : vector<8x1xf32> to vector<8x128xf32>
    %245 = arith.subf %239, %244 : vector<8x128xf32>
    %246 = arith.mulf %245, %245 : vector<8x128xf32>
    %cst_74 = arith.constant dense<0.000000e+00> : vector<8xf32>
    %247 = vector.multi_reduction <add>, %246, %cst_74 [1] : vector<8x128xf32> to vector<8xf32>
    %248 = vector.shape_cast %247 : vector<8xf32> to vector<8x1xf32>
    %cst_75 = arith.constant 1.280000e+02 : f32
    %249 = vector.broadcast %cst_75 : f32 to vector<8x1xf32>
    %250 = arith.divf %248, %249 : vector<8x1xf32>
    %251 = vector.broadcast %243 : vector<8x1xf32> to vector<8x128xf32>
    %252 = arith.subf %239, %251 : vector<8x128xf32>
    %cst_76 = arith.constant 9.99999974E-6 : f32
    %253 = vector.broadcast %cst_76 : f32 to vector<8x1xf32>
    %254 = arith.addf %250, %253 : vector<8x1xf32>
    %255 = math.rsqrt %254 : vector<8x1xf32>
    %256 = vector.broadcast %255 : vector<8x1xf32> to vector<8x128xf32>
    %257 = arith.mulf %252, %256 : vector<8x128xf32>
    %258 = vector.broadcast %143 : vector<1x128xf32> to vector<8x128xf32>
    %259 = arith.mulf %257, %258 : vector<8x128xf32>
    %260 = vector.broadcast %144 : vector<1x128xf32> to vector<8x128xf32>
    %261 = arith.addf %259, %260 : vector<8x128xf32>
    %c2 = arith.constant 2 : index
    %c0_77 = arith.constant 0 : index
    %c0_78 = arith.constant 0 : index
    %262 = vector.load %arg6[%c2, %c0_77, %c0_78] : memref<8x16x128xf32, #tpu.memory_space<vmem>>, vector<1x16x128xf32>
    %263 = vector.shape_cast %262 : vector<1x16x128xf32> to vector<16x128xf32>
    %264 = vector.extract_strided_slice %263 {offsets = [0, 0], sizes = [1, 128], strides = [1, 1]} : vector<16x128xf32> to vector<1x128xf32>
    %265 = vector.extract_strided_slice %263 {offsets = [1, 0], sizes = [1, 128], strides = [1, 1]} : vector<16x128xf32> to vector<1x128xf32>
    %266 = vector.extract_strided_slice %263 {offsets = [2, 0], sizes = [1, 128], strides = [1, 1]} : vector<16x128xf32> to vector<1x128xf32>
    %267 = vector.extract_strided_slice %263 {offsets = [3, 0], sizes = [1, 128], strides = [1, 1]} : vector<16x128xf32> to vector<1x128xf32>
    %268 = vector.extract_strided_slice %263 {offsets = [4, 0], sizes = [1, 128], strides = [1, 1]} : vector<16x128xf32> to vector<1x128xf32>
    %269 = vector.extract_strided_slice %263 {offsets = [5, 0], sizes = [1, 128], strides = [1, 1]} : vector<16x128xf32> to vector<1x128xf32>
    %270 = vector.extract_strided_slice %263 {offsets = [6, 0], sizes = [1, 128], strides = [1, 1]} : vector<16x128xf32> to vector<1x128xf32>
    %271 = vector.extract_strided_slice %263 {offsets = [7, 0], sizes = [1, 128], strides = [1, 1]} : vector<16x128xf32> to vector<1x128xf32>
    %272 = vector.extract_strided_slice %263 {offsets = [8, 0], sizes = [1, 128], strides = [1, 1]} : vector<16x128xf32> to vector<1x128xf32>
    %273 = vector.extract_strided_slice %263 {offsets = [9, 0], sizes = [1, 128], strides = [1, 1]} : vector<16x128xf32> to vector<1x128xf32>
    %274 = vector.extract_strided_slice %263 {offsets = [10, 0], sizes = [1, 128], strides = [1, 1]} : vector<16x128xf32> to vector<1x128xf32>
    %275 = vector.extract_strided_slice %263 {offsets = [11, 0], sizes = [1, 128], strides = [1, 1]} : vector<16x128xf32> to vector<1x128xf32>
    %c2_79 = arith.constant 2 : index
    %c0_80 = arith.constant 0 : index
    %c0_81 = arith.constant 0 : index
    %276 = vector.load %arg4[%c2_79, %c0_80, %c0_81] : memref<8x8x512xf32, #tpu.memory_space<vmem>>, vector<1x8x512xf32>
    %277 = vector.shape_cast %276 : vector<1x8x512xf32> to vector<8x512xf32>
    %278 = vector.extract_strided_slice %277 {offsets = [0, 0], sizes = [1, 512], strides = [1, 1]} : vector<8x512xf32> to vector<1x512xf32>
    %279 = vector.extract_strided_slice %277 {offsets = [1, 0], sizes = [1, 512], strides = [1, 1]} : vector<8x512xf32> to vector<1x512xf32>
    %c2_82 = arith.constant 2 : index
    %c0_83 = arith.constant 0 : index
    %c0_84 = arith.constant 0 : index
    %280 = vector.load %arg2[%c2_82, %c0_83, %c0_84] : memref<8x128x256xi8, #tpu.memory_space<vmem>>, vector<1x128x128xi8>
    %281 = vector.shape_cast %280 : vector<1x128x128xi8> to vector<128x128xi8>
    %282 = arith.sitofp %281 : vector<128x128xi8> to vector<128x128xf32>
    %283 = arith.truncf %282 : vector<128x128xf32> to vector<128x128xbf16>
    %284 = arith.truncf %261 : vector<8x128xf32> to vector<8x128xbf16>
    %cst_85 = arith.constant dense<0.000000e+00> : vector<8x128xf32>
    %285 = tpu.matmul %284, %283, %cst_85 {dimension_numbers = #tpu.dot_dimension_numbers<[1], [0], [0], [1], [0, 0, 1, 1], [], []>} : vector<8x128xbf16>, vector<128x128xbf16>, vector<8x128xf32> -> vector<8x128xf32>
    %286 = vector.broadcast %273 : vector<1x128xf32> to vector<8x128xf32>
    %287 = arith.mulf %285, %286 : vector<8x128xf32>
    %288 = vector.broadcast %264 : vector<1x128xf32> to vector<8x128xf32>
    %289 = arith.addf %287, %288 : vector<8x128xf32>
    %290 = arith.addf %261, %289 : vector<8x128xf32>
    %cst_86 = arith.constant dense<0.000000e+00> : vector<8xf32>
    %291 = vector.multi_reduction <add>, %290, %cst_86 [1] : vector<8x128xf32> to vector<8xf32>
    %292 = vector.shape_cast %291 : vector<8xf32> to vector<8x1xf32>
    %cst_87 = arith.constant 1.280000e+02 : f32
    %293 = vector.broadcast %cst_87 : f32 to vector<8x1xf32>
    %294 = arith.divf %292, %293 : vector<8x1xf32>
    %295 = vector.broadcast %294 : vector<8x1xf32> to vector<8x128xf32>
    %296 = arith.subf %290, %295 : vector<8x128xf32>
    %297 = arith.mulf %296, %296 : vector<8x128xf32>
    %cst_88 = arith.constant dense<0.000000e+00> : vector<8xf32>
    %298 = vector.multi_reduction <add>, %297, %cst_88 [1] : vector<8x128xf32> to vector<8xf32>
    %299 = vector.shape_cast %298 : vector<8xf32> to vector<8x1xf32>
    %cst_89 = arith.constant 1.280000e+02 : f32
    %300 = vector.broadcast %cst_89 : f32 to vector<8x1xf32>
    %301 = arith.divf %299, %300 : vector<8x1xf32>
    %302 = vector.broadcast %294 : vector<8x1xf32> to vector<8x128xf32>
    %303 = arith.subf %290, %302 : vector<8x128xf32>
    %cst_90 = arith.constant 9.99999974E-6 : f32
    %304 = vector.broadcast %cst_90 : f32 to vector<8x1xf32>
    %305 = arith.addf %301, %304 : vector<8x1xf32>
    %306 = math.rsqrt %305 : vector<8x1xf32>
    %307 = vector.broadcast %306 : vector<8x1xf32> to vector<8x128xf32>
    %308 = arith.mulf %303, %307 : vector<8x128xf32>
    %309 = vector.broadcast %267 : vector<1x128xf32> to vector<8x128xf32>
    %310 = arith.mulf %308, %309 : vector<8x128xf32>
    %311 = vector.broadcast %268 : vector<1x128xf32> to vector<8x128xf32>
    %312 = arith.addf %310, %311 : vector<8x128xf32>
    %c2_91 = arith.constant 2 : index
    %c0_92 = arith.constant 0 : index
    %c128_93 = arith.constant 128 : index
    %313 = vector.load %arg2[%c2_91, %c0_92, %c128_93] : memref<8x128x256xi8, #tpu.memory_space<vmem>>, vector<1x128x128xi8>
    %314 = vector.shape_cast %313 : vector<1x128x128xi8> to vector<128x128xi8>
    %315 = arith.sitofp %314 : vector<128x128xi8> to vector<128x128xf32>
    %316 = arith.truncf %315 : vector<128x128xf32> to vector<128x128xbf16>
    %cst_94 = arith.constant dense<0.000000e+00> : vector<8x128xf32>
    %317 = tpu.matmul %5, %316, %cst_94 {dimension_numbers = #tpu.dot_dimension_numbers<[1], [0], [0], [1], [0, 0, 1, 1], [], []>} : vector<8x128xbf16>, vector<128x128xbf16>, vector<8x128xf32> -> vector<8x128xf32>
    %318 = vector.broadcast %274 : vector<1x128xf32> to vector<8x128xf32>
    %319 = arith.mulf %317, %318 : vector<8x128xf32>
    %320 = vector.broadcast %265 : vector<1x128xf32> to vector<8x128xf32>
    %321 = arith.addf %319, %320 : vector<8x128xf32>
    %322 = arith.addf %312, %321 : vector<8x128xf32>
    %cst_95 = arith.constant dense<0.000000e+00> : vector<8xf32>
    %323 = vector.multi_reduction <add>, %322, %cst_95 [1] : vector<8x128xf32> to vector<8xf32>
    %324 = vector.shape_cast %323 : vector<8xf32> to vector<8x1xf32>
    %cst_96 = arith.constant 1.280000e+02 : f32
    %325 = vector.broadcast %cst_96 : f32 to vector<8x1xf32>
    %326 = arith.divf %324, %325 : vector<8x1xf32>
    %327 = vector.broadcast %326 : vector<8x1xf32> to vector<8x128xf32>
    %328 = arith.subf %322, %327 : vector<8x128xf32>
    %329 = arith.mulf %328, %328 : vector<8x128xf32>
    %cst_97 = arith.constant dense<0.000000e+00> : vector<8xf32>
    %330 = vector.multi_reduction <add>, %329, %cst_97 [1] : vector<8x128xf32> to vector<8xf32>
    %331 = vector.shape_cast %330 : vector<8xf32> to vector<8x1xf32>
    %cst_98 = arith.constant 1.280000e+02 : f32
    %332 = vector.broadcast %cst_98 : f32 to vector<8x1xf32>
    %333 = arith.divf %331, %332 : vector<8x1xf32>
    %334 = vector.broadcast %326 : vector<8x1xf32> to vector<8x128xf32>
    %335 = arith.subf %322, %334 : vector<8x128xf32>
    %cst_99 = arith.constant 9.99999974E-6 : f32
    %336 = vector.broadcast %cst_99 : f32 to vector<8x1xf32>
    %337 = arith.addf %333, %336 : vector<8x1xf32>
    %338 = math.rsqrt %337 : vector<8x1xf32>
    %339 = vector.broadcast %338 : vector<8x1xf32> to vector<8x128xf32>
    %340 = arith.mulf %335, %339 : vector<8x128xf32>
    %341 = vector.broadcast %269 : vector<1x128xf32> to vector<8x128xf32>
    %342 = arith.mulf %340, %341 : vector<8x128xf32>
    %343 = vector.broadcast %270 : vector<1x128xf32> to vector<8x128xf32>
    %344 = arith.addf %342, %343 : vector<8x128xf32>
    %345 = arith.truncf %344 : vector<8x128xf32> to vector<8x128xbf16>
    %c2_100 = arith.constant 2 : index
    %c0_101 = arith.constant 0 : index
    %c0_102 = arith.constant 0 : index
    %346 = vector.load %arg3[%c2_100, %c0_101, %c0_102] : memref<8x128x512xi8, #tpu.memory_space<vmem>>, vector<1x128x512xi8>
    %347 = vector.shape_cast %346 : vector<1x128x512xi8> to vector<128x512xi8>
    %348 = arith.sitofp %347 : vector<128x512xi8> to vector<128x512xf32>
    %349 = arith.truncf %348 : vector<128x512xf32> to vector<128x512xbf16>
    %cst_103 = arith.constant dense<0.000000e+00> : vector<8x512xf32>
    %350 = tpu.matmul %345, %349, %cst_103 {dimension_numbers = #tpu.dot_dimension_numbers<[1], [0], [0], [1], [0, 0, 1, 1], [], []>} : vector<8x128xbf16>, vector<128x512xbf16>, vector<8x512xf32> -> vector<8x512xf32>
    %351 = vector.broadcast %279 : vector<1x512xf32> to vector<8x512xf32>
    %352 = arith.mulf %350, %351 : vector<8x512xf32>
    %353 = vector.broadcast %278 : vector<1x512xf32> to vector<8x512xf32>
    %354 = arith.addf %352, %353 : vector<8x512xf32>
    %cst_104 = arith.constant 0.000000e+00 : f32
    %355 = vector.broadcast %cst_104 : f32 to vector<8x512xf32>
    %356 = arith.maximumf %354, %355 : vector<8x512xf32>
    %357 = arith.truncf %356 : vector<8x512xf32> to vector<8x512xbf16>
    %c2_105 = arith.constant 2 : index
    %c0_106 = arith.constant 0 : index
    %c0_107 = arith.constant 0 : index
    %358 = vector.load %arg5[%c2_105, %c0_106, %c0_107] : memref<8x512x128xi8, #tpu.memory_space<vmem>>, vector<1x512x128xi8>
    %359 = vector.shape_cast %358 : vector<1x512x128xi8> to vector<512x128xi8>
    %360 = arith.sitofp %359 : vector<512x128xi8> to vector<512x128xf32>
    %361 = arith.truncf %360 : vector<512x128xf32> to vector<512x128xbf16>
    %cst_108 = arith.constant dense<0.000000e+00> : vector<8x128xf32>
    %362 = tpu.matmul %357, %361, %cst_108 {dimension_numbers = #tpu.dot_dimension_numbers<[1], [0], [0], [1], [0, 0, 1, 1], [], []>} : vector<8x512xbf16>, vector<512x128xbf16>, vector<8x128xf32> -> vector<8x128xf32>
    %363 = vector.broadcast %275 : vector<1x128xf32> to vector<8x128xf32>
    %364 = arith.mulf %362, %363 : vector<8x128xf32>
    %365 = vector.broadcast %266 : vector<1x128xf32> to vector<8x128xf32>
    %366 = arith.addf %364, %365 : vector<8x128xf32>
    %367 = arith.addf %344, %366 : vector<8x128xf32>
    %cst_109 = arith.constant dense<0.000000e+00> : vector<8xf32>
    %368 = vector.multi_reduction <add>, %367, %cst_109 [1] : vector<8x128xf32> to vector<8xf32>
    %369 = vector.shape_cast %368 : vector<8xf32> to vector<8x1xf32>
    %cst_110 = arith.constant 1.280000e+02 : f32
    %370 = vector.broadcast %cst_110 : f32 to vector<8x1xf32>
    %371 = arith.divf %369, %370 : vector<8x1xf32>
    %372 = vector.broadcast %371 : vector<8x1xf32> to vector<8x128xf32>
    %373 = arith.subf %367, %372 : vector<8x128xf32>
    %374 = arith.mulf %373, %373 : vector<8x128xf32>
    %cst_111 = arith.constant dense<0.000000e+00> : vector<8xf32>
    %375 = vector.multi_reduction <add>, %374, %cst_111 [1] : vector<8x128xf32> to vector<8xf32>
    %376 = vector.shape_cast %375 : vector<8xf32> to vector<8x1xf32>
    %cst_112 = arith.constant 1.280000e+02 : f32
    %377 = vector.broadcast %cst_112 : f32 to vector<8x1xf32>
    %378 = arith.divf %376, %377 : vector<8x1xf32>
    %379 = vector.broadcast %371 : vector<8x1xf32> to vector<8x128xf32>
    %380 = arith.subf %367, %379 : vector<8x128xf32>
    %cst_113 = arith.constant 9.99999974E-6 : f32
    %381 = vector.broadcast %cst_113 : f32 to vector<8x1xf32>
    %382 = arith.addf %378, %381 : vector<8x1xf32>
    %383 = math.rsqrt %382 : vector<8x1xf32>
    %384 = vector.broadcast %383 : vector<8x1xf32> to vector<8x128xf32>
    %385 = arith.mulf %380, %384 : vector<8x128xf32>
    %386 = vector.broadcast %271 : vector<1x128xf32> to vector<8x128xf32>
    %387 = arith.mulf %385, %386 : vector<8x128xf32>
    %388 = vector.broadcast %272 : vector<1x128xf32> to vector<8x128xf32>
    %389 = arith.addf %387, %388 : vector<8x128xf32>
    %c3 = arith.constant 3 : index
    %c0_114 = arith.constant 0 : index
    %c0_115 = arith.constant 0 : index
    %390 = vector.load %arg6[%c3, %c0_114, %c0_115] : memref<8x16x128xf32, #tpu.memory_space<vmem>>, vector<1x16x128xf32>
    %391 = vector.shape_cast %390 : vector<1x16x128xf32> to vector<16x128xf32>
    %392 = vector.extract_strided_slice %391 {offsets = [0, 0], sizes = [1, 128], strides = [1, 1]} : vector<16x128xf32> to vector<1x128xf32>
    %393 = vector.extract_strided_slice %391 {offsets = [1, 0], sizes = [1, 128], strides = [1, 1]} : vector<16x128xf32> to vector<1x128xf32>
    %394 = vector.extract_strided_slice %391 {offsets = [2, 0], sizes = [1, 128], strides = [1, 1]} : vector<16x128xf32> to vector<1x128xf32>
    %395 = vector.extract_strided_slice %391 {offsets = [3, 0], sizes = [1, 128], strides = [1, 1]} : vector<16x128xf32> to vector<1x128xf32>
    %396 = vector.extract_strided_slice %391 {offsets = [4, 0], sizes = [1, 128], strides = [1, 1]} : vector<16x128xf32> to vector<1x128xf32>
    %397 = vector.extract_strided_slice %391 {offsets = [5, 0], sizes = [1, 128], strides = [1, 1]} : vector<16x128xf32> to vector<1x128xf32>
    %398 = vector.extract_strided_slice %391 {offsets = [6, 0], sizes = [1, 128], strides = [1, 1]} : vector<16x128xf32> to vector<1x128xf32>
    %399 = vector.extract_strided_slice %391 {offsets = [7, 0], sizes = [1, 128], strides = [1, 1]} : vector<16x128xf32> to vector<1x128xf32>
    %400 = vector.extract_strided_slice %391 {offsets = [8, 0], sizes = [1, 128], strides = [1, 1]} : vector<16x128xf32> to vector<1x128xf32>
    %401 = vector.extract_strided_slice %391 {offsets = [9, 0], sizes = [1, 128], strides = [1, 1]} : vector<16x128xf32> to vector<1x128xf32>
    %402 = vector.extract_strided_slice %391 {offsets = [10, 0], sizes = [1, 128], strides = [1, 1]} : vector<16x128xf32> to vector<1x128xf32>
    %403 = vector.extract_strided_slice %391 {offsets = [11, 0], sizes = [1, 128], strides = [1, 1]} : vector<16x128xf32> to vector<1x128xf32>
    %c3_116 = arith.constant 3 : index
    %c0_117 = arith.constant 0 : index
    %c0_118 = arith.constant 0 : index
    %404 = vector.load %arg4[%c3_116, %c0_117, %c0_118] : memref<8x8x512xf32, #tpu.memory_space<vmem>>, vector<1x8x512xf32>
    %405 = vector.shape_cast %404 : vector<1x8x512xf32> to vector<8x512xf32>
    %406 = vector.extract_strided_slice %405 {offsets = [0, 0], sizes = [1, 512], strides = [1, 1]} : vector<8x512xf32> to vector<1x512xf32>
    %407 = vector.extract_strided_slice %405 {offsets = [1, 0], sizes = [1, 512], strides = [1, 1]} : vector<8x512xf32> to vector<1x512xf32>
    %c3_119 = arith.constant 3 : index
    %c0_120 = arith.constant 0 : index
    %c0_121 = arith.constant 0 : index
    %408 = vector.load %arg2[%c3_119, %c0_120, %c0_121] : memref<8x128x256xi8, #tpu.memory_space<vmem>>, vector<1x128x128xi8>
    %409 = vector.shape_cast %408 : vector<1x128x128xi8> to vector<128x128xi8>
    %410 = arith.sitofp %409 : vector<128x128xi8> to vector<128x128xf32>
    %411 = arith.truncf %410 : vector<128x128xf32> to vector<128x128xbf16>
    %412 = arith.truncf %389 : vector<8x128xf32> to vector<8x128xbf16>
    %cst_122 = arith.constant dense<0.000000e+00> : vector<8x128xf32>
    %413 = tpu.matmul %412, %411, %cst_122 {dimension_numbers = #tpu.dot_dimension_numbers<[1], [0], [0], [1], [0, 0, 1, 1], [], []>} : vector<8x128xbf16>, vector<128x128xbf16>, vector<8x128xf32> -> vector<8x128xf32>
    %414 = vector.broadcast %401 : vector<1x128xf32> to vector<8x128xf32>
    %415 = arith.mulf %413, %414 : vector<8x128xf32>
    %416 = vector.broadcast %392 : vector<1x128xf32> to vector<8x128xf32>
    %417 = arith.addf %415, %416 : vector<8x128xf32>
    %418 = arith.addf %389, %417 : vector<8x128xf32>
    %cst_123 = arith.constant dense<0.000000e+00> : vector<8xf32>
    %419 = vector.multi_reduction <add>, %418, %cst_123 [1] : vector<8x128xf32> to vector<8xf32>
    %420 = vector.shape_cast %419 : vector<8xf32> to vector<8x1xf32>
    %cst_124 = arith.constant 1.280000e+02 : f32
    %421 = vector.broadcast %cst_124 : f32 to vector<8x1xf32>
    %422 = arith.divf %420, %421 : vector<8x1xf32>
    %423 = vector.broadcast %422 : vector<8x1xf32> to vector<8x128xf32>
    %424 = arith.subf %418, %423 : vector<8x128xf32>
    %425 = arith.mulf %424, %424 : vector<8x128xf32>
    %cst_125 = arith.constant dense<0.000000e+00> : vector<8xf32>
    %426 = vector.multi_reduction <add>, %425, %cst_125 [1] : vector<8x128xf32> to vector<8xf32>
    %427 = vector.shape_cast %426 : vector<8xf32> to vector<8x1xf32>
    %cst_126 = arith.constant 1.280000e+02 : f32
    %428 = vector.broadcast %cst_126 : f32 to vector<8x1xf32>
    %429 = arith.divf %427, %428 : vector<8x1xf32>
    %430 = vector.broadcast %422 : vector<8x1xf32> to vector<8x128xf32>
    %431 = arith.subf %418, %430 : vector<8x128xf32>
    %cst_127 = arith.constant 9.99999974E-6 : f32
    %432 = vector.broadcast %cst_127 : f32 to vector<8x1xf32>
    %433 = arith.addf %429, %432 : vector<8x1xf32>
    %434 = math.rsqrt %433 : vector<8x1xf32>
    %435 = vector.broadcast %434 : vector<8x1xf32> to vector<8x128xf32>
    %436 = arith.mulf %431, %435 : vector<8x128xf32>
    %437 = vector.broadcast %395 : vector<1x128xf32> to vector<8x128xf32>
    %438 = arith.mulf %436, %437 : vector<8x128xf32>
    %439 = vector.broadcast %396 : vector<1x128xf32> to vector<8x128xf32>
    %440 = arith.addf %438, %439 : vector<8x128xf32>
    %c3_128 = arith.constant 3 : index
    %c0_129 = arith.constant 0 : index
    %c128_130 = arith.constant 128 : index
    %441 = vector.load %arg2[%c3_128, %c0_129, %c128_130] : memref<8x128x256xi8, #tpu.memory_space<vmem>>, vector<1x128x128xi8>
    %442 = vector.shape_cast %441 : vector<1x128x128xi8> to vector<128x128xi8>
    %443 = arith.sitofp %442 : vector<128x128xi8> to vector<128x128xf32>
    %444 = arith.truncf %443 : vector<128x128xf32> to vector<128x128xbf16>
    %cst_131 = arith.constant dense<0.000000e+00> : vector<8x128xf32>
    %445 = tpu.matmul %5, %444, %cst_131 {dimension_numbers = #tpu.dot_dimension_numbers<[1], [0], [0], [1], [0, 0, 1, 1], [], []>} : vector<8x128xbf16>, vector<128x128xbf16>, vector<8x128xf32> -> vector<8x128xf32>
    %446 = vector.broadcast %402 : vector<1x128xf32> to vector<8x128xf32>
    %447 = arith.mulf %445, %446 : vector<8x128xf32>
    %448 = vector.broadcast %393 : vector<1x128xf32> to vector<8x128xf32>
    %449 = arith.addf %447, %448 : vector<8x128xf32>
    %450 = arith.addf %440, %449 : vector<8x128xf32>
    %cst_132 = arith.constant dense<0.000000e+00> : vector<8xf32>
    %451 = vector.multi_reduction <add>, %450, %cst_132 [1] : vector<8x128xf32> to vector<8xf32>
    %452 = vector.shape_cast %451 : vector<8xf32> to vector<8x1xf32>
    %cst_133 = arith.constant 1.280000e+02 : f32
    %453 = vector.broadcast %cst_133 : f32 to vector<8x1xf32>
    %454 = arith.divf %452, %453 : vector<8x1xf32>
    %455 = vector.broadcast %454 : vector<8x1xf32> to vector<8x128xf32>
    %456 = arith.subf %450, %455 : vector<8x128xf32>
    %457 = arith.mulf %456, %456 : vector<8x128xf32>
    %cst_134 = arith.constant dense<0.000000e+00> : vector<8xf32>
    %458 = vector.multi_reduction <add>, %457, %cst_134 [1] : vector<8x128xf32> to vector<8xf32>
    %459 = vector.shape_cast %458 : vector<8xf32> to vector<8x1xf32>
    %cst_135 = arith.constant 1.280000e+02 : f32
    %460 = vector.broadcast %cst_135 : f32 to vector<8x1xf32>
    %461 = arith.divf %459, %460 : vector<8x1xf32>
    %462 = vector.broadcast %454 : vector<8x1xf32> to vector<8x128xf32>
    %463 = arith.subf %450, %462 : vector<8x128xf32>
    %cst_136 = arith.constant 9.99999974E-6 : f32
    %464 = vector.broadcast %cst_136 : f32 to vector<8x1xf32>
    %465 = arith.addf %461, %464 : vector<8x1xf32>
    %466 = math.rsqrt %465 : vector<8x1xf32>
    %467 = vector.broadcast %466 : vector<8x1xf32> to vector<8x128xf32>
    %468 = arith.mulf %463, %467 : vector<8x128xf32>
    %469 = vector.broadcast %397 : vector<1x128xf32> to vector<8x128xf32>
    %470 = arith.mulf %468, %469 : vector<8x128xf32>
    %471 = vector.broadcast %398 : vector<1x128xf32> to vector<8x128xf32>
    %472 = arith.addf %470, %471 : vector<8x128xf32>
    %473 = arith.truncf %472 : vector<8x128xf32> to vector<8x128xbf16>
    %c3_137 = arith.constant 3 : index
    %c0_138 = arith.constant 0 : index
    %c0_139 = arith.constant 0 : index
    %474 = vector.load %arg3[%c3_137, %c0_138, %c0_139] : memref<8x128x512xi8, #tpu.memory_space<vmem>>, vector<1x128x512xi8>
    %475 = vector.shape_cast %474 : vector<1x128x512xi8> to vector<128x512xi8>
    %476 = arith.sitofp %475 : vector<128x512xi8> to vector<128x512xf32>
    %477 = arith.truncf %476 : vector<128x512xf32> to vector<128x512xbf16>
    %cst_140 = arith.constant dense<0.000000e+00> : vector<8x512xf32>
    %478 = tpu.matmul %473, %477, %cst_140 {dimension_numbers = #tpu.dot_dimension_numbers<[1], [0], [0], [1], [0, 0, 1, 1], [], []>} : vector<8x128xbf16>, vector<128x512xbf16>, vector<8x512xf32> -> vector<8x512xf32>
    %479 = vector.broadcast %407 : vector<1x512xf32> to vector<8x512xf32>
    %480 = arith.mulf %478, %479 : vector<8x512xf32>
    %481 = vector.broadcast %406 : vector<1x512xf32> to vector<8x512xf32>
    %482 = arith.addf %480, %481 : vector<8x512xf32>
    %cst_141 = arith.constant 0.000000e+00 : f32
    %483 = vector.broadcast %cst_141 : f32 to vector<8x512xf32>
    %484 = arith.maximumf %482, %483 : vector<8x512xf32>
    %485 = arith.truncf %484 : vector<8x512xf32> to vector<8x512xbf16>
    %c3_142 = arith.constant 3 : index
    %c0_143 = arith.constant 0 : index
    %c0_144 = arith.constant 0 : index
    %486 = vector.load %arg5[%c3_142, %c0_143, %c0_144] : memref<8x512x128xi8, #tpu.memory_space<vmem>>, vector<1x512x128xi8>
    %487 = vector.shape_cast %486 : vector<1x512x128xi8> to vector<512x128xi8>
    %488 = arith.sitofp %487 : vector<512x128xi8> to vector<512x128xf32>
    %489 = arith.truncf %488 : vector<512x128xf32> to vector<512x128xbf16>
    %cst_145 = arith.constant dense<0.000000e+00> : vector<8x128xf32>
    %490 = tpu.matmul %485, %489, %cst_145 {dimension_numbers = #tpu.dot_dimension_numbers<[1], [0], [0], [1], [0, 0, 1, 1], [], []>} : vector<8x512xbf16>, vector<512x128xbf16>, vector<8x128xf32> -> vector<8x128xf32>
    %491 = vector.broadcast %403 : vector<1x128xf32> to vector<8x128xf32>
    %492 = arith.mulf %490, %491 : vector<8x128xf32>
    %493 = vector.broadcast %394 : vector<1x128xf32> to vector<8x128xf32>
    %494 = arith.addf %492, %493 : vector<8x128xf32>
    %495 = arith.addf %472, %494 : vector<8x128xf32>
    %cst_146 = arith.constant dense<0.000000e+00> : vector<8xf32>
    %496 = vector.multi_reduction <add>, %495, %cst_146 [1] : vector<8x128xf32> to vector<8xf32>
    %497 = vector.shape_cast %496 : vector<8xf32> to vector<8x1xf32>
    %cst_147 = arith.constant 1.280000e+02 : f32
    %498 = vector.broadcast %cst_147 : f32 to vector<8x1xf32>
    %499 = arith.divf %497, %498 : vector<8x1xf32>
    %500 = vector.broadcast %499 : vector<8x1xf32> to vector<8x128xf32>
    %501 = arith.subf %495, %500 : vector<8x128xf32>
    %502 = arith.mulf %501, %501 : vector<8x128xf32>
    %cst_148 = arith.constant dense<0.000000e+00> : vector<8xf32>
    %503 = vector.multi_reduction <add>, %502, %cst_148 [1] : vector<8x128xf32> to vector<8xf32>
    %504 = vector.shape_cast %503 : vector<8xf32> to vector<8x1xf32>
    %cst_149 = arith.constant 1.280000e+02 : f32
    %505 = vector.broadcast %cst_149 : f32 to vector<8x1xf32>
    %506 = arith.divf %504, %505 : vector<8x1xf32>
    %507 = vector.broadcast %499 : vector<8x1xf32> to vector<8x128xf32>
    %508 = arith.subf %495, %507 : vector<8x128xf32>
    %cst_150 = arith.constant 9.99999974E-6 : f32
    %509 = vector.broadcast %cst_150 : f32 to vector<8x1xf32>
    %510 = arith.addf %506, %509 : vector<8x1xf32>
    %511 = math.rsqrt %510 : vector<8x1xf32>
    %512 = vector.broadcast %511 : vector<8x1xf32> to vector<8x128xf32>
    %513 = arith.mulf %508, %512 : vector<8x128xf32>
    %514 = vector.broadcast %399 : vector<1x128xf32> to vector<8x128xf32>
    %515 = arith.mulf %513, %514 : vector<8x128xf32>
    %516 = vector.broadcast %400 : vector<1x128xf32> to vector<8x128xf32>
    %517 = arith.addf %515, %516 : vector<8x128xf32>
    %c4 = arith.constant 4 : index
    %c0_151 = arith.constant 0 : index
    %c0_152 = arith.constant 0 : index
    %518 = vector.load %arg6[%c4, %c0_151, %c0_152] : memref<8x16x128xf32, #tpu.memory_space<vmem>>, vector<1x16x128xf32>
    %519 = vector.shape_cast %518 : vector<1x16x128xf32> to vector<16x128xf32>
    %520 = vector.extract_strided_slice %519 {offsets = [0, 0], sizes = [1, 128], strides = [1, 1]} : vector<16x128xf32> to vector<1x128xf32>
    %521 = vector.extract_strided_slice %519 {offsets = [1, 0], sizes = [1, 128], strides = [1, 1]} : vector<16x128xf32> to vector<1x128xf32>
    %522 = vector.extract_strided_slice %519 {offsets = [2, 0], sizes = [1, 128], strides = [1, 1]} : vector<16x128xf32> to vector<1x128xf32>
    %523 = vector.extract_strided_slice %519 {offsets = [3, 0], sizes = [1, 128], strides = [1, 1]} : vector<16x128xf32> to vector<1x128xf32>
    %524 = vector.extract_strided_slice %519 {offsets = [4, 0], sizes = [1, 128], strides = [1, 1]} : vector<16x128xf32> to vector<1x128xf32>
    %525 = vector.extract_strided_slice %519 {offsets = [5, 0], sizes = [1, 128], strides = [1, 1]} : vector<16x128xf32> to vector<1x128xf32>
    %526 = vector.extract_strided_slice %519 {offsets = [6, 0], sizes = [1, 128], strides = [1, 1]} : vector<16x128xf32> to vector<1x128xf32>
    %527 = vector.extract_strided_slice %519 {offsets = [7, 0], sizes = [1, 128], strides = [1, 1]} : vector<16x128xf32> to vector<1x128xf32>
    %528 = vector.extract_strided_slice %519 {offsets = [8, 0], sizes = [1, 128], strides = [1, 1]} : vector<16x128xf32> to vector<1x128xf32>
    %529 = vector.extract_strided_slice %519 {offsets = [9, 0], sizes = [1, 128], strides = [1, 1]} : vector<16x128xf32> to vector<1x128xf32>
    %530 = vector.extract_strided_slice %519 {offsets = [10, 0], sizes = [1, 128], strides = [1, 1]} : vector<16x128xf32> to vector<1x128xf32>
    %531 = vector.extract_strided_slice %519 {offsets = [11, 0], sizes = [1, 128], strides = [1, 1]} : vector<16x128xf32> to vector<1x128xf32>
    %c4_153 = arith.constant 4 : index
    %c0_154 = arith.constant 0 : index
    %c0_155 = arith.constant 0 : index
    %532 = vector.load %arg4[%c4_153, %c0_154, %c0_155] : memref<8x8x512xf32, #tpu.memory_space<vmem>>, vector<1x8x512xf32>
    %533 = vector.shape_cast %532 : vector<1x8x512xf32> to vector<8x512xf32>
    %534 = vector.extract_strided_slice %533 {offsets = [0, 0], sizes = [1, 512], strides = [1, 1]} : vector<8x512xf32> to vector<1x512xf32>
    %535 = vector.extract_strided_slice %533 {offsets = [1, 0], sizes = [1, 512], strides = [1, 1]} : vector<8x512xf32> to vector<1x512xf32>
    %c4_156 = arith.constant 4 : index
    %c0_157 = arith.constant 0 : index
    %c0_158 = arith.constant 0 : index
    %536 = vector.load %arg2[%c4_156, %c0_157, %c0_158] : memref<8x128x256xi8, #tpu.memory_space<vmem>>, vector<1x128x128xi8>
    %537 = vector.shape_cast %536 : vector<1x128x128xi8> to vector<128x128xi8>
    %538 = arith.sitofp %537 : vector<128x128xi8> to vector<128x128xf32>
    %539 = arith.truncf %538 : vector<128x128xf32> to vector<128x128xbf16>
    %540 = arith.truncf %517 : vector<8x128xf32> to vector<8x128xbf16>
    %cst_159 = arith.constant dense<0.000000e+00> : vector<8x128xf32>
    %541 = tpu.matmul %540, %539, %cst_159 {dimension_numbers = #tpu.dot_dimension_numbers<[1], [0], [0], [1], [0, 0, 1, 1], [], []>} : vector<8x128xbf16>, vector<128x128xbf16>, vector<8x128xf32> -> vector<8x128xf32>
    %542 = vector.broadcast %529 : vector<1x128xf32> to vector<8x128xf32>
    %543 = arith.mulf %541, %542 : vector<8x128xf32>
    %544 = vector.broadcast %520 : vector<1x128xf32> to vector<8x128xf32>
    %545 = arith.addf %543, %544 : vector<8x128xf32>
    %546 = arith.addf %517, %545 : vector<8x128xf32>
    %cst_160 = arith.constant dense<0.000000e+00> : vector<8xf32>
    %547 = vector.multi_reduction <add>, %546, %cst_160 [1] : vector<8x128xf32> to vector<8xf32>
    %548 = vector.shape_cast %547 : vector<8xf32> to vector<8x1xf32>
    %cst_161 = arith.constant 1.280000e+02 : f32
    %549 = vector.broadcast %cst_161 : f32 to vector<8x1xf32>
    %550 = arith.divf %548, %549 : vector<8x1xf32>
    %551 = vector.broadcast %550 : vector<8x1xf32> to vector<8x128xf32>
    %552 = arith.subf %546, %551 : vector<8x128xf32>
    %553 = arith.mulf %552, %552 : vector<8x128xf32>
    %cst_162 = arith.constant dense<0.000000e+00> : vector<8xf32>
    %554 = vector.multi_reduction <add>, %553, %cst_162 [1] : vector<8x128xf32> to vector<8xf32>
    %555 = vector.shape_cast %554 : vector<8xf32> to vector<8x1xf32>
    %cst_163 = arith.constant 1.280000e+02 : f32
    %556 = vector.broadcast %cst_163 : f32 to vector<8x1xf32>
    %557 = arith.divf %555, %556 : vector<8x1xf32>
    %558 = vector.broadcast %550 : vector<8x1xf32> to vector<8x128xf32>
    %559 = arith.subf %546, %558 : vector<8x128xf32>
    %cst_164 = arith.constant 9.99999974E-6 : f32
    %560 = vector.broadcast %cst_164 : f32 to vector<8x1xf32>
    %561 = arith.addf %557, %560 : vector<8x1xf32>
    %562 = math.rsqrt %561 : vector<8x1xf32>
    %563 = vector.broadcast %562 : vector<8x1xf32> to vector<8x128xf32>
    %564 = arith.mulf %559, %563 : vector<8x128xf32>
    %565 = vector.broadcast %523 : vector<1x128xf32> to vector<8x128xf32>
    %566 = arith.mulf %564, %565 : vector<8x128xf32>
    %567 = vector.broadcast %524 : vector<1x128xf32> to vector<8x128xf32>
    %568 = arith.addf %566, %567 : vector<8x128xf32>
    %c4_165 = arith.constant 4 : index
    %c0_166 = arith.constant 0 : index
    %c128_167 = arith.constant 128 : index
    %569 = vector.load %arg2[%c4_165, %c0_166, %c128_167] : memref<8x128x256xi8, #tpu.memory_space<vmem>>, vector<1x128x128xi8>
    %570 = vector.shape_cast %569 : vector<1x128x128xi8> to vector<128x128xi8>
    %571 = arith.sitofp %570 : vector<128x128xi8> to vector<128x128xf32>
    %572 = arith.truncf %571 : vector<128x128xf32> to vector<128x128xbf16>
    %cst_168 = arith.constant dense<0.000000e+00> : vector<8x128xf32>
    %573 = tpu.matmul %5, %572, %cst_168 {dimension_numbers = #tpu.dot_dimension_numbers<[1], [0], [0], [1], [0, 0, 1, 1], [], []>} : vector<8x128xbf16>, vector<128x128xbf16>, vector<8x128xf32> -> vector<8x128xf32>
    %574 = vector.broadcast %530 : vector<1x128xf32> to vector<8x128xf32>
    %575 = arith.mulf %573, %574 : vector<8x128xf32>
    %576 = vector.broadcast %521 : vector<1x128xf32> to vector<8x128xf32>
    %577 = arith.addf %575, %576 : vector<8x128xf32>
    %578 = arith.addf %568, %577 : vector<8x128xf32>
    %cst_169 = arith.constant dense<0.000000e+00> : vector<8xf32>
    %579 = vector.multi_reduction <add>, %578, %cst_169 [1] : vector<8x128xf32> to vector<8xf32>
    %580 = vector.shape_cast %579 : vector<8xf32> to vector<8x1xf32>
    %cst_170 = arith.constant 1.280000e+02 : f32
    %581 = vector.broadcast %cst_170 : f32 to vector<8x1xf32>
    %582 = arith.divf %580, %581 : vector<8x1xf32>
    %583 = vector.broadcast %582 : vector<8x1xf32> to vector<8x128xf32>
    %584 = arith.subf %578, %583 : vector<8x128xf32>
    %585 = arith.mulf %584, %584 : vector<8x128xf32>
    %cst_171 = arith.constant dense<0.000000e+00> : vector<8xf32>
    %586 = vector.multi_reduction <add>, %585, %cst_171 [1] : vector<8x128xf32> to vector<8xf32>
    %587 = vector.shape_cast %586 : vector<8xf32> to vector<8x1xf32>
    %cst_172 = arith.constant 1.280000e+02 : f32
    %588 = vector.broadcast %cst_172 : f32 to vector<8x1xf32>
    %589 = arith.divf %587, %588 : vector<8x1xf32>
    %590 = vector.broadcast %582 : vector<8x1xf32> to vector<8x128xf32>
    %591 = arith.subf %578, %590 : vector<8x128xf32>
    %cst_173 = arith.constant 9.99999974E-6 : f32
    %592 = vector.broadcast %cst_173 : f32 to vector<8x1xf32>
    %593 = arith.addf %589, %592 : vector<8x1xf32>
    %594 = math.rsqrt %593 : vector<8x1xf32>
    %595 = vector.broadcast %594 : vector<8x1xf32> to vector<8x128xf32>
    %596 = arith.mulf %591, %595 : vector<8x128xf32>
    %597 = vector.broadcast %525 : vector<1x128xf32> to vector<8x128xf32>
    %598 = arith.mulf %596, %597 : vector<8x128xf32>
    %599 = vector.broadcast %526 : vector<1x128xf32> to vector<8x128xf32>
    %600 = arith.addf %598, %599 : vector<8x128xf32>
    %601 = arith.truncf %600 : vector<8x128xf32> to vector<8x128xbf16>
    %c4_174 = arith.constant 4 : index
    %c0_175 = arith.constant 0 : index
    %c0_176 = arith.constant 0 : index
    %602 = vector.load %arg3[%c4_174, %c0_175, %c0_176] : memref<8x128x512xi8, #tpu.memory_space<vmem>>, vector<1x128x512xi8>
    %603 = vector.shape_cast %602 : vector<1x128x512xi8> to vector<128x512xi8>
    %604 = arith.sitofp %603 : vector<128x512xi8> to vector<128x512xf32>
    %605 = arith.truncf %604 : vector<128x512xf32> to vector<128x512xbf16>
    %cst_177 = arith.constant dense<0.000000e+00> : vector<8x512xf32>
    %606 = tpu.matmul %601, %605, %cst_177 {dimension_numbers = #tpu.dot_dimension_numbers<[1], [0], [0], [1], [0, 0, 1, 1], [], []>} : vector<8x128xbf16>, vector<128x512xbf16>, vector<8x512xf32> -> vector<8x512xf32>
    %607 = vector.broadcast %535 : vector<1x512xf32> to vector<8x512xf32>
    %608 = arith.mulf %606, %607 : vector<8x512xf32>
    %609 = vector.broadcast %534 : vector<1x512xf32> to vector<8x512xf32>
    %610 = arith.addf %608, %609 : vector<8x512xf32>
    %cst_178 = arith.constant 0.000000e+00 : f32
    %611 = vector.broadcast %cst_178 : f32 to vector<8x512xf32>
    %612 = arith.maximumf %610, %611 : vector<8x512xf32>
    %613 = arith.truncf %612 : vector<8x512xf32> to vector<8x512xbf16>
    %c4_179 = arith.constant 4 : index
    %c0_180 = arith.constant 0 : index
    %c0_181 = arith.constant 0 : index
    %614 = vector.load %arg5[%c4_179, %c0_180, %c0_181] : memref<8x512x128xi8, #tpu.memory_space<vmem>>, vector<1x512x128xi8>
    %615 = vector.shape_cast %614 : vector<1x512x128xi8> to vector<512x128xi8>
    %616 = arith.sitofp %615 : vector<512x128xi8> to vector<512x128xf32>
    %617 = arith.truncf %616 : vector<512x128xf32> to vector<512x128xbf16>
    %cst_182 = arith.constant dense<0.000000e+00> : vector<8x128xf32>
    %618 = tpu.matmul %613, %617, %cst_182 {dimension_numbers = #tpu.dot_dimension_numbers<[1], [0], [0], [1], [0, 0, 1, 1], [], []>} : vector<8x512xbf16>, vector<512x128xbf16>, vector<8x128xf32> -> vector<8x128xf32>
    %619 = vector.broadcast %531 : vector<1x128xf32> to vector<8x128xf32>
    %620 = arith.mulf %618, %619 : vector<8x128xf32>
    %621 = vector.broadcast %522 : vector<1x128xf32> to vector<8x128xf32>
    %622 = arith.addf %620, %621 : vector<8x128xf32>
    %623 = arith.addf %600, %622 : vector<8x128xf32>
    %cst_183 = arith.constant dense<0.000000e+00> : vector<8xf32>
    %624 = vector.multi_reduction <add>, %623, %cst_183 [1] : vector<8x128xf32> to vector<8xf32>
    %625 = vector.shape_cast %624 : vector<8xf32> to vector<8x1xf32>
    %cst_184 = arith.constant 1.280000e+02 : f32
    %626 = vector.broadcast %cst_184 : f32 to vector<8x1xf32>
    %627 = arith.divf %625, %626 : vector<8x1xf32>
    %628 = vector.broadcast %627 : vector<8x1xf32> to vector<8x128xf32>
    %629 = arith.subf %623, %628 : vector<8x128xf32>
    %630 = arith.mulf %629, %629 : vector<8x128xf32>
    %cst_185 = arith.constant dense<0.000000e+00> : vector<8xf32>
    %631 = vector.multi_reduction <add>, %630, %cst_185 [1] : vector<8x128xf32> to vector<8xf32>
    %632 = vector.shape_cast %631 : vector<8xf32> to vector<8x1xf32>
    %cst_186 = arith.constant 1.280000e+02 : f32
    %633 = vector.broadcast %cst_186 : f32 to vector<8x1xf32>
    %634 = arith.divf %632, %633 : vector<8x1xf32>
    %635 = vector.broadcast %627 : vector<8x1xf32> to vector<8x128xf32>
    %636 = arith.subf %623, %635 : vector<8x128xf32>
    %cst_187 = arith.constant 9.99999974E-6 : f32
    %637 = vector.broadcast %cst_187 : f32 to vector<8x1xf32>
    %638 = arith.addf %634, %637 : vector<8x1xf32>
    %639 = math.rsqrt %638 : vector<8x1xf32>
    %640 = vector.broadcast %639 : vector<8x1xf32> to vector<8x128xf32>
    %641 = arith.mulf %636, %640 : vector<8x128xf32>
    %642 = vector.broadcast %527 : vector<1x128xf32> to vector<8x128xf32>
    %643 = arith.mulf %641, %642 : vector<8x128xf32>
    %644 = vector.broadcast %528 : vector<1x128xf32> to vector<8x128xf32>
    %645 = arith.addf %643, %644 : vector<8x128xf32>
    %c5 = arith.constant 5 : index
    %c0_188 = arith.constant 0 : index
    %c0_189 = arith.constant 0 : index
    %646 = vector.load %arg6[%c5, %c0_188, %c0_189] : memref<8x16x128xf32, #tpu.memory_space<vmem>>, vector<1x16x128xf32>
    %647 = vector.shape_cast %646 : vector<1x16x128xf32> to vector<16x128xf32>
    %648 = vector.extract_strided_slice %647 {offsets = [0, 0], sizes = [1, 128], strides = [1, 1]} : vector<16x128xf32> to vector<1x128xf32>
    %649 = vector.extract_strided_slice %647 {offsets = [1, 0], sizes = [1, 128], strides = [1, 1]} : vector<16x128xf32> to vector<1x128xf32>
    %650 = vector.extract_strided_slice %647 {offsets = [2, 0], sizes = [1, 128], strides = [1, 1]} : vector<16x128xf32> to vector<1x128xf32>
    %651 = vector.extract_strided_slice %647 {offsets = [3, 0], sizes = [1, 128], strides = [1, 1]} : vector<16x128xf32> to vector<1x128xf32>
    %652 = vector.extract_strided_slice %647 {offsets = [4, 0], sizes = [1, 128], strides = [1, 1]} : vector<16x128xf32> to vector<1x128xf32>
    %653 = vector.extract_strided_slice %647 {offsets = [5, 0], sizes = [1, 128], strides = [1, 1]} : vector<16x128xf32> to vector<1x128xf32>
    %654 = vector.extract_strided_slice %647 {offsets = [6, 0], sizes = [1, 128], strides = [1, 1]} : vector<16x128xf32> to vector<1x128xf32>
    %655 = vector.extract_strided_slice %647 {offsets = [7, 0], sizes = [1, 128], strides = [1, 1]} : vector<16x128xf32> to vector<1x128xf32>
    %656 = vector.extract_strided_slice %647 {offsets = [8, 0], sizes = [1, 128], strides = [1, 1]} : vector<16x128xf32> to vector<1x128xf32>
    %657 = vector.extract_strided_slice %647 {offsets = [9, 0], sizes = [1, 128], strides = [1, 1]} : vector<16x128xf32> to vector<1x128xf32>
    %658 = vector.extract_strided_slice %647 {offsets = [10, 0], sizes = [1, 128], strides = [1, 1]} : vector<16x128xf32> to vector<1x128xf32>
    %659 = vector.extract_strided_slice %647 {offsets = [11, 0], sizes = [1, 128], strides = [1, 1]} : vector<16x128xf32> to vector<1x128xf32>
    %c5_190 = arith.constant 5 : index
    %c0_191 = arith.constant 0 : index
    %c0_192 = arith.constant 0 : index
    %660 = vector.load %arg4[%c5_190, %c0_191, %c0_192] : memref<8x8x512xf32, #tpu.memory_space<vmem>>, vector<1x8x512xf32>
    %661 = vector.shape_cast %660 : vector<1x8x512xf32> to vector<8x512xf32>
    %662 = vector.extract_strided_slice %661 {offsets = [0, 0], sizes = [1, 512], strides = [1, 1]} : vector<8x512xf32> to vector<1x512xf32>
    %663 = vector.extract_strided_slice %661 {offsets = [1, 0], sizes = [1, 512], strides = [1, 1]} : vector<8x512xf32> to vector<1x512xf32>
    %c5_193 = arith.constant 5 : index
    %c0_194 = arith.constant 0 : index
    %c0_195 = arith.constant 0 : index
    %664 = vector.load %arg2[%c5_193, %c0_194, %c0_195] : memref<8x128x256xi8, #tpu.memory_space<vmem>>, vector<1x128x128xi8>
    %665 = vector.shape_cast %664 : vector<1x128x128xi8> to vector<128x128xi8>
    %666 = arith.sitofp %665 : vector<128x128xi8> to vector<128x128xf32>
    %667 = arith.truncf %666 : vector<128x128xf32> to vector<128x128xbf16>
    %668 = arith.truncf %645 : vector<8x128xf32> to vector<8x128xbf16>
    %cst_196 = arith.constant dense<0.000000e+00> : vector<8x128xf32>
    %669 = tpu.matmul %668, %667, %cst_196 {dimension_numbers = #tpu.dot_dimension_numbers<[1], [0], [0], [1], [0, 0, 1, 1], [], []>} : vector<8x128xbf16>, vector<128x128xbf16>, vector<8x128xf32> -> vector<8x128xf32>
    %670 = vector.broadcast %657 : vector<1x128xf32> to vector<8x128xf32>
    %671 = arith.mulf %669, %670 : vector<8x128xf32>
    %672 = vector.broadcast %648 : vector<1x128xf32> to vector<8x128xf32>
    %673 = arith.addf %671, %672 : vector<8x128xf32>
    %674 = arith.addf %645, %673 : vector<8x128xf32>
    %cst_197 = arith.constant dense<0.000000e+00> : vector<8xf32>
    %675 = vector.multi_reduction <add>, %674, %cst_197 [1] : vector<8x128xf32> to vector<8xf32>
    %676 = vector.shape_cast %675 : vector<8xf32> to vector<8x1xf32>
    %cst_198 = arith.constant 1.280000e+02 : f32
    %677 = vector.broadcast %cst_198 : f32 to vector<8x1xf32>
    %678 = arith.divf %676, %677 : vector<8x1xf32>
    %679 = vector.broadcast %678 : vector<8x1xf32> to vector<8x128xf32>
    %680 = arith.subf %674, %679 : vector<8x128xf32>
    %681 = arith.mulf %680, %680 : vector<8x128xf32>
    %cst_199 = arith.constant dense<0.000000e+00> : vector<8xf32>
    %682 = vector.multi_reduction <add>, %681, %cst_199 [1] : vector<8x128xf32> to vector<8xf32>
    %683 = vector.shape_cast %682 : vector<8xf32> to vector<8x1xf32>
    %cst_200 = arith.constant 1.280000e+02 : f32
    %684 = vector.broadcast %cst_200 : f32 to vector<8x1xf32>
    %685 = arith.divf %683, %684 : vector<8x1xf32>
    %686 = vector.broadcast %678 : vector<8x1xf32> to vector<8x128xf32>
    %687 = arith.subf %674, %686 : vector<8x128xf32>
    %cst_201 = arith.constant 9.99999974E-6 : f32
    %688 = vector.broadcast %cst_201 : f32 to vector<8x1xf32>
    %689 = arith.addf %685, %688 : vector<8x1xf32>
    %690 = math.rsqrt %689 : vector<8x1xf32>
    %691 = vector.broadcast %690 : vector<8x1xf32> to vector<8x128xf32>
    %692 = arith.mulf %687, %691 : vector<8x128xf32>
    %693 = vector.broadcast %651 : vector<1x128xf32> to vector<8x128xf32>
    %694 = arith.mulf %692, %693 : vector<8x128xf32>
    %695 = vector.broadcast %652 : vector<1x128xf32> to vector<8x128xf32>
    %696 = arith.addf %694, %695 : vector<8x128xf32>
    %c5_202 = arith.constant 5 : index
    %c0_203 = arith.constant 0 : index
    %c128_204 = arith.constant 128 : index
    %697 = vector.load %arg2[%c5_202, %c0_203, %c128_204] : memref<8x128x256xi8, #tpu.memory_space<vmem>>, vector<1x128x128xi8>
    %698 = vector.shape_cast %697 : vector<1x128x128xi8> to vector<128x128xi8>
    %699 = arith.sitofp %698 : vector<128x128xi8> to vector<128x128xf32>
    %700 = arith.truncf %699 : vector<128x128xf32> to vector<128x128xbf16>
    %cst_205 = arith.constant dense<0.000000e+00> : vector<8x128xf32>
    %701 = tpu.matmul %5, %700, %cst_205 {dimension_numbers = #tpu.dot_dimension_numbers<[1], [0], [0], [1], [0, 0, 1, 1], [], []>} : vector<8x128xbf16>, vector<128x128xbf16>, vector<8x128xf32> -> vector<8x128xf32>
    %702 = vector.broadcast %658 : vector<1x128xf32> to vector<8x128xf32>
    %703 = arith.mulf %701, %702 : vector<8x128xf32>
    %704 = vector.broadcast %649 : vector<1x128xf32> to vector<8x128xf32>
    %705 = arith.addf %703, %704 : vector<8x128xf32>
    %706 = arith.addf %696, %705 : vector<8x128xf32>
    %cst_206 = arith.constant dense<0.000000e+00> : vector<8xf32>
    %707 = vector.multi_reduction <add>, %706, %cst_206 [1] : vector<8x128xf32> to vector<8xf32>
    %708 = vector.shape_cast %707 : vector<8xf32> to vector<8x1xf32>
    %cst_207 = arith.constant 1.280000e+02 : f32
    %709 = vector.broadcast %cst_207 : f32 to vector<8x1xf32>
    %710 = arith.divf %708, %709 : vector<8x1xf32>
    %711 = vector.broadcast %710 : vector<8x1xf32> to vector<8x128xf32>
    %712 = arith.subf %706, %711 : vector<8x128xf32>
    %713 = arith.mulf %712, %712 : vector<8x128xf32>
    %cst_208 = arith.constant dense<0.000000e+00> : vector<8xf32>
    %714 = vector.multi_reduction <add>, %713, %cst_208 [1] : vector<8x128xf32> to vector<8xf32>
    %715 = vector.shape_cast %714 : vector<8xf32> to vector<8x1xf32>
    %cst_209 = arith.constant 1.280000e+02 : f32
    %716 = vector.broadcast %cst_209 : f32 to vector<8x1xf32>
    %717 = arith.divf %715, %716 : vector<8x1xf32>
    %718 = vector.broadcast %710 : vector<8x1xf32> to vector<8x128xf32>
    %719 = arith.subf %706, %718 : vector<8x128xf32>
    %cst_210 = arith.constant 9.99999974E-6 : f32
    %720 = vector.broadcast %cst_210 : f32 to vector<8x1xf32>
    %721 = arith.addf %717, %720 : vector<8x1xf32>
    %722 = math.rsqrt %721 : vector<8x1xf32>
    %723 = vector.broadcast %722 : vector<8x1xf32> to vector<8x128xf32>
    %724 = arith.mulf %719, %723 : vector<8x128xf32>
    %725 = vector.broadcast %653 : vector<1x128xf32> to vector<8x128xf32>
    %726 = arith.mulf %724, %725 : vector<8x128xf32>
    %727 = vector.broadcast %654 : vector<1x128xf32> to vector<8x128xf32>
    %728 = arith.addf %726, %727 : vector<8x128xf32>
    %729 = arith.truncf %728 : vector<8x128xf32> to vector<8x128xbf16>
    %c5_211 = arith.constant 5 : index
    %c0_212 = arith.constant 0 : index
    %c0_213 = arith.constant 0 : index
    %730 = vector.load %arg3[%c5_211, %c0_212, %c0_213] : memref<8x128x512xi8, #tpu.memory_space<vmem>>, vector<1x128x512xi8>
    %731 = vector.shape_cast %730 : vector<1x128x512xi8> to vector<128x512xi8>
    %732 = arith.sitofp %731 : vector<128x512xi8> to vector<128x512xf32>
    %733 = arith.truncf %732 : vector<128x512xf32> to vector<128x512xbf16>
    %cst_214 = arith.constant dense<0.000000e+00> : vector<8x512xf32>
    %734 = tpu.matmul %729, %733, %cst_214 {dimension_numbers = #tpu.dot_dimension_numbers<[1], [0], [0], [1], [0, 0, 1, 1], [], []>} : vector<8x128xbf16>, vector<128x512xbf16>, vector<8x512xf32> -> vector<8x512xf32>
    %735 = vector.broadcast %663 : vector<1x512xf32> to vector<8x512xf32>
    %736 = arith.mulf %734, %735 : vector<8x512xf32>
    %737 = vector.broadcast %662 : vector<1x512xf32> to vector<8x512xf32>
    %738 = arith.addf %736, %737 : vector<8x512xf32>
    %cst_215 = arith.constant 0.000000e+00 : f32
    %739 = vector.broadcast %cst_215 : f32 to vector<8x512xf32>
    %740 = arith.maximumf %738, %739 : vector<8x512xf32>
    %741 = arith.truncf %740 : vector<8x512xf32> to vector<8x512xbf16>
    %c5_216 = arith.constant 5 : index
    %c0_217 = arith.constant 0 : index
    %c0_218 = arith.constant 0 : index
    %742 = vector.load %arg5[%c5_216, %c0_217, %c0_218] : memref<8x512x128xi8, #tpu.memory_space<vmem>>, vector<1x512x128xi8>
    %743 = vector.shape_cast %742 : vector<1x512x128xi8> to vector<512x128xi8>
    %744 = arith.sitofp %743 : vector<512x128xi8> to vector<512x128xf32>
    %745 = arith.truncf %744 : vector<512x128xf32> to vector<512x128xbf16>
    %cst_219 = arith.constant dense<0.000000e+00> : vector<8x128xf32>
    %746 = tpu.matmul %741, %745, %cst_219 {dimension_numbers = #tpu.dot_dimension_numbers<[1], [0], [0], [1], [0, 0, 1, 1], [], []>} : vector<8x512xbf16>, vector<512x128xbf16>, vector<8x128xf32> -> vector<8x128xf32>
    %747 = vector.broadcast %659 : vector<1x128xf32> to vector<8x128xf32>
    %748 = arith.mulf %746, %747 : vector<8x128xf32>
    %749 = vector.broadcast %650 : vector<1x128xf32> to vector<8x128xf32>
    %750 = arith.addf %748, %749 : vector<8x128xf32>
    %751 = arith.addf %728, %750 : vector<8x128xf32>
    %cst_220 = arith.constant dense<0.000000e+00> : vector<8xf32>
    %752 = vector.multi_reduction <add>, %751, %cst_220 [1] : vector<8x128xf32> to vector<8xf32>
    %753 = vector.shape_cast %752 : vector<8xf32> to vector<8x1xf32>
    %cst_221 = arith.constant 1.280000e+02 : f32
    %754 = vector.broadcast %cst_221 : f32 to vector<8x1xf32>
    %755 = arith.divf %753, %754 : vector<8x1xf32>
    %756 = vector.broadcast %755 : vector<8x1xf32> to vector<8x128xf32>
    %757 = arith.subf %751, %756 : vector<8x128xf32>
    %758 = arith.mulf %757, %757 : vector<8x128xf32>
    %cst_222 = arith.constant dense<0.000000e+00> : vector<8xf32>
    %759 = vector.multi_reduction <add>, %758, %cst_222 [1] : vector<8x128xf32> to vector<8xf32>
    %760 = vector.shape_cast %759 : vector<8xf32> to vector<8x1xf32>
    %cst_223 = arith.constant 1.280000e+02 : f32
    %761 = vector.broadcast %cst_223 : f32 to vector<8x1xf32>
    %762 = arith.divf %760, %761 : vector<8x1xf32>
    %763 = vector.broadcast %755 : vector<8x1xf32> to vector<8x128xf32>
    %764 = arith.subf %751, %763 : vector<8x128xf32>
    %cst_224 = arith.constant 9.99999974E-6 : f32
    %765 = vector.broadcast %cst_224 : f32 to vector<8x1xf32>
    %766 = arith.addf %762, %765 : vector<8x1xf32>
    %767 = math.rsqrt %766 : vector<8x1xf32>
    %768 = vector.broadcast %767 : vector<8x1xf32> to vector<8x128xf32>
    %769 = arith.mulf %764, %768 : vector<8x128xf32>
    %770 = vector.broadcast %655 : vector<1x128xf32> to vector<8x128xf32>
    %771 = arith.mulf %769, %770 : vector<8x128xf32>
    %772 = vector.broadcast %656 : vector<1x128xf32> to vector<8x128xf32>
    %773 = arith.addf %771, %772 : vector<8x128xf32>
    %c6 = arith.constant 6 : index
    %c0_225 = arith.constant 0 : index
    %c0_226 = arith.constant 0 : index
    %774 = vector.load %arg6[%c6, %c0_225, %c0_226] : memref<8x16x128xf32, #tpu.memory_space<vmem>>, vector<1x16x128xf32>
    %775 = vector.shape_cast %774 : vector<1x16x128xf32> to vector<16x128xf32>
    %776 = vector.extract_strided_slice %775 {offsets = [0, 0], sizes = [1, 128], strides = [1, 1]} : vector<16x128xf32> to vector<1x128xf32>
    %777 = vector.extract_strided_slice %775 {offsets = [1, 0], sizes = [1, 128], strides = [1, 1]} : vector<16x128xf32> to vector<1x128xf32>
    %778 = vector.extract_strided_slice %775 {offsets = [2, 0], sizes = [1, 128], strides = [1, 1]} : vector<16x128xf32> to vector<1x128xf32>
    %779 = vector.extract_strided_slice %775 {offsets = [3, 0], sizes = [1, 128], strides = [1, 1]} : vector<16x128xf32> to vector<1x128xf32>
    %780 = vector.extract_strided_slice %775 {offsets = [4, 0], sizes = [1, 128], strides = [1, 1]} : vector<16x128xf32> to vector<1x128xf32>
    %781 = vector.extract_strided_slice %775 {offsets = [5, 0], sizes = [1, 128], strides = [1, 1]} : vector<16x128xf32> to vector<1x128xf32>
    %782 = vector.extract_strided_slice %775 {offsets = [6, 0], sizes = [1, 128], strides = [1, 1]} : vector<16x128xf32> to vector<1x128xf32>
    %783 = vector.extract_strided_slice %775 {offsets = [7, 0], sizes = [1, 128], strides = [1, 1]} : vector<16x128xf32> to vector<1x128xf32>
    %784 = vector.extract_strided_slice %775 {offsets = [8, 0], sizes = [1, 128], strides = [1, 1]} : vector<16x128xf32> to vector<1x128xf32>
    %785 = vector.extract_strided_slice %775 {offsets = [9, 0], sizes = [1, 128], strides = [1, 1]} : vector<16x128xf32> to vector<1x128xf32>
    %786 = vector.extract_strided_slice %775 {offsets = [10, 0], sizes = [1, 128], strides = [1, 1]} : vector<16x128xf32> to vector<1x128xf32>
    %787 = vector.extract_strided_slice %775 {offsets = [11, 0], sizes = [1, 128], strides = [1, 1]} : vector<16x128xf32> to vector<1x128xf32>
    %c6_227 = arith.constant 6 : index
    %c0_228 = arith.constant 0 : index
    %c0_229 = arith.constant 0 : index
    %788 = vector.load %arg4[%c6_227, %c0_228, %c0_229] : memref<8x8x512xf32, #tpu.memory_space<vmem>>, vector<1x8x512xf32>
    %789 = vector.shape_cast %788 : vector<1x8x512xf32> to vector<8x512xf32>
    %790 = vector.extract_strided_slice %789 {offsets = [0, 0], sizes = [1, 512], strides = [1, 1]} : vector<8x512xf32> to vector<1x512xf32>
    %791 = vector.extract_strided_slice %789 {offsets = [1, 0], sizes = [1, 512], strides = [1, 1]} : vector<8x512xf32> to vector<1x512xf32>
    %c6_230 = arith.constant 6 : index
    %c0_231 = arith.constant 0 : index
    %c0_232 = arith.constant 0 : index
    %792 = vector.load %arg2[%c6_230, %c0_231, %c0_232] : memref<8x128x256xi8, #tpu.memory_space<vmem>>, vector<1x128x128xi8>
    %793 = vector.shape_cast %792 : vector<1x128x128xi8> to vector<128x128xi8>
    %794 = arith.sitofp %793 : vector<128x128xi8> to vector<128x128xf32>
    %795 = arith.truncf %794 : vector<128x128xf32> to vector<128x128xbf16>
    %796 = arith.truncf %773 : vector<8x128xf32> to vector<8x128xbf16>
    %cst_233 = arith.constant dense<0.000000e+00> : vector<8x128xf32>
    %797 = tpu.matmul %796, %795, %cst_233 {dimension_numbers = #tpu.dot_dimension_numbers<[1], [0], [0], [1], [0, 0, 1, 1], [], []>} : vector<8x128xbf16>, vector<128x128xbf16>, vector<8x128xf32> -> vector<8x128xf32>
    %798 = vector.broadcast %785 : vector<1x128xf32> to vector<8x128xf32>
    %799 = arith.mulf %797, %798 : vector<8x128xf32>
    %800 = vector.broadcast %776 : vector<1x128xf32> to vector<8x128xf32>
    %801 = arith.addf %799, %800 : vector<8x128xf32>
    %802 = arith.addf %773, %801 : vector<8x128xf32>
    %cst_234 = arith.constant dense<0.000000e+00> : vector<8xf32>
    %803 = vector.multi_reduction <add>, %802, %cst_234 [1] : vector<8x128xf32> to vector<8xf32>
    %804 = vector.shape_cast %803 : vector<8xf32> to vector<8x1xf32>
    %cst_235 = arith.constant 1.280000e+02 : f32
    %805 = vector.broadcast %cst_235 : f32 to vector<8x1xf32>
    %806 = arith.divf %804, %805 : vector<8x1xf32>
    %807 = vector.broadcast %806 : vector<8x1xf32> to vector<8x128xf32>
    %808 = arith.subf %802, %807 : vector<8x128xf32>
    %809 = arith.mulf %808, %808 : vector<8x128xf32>
    %cst_236 = arith.constant dense<0.000000e+00> : vector<8xf32>
    %810 = vector.multi_reduction <add>, %809, %cst_236 [1] : vector<8x128xf32> to vector<8xf32>
    %811 = vector.shape_cast %810 : vector<8xf32> to vector<8x1xf32>
    %cst_237 = arith.constant 1.280000e+02 : f32
    %812 = vector.broadcast %cst_237 : f32 to vector<8x1xf32>
    %813 = arith.divf %811, %812 : vector<8x1xf32>
    %814 = vector.broadcast %806 : vector<8x1xf32> to vector<8x128xf32>
    %815 = arith.subf %802, %814 : vector<8x128xf32>
    %cst_238 = arith.constant 9.99999974E-6 : f32
    %816 = vector.broadcast %cst_238 : f32 to vector<8x1xf32>
    %817 = arith.addf %813, %816 : vector<8x1xf32>
    %818 = math.rsqrt %817 : vector<8x1xf32>
    %819 = vector.broadcast %818 : vector<8x1xf32> to vector<8x128xf32>
    %820 = arith.mulf %815, %819 : vector<8x128xf32>
    %821 = vector.broadcast %779 : vector<1x128xf32> to vector<8x128xf32>
    %822 = arith.mulf %820, %821 : vector<8x128xf32>
    %823 = vector.broadcast %780 : vector<1x128xf32> to vector<8x128xf32>
    %824 = arith.addf %822, %823 : vector<8x128xf32>
    %c6_239 = arith.constant 6 : index
    %c0_240 = arith.constant 0 : index
    %c128_241 = arith.constant 128 : index
    %825 = vector.load %arg2[%c6_239, %c0_240, %c128_241] : memref<8x128x256xi8, #tpu.memory_space<vmem>>, vector<1x128x128xi8>
    %826 = vector.shape_cast %825 : vector<1x128x128xi8> to vector<128x128xi8>
    %827 = arith.sitofp %826 : vector<128x128xi8> to vector<128x128xf32>
    %828 = arith.truncf %827 : vector<128x128xf32> to vector<128x128xbf16>
    %cst_242 = arith.constant dense<0.000000e+00> : vector<8x128xf32>
    %829 = tpu.matmul %5, %828, %cst_242 {dimension_numbers = #tpu.dot_dimension_numbers<[1], [0], [0], [1], [0, 0, 1, 1], [], []>} : vector<8x128xbf16>, vector<128x128xbf16>, vector<8x128xf32> -> vector<8x128xf32>
    %830 = vector.broadcast %786 : vector<1x128xf32> to vector<8x128xf32>
    %831 = arith.mulf %829, %830 : vector<8x128xf32>
    %832 = vector.broadcast %777 : vector<1x128xf32> to vector<8x128xf32>
    %833 = arith.addf %831, %832 : vector<8x128xf32>
    %834 = arith.addf %824, %833 : vector<8x128xf32>
    %cst_243 = arith.constant dense<0.000000e+00> : vector<8xf32>
    %835 = vector.multi_reduction <add>, %834, %cst_243 [1] : vector<8x128xf32> to vector<8xf32>
    %836 = vector.shape_cast %835 : vector<8xf32> to vector<8x1xf32>
    %cst_244 = arith.constant 1.280000e+02 : f32
    %837 = vector.broadcast %cst_244 : f32 to vector<8x1xf32>
    %838 = arith.divf %836, %837 : vector<8x1xf32>
    %839 = vector.broadcast %838 : vector<8x1xf32> to vector<8x128xf32>
    %840 = arith.subf %834, %839 : vector<8x128xf32>
    %841 = arith.mulf %840, %840 : vector<8x128xf32>
    %cst_245 = arith.constant dense<0.000000e+00> : vector<8xf32>
    %842 = vector.multi_reduction <add>, %841, %cst_245 [1] : vector<8x128xf32> to vector<8xf32>
    %843 = vector.shape_cast %842 : vector<8xf32> to vector<8x1xf32>
    %cst_246 = arith.constant 1.280000e+02 : f32
    %844 = vector.broadcast %cst_246 : f32 to vector<8x1xf32>
    %845 = arith.divf %843, %844 : vector<8x1xf32>
    %846 = vector.broadcast %838 : vector<8x1xf32> to vector<8x128xf32>
    %847 = arith.subf %834, %846 : vector<8x128xf32>
    %cst_247 = arith.constant 9.99999974E-6 : f32
    %848 = vector.broadcast %cst_247 : f32 to vector<8x1xf32>
    %849 = arith.addf %845, %848 : vector<8x1xf32>
    %850 = math.rsqrt %849 : vector<8x1xf32>
    %851 = vector.broadcast %850 : vector<8x1xf32> to vector<8x128xf32>
    %852 = arith.mulf %847, %851 : vector<8x128xf32>
    %853 = vector.broadcast %781 : vector<1x128xf32> to vector<8x128xf32>
    %854 = arith.mulf %852, %853 : vector<8x128xf32>
    %855 = vector.broadcast %782 : vector<1x128xf32> to vector<8x128xf32>
    %856 = arith.addf %854, %855 : vector<8x128xf32>
    %857 = arith.truncf %856 : vector<8x128xf32> to vector<8x128xbf16>
    %c6_248 = arith.constant 6 : index
    %c0_249 = arith.constant 0 : index
    %c0_250 = arith.constant 0 : index
    %858 = vector.load %arg3[%c6_248, %c0_249, %c0_250] : memref<8x128x512xi8, #tpu.memory_space<vmem>>, vector<1x128x512xi8>
    %859 = vector.shape_cast %858 : vector<1x128x512xi8> to vector<128x512xi8>
    %860 = arith.sitofp %859 : vector<128x512xi8> to vector<128x512xf32>
    %861 = arith.truncf %860 : vector<128x512xf32> to vector<128x512xbf16>
    %cst_251 = arith.constant dense<0.000000e+00> : vector<8x512xf32>
    %862 = tpu.matmul %857, %861, %cst_251 {dimension_numbers = #tpu.dot_dimension_numbers<[1], [0], [0], [1], [0, 0, 1, 1], [], []>} : vector<8x128xbf16>, vector<128x512xbf16>, vector<8x512xf32> -> vector<8x512xf32>
    %863 = vector.broadcast %791 : vector<1x512xf32> to vector<8x512xf32>
    %864 = arith.mulf %862, %863 : vector<8x512xf32>
    %865 = vector.broadcast %790 : vector<1x512xf32> to vector<8x512xf32>
    %866 = arith.addf %864, %865 : vector<8x512xf32>
    %cst_252 = arith.constant 0.000000e+00 : f32
    %867 = vector.broadcast %cst_252 : f32 to vector<8x512xf32>
    %868 = arith.maximumf %866, %867 : vector<8x512xf32>
    %869 = arith.truncf %868 : vector<8x512xf32> to vector<8x512xbf16>
    %c6_253 = arith.constant 6 : index
    %c0_254 = arith.constant 0 : index
    %c0_255 = arith.constant 0 : index
    %870 = vector.load %arg5[%c6_253, %c0_254, %c0_255] : memref<8x512x128xi8, #tpu.memory_space<vmem>>, vector<1x512x128xi8>
    %871 = vector.shape_cast %870 : vector<1x512x128xi8> to vector<512x128xi8>
    %872 = arith.sitofp %871 : vector<512x128xi8> to vector<512x128xf32>
    %873 = arith.truncf %872 : vector<512x128xf32> to vector<512x128xbf16>
    %cst_256 = arith.constant dense<0.000000e+00> : vector<8x128xf32>
    %874 = tpu.matmul %869, %873, %cst_256 {dimension_numbers = #tpu.dot_dimension_numbers<[1], [0], [0], [1], [0, 0, 1, 1], [], []>} : vector<8x512xbf16>, vector<512x128xbf16>, vector<8x128xf32> -> vector<8x128xf32>
    %875 = vector.broadcast %787 : vector<1x128xf32> to vector<8x128xf32>
    %876 = arith.mulf %874, %875 : vector<8x128xf32>
    %877 = vector.broadcast %778 : vector<1x128xf32> to vector<8x128xf32>
    %878 = arith.addf %876, %877 : vector<8x128xf32>
    %879 = arith.addf %856, %878 : vector<8x128xf32>
    %cst_257 = arith.constant dense<0.000000e+00> : vector<8xf32>
    %880 = vector.multi_reduction <add>, %879, %cst_257 [1] : vector<8x128xf32> to vector<8xf32>
    %881 = vector.shape_cast %880 : vector<8xf32> to vector<8x1xf32>
    %cst_258 = arith.constant 1.280000e+02 : f32
    %882 = vector.broadcast %cst_258 : f32 to vector<8x1xf32>
    %883 = arith.divf %881, %882 : vector<8x1xf32>
    %884 = vector.broadcast %883 : vector<8x1xf32> to vector<8x128xf32>
    %885 = arith.subf %879, %884 : vector<8x128xf32>
    %886 = arith.mulf %885, %885 : vector<8x128xf32>
    %cst_259 = arith.constant dense<0.000000e+00> : vector<8xf32>
    %887 = vector.multi_reduction <add>, %886, %cst_259 [1] : vector<8x128xf32> to vector<8xf32>
    %888 = vector.shape_cast %887 : vector<8xf32> to vector<8x1xf32>
    %cst_260 = arith.constant 1.280000e+02 : f32
    %889 = vector.broadcast %cst_260 : f32 to vector<8x1xf32>
    %890 = arith.divf %888, %889 : vector<8x1xf32>
    %891 = vector.broadcast %883 : vector<8x1xf32> to vector<8x128xf32>
    %892 = arith.subf %879, %891 : vector<8x128xf32>
    %cst_261 = arith.constant 9.99999974E-6 : f32
    %893 = vector.broadcast %cst_261 : f32 to vector<8x1xf32>
    %894 = arith.addf %890, %893 : vector<8x1xf32>
    %895 = math.rsqrt %894 : vector<8x1xf32>
    %896 = vector.broadcast %895 : vector<8x1xf32> to vector<8x128xf32>
    %897 = arith.mulf %892, %896 : vector<8x128xf32>
    %898 = vector.broadcast %783 : vector<1x128xf32> to vector<8x128xf32>
    %899 = arith.mulf %897, %898 : vector<8x128xf32>
    %900 = vector.broadcast %784 : vector<1x128xf32> to vector<8x128xf32>
    %901 = arith.addf %899, %900 : vector<8x128xf32>
    %c7 = arith.constant 7 : index
    %c0_262 = arith.constant 0 : index
    %c0_263 = arith.constant 0 : index
    %902 = vector.load %arg6[%c7, %c0_262, %c0_263] : memref<8x16x128xf32, #tpu.memory_space<vmem>>, vector<1x16x128xf32>
    %903 = vector.shape_cast %902 : vector<1x16x128xf32> to vector<16x128xf32>
    %904 = vector.extract_strided_slice %903 {offsets = [0, 0], sizes = [1, 128], strides = [1, 1]} : vector<16x128xf32> to vector<1x128xf32>
    %905 = vector.extract_strided_slice %903 {offsets = [1, 0], sizes = [1, 128], strides = [1, 1]} : vector<16x128xf32> to vector<1x128xf32>
    %906 = vector.extract_strided_slice %903 {offsets = [2, 0], sizes = [1, 128], strides = [1, 1]} : vector<16x128xf32> to vector<1x128xf32>
    %907 = vector.extract_strided_slice %903 {offsets = [3, 0], sizes = [1, 128], strides = [1, 1]} : vector<16x128xf32> to vector<1x128xf32>
    %908 = vector.extract_strided_slice %903 {offsets = [4, 0], sizes = [1, 128], strides = [1, 1]} : vector<16x128xf32> to vector<1x128xf32>
    %909 = vector.extract_strided_slice %903 {offsets = [5, 0], sizes = [1, 128], strides = [1, 1]} : vector<16x128xf32> to vector<1x128xf32>
    %910 = vector.extract_strided_slice %903 {offsets = [6, 0], sizes = [1, 128], strides = [1, 1]} : vector<16x128xf32> to vector<1x128xf32>
    %911 = vector.extract_strided_slice %903 {offsets = [7, 0], sizes = [1, 128], strides = [1, 1]} : vector<16x128xf32> to vector<1x128xf32>
    %912 = vector.extract_strided_slice %903 {offsets = [8, 0], sizes = [1, 128], strides = [1, 1]} : vector<16x128xf32> to vector<1x128xf32>
    %913 = vector.extract_strided_slice %903 {offsets = [9, 0], sizes = [1, 128], strides = [1, 1]} : vector<16x128xf32> to vector<1x128xf32>
    %914 = vector.extract_strided_slice %903 {offsets = [10, 0], sizes = [1, 128], strides = [1, 1]} : vector<16x128xf32> to vector<1x128xf32>
    %915 = vector.extract_strided_slice %903 {offsets = [11, 0], sizes = [1, 128], strides = [1, 1]} : vector<16x128xf32> to vector<1x128xf32>
    %c7_264 = arith.constant 7 : index
    %c0_265 = arith.constant 0 : index
    %c0_266 = arith.constant 0 : index
    %916 = vector.load %arg4[%c7_264, %c0_265, %c0_266] : memref<8x8x512xf32, #tpu.memory_space<vmem>>, vector<1x8x512xf32>
    %917 = vector.shape_cast %916 : vector<1x8x512xf32> to vector<8x512xf32>
    %918 = vector.extract_strided_slice %917 {offsets = [0, 0], sizes = [1, 512], strides = [1, 1]} : vector<8x512xf32> to vector<1x512xf32>
    %919 = vector.extract_strided_slice %917 {offsets = [1, 0], sizes = [1, 512], strides = [1, 1]} : vector<8x512xf32> to vector<1x512xf32>
    %c7_267 = arith.constant 7 : index
    %c0_268 = arith.constant 0 : index
    %c0_269 = arith.constant 0 : index
    %920 = vector.load %arg2[%c7_267, %c0_268, %c0_269] : memref<8x128x256xi8, #tpu.memory_space<vmem>>, vector<1x128x128xi8>
    %921 = vector.shape_cast %920 : vector<1x128x128xi8> to vector<128x128xi8>
    %922 = arith.sitofp %921 : vector<128x128xi8> to vector<128x128xf32>
    %923 = arith.truncf %922 : vector<128x128xf32> to vector<128x128xbf16>
    %924 = arith.truncf %901 : vector<8x128xf32> to vector<8x128xbf16>
    %cst_270 = arith.constant dense<0.000000e+00> : vector<8x128xf32>
    %925 = tpu.matmul %924, %923, %cst_270 {dimension_numbers = #tpu.dot_dimension_numbers<[1], [0], [0], [1], [0, 0, 1, 1], [], []>} : vector<8x128xbf16>, vector<128x128xbf16>, vector<8x128xf32> -> vector<8x128xf32>
    %926 = vector.broadcast %913 : vector<1x128xf32> to vector<8x128xf32>
    %927 = arith.mulf %925, %926 : vector<8x128xf32>
    %928 = vector.broadcast %904 : vector<1x128xf32> to vector<8x128xf32>
    %929 = arith.addf %927, %928 : vector<8x128xf32>
    %930 = arith.addf %901, %929 : vector<8x128xf32>
    %cst_271 = arith.constant dense<0.000000e+00> : vector<8xf32>
    %931 = vector.multi_reduction <add>, %930, %cst_271 [1] : vector<8x128xf32> to vector<8xf32>
    %932 = vector.shape_cast %931 : vector<8xf32> to vector<8x1xf32>
    %cst_272 = arith.constant 1.280000e+02 : f32
    %933 = vector.broadcast %cst_272 : f32 to vector<8x1xf32>
    %934 = arith.divf %932, %933 : vector<8x1xf32>
    %935 = vector.broadcast %934 : vector<8x1xf32> to vector<8x128xf32>
    %936 = arith.subf %930, %935 : vector<8x128xf32>
    %937 = arith.mulf %936, %936 : vector<8x128xf32>
    %cst_273 = arith.constant dense<0.000000e+00> : vector<8xf32>
    %938 = vector.multi_reduction <add>, %937, %cst_273 [1] : vector<8x128xf32> to vector<8xf32>
    %939 = vector.shape_cast %938 : vector<8xf32> to vector<8x1xf32>
    %cst_274 = arith.constant 1.280000e+02 : f32
    %940 = vector.broadcast %cst_274 : f32 to vector<8x1xf32>
    %941 = arith.divf %939, %940 : vector<8x1xf32>
    %942 = vector.broadcast %934 : vector<8x1xf32> to vector<8x128xf32>
    %943 = arith.subf %930, %942 : vector<8x128xf32>
    %cst_275 = arith.constant 9.99999974E-6 : f32
    %944 = vector.broadcast %cst_275 : f32 to vector<8x1xf32>
    %945 = arith.addf %941, %944 : vector<8x1xf32>
    %946 = math.rsqrt %945 : vector<8x1xf32>
    %947 = vector.broadcast %946 : vector<8x1xf32> to vector<8x128xf32>
    %948 = arith.mulf %943, %947 : vector<8x128xf32>
    %949 = vector.broadcast %907 : vector<1x128xf32> to vector<8x128xf32>
    %950 = arith.mulf %948, %949 : vector<8x128xf32>
    %951 = vector.broadcast %908 : vector<1x128xf32> to vector<8x128xf32>
    %952 = arith.addf %950, %951 : vector<8x128xf32>
    %c7_276 = arith.constant 7 : index
    %c0_277 = arith.constant 0 : index
    %c128_278 = arith.constant 128 : index
    %953 = vector.load %arg2[%c7_276, %c0_277, %c128_278] : memref<8x128x256xi8, #tpu.memory_space<vmem>>, vector<1x128x128xi8>
    %954 = vector.shape_cast %953 : vector<1x128x128xi8> to vector<128x128xi8>
    %955 = arith.sitofp %954 : vector<128x128xi8> to vector<128x128xf32>
    %956 = arith.truncf %955 : vector<128x128xf32> to vector<128x128xbf16>
    %cst_279 = arith.constant dense<0.000000e+00> : vector<8x128xf32>
    %957 = tpu.matmul %5, %956, %cst_279 {dimension_numbers = #tpu.dot_dimension_numbers<[1], [0], [0], [1], [0, 0, 1, 1], [], []>} : vector<8x128xbf16>, vector<128x128xbf16>, vector<8x128xf32> -> vector<8x128xf32>
    %958 = vector.broadcast %914 : vector<1x128xf32> to vector<8x128xf32>
    %959 = arith.mulf %957, %958 : vector<8x128xf32>
    %960 = vector.broadcast %905 : vector<1x128xf32> to vector<8x128xf32>
    %961 = arith.addf %959, %960 : vector<8x128xf32>
    %962 = arith.addf %952, %961 : vector<8x128xf32>
    %cst_280 = arith.constant dense<0.000000e+00> : vector<8xf32>
    %963 = vector.multi_reduction <add>, %962, %cst_280 [1] : vector<8x128xf32> to vector<8xf32>
    %964 = vector.shape_cast %963 : vector<8xf32> to vector<8x1xf32>
    %cst_281 = arith.constant 1.280000e+02 : f32
    %965 = vector.broadcast %cst_281 : f32 to vector<8x1xf32>
    %966 = arith.divf %964, %965 : vector<8x1xf32>
    %967 = vector.broadcast %966 : vector<8x1xf32> to vector<8x128xf32>
    %968 = arith.subf %962, %967 : vector<8x128xf32>
    %969 = arith.mulf %968, %968 : vector<8x128xf32>
    %cst_282 = arith.constant dense<0.000000e+00> : vector<8xf32>
    %970 = vector.multi_reduction <add>, %969, %cst_282 [1] : vector<8x128xf32> to vector<8xf32>
    %971 = vector.shape_cast %970 : vector<8xf32> to vector<8x1xf32>
    %cst_283 = arith.constant 1.280000e+02 : f32
    %972 = vector.broadcast %cst_283 : f32 to vector<8x1xf32>
    %973 = arith.divf %971, %972 : vector<8x1xf32>
    %974 = vector.broadcast %966 : vector<8x1xf32> to vector<8x128xf32>
    %975 = arith.subf %962, %974 : vector<8x128xf32>
    %cst_284 = arith.constant 9.99999974E-6 : f32
    %976 = vector.broadcast %cst_284 : f32 to vector<8x1xf32>
    %977 = arith.addf %973, %976 : vector<8x1xf32>
    %978 = math.rsqrt %977 : vector<8x1xf32>
    %979 = vector.broadcast %978 : vector<8x1xf32> to vector<8x128xf32>
    %980 = arith.mulf %975, %979 : vector<8x128xf32>
    %981 = vector.broadcast %909 : vector<1x128xf32> to vector<8x128xf32>
    %982 = arith.mulf %980, %981 : vector<8x128xf32>
    %983 = vector.broadcast %910 : vector<1x128xf32> to vector<8x128xf32>
    %984 = arith.addf %982, %983 : vector<8x128xf32>
    %985 = arith.truncf %984 : vector<8x128xf32> to vector<8x128xbf16>
    %c7_285 = arith.constant 7 : index
    %c0_286 = arith.constant 0 : index
    %c0_287 = arith.constant 0 : index
    %986 = vector.load %arg3[%c7_285, %c0_286, %c0_287] : memref<8x128x512xi8, #tpu.memory_space<vmem>>, vector<1x128x512xi8>
    %987 = vector.shape_cast %986 : vector<1x128x512xi8> to vector<128x512xi8>
    %988 = arith.sitofp %987 : vector<128x512xi8> to vector<128x512xf32>
    %989 = arith.truncf %988 : vector<128x512xf32> to vector<128x512xbf16>
    %cst_288 = arith.constant dense<0.000000e+00> : vector<8x512xf32>
    %990 = tpu.matmul %985, %989, %cst_288 {dimension_numbers = #tpu.dot_dimension_numbers<[1], [0], [0], [1], [0, 0, 1, 1], [], []>} : vector<8x128xbf16>, vector<128x512xbf16>, vector<8x512xf32> -> vector<8x512xf32>
    %991 = vector.broadcast %919 : vector<1x512xf32> to vector<8x512xf32>
    %992 = arith.mulf %990, %991 : vector<8x512xf32>
    %993 = vector.broadcast %918 : vector<1x512xf32> to vector<8x512xf32>
    %994 = arith.addf %992, %993 : vector<8x512xf32>
    %cst_289 = arith.constant 0.000000e+00 : f32
    %995 = vector.broadcast %cst_289 : f32 to vector<8x512xf32>
    %996 = arith.maximumf %994, %995 : vector<8x512xf32>
    %997 = arith.truncf %996 : vector<8x512xf32> to vector<8x512xbf16>
    %c7_290 = arith.constant 7 : index
    %c0_291 = arith.constant 0 : index
    %c0_292 = arith.constant 0 : index
    %998 = vector.load %arg5[%c7_290, %c0_291, %c0_292] : memref<8x512x128xi8, #tpu.memory_space<vmem>>, vector<1x512x128xi8>
    %999 = vector.shape_cast %998 : vector<1x512x128xi8> to vector<512x128xi8>
    %1000 = arith.sitofp %999 : vector<512x128xi8> to vector<512x128xf32>
    %1001 = arith.truncf %1000 : vector<512x128xf32> to vector<512x128xbf16>
    %cst_293 = arith.constant dense<0.000000e+00> : vector<8x128xf32>
    %1002 = tpu.matmul %997, %1001, %cst_293 {dimension_numbers = #tpu.dot_dimension_numbers<[1], [0], [0], [1], [0, 0, 1, 1], [], []>} : vector<8x512xbf16>, vector<512x128xbf16>, vector<8x128xf32> -> vector<8x128xf32>
    %1003 = vector.broadcast %915 : vector<1x128xf32> to vector<8x128xf32>
    %1004 = arith.mulf %1002, %1003 : vector<8x128xf32>
    %1005 = vector.broadcast %906 : vector<1x128xf32> to vector<8x128xf32>
    %1006 = arith.addf %1004, %1005 : vector<8x128xf32>
    %1007 = arith.addf %984, %1006 : vector<8x128xf32>
    %cst_294 = arith.constant dense<0.000000e+00> : vector<8xf32>
    %1008 = vector.multi_reduction <add>, %1007, %cst_294 [1] : vector<8x128xf32> to vector<8xf32>
    %1009 = vector.shape_cast %1008 : vector<8xf32> to vector<8x1xf32>
    %cst_295 = arith.constant 1.280000e+02 : f32
    %1010 = vector.broadcast %cst_295 : f32 to vector<8x1xf32>
    %1011 = arith.divf %1009, %1010 : vector<8x1xf32>
    %1012 = vector.broadcast %1011 : vector<8x1xf32> to vector<8x128xf32>
    %1013 = arith.subf %1007, %1012 : vector<8x128xf32>
    %1014 = arith.mulf %1013, %1013 : vector<8x128xf32>
    %cst_296 = arith.constant dense<0.000000e+00> : vector<8xf32>
    %1015 = vector.multi_reduction <add>, %1014, %cst_296 [1] : vector<8x128xf32> to vector<8xf32>
    %1016 = vector.shape_cast %1015 : vector<8xf32> to vector<8x1xf32>
    %cst_297 = arith.constant 1.280000e+02 : f32
    %1017 = vector.broadcast %cst_297 : f32 to vector<8x1xf32>
    %1018 = arith.divf %1016, %1017 : vector<8x1xf32>
    %1019 = vector.broadcast %1011 : vector<8x1xf32> to vector<8x128xf32>
    %1020 = arith.subf %1007, %1019 : vector<8x128xf32>
    %cst_298 = arith.constant 9.99999974E-6 : f32
    %1021 = vector.broadcast %cst_298 : f32 to vector<8x1xf32>
    %1022 = arith.addf %1018, %1021 : vector<8x1xf32>
    %1023 = math.rsqrt %1022 : vector<8x1xf32>
    %1024 = vector.broadcast %1023 : vector<8x1xf32> to vector<8x128xf32>
    %1025 = arith.mulf %1020, %1024 : vector<8x128xf32>
    %1026 = vector.broadcast %911 : vector<1x128xf32> to vector<8x128xf32>
    %1027 = arith.mulf %1025, %1026 : vector<8x128xf32>
    %1028 = vector.broadcast %912 : vector<1x128xf32> to vector<8x128xf32>
    %1029 = arith.addf %1027, %1028 : vector<8x128xf32>
    %c0_299 = arith.constant 0 : index
    %c0_300 = arith.constant 0 : index
    %1030 = vector.load %arg9[%c0_299, %c0_300] : memref<8x128xf32, #tpu.memory_space<vmem>>, vector<8x128xf32>
    tpu.vector_store %arg9[%c0_299, %c0_300], %1029 {strides = array<i32>} : memref<8x128xf32, #tpu.memory_space<vmem>>, vector<8x128xf32>,
    %c1_i32 = arith.constant 1 : i32
    %1031 = arith.cmpi eq, %arg0, %c1_i32 : i32
    %1032 = arith.extui %1031 : i1 to i32
    %c0_i32_301 = arith.constant 0 : i32
    %1033 = arith.cmpi ne, %1032, %c0_i32_301 : i32
    scf.if %1033 {
      "tpu.region"() ({
        %alloca = memref.alloca() : memref<128x128xbf16, #tpu.memory_space<vmem>>
        %1034 = tpu.sem_alloc : memref<!tpu.dma_semaphore, #tpu.memory_space<semaphore_mem>>
        tpu.enqueue_dma source(%arg8 : memref<128x128xbf16, #tpu.memory_space<any>>) target(%alloca : memref<128x128xbf16, #tpu.memory_space<vmem>>) target_semaphore(%1034 : memref<!tpu.dma_semaphore, #tpu.memory_space<semaphore_mem>>)
        %c1_302 = arith.constant 1 : index
        %c0_303 = arith.constant 0 : index
        %1035 = vector.load %arg7[%c1_302, %c0_303] : memref<8x128xf32, #tpu.memory_space<vmem>>, vector<1x128xf32>
        %c2_304 = arith.constant 2 : index
        %c0_305 = arith.constant 0 : index
        %1036 = vector.load %arg7[%c2_304, %c0_305] : memref<8x128xf32, #tpu.memory_space<vmem>>, vector<1x128xf32>
        %cst_306 = arith.constant dense<0.000000e+00> : vector<8xf32>
        %1037 = vector.multi_reduction <add>, %1029, %cst_306 [1] : vector<8x128xf32> to vector<8xf32>
        %1038 = vector.shape_cast %1037 : vector<8xf32> to vector<8x1xf32>
        %cst_307 = arith.constant 1.280000e+02 : f32
        %1039 = vector.broadcast %cst_307 : f32 to vector<8x1xf32>
        %1040 = arith.divf %1038, %1039 : vector<8x1xf32>
        %1041 = vector.broadcast %1040 : vector<8x1xf32> to vector<8x128xf32>
        %1042 = arith.subf %1029, %1041 : vector<8x128xf32>
        %1043 = arith.mulf %1042, %1042 : vector<8x128xf32>
        %cst_308 = arith.constant dense<0.000000e+00> : vector<8xf32>
        %1044 = vector.multi_reduction <add>, %1043, %cst_308 [1] : vector<8x128xf32> to vector<8xf32>
        %1045 = vector.shape_cast %1044 : vector<8xf32> to vector<8x1xf32>
        %cst_309 = arith.constant 1.280000e+02 : f32
        %1046 = vector.broadcast %cst_309 : f32 to vector<8x1xf32>
        %1047 = arith.divf %1045, %1046 : vector<8x1xf32>
        %1048 = vector.broadcast %1040 : vector<8x1xf32> to vector<8x128xf32>
        %1049 = arith.subf %1029, %1048 : vector<8x128xf32>
        %cst_310 = arith.constant 9.99999974E-6 : f32
        %1050 = vector.broadcast %cst_310 : f32 to vector<8x1xf32>
        %1051 = arith.addf %1047, %1050 : vector<8x1xf32>
        %1052 = math.rsqrt %1051 : vector<8x1xf32>
        %1053 = vector.broadcast %1052 : vector<8x1xf32> to vector<8x128xf32>
        %1054 = arith.mulf %1049, %1053 : vector<8x128xf32>
        %1055 = vector.broadcast %1035 : vector<1x128xf32> to vector<8x128xf32>
        %1056 = arith.mulf %1054, %1055 : vector<8x128xf32>
        %1057 = vector.broadcast %1036 : vector<1x128xf32> to vector<8x128xf32>
        %1058 = arith.addf %1056, %1057 : vector<8x128xf32>
        tpu.wait_dma2 semaphore(%1034 : memref<!tpu.dma_semaphore, #tpu.memory_space<semaphore_mem>>) src(%arg8 : memref<128x128xbf16, #tpu.memory_space<any>>) dst(%alloca : memref<128x128xbf16, #tpu.memory_space<vmem>>)
        %1059 = arith.truncf %1058 : vector<8x128xf32> to vector<8x128xbf16>
        %c0_311 = arith.constant 0 : index
        %c0_312 = arith.constant 0 : index
        %1060 = vector.load %alloca[%c0_311, %c0_312] : memref<128x128xbf16, #tpu.memory_space<vmem>>, vector<128x128xbf16>
        %cst_313 = arith.constant dense<0.000000e+00> : vector<8x128xf32>
        %1061 = tpu.matmul %1059, %1060, %cst_313 {dimension_numbers = #tpu.dot_dimension_numbers<[1], [0], [0], [1], [0, 0, 1, 1], [], []>} : vector<8x128xbf16>, vector<128x128xbf16>, vector<8x128xf32> -> vector<8x128xf32>
        %c3_314 = arith.constant 3 : index
        %c0_315 = arith.constant 0 : index
        %1062 = vector.load %arg7[%c3_314, %c0_315] : memref<8x128xf32, #tpu.memory_space<vmem>>, vector<1x128xf32>
        %1063 = vector.broadcast %1062 : vector<1x128xf32> to vector<8x128xf32>
        %1064 = arith.addf %1061, %1063 : vector<8x128xf32>
        %c0_316 = arith.constant 0 : index
        %c0_317 = arith.constant 0 : index
        %1065 = vector.load %arg9[%c0_316, %c0_317] : memref<8x128xf32, #tpu.memory_space<vmem>>, vector<8x128xf32>
        tpu.vector_store %arg9[%c0_316, %c0_317], %1064 {strides = array<i32>} : memref<8x128xf32, #tpu.memory_space<vmem>>, vector<8x128xf32>,
        tpu.yield
      }) : () -> ()
    } else {
    }
    return
  }
  func.func @transform_0(%arg0: i32) -> (i32, i32) {
    %c0_i32 = arith.constant 0 : i32
    %c0_i32_0 = arith.constant 0 : i32
    %c0_i32_1 = arith.constant 0 : i32
    return %c0_i32, %c0_i32_0 : i32, i32
  }
  func.func @transform_1(%arg0: i32) -> (i32, i32, i32) {
    %c0_i32 = arith.constant 0 : i32
    %c0_i32_0 = arith.constant 0 : i32
    %c0_i32_1 = arith.constant 0 : i32
    return %arg0, %c0_i32, %c0_i32_0 : i32, i32, i32
  }
  func.func @transform_2(%arg0: i32) -> (i32, i32, i32) {
    %c0_i32 = arith.constant 0 : i32
    %c0_i32_0 = arith.constant 0 : i32
    %c0_i32_1 = arith.constant 0 : i32
    return %arg0, %c0_i32, %c0_i32_0 : i32, i32, i32
  }
  func.func @transform_3(%arg0: i32) -> (i32, i32, i32) {
    %c0_i32 = arith.constant 0 : i32
    %c0_i32_0 = arith.constant 0 : i32
    %c0_i32_1 = arith.constant 0 : i32
    return %arg0, %c0_i32, %c0_i32_0 : i32, i32, i32
  }
  func.func @transform_4(%arg0: i32) -> (i32, i32, i32) {
    %c0_i32 = arith.constant 0 : i32
    %c0_i32_0 = arith.constant 0 : i32
    %c0_i32_1 = arith.constant 0 : i32
    return %arg0, %c0_i32, %c0_i32_0 : i32, i32, i32
  }
  func.func @transform_5(%arg0: i32) -> (i32, i32, i32) {
    %c0_i32 = arith.constant 0 : i32
    %c0_i32_0 = arith.constant 0 : i32
    %c0_i32_1 = arith.constant 0 : i32
    return %arg0, %c0_i32, %c0_i32_0 : i32, i32, i32
  }
  func.func @transform_6(%arg0: i32) -> (i32, i32) {
    %c0_i32 = arith.constant 0 : i32
    %c0_i32_0 = arith.constant 0 : i32
    %c0_i32_1 = arith.constant 0 : i32
    return %c0_i32, %c0_i32_0 : i32, i32
  }
  func.func @transform_8(%arg0: i32) -> (i32, i32) {
    %c0_i32 = arith.constant 0 : i32
    %c0_i32_0 = arith.constant 0 : i32
    %c0_i32_1 = arith.constant 0 : i32
    return %c0_i32, %c0_i32_0 : i32, i32
  }
}

</mosaic_0001>

<bundles_post_ra>
// kernel: tpu_custom_call.1
= control target key start
LH: loop header
LB: loop body
LE: loop exit
PB: predicated region body
PF: predicated region fallthrough
CT: control target
= control target key end

     0   :  { %s7893_s0 = inlined_call_operand.hbm [shape: f32[8,128], index: 0, kind: input, shape index: {}]   ;;  %s7894_s1 = inlined_call_operand.hbm [shape: s8[16,128,256], index: 1, kind: input, shape index: {}]   ;;  %s7895_s2 = inlined_call_operand.hbm [shape: s8[16,128,512], index: 2, kind: input, shape index: {}]   ;;  %s7896_s3 = inlined_call_operand.hbm [shape: f32[16,8,512], index: 3, kind: input, shape index: {}]   ;;  %s7897_s4 = inlined_call_operand.hbm [shape: s8[16,512,128], index: 4, kind: input, shape index: {}]   ;;  %s7898_s5 = inlined_call_operand.hbm [shape: f32[16,16,128], index: 5, kind: input, shape index: {}]   ;;  %s7899_s6 = inlined_call_operand.vmem [shape: f32[8,128], index: 6, kind: input, shape index: {}]   ;;  %s7900_s7 = inlined_call_operand.hbm [shape: bf16[128,128], index: 7, kind: input, shape index: {}]   ;;  %s7901_s8 = inlined_call_operand.hbm [shape: f32[8,128], index: 8, kind: output, shape index: {}]  }
   0x1   :  { %7914 = sst [smem:[#allocation29_spill]] %s7894_s1 }
   0x2   :  { %7915 = sst [smem:[#allocation30_spill]] %s7896_s3 }
   0x3   :  { %13 = vsyncpa [#allocation3], 0 }
   0x4   :  { %14 = vsyncpa [#allocation6], 0 }
   0x5   :  { %16 = vsyncpa [#allocation6 + $0x1], 0 }
   0x6   :  { %17 = vsyncpa [#allocation9], 0 }
   0x7   :  { %19 = vsyncpa [#allocation9 + $0x1], 0 }
   0x8   :  { %20 = vsyncpa [#allocation12], 0 }
   0x9   :  { %22 = vsyncpa [#allocation12 + $0x1], 0 }
   0xa   :  { %23 = vsyncpa [#allocation4], 0  ;;  %s6579_s27 = smov 0   ;;  %s6581_s28 = smov 0  }
   0xb   :  { %s6583_s29 = smov 0   ;;  %s6585_s30 = smov 0  }
   0xc LB: > { %7916 = sst [smem:[#allocation26_spill]] %s6509_s29  ;;  %s6600_s9 = sadd.s32 1, %s6513_s30   ;;  %s6513_s30 = sphi %s6585_s30, %s7935_s30   ;;  %s6509_s29 = sphi %s6583_s29, %s7937_s29   ;;  %s6505_s28 = sphi %s6581_s28, %s7939_s28   ;;  %s6501_s27 = sphi %s6579_s27, %s7938_s27  }
   0xd   : > { %7917 = sst [smem:[#allocation27_spill]] %s6600_s9  ;;  %s57_s10 = sadd.s32 1, %s6509_s29 }
   0xe   : > { %s54_s11 = ssub.s32 %s6513_s30, %s6600_s9  ;;  %p64_p0 = scmp.ne.s32.totalorder %s6509_s29, %s6505_s28 }
   0xf   : > { %p55_p1 = scmp.eq.s32.totalorder %s54_s11, 0  ;;  %p65_p2 = scmp.eq.s32.totalorder %s6513_s30, 0 }
  0x10   : > { %p6135_p3 = scmp.lt.s32.totalorder %s6513_s30, 2  ;;  %s254_s13 = sand.u32 1, %s6513_s30  }
  0x11   : > { %s6610_s12 = scalar_select %p55_p1, %s6509_s29, %s57_s10  }
  0x12   : > { %p66_p4 = por %p65_p2, %p64_p0  ;;  %s6614_s14 = sand.u32 1, %s6509_s29  }
  0x13   : > { %7918 = sst [smem:[#allocation28_spill]] %s6610_s12  ;;  %s4882_s15 = sshll.u32 %s6614_s14, 9 }
  0x14   : > { %s5242_s16 = sshll.u32 %s6513_s30, 13  ;;  %s7919_s1 = sld [smem:[#allocation29_spill]] }
  0x15   : > { %s258_s20 = scalar_lea.vmem [#allocation5], %s4882_s15  ;;  %p6623_p5 = pnand %p6135_p3, %p66_p4 }
  0x16   : > { %s266_s21 = sshll.u32 %s258_s20, 4  ;;  %s6631_s23 = scalar_lea.sflag [#allocation6], %s254_s13  ;;  %s6627_s21 = int_to_ptr.vmem [resolvable:$true] %s266_s21 }
  0x17   : > { %s7920_s22 = scalar_select %p6623_p5, 1, 0 }
  0x18   : > { %p6637_p7 = pneg %p6623_p5 }
  0x1a   : > { %s6621_s19 = scalar_lea.hbm %s7919_s1, %s5242_s16  ;;  %s6240_s11 = scalar_lea.hbm %s7919_s1, 16384 }
  0x1b   : > { %s6235_s24 = scalar_lea.hbm %s6621_s19, 8192  ;;  %p6241_p10 = scmp.lt.u32.totalorder %s6621_s19, %s7919_s1 }
  0x1c   : > { %p6236_p6 = scmp.ne.s32.totalorder %s6621_s19, %s6235_s24  ;;  %p6242_p11 = scmp.lt.u32.totalorder %s6240_s11, %s6235_s24 }
  0x1d   : > { %s7921_s25 = scalar_select %p6637_p7, 1, 0 }
  0x1e   : > { %p6238_p8 = pnand %p6637_p7, %p6236_p6  ;;  %p6243_p12 = por %p6242_p11, %p6241_p10 }
  0x1f   : > { %p6244_p13 = scmp.lt.u32.totalorder %s6235_s24, %s6621_s19 }
  0x20   : > { %p6239_p9 = pneg %p6238_p8 }
  0x21   : > { %p6245_p0 = por %p6244_p13, %p6243_p12 }
  0x23   : > { %p6246_p1 = pnand %p6245_p0, %p6239_p9 }
  0x25   : > { %6249 = shalt.err (!%p6246_p1)
}
  0x26   : > { %s6250_s17 = scalar_lea.vmem %s6627_s21, 8192  ;;  %s6515_s18 = smov [#allocation5]  }
  0x27   : > { %p6251_p2 = scmp.ne.s32.totalorder %s6627_s21, %s6250_s17  ;;  %s6255_s20 = sshll.u32 %s6515_s18, 4  ;;  %s6256_s20 = int_to_ptr.vmem [resolvable:$false] %s6255_s20 }
  0x28   : > { %s6257_s26 = scalar_lea.vmem %s6256_s20, 16384  ;;  %p6258_p6 = scmp.lt.s32.totalorder %s6627_s21, %s6256_s20 }
  0x29   : > { %p6253_p3 = pnand %p6251_p2, %p6637_p7  ;;  %p6259_p8 = scmp.lt.s32.totalorder %s6257_s26, %s6250_s17 }
  0x2b   : > { %p6254_p4 = pneg %p6253_p3  ;;  %p6260_p10 = por %p6259_p8, %p6258_p6 }
  0x2d   : > { %p6261_p11 = pnand %p6260_p10, %p6254_p4 }
  0x2f   : > { %6264 = shalt.err (!%p6261_p11)
}
  0x30   : > { %s6516_s24 = smov 256   ;;  %s6517_s10 = smov 16  }
  0x31   : > { %6121 = dma.hbm_to_vmem [thread:$0]  (!%p6623_p5), %s6621_s19, 8192, %s6627_s21, %s6631_s23, %s6516_s24, %s6516_s24, %s6517_s10  }
  0x32   : > { %s4890_s11 = sshll.u32 %s6614_s14, 8  ;;  %s5246_s15 = sshll.u32 %s6513_s30, 12 }
  0x33   : > { %s7922_s3 = sld [smem:[#allocation30_spill]]  ;;  %s302_s20 = scalar_lea.vmem [#allocation8], %s4890_s11 }
  0x34   : > { %s310_s26 = sshll.u32 %s302_s20, 4  ;;  %s6672_s1 = scalar_lea.sflag [#allocation9], %s254_s13  ;;  %s6668_s26 = int_to_ptr.vmem [resolvable:$true] %s310_s26 }
  0x39   : > { %s6666_s17 = scalar_lea.hbm %s7922_s3, %s5246_s15  ;;  %s6270_s24 = scalar_lea.hbm %s7922_s3, 8192 }
  0x3a   : > { %s6265_s12 = scalar_lea.hbm %s6666_s17, 4096  ;;  %p6271_p0 = scmp.lt.u32.totalorder %s6666_s17, %s7922_s3 }
  0x3b   : > { %p6266_p9 = scmp.ne.s32.totalorder %s6666_s17, %s6265_s12  ;;  %p6272_p1 = scmp.lt.u32.totalorder %s6270_s24, %s6265_s12 }
  0x3c   : > { %p6274_p3 = scmp.lt.u32.totalorder %s6265_s12, %s6666_s17 }
  0x3d   : > { %p6268_p12 = pnand %p6266_p9, %p6637_p7  ;;  %p6273_p2 = por %p6272_p1, %p6271_p0 }
  0x3f   : > { %p6269_p13 = pneg %p6268_p12  ;;  %p6275_p4 = por %p6274_p3, %p6273_p2 }
  0x41   : > { %p6276_p6 = pnand %p6275_p4, %p6269_p13 }
  0x43   : > { %6279 = shalt.err (!%p6276_p6)
}
  0x44   : > { %s6280_s13 = scalar_lea.vmem %s6668_s26, 4096  ;;  %s6518_s11 = smov [#allocation8]  }
  0x45   : > { %p6281_p8 = scmp.ne.s32.totalorder %s6668_s26, %s6280_s13  ;;  %s6285_s16 = sshll.u32 %s6518_s11, 4  ;;  %s6286_s16 = int_to_ptr.vmem [resolvable:$false] %s6285_s16 }
  0x46   : > { %s6287_s18 = scalar_lea.vmem %s6286_s16, 8192  ;;  %p6288_p9 = scmp.lt.s32.totalorder %s6668_s26, %s6286_s16 }
  0x47   : > { %p6283_p10 = pnand %p6281_p8, %p6637_p7  ;;  %p6289_p12 = scmp.lt.s32.totalorder %s6287_s18, %s6280_s13 }
  0x49   : > { %p6284_p11 = pneg %p6283_p10  ;;  %p6290_p0 = por %p6289_p12, %p6288_p9 }
  0x4b   : > { %p6291_p1 = pnand %p6290_p0, %p6284_p11 }
  0x4d   : > { %6294 = shalt.err (!%p6291_p1)
}
  0x4e   : > { %s7902_s12 = smov 512   ;;  %s7903_s20 = smov 32  }
  0x4f   : > { %6127 = dma.hbm_to_vmem [thread:$0]  (!%p6623_p5), %s6666_s17, 4096, %s6668_s26, %s6672_s1, %s7902_s12, %s7902_s12, %s7903_s20  }
  0x50   : > { %s6700_s19 = sadd.s32 4294967295, %s6513_s30   ;;  %p70_p13 = scmp.ne.s32.totalorder %s6505_s28, %s6501_s27 }
  0x51   : > { %p7907_p2 = scmp.eq.s32.totalorder %s6700_s19, 0  ;;  %p4879_p3 = scmp.ge.s32.totalorder %s6513_s30, 1 }
  0x52   : > { %p227_p4 = scmp.lt.s32.totalorder %s6513_s30, 3  ;;  %s6521_s26 = smov [#allocation2]  }
  0x53   : > { %p6709_p6 = por %p7907_p2, %p70_p13  ;;  %s240_s24 = sshll.u32 %s6521_s26, 4  ;;  %s241_s24 = int_to_ptr.vmem [resolvable:$true] %s240_s24 }
  0x54   : > { %p6714_p10 = pnand %p4879_p3, %p227_p4  ;;  %s4886_s10 = sshll.u32 %s6614_s14, 10 }
  0x55   : > { %s7923_s21 = scalar_select %p6709_p6, 1, 0 }
  0x56   : > { %s7924_s17 = scalar_select %p6714_p10, 1, 0 }
  0x57   : > { %p6114_p11 = pneg %p6714_p10  ;;  %s5244_s27 = sshll.u32 %s6513_s30, 14 }
  0x58   : > { %s6733_s16 = scalar_lea.hbm %s7895_s2, %s5244_s27  ;;  %s280_s18 = scalar_lea.vmem [#allocation7], %s4886_s10 }
  0x59   : > { %p6724_p9 = pnand %p6114_p11, %p7907_p2  ;;  %s288_s26 = sshll.u32 %s280_s18, 4  ;;  %s6737_s26 = int_to_ptr.vmem [resolvable:$true] %s288_s26 }
  0x5a   : > { %s6295_s3 = scalar_lea.hbm %s7893_s0, 128 }
  0x5b   : > { %p6296_p12 = scmp.ne.s32.totalorder %s7893_s0, %s6295_s3  ;;  %p6297_p0 = pneg %p6724_p9 }
  0x5c   : > { %p6302_p3 = scmp.lt.u32.totalorder %s6295_s3, %s7893_s0 }
  0x5d   : > { %p6298_p1 = pnand %p6297_p0, %p6296_p12 }
  0x5f   : > { %p6299_p13 = pneg %p6298_p1 }
  0x61   : > { %p6304_p4 = pnand %p6302_p3, %p6299_p13 }
  0x63   : > { %6307 = shalt.err (!%p6304_p4)
}
  0x64   : > { %s6308_s18 = scalar_lea.vmem %s241_s24, 128  ;;  %p6316_p6 = scmp.lt.s32.totalorder %s241_s24, %s241_s24 }
  0x65   : > { %p6309_p11 = scmp.ne.s32.totalorder %s241_s24, %s6308_s18  ;;  %p6317_p10 = scmp.lt.s32.totalorder %s6308_s18, %s6308_s18 }
  0x67   : > { %p6311_p8 = pnand %p6309_p11, %p6297_p0  ;;  %p6318_p5 = por %p6317_p10, %p6316_p6 }
  0x69   : > { %p6312_p2 = pneg %p6311_p8 }
  0x6b   : > { %p6319_p7 = pnand %p6318_p5, %p6312_p2 }
  0x6d   : > { %6322 = shalt.err (!%p6319_p7)
}
  0x6e   : > { %6117 = dma.hbm_to_vmem [thread:$0]  (!%p6724_p9), %s7893_s0, 128, %s241_s24, [#allocation3]  }
  0x6f   : > { %s6323_s3 = scalar_lea.hbm %s6733_s16, 16384  ;;  %p7926_p0 = scmp.ne.s32.totalorder %s7921_s25, 0 }
  0x70   : > { %p6324_p12 = scmp.ne.s32.totalorder %s6733_s16, %s6323_s3  ;;  %s6328_s13 = scalar_lea.hbm %s7895_s2, 32768 }
  0x71   : > { %p6329_p5 = scmp.lt.u32.totalorder %s6733_s16, %s7895_s2  ;;  %p6330_p7 = scmp.lt.u32.totalorder %s6328_s13, %s6323_s3 }
  0x72   : > { %p6326_p8 = pnand %p6324_p12, %p7926_p0  ;;  %p6332_p6 = scmp.lt.u32.totalorder %s6323_s3, %s6733_s16 }
  0x73   : > { %p6331_p2 = por %p6330_p7, %p6329_p5 }
  0x74   : > { %p6327_p1 = pneg %p6326_p8 }
  0x75   : > { %p6333_p10 = por %p6332_p6, %p6331_p2 }
  0x77   : > { %p6334_p13 = pnand %p6333_p10, %p6327_p1 }
  0x79   : > { %6337 = shalt.err (!%p6334_p13)
}
  0x7a   : > { %s6338_s24 = scalar_lea.vmem %s6737_s26, 16384  ;;  %s6522_s18 = smov [#allocation7]  }
  0x7b   : > { %p6339_p9 = scmp.ne.s32.totalorder %s6737_s26, %s6338_s24  ;;  %s6343_s29 = sshll.u32 %s6522_s18, 4  ;;  %s6344_s29 = int_to_ptr.vmem [resolvable:$false] %s6343_s29 }
  0x7c   : > { %s6345_s9 = scalar_lea.vmem %s6344_s29, 32768  ;;  %p6346_p11 = scmp.lt.s32.totalorder %s6737_s26, %s6344_s29 }
  0x7d   : > { %p6341_p3 = pnand %p6339_p9, %p7926_p0  ;;  %p6347_p12 = scmp.lt.s32.totalorder %s6345_s9, %s6338_s24 }
  0x7f   : > { %p6342_p4 = pneg %p6341_p3  ;;  %p6348_p8 = por %p6347_p12, %p6346_p11 }
  0x81   : > { %p6349_p5 = pnand %p6348_p8, %p6342_p4 }
  0x83   : > { %6352 = shalt.err (!%p6349_p5)
}
  0x84   : > { %p7927_p1 = scmp.ne.s32.totalorder %s7920_s22, 0  ;;  %s7928_s3 = smov 32  }
  0x85   : > { %s7929_s12 = smov 512   ;;  %s6785_s11 = scalar_lea.hbm %s7897_s4, %s5244_s27 }
  0x86   : > { %6124 = dma.hbm_to_vmem [thread:$0]  (!%p7927_p1), %s6733_s16, 16384, %s6737_s26, %s6631_s23, %s7929_s12, %s7929_s12, %s7928_s3  }
  0x87   : > { %s324_s15 = scalar_lea.vmem [#allocation10], %s4886_s10  ;;  %s6353_s18 = scalar_lea.hbm %s6785_s11, 16384 }
  0x88   : > { %s332_s24 = sshll.u32 %s324_s15, 4  ;;  %p6354_p7 = scmp.ne.s32.totalorder %s6785_s11, %s6353_s18  ;;  %s6789_s24 = int_to_ptr.vmem [resolvable:$true] %s332_s24 }
  0x89   : > { %s6358_s26 = scalar_lea.hbm %s7897_s4, 32768  ;;  %p6359_p10 = scmp.lt.u32.totalorder %s6785_s11, %s7897_s4 }
  0x8a   : > { %p6356_p2 = pnand %p6354_p7, %p7926_p0  ;;  %p6360_p13 = scmp.lt.u32.totalorder %s6358_s26, %s6353_s18 }
  0x8b   : > { %p6362_p3 = scmp.lt.u32.totalorder %s6353_s18, %s6785_s11 }
  0x8c   : > { %p6357_p6 = pneg %p6356_p2  ;;  %p6361_p9 = por %p6360_p13, %p6359_p10 }
  0x8e   : > { %p6363_p4 = por %p6362_p3, %p6361_p9 }
  0x90   : > { %p6364_p11 = pnand %p6363_p4, %p6357_p6 }
  0x92   : > { %6367 = shalt.err (!%p6364_p11)
}
  0x93   : > { %s6368_s10 = scalar_lea.vmem %s6789_s24, 16384  ;;  %s6523_s9 = smov [#allocation10]  }
  0x94   : > { %p6369_p12 = scmp.ne.s32.totalorder %s6789_s24, %s6368_s10  ;;  %s6373_s3 = sshll.u32 %s6523_s9, 4  ;;  %s6374_s3 = int_to_ptr.vmem [resolvable:$false] %s6373_s3 }
  0x95   : > { %s6375_s12 = scalar_lea.vmem %s6374_s3, 32768  ;;  %p6376_p7 = scmp.lt.s32.totalorder %s6789_s24, %s6374_s3 }
  0x96   : > { %p6371_p8 = pnand %p6369_p12, %p7926_p0  ;;  %p6377_p2 = scmp.lt.s32.totalorder %s6375_s12, %s6368_s10 }
  0x98   : > { %p6372_p5 = pneg %p6371_p8  ;;  %p6378_p10 = por %p6377_p2, %p6376_p7 }
  0x9a   : > { %p6379_p13 = pnand %p6378_p10, %p6372_p5 }
  0x9c   : > { %6382 = shalt.err (!%p6379_p13)
}
  0x9d   : > { %s6524_s20 = smov 128   ;;  %s6525_s13 = smov 8  }
  0x9e   : > { %6130 = dma.hbm_to_vmem [thread:$0]  (!%p7927_p1), %s6785_s11, 16384, %s6789_s24, %s6672_s1, %s6524_s20, %s6524_s20, %s6525_s13  }
  0x9f   : > { %s4898_s15 = sshll.u32 %s6614_s14, 7  ;;  %s5250_s18 = sshll.u32 %s6513_s30, 11 }
  0xa0   : > { %s6821_s26 = scalar_lea.hbm %s7898_s5, %s5250_s18  ;;  %s346_s27 = scalar_lea.vmem [#allocation11], %s4898_s15 }
  0xa1   : > { %s354_s29 = sshll.u32 %s346_s27, 4  ;;  %s343_s10 = scalar_lea.sflag [#allocation12], %s6614_s14  ;;  %s6823_s29 = int_to_ptr.vmem [resolvable:$true] %s354_s29 }
  0xa2   : > { %s6383_s9 = scalar_lea.hbm %s6821_s26, 2048  ;;  %s6388_s11 = scalar_lea.hbm %s7898_s5, 4096 }
  0xa3   : > { %p6384_p6 = scmp.ne.s32.totalorder %s6821_s26, %s6383_s9  ;;  %p6389_p4 = scmp.lt.u32.totalorder %s6821_s26, %s7898_s5 }
  0xa4   : > { %p6390_p11 = scmp.lt.u32.totalorder %s6388_s11, %s6383_s9  ;;  %p6392_p8 = scmp.lt.u32.totalorder %s6383_s9, %s6821_s26 }
  0xa5   : > { %p6386_p9 = pnand %p6384_p6, %p7926_p0 }
  0xa6   : > { %p6391_p12 = por %p6390_p11, %p6389_p4 }
  0xa7   : > { %p6387_p3 = pneg %p6386_p9 }
  0xa8   : > { %p6393_p5 = por %p6392_p8, %p6391_p12 }
  0xaa   : > { %p6394_p7 = pnand %p6393_p5, %p6387_p3 }
  0xac   : > { %6397 = shalt.err (!%p6394_p7)
}
  0xad   : > { %s6398_s12 = scalar_lea.vmem %s6823_s29, 2048  ;;  %s6526_s15 = smov [#allocation11]  }
  0xae   : > { %p6399_p2 = scmp.ne.s32.totalorder %s6823_s29, %s6398_s12  ;;  %s6403_s18 = sshll.u32 %s6526_s15, 4  ;;  %s6404_s18 = int_to_ptr.vmem [resolvable:$false] %s6403_s18 }
  0xaf   : > { %s6405_s23 = scalar_lea.vmem %s6404_s18, 4096  ;;  %p6406_p6 = scmp.lt.s32.totalorder %s6823_s29, %s6404_s18 }
  0xb0   : > { %p6401_p10 = pnand %p6399_p2, %p7926_p0  ;;  %p6407_p9 = scmp.lt.s32.totalorder %s6405_s23, %s6398_s12 }
  0xb2   : > { %p6402_p13 = pneg %p6401_p10  ;;  %p6408_p4 = por %p6407_p9, %p6406_p6 }
  0xb4   : > { %p6409_p11 = pnand %p6408_p4, %p6402_p13 }
  0xb6   : > { %6412 = shalt.err (!%p6409_p11)
}
  0xb7   : > { %6133 = dma.hbm_to_vmem [thread:$0]  (!%p7927_p1), %s6821_s26, 2048, %s6823_s29, %s343_s10, %s6524_s20, %s6524_s20, %s6525_s13  }
  0xb8   : > { %p7930_p0 = scmp.ne.s32.totalorder %s7924_s17, 0 }
  0xb9   : > { %p7931_p3 = scmp.eq.s32.totalorder (!%p7930_p0), %s6700_s19, 0 }
  0xba   : > { %366 = sbr.rel (%p7930_p0) target bundleno = 13648 (0x3550), region = 48 }
  0xc1   : > { %6478 = dma.done.wait (%p7931_p3), [#allocation3], 128   ;;  %p7932_p12 = pmov %p7931_p3 }
  0xc2   : > { %s372_s22 = sand.u32 1, %s6700_s19   ;;  %s374_s25 = sand.u32 1, %s6505_s28  }
  0xc3   : > { %6480 = vsyncadd (%p7932_p12), [#allocation3], 4294967168  ;;  %s4904_s16 = sshll.u32 %s374_s25, 9  ;;  %s373_s27 = scalar_lea.sflag [#allocation6], %s372_s22 }
  0xc4   : > { %s6860_s14 = scalar_lea.vmem [#allocation5], %s4904_s16  ;;  %p7933_p8 = scmp.ne.s32.totalorder %s7923_s21, 0 }
  0xc6   : > { %6482 = dma.done.wait (%p7933_p8), %s373_s27, 24576  }
  0xc7   : > { %6484 = vsyncadd (%p7933_p8), %s373_s27, 4294942720  ;;  %s4905_s17 = sshll.u32 %s374_s25, 10  ;;  %s4906_s20 = sshll.u32 %s374_s25, 8 }
  0xc8   : > { %s6866_s13 = scalar_lea.vmem [#allocation7], %s4905_s17  ;;  %s391_s26 = scalar_lea.sflag [#allocation9], %s372_s22 }
  0xc9   : > { %s6868_s29 = scalar_lea.vmem [#allocation8], %s4906_s20 }
  0xca   : > { %6486 = dma.done.wait (%p7933_p8), %s391_s26, 20480  }
  0xcb   : > { %6488 = vsyncadd (%p7933_p8), %s391_s26, 4294946816  ;;  %s4908_s10 = sshll.u32 %s374_s25, 7  ;;  %s6874_s9 = scalar_lea.vmem [#allocation10], %s4905_s17 }
  0xcc   : > { %s409_s1 = scalar_lea.sflag [#allocation12], %s374_s25  ;;  %s6876_s30 = scalar_lea.vmem [#allocation11], %s4908_s10 }
  0xcd   : > { %6490 = dma.done.wait (%p7933_p8), %s409_s1, 2048  }
  0xce   : > { %6492 = vsyncadd (%p7933_p8), %s409_s1, 4294965248  ;;  %p7934_p1 = scmp.ne.s32.totalorder %s6700_s19, 0 }
  0xcf   : > { %v4910_v0 = vld [vmem:[%s7899_s6] ss:$0 sm:$0xff] (!%p7934_p1) }
  0xd0   : > { %467 = sbr.rel (%p7934_p1) target bundleno = 215 (0xd7), region = 76  ;;  %473 = vst [vmem:[#allocation13] sm:$0xff] (!%p7934_p1), %v4910_v0 }
  0xd7 PF: > { %v483_v1 = vld [vmem:[%s6860_s14] sm:$0xff]  ;;  %v6527_v2 = vmov 0.0   ;;  %vm6528_vm0 = vmmov 0   ;;  %v484_v5 = vld [vmem:[%s6860_s14 + $0x10] sm:$0xff]  ;;  %v569_v16 = vld [vmem:[%s6860_s14 + $0x8] sm:$0xff]  ;;  %v536_v30 = vlaneseq  ;;  %p5233_p5 = scmp.ne.s32.totalorder %s6700_s19, 1 }
  0xd8   : > { %5756 = vmatprep.subr.bf16.mxu0 %v6527_v2  ;;  %v487_v3 = vunpack.c.l.s8.bf16 %v483_v1  ;;  %5772 = vmatprep.mubr.msk.bf16.mxu0 %vm6528_vm0, %v6527_v2  ;;  %v488_v4 = vunpack.c.h.s8.bf16 %v483_v1  ;;  %v489_v6 = vunpack.c.l.s8.bf16 %v484_v5  ;;  %v490_v7 = vunpack.c.h.s8.bf16 %v484_v5  ;;  %v485_v8 = vld [vmem:[%s6860_s14 + $0x20] sm:$0xff]  ;;  %v486_v11 = vld [vmem:[%s6860_s14 + $0x30] sm:$0xff]  ;;  %v570_v19 = vld [vmem:[%s6860_s14 + $0x18] sm:$0xff] }
  0xd9   : > { %5776 = vmatprep.subr.bf16.mxu1 %v6527_v2  ;;  %5792 = vmatprep.mubr.msk.bf16.mxu1 %vm6528_vm0, %v6527_v2  ;;  %v491_v9 = vunpack.c.l.s8.bf16 %v485_v8  ;;  %v492_v10 = vunpack.c.h.s8.bf16 %v485_v8  ;;  %v493_v12 = vunpack.c.l.s8.bf16 %v486_v11  ;;  %v494_v13 = vunpack.c.h.s8.bf16 %v486_v11  ;;  %v474_v14 = vld [vmem:[#allocation13] sm:$0xff]  ;;  %v571_v22 = vld [vmem:[%s6860_s14 + $0x28] sm:$0xff]  ;;  %v572_v25 = vld [vmem:[%s6860_s14 + $0x38] sm:$0xff] }
  0xda   : > { %5757 = vmatpush3.bf16.msra.mxu0 %v487_v3  ;;  %v495_v15 = vpack.c.bf16 %v474_v14, %v474_v14  ;;  %v573_v17 = vunpack.c.l.s8.bf16 %v569_v16  ;;  %v574_v18 = vunpack.c.h.s8.bf16 %v569_v16  ;;  %v575_v20 = vunpack.c.l.s8.bf16 %v570_v19  ;;  %v475_v28 = vld [vmem:[#allocation2] sm:$0xff]  ;;  %v6924_v33 = vld [vmem:[%s6876_s30 + $0x8] sm:$0xff]  ;;  %v6930_v35 = vld [vmem:[%s6876_s30] sm:$0xff] }
  0xdb   : > { %5758 = vmatprep.subr.bf16.mxu0 %v6527_v2  ;;  %v576_v21 = vunpack.c.h.s8.bf16 %v570_v19  ;;  %v577_v23 = vunpack.c.l.s8.bf16 %v571_v22  ;;  %v578_v24 = vunpack.c.h.s8.bf16 %v571_v22  ;;  %v579_v26 = vunpack.c.l.s8.bf16 %v572_v25  ;;  %v657_v8 = vld [vmem:[%s6866_s13 + $0x18] sm:$0xff] }
  0xdc   : > { %5777 = vmatpush3.bf16.msra.mxu1 %v573_v17  ;;  %v580_v27 = vunpack.c.h.s8.bf16 %v572_v25  ;;  %v6915_v29 = vpack.c.bf16 %v475_v28, %v475_v28  ;;  %v6918_v31 = vshrl.u32 %v536_v30, 7  ;;  %v673_v11 = vunpack.c.l.s8.bf16 %v657_v8  ;;  %v659_v17 = vld [vmem:[%s6866_s13 + $0x28] sm:$0xff]  ;;  %v660_v28 = vld [vmem:[%s6866_s13 + $0x30] sm:$0xff] }
  0xdd   : > { %5778 = vmatprep.subr.bf16.mxu1 %v6527_v2  ;;  %v677_v16 = vunpack.c.h.s8.bf16 %v657_v8 }
  0xde   : > { %5759 = vmatpush3.bf16.msra.mxu0 %v488_v4  ;;  %v6921_v32 = vsub.s32 1, %v6918_v31  ;;  %v6927_v34 = vsub.s32 0, %v6918_v31  ;;  %v6937_v56 = vsub.s32 2, %v6918_v31  ;;  %v6942_v58 = vsub.s32 3, %v6918_v31 }
  0xdf   : > { %5760 = vmatprep.subr.bf16.mxu0 %v6527_v2  ;;  %v6945_v59 = vsub.s32 4, %v6918_v31 }
  0xe0   : > { %5779 = vmatpush3.bf16.msra.mxu1 %v574_v18  ;;  %v539_v36 = vrot.slane %v6924_v33, %v6921_v32  ;;  %v544_v37 = vrot.slane %v6930_v35, %v6927_v34  ;;  %v624_v57 = vrot.slane %v6924_v33, %v6937_v56  ;;  %v629_v61 = vrot.slane %v6930_v35, %v6921_v32  ;;  %v661_v18 = vld [vmem:[%s6866_s13 + $0x38] sm:$0xff] }
  0xe1   : > { %5780 = vmatprep.subr.bf16.mxu1 %v6527_v2  ;;  %v562_v62 = vrot.slane %v6930_v35, %v6942_v58  ;;  %v567_v1 = vrot.slane %v6930_v35, %v6945_v59  ;;  %v681_v22 = vunpack.c.l.s8.bf16 %v661_v18 }
  0xe2   : > { %5761 = vmatpush3.bf16.msra.mxu0 %v489_v6 }
  0xe3   : > { %5762 = vmatprep.subr.bf16.mxu0 %v6527_v2 }
  0xe4   : > { %5781 = vmatpush3.bf16.msra.mxu1 %v575_v20 }
  0xe5   : > { %5782 = vmatprep.subr.bf16.mxu1 %v6527_v2 }
  0xe6   : > { %5763 = vmatpush3.bf16.msra.mxu0 %v490_v7  ;;  %v655_v7 = vld [vmem:[%s6866_s13 + $0x8] sm:$0xff] }
  0xe7   : > { %5764 = vmatprep.subr.bf16.mxu0 %v6527_v2 }
  0xe8   : > { %5783 = vmatpush3.bf16.msra.mxu1 %v576_v21  ;;  %v679_v21 = vunpack.c.l.s8.bf16 %v659_v17 }
  0xe9   : > { %5784 = vmatprep.subr.bf16.mxu1 %v6527_v2 }
  0xea   : > { %5765 = vmatpush3.bf16.msra.mxu0 %v491_v9  ;;  %v654_v9 = vld [vmem:[%s6866_s13] sm:$0xff] }
  0xeb   : > { %5766 = vmatprep.subr.bf16.mxu0 %v6527_v2  ;;  %v674_v19 = vunpack.c.h.s8.bf16 %v654_v9 }
  0xec   : > { %5785 = vmatpush3.bf16.msra.mxu1 %v577_v23 }
  0xed   : > { %5786 = vmatprep.subr.bf16.mxu1 %v6527_v2 }
  0xee   : > { %5767 = vmatpush3.bf16.msra.mxu0 %v492_v10  ;;  %v671_v10 = vunpack.c.l.s8.bf16 %v655_v7 }
  0xef   : > { %5768 = vmatprep.subr.bf16.mxu0 %v6527_v2 }
  0xf0   : > { %5787 = vmatpush3.bf16.msra.mxu1 %v578_v24 }
  0xf1   : > { %5788 = vmatprep.subr.bf16.mxu1 %v6527_v2 }
  0xf2   : > { %5769 = vmatpush3.bf16.msra.mxu0 %v493_v12  ;;  %v670_v12 = vunpack.c.l.s8.bf16 %v654_v9 }
  0xf3   : > { %5770 = vmatprep.subr.bf16.mxu0 %v6527_v2 }
  0xf4   : > { %5789 = vmatpush3.bf16.msra.mxu1 %v579_v26 }
  0xf5   : > { %5790 = vmatprep.subr.bf16.mxu1 %v6527_v2 }
  0xf6   : > { %5771 = vmatpush3.bf16.msra.mxu0 %v494_v13  ;;  %v656_v13 = vld [vmem:[%s6866_s13 + $0x10] sm:$0xff] }
  0xf7   : > { %702 = vmatprep.subr.bf16.mxu0 %v671_v10  ;;  %v676_v20 = vunpack.c.h.s8.bf16 %v656_v13 }
  0xf8   : > { %5791 = vmatpush3.bf16.msra.mxu1 %v580_v27  ;;  %v658_v27 = vld [vmem:[%s6866_s13 + $0x20] sm:$0xff] }
  0xf9   : > { %5773 = vmatmul.mubr.bf16.vlgmr.msra.gmra.mrb[0].mxu0 %v495_v15  ;;  %v672_v15 = vunpack.c.l.s8.bf16 %v656_v13  ;;  %743 = vmatprep.subr.bf16.mxu1 %v673_v11  ;;  %v678_v30 = vunpack.c.l.s8.bf16 %v658_v27  ;;  %v6978_v13 = vsub.s32 5, %v6918_v31 }
  0xfa   : > { %703 = vmatpush1.bf16.msra.mxu0 %v670_v12 }
  0xfb   : > { %5793 = vmatmul.mubr.bf16.vlgmr.msra.gmra.mrb[0].mxu1 %v6915_v29 }
  0xfc   : > { %744 = vmatpush1.bf16.msra.mxu1 %v672_v15  ;;  %v646_v15 = vrot.slane %v6930_v35, %v6978_v13 }
  0xfd   : > { %745 = vmatprep.subr.bf16.mxu1 %v677_v16 }
 0x100   : > { %746 = vmatpush1.bf16.msra.mxu1 %v676_v20  ;;  %v832_v20 = vld [vmem:[%s6874_s9] sm:$0xff] }
 0x101   : > { %747 = vmatprep.subr.bf16.mxu1 %v681_v22 }
 0x1cc   : > { %v530_v38 = vpop.f32.mrb[0].mxu0 }
 0x1cd   : > { %v540_v39 = vmul.f32 %v539_v36, %v530_v38  ;;  %v5774_v40 = vpop.f32.mrb[1].mxu0  ;;  %v680_v36 = vunpack.c.l.s8.bf16 %v660_v28  ;;  %v685_v38 = vunpack.c.h.s8.bf16 %v661_v18 }
 0x1ce   : > { %v533_v41 = vpop.f32.mrb[2].mxu0  ;;  %v615_v49 = vpop.f32.mrb[0].mxu1  ;;  %v684_v40 = vunpack.c.h.s8.bf16 %v660_v28 }
 0x1cf   : > { %v545_v42 = vadd.f32 %v544_v37, %v540_v39  ;;  %v5775_v43 = vpop.f32.mrb[3].mxu0  ;;  %v5794_v50 = vpop.f32.mrb[1].mxu1  ;;  %v625_v60 = vmul.f32 %v624_v57, %v615_v49  ;;  %748 = vmatpush1.bf16.msra.mxu1 %v680_v36  ;;  %v683_v37 = vunpack.c.h.s8.bf16 %v659_v17  ;;  %v682_v39 = vunpack.c.h.s8.bf16 %v658_v27  ;;  %v663_v41 = vld [vmem:[%s6866_s13 + $0x48] sm:$0xff] }
 0x1d0   : > { %v618_v51 = vpop.f32.mrb[2].mxu1  ;;  %749 = vmatprep.subr.bf16.mxu1 %v685_v38  ;;  %v687_v43 = vunpack.c.l.s8.bf16 %v663_v41  ;;  %v691_v49 = vunpack.c.h.s8.bf16 %v663_v41  ;;  %v845_v36 = vld [vmem:[%s6874_s9 + $0x68] sm:$0xff] }
 0x1d1   : > { %v546_v44 = vadd.f32 %v545_v42, %v474_v14  ;;  %v5795_v52 = vpop.f32.mrb[3].mxu1  ;;  %v630_v3 = vadd.f32 %v629_v61, %v625_v60  ;;  %v675_v14 = vunpack.c.h.s8.bf16 %v655_v7  ;;  %v665_v42 = vld [vmem:[%s6866_s13 + $0x58] sm:$0xff]  ;;  %v666_v60 = vld [vmem:[%s6866_s13 + $0x60] sm:$0xff]  ;;  %v668_v61 = vld [vmem:[%s6866_s13 + $0x70] sm:$0xff] }
 0x1d2   : > { %v693_v50 = vunpack.c.h.s8.bf16 %v665_v42  ;;  %v844_v7 = vld [vmem:[%s6874_s9 + $0x60] sm:$0xff]  ;;  %v841_v41 = vld [vmem:[%s6874_s9 + $0x48] sm:$0xff] }
 0x1d3   : > { %547 = vadd.xlane.f32.xlu0 %v546_v44  ;;  %704 = vmatprep.subr.bf16.mxu0 %v675_v14  ;;  %v872_v9 = vunpack.c.l.s8.bf16 %v844_v7  ;;  %v6981_v14 = vsub.s32 6, %v6918_v31  ;;  %v873_v28 = vunpack.c.h.s8.bf16 %v844_v7 }
 0x1d4   : > { %705 = vmatpush1.bf16.msra.mxu0 %v674_v19  ;;  %750 = vmatpush1.bf16.msra.mxu1 %v684_v40  ;;  %v833_v40 = vld [vmem:[%s6874_s9 + $0x8] sm:$0xff] }
 0x1d5   : > { %706 = vmatprep.subr.bf16.mxu0 %v679_v21  ;;  %v651_v18 = vrot.slane %v6930_v35, %v6981_v14  ;;  %v840_v21 = vld [vmem:[%s6874_s9 + $0x40] sm:$0xff] }
 0x1d8   : > { %707 = vmatpush1.bf16.msra.mxu0 %v678_v30  ;;  %v837_v30 = vld [vmem:[%s6874_s9 + $0x28] sm:$0xff] }
 0x1d9   : > { %708 = vmatprep.subr.bf16.mxu0 %v683_v37  ;;  %v865_v37 = vunpack.c.h.s8.bf16 %v840_v21  ;;  %v858_v38 = vunpack.c.l.s8.bf16 %v837_v30 }
 0x1dc   : > { %709 = vmatpush1.bf16.msra.mxu0 %v682_v39  ;;  %v874_v39 = vunpack.c.l.s8.bf16 %v845_v36 }
 0x1dd   : > { %710 = vmatprep.subr.bf16.mxu0 %v687_v43  ;;  %v866_v43 = vunpack.c.l.s8.bf16 %v841_v41 }
 0x260   : > { %v548_v45 = vpop.xlane.xlu0 %547 }
 0x261   : > { %v550_v46 = vmul.f32 0.0078125, %v548_v45  ;;  %v662_v45 = vld [vmem:[%s6866_s13 + $0x40] sm:$0xff] }
 0x262   : > { %v690_v51 = vunpack.c.h.s8.bf16 %v662_v45 }
 0x263   : > { %v551_v47 = vsub.f32 %v546_v44, %v550_v46  ;;  %v689_v44 = vunpack.c.l.s8.bf16 %v665_v42  ;;  %v664_v46 = vld [vmem:[%s6866_s13 + $0x50] sm:$0xff]  ;;  %v850_v42 = vunpack.c.l.s8.bf16 %v833_v40 }
 0x264   : > { %v692_v52 = vunpack.c.h.s8.bf16 %v664_v46 }
 0x265   : > { %v552_v48 = vmul.f32 %v551_v47, %v551_v47  ;;  %751 = vmatprep.subr.bf16.mxu1 %v689_v44  ;;  %v859_v44 = vunpack.c.h.s8.bf16 %v837_v30 }
 0x267   : > { %553 = vadd.xlane.f32.xlu0 %v552_v48  ;;  %v688_v48 = vunpack.c.l.s8.bf16 %v664_v46  ;;  %v838_v46 = vld [vmem:[%s6874_s9 + $0x30] sm:$0xff] }
 0x269   : > { %752 = vmatpush1.bf16.msra.mxu1 %v688_v48  ;;  %v851_v48 = vunpack.c.h.s8.bf16 %v833_v40 }
 0x26a   : > { %753 = vmatprep.subr.bf16.mxu1 %v693_v50  ;;  %v860_v50 = vunpack.c.l.s8.bf16 %v838_v46 }
 0x26d   : > { %754 = vmatpush1.bf16.msra.mxu1 %v692_v52  ;;  %v834_v52 = vld [vmem:[%s6874_s9 + $0x10] sm:$0xff] }
 0x2f4   : > { %v554_v53 = vpop.xlane.xlu0 %553 }
 0x2f5   : > { %v555_v54 = vmul.f32 0.0078125, %v554_v53  ;;  %v667_v53 = vld [vmem:[%s6866_s13 + $0x68] sm:$0xff] }
 0x2f7   : > { %v556_v55 = vadd.f32 1e-05, %v555_v54  ;;  %v669_v54 = vld [vmem:[%s6866_s13 + $0x78] sm:$0xff] }
 0x2f8   : > { %v697_v57 = vunpack.c.l.s8.bf16 %v669_v54 }
 0x2f9   : > { %6185 = vrsqrt.f32 %v556_v55  ;;  %v695_v55 = vunpack.c.l.s8.bf16 %v667_v53 }
 0x2fa   : > { %755 = vmatprep.subr.bf16.mxu1 %v697_v57  ;;  %v861_v57 = vunpack.c.h.s8.bf16 %v838_v46 }
 0x303   : > { %v6186_v63 = vpop.eup %6185 }
 0x304   : > { %v558_v0 = vmul.f32 %v6186_v63, %v551_v47  ;;  %v686_v47 = vunpack.c.l.s8.bf16 %v662_v45  ;;  %v696_v63 = vunpack.c.l.s8.bf16 %v668_v61  ;;  %v875_v45 = vunpack.c.h.s8.bf16 %v845_v36 }
 0x306   : > { %v563_v4 = vmul.f32 %v562_v62, %v558_v0  ;;  %711 = vmatpush1.bf16.msra.mxu0 %v686_v47  ;;  %v694_v62 = vunpack.c.l.s8.bf16 %v666_v60  ;;  %v699_v0 = vunpack.c.h.s8.bf16 %v667_v53  ;;  %756 = vmatpush1.bf16.msra.mxu1 %v696_v63  ;;  %v846_v47 = vld [vmem:[%s6874_s9 + $0x70] sm:$0xff]  ;;  %v839_v63 = vld [vmem:[%s6874_s9 + $0x38] sm:$0xff] }
 0x307   : > { %712 = vmatprep.subr.bf16.mxu0 %v691_v49  ;;  %v867_v49 = vunpack.c.h.s8.bf16 %v841_v41  ;;  %v842_v53 = vld [vmem:[%s6874_s9 + $0x50] sm:$0xff] }
 0x308   : > { %v568_v5 = vadd.f32 %v567_v1, %v563_v4  ;;  %v701_v1 = vunpack.c.h.s8.bf16 %v669_v54  ;;  %v700_v4 = vunpack.c.h.s8.bf16 %v668_v61  ;;  %v852_v54 = vunpack.c.l.s8.bf16 %v834_v52 }
 0x309   : > { %v853_v61 = vunpack.c.h.s8.bf16 %v834_v52 }
 0x30a   : > { %v631_v6 = vadd.f32 %v630_v3, %v568_v5  ;;  %713 = vmatpush1.bf16.msra.mxu0 %v690_v51  ;;  %v698_v3 = vunpack.c.h.s8.bf16 %v666_v60  ;;  %757 = vmatprep.subr.bf16.mxu1 %v701_v1  ;;  %v6529_v5 = vmov 0   ;;  %v876_v51 = vunpack.c.l.s8.bf16 %v846_v47 }
 0x30b   : > { %714 = vmatprep.subr.bf16.mxu0 %v695_v55  ;;  %734 = vmatprep.mubr.bf16.mxu0 %v6529_v5  ;;  %v868_v55 = vunpack.c.l.s8.bf16 %v842_v53  ;;  %v877_v60 = vunpack.c.h.s8.bf16 %v846_v47  ;;  %v862_v1 = vunpack.c.l.s8.bf16 %v839_v63 }
 0x30c   : > { %632 = vadd.xlane.f32.xlu1 %v631_v6  ;;  %775 = vmatprep.mubr.bf16.mxu1 %v6529_v5 }
 0x30d   : > { %758 = vmatpush1.bf16.msra.mxu1 %v700_v4  ;;  %v835_v4 = vld [vmem:[%s6874_s9 + $0x18] sm:$0xff] }
 0x30e   : > { %715 = vmatpush1.bf16.msra.mxu0 %v694_v62  ;;  %5291 = vmatprep.subr.bf16.mxu1 %v872_v9  ;;  %v869_v62 = vunpack.c.h.s8.bf16 %v842_v53  ;;  %v854_v7 = vunpack.c.l.s8.bf16 %v835_v4  ;;  %v863_v9 = vunpack.c.h.s8.bf16 %v839_v63 }
 0x30f   : > { %716 = vmatprep.subr.bf16.mxu0 %v699_v0  ;;  %v847_v0 = vld [vmem:[%s6874_s9 + $0x78] sm:$0xff] }
 0x312   : > { %717 = vmatpush1.bf16.msra.mxu0 %v698_v3  ;;  %v878_v3 = vunpack.c.l.s8.bf16 %v847_v0 }
 0x399   : > { %v633_v23 = vpop.xlane.xlu1 %632 }
 0x39a   : > { %v634_v24 = vmul.f32 0.0078125, %v633_v23  ;;  %v848_v23 = vunpack.c.l.s8.bf16 %v832_v20 }
 0x39c   : > { %v6959_v25 = vsub.f32 %v631_v6, %v634_v24  ;;  %v836_v6 = vld [vmem:[%s6874_s9 + $0x20] sm:$0xff]  ;;  %v864_v24 = vunpack.c.l.s8.bf16 %v840_v21 }
 0x39d   : > { %v856_v8 = vunpack.c.l.s8.bf16 %v836_v6  ;;  %v857_v27 = vunpack.c.h.s8.bf16 %v836_v6  ;;  %v843_v6 = vld [vmem:[%s6874_s9 + $0x58] sm:$0xff] }
 0x39e   : > { %v636_v26 = vmul.f32 %v6959_v25, %v6959_v25 }
 0x39f   : > { %5269 = vmatprep.subr.bf16.mxu0 %v856_v8  ;;  %v870_v8 = vunpack.c.l.s8.bf16 %v843_v6 }
 0x3a0   : > { %637 = vadd.xlane.f32.xlu1 %v636_v26 }
 0x42d   : > { %v638_v10 = vpop.xlane.xlu1 %637 }
 0x42e   : > { %v639_v11 = vmul.f32 0.0078125, %v638_v10  ;;  %v879_v10 = vunpack.c.h.s8.bf16 %v847_v0 }
 0x430   : > { %v640_v12 = vadd.f32 1e-05, %v639_v11  ;;  %v855_v11 = vunpack.c.h.s8.bf16 %v835_v4  ;;  %v963_v4 = vrot.slane %v6924_v33, %v6942_v58 }
 0x432   : > { %6187 = vrsqrt.f32 %v640_v12  ;;  %v871_v12 = vunpack.c.h.s8.bf16 %v843_v6 }
 0x43c   : > { %v6188_v16 = vpop.eup %6187 }
 0x43d   : > { %v642_v17 = vmul.f32 %v6188_v16, %v6959_v25  ;;  %v849_v25 = vunpack.c.h.s8.bf16 %v832_v20  ;;  %v481_v16 = vld [vmem:[%s6868_s29 + $0x10] sm:$0xff] }
 0x43e   : > { %v795_v20 = vrot.slane %v481_v16, %v6921_v32 }
 0x43f   : > { %v647_v19 = vmul.f32 %v646_v15, %v642_v17  ;;  %v479_v15 = vld [vmem:[%s6868_s29] sm:$0xff]  ;;  %v480_v17 = vld [vmem:[%s6868_s29 + $0x8] sm:$0xff] }
 0x440   : > { %v791_v21 = vrot.slane %v480_v17, %v6921_v32  ;;  %v811_v30 = vrot.slane %v480_v17, %v6927_v34  ;;  %v4917_v17 = vld [vmem:[%s6860_s14 + $0x40] sm:$0xff] }
 0x441   : > { %v6990_v22 = vadd.f32 %v651_v18, %v647_v19  ;;  %v482_v18 = vld [vmem:[%s6868_s29 + $0x18] sm:$0xff]  ;;  %v787_v19 = vrot.slane %v479_v15, %v6921_v32 }
 0x442   : > { %v819_v36 = vrot.slane %v482_v18, %v6927_v34 }
 0x443   : > { %v653_v26 = vpack.c.bf16 %v6990_v22, %v6990_v22 }
 0x445   : > { %735 = vmatmul.mubr.bf16.vlgmr.msra.gmra.mrb[4].mxu0 %v653_v26  ;;  %776 = vmatmul.mubr.bf16.vlgmr.msra.gmra.mrb[4].mxu1 %v653_v26  ;;  %v815_v26 = vrot.slane %v481_v16, %v6927_v34 }
 0x446   : > { %5270 = vmatpush3.bf16.msra.mxu0 %v848_v23  ;;  %5292 = vmatpush3.bf16.msra.mxu1 %v864_v24  ;;  %v799_v23 = vrot.slane %v482_v18, %v6921_v32  ;;  %v807_v24 = vrot.slane %v479_v15, %v6927_v34  ;;  %v1005_v18 = vunpack.c.l.s8.bf16 %v4917_v17 }
 0x447   : > { %5271 = vmatprep.subr.bf16.mxu0 %v857_v27  ;;  %5293 = vmatprep.subr.bf16.mxu1 %v873_v28 }
 0x44a   : > { %5272 = vmatpush3.bf16.msra.mxu0 %v849_v25  ;;  %5294 = vmatpush3.bf16.msra.mxu1 %v865_v37 }
 0x44b   : > { %5273 = vmatprep.subr.bf16.mxu0 %v858_v38  ;;  %5295 = vmatprep.subr.bf16.mxu1 %v874_v39 }
 0x44e   : > { %5274 = vmatpush3.bf16.msra.mxu0 %v850_v42  ;;  %5296 = vmatpush3.bf16.msra.mxu1 %v866_v43 }
 0x44f   : > { %5275 = vmatprep.subr.bf16.mxu0 %v859_v44  ;;  %5297 = vmatprep.subr.bf16.mxu1 %v875_v45 }
 0x452   : > { %5276 = vmatpush3.bf16.msra.mxu0 %v851_v48  ;;  %5298 = vmatpush3.bf16.msra.mxu1 %v867_v49 }
 0x453   : > { %5277 = vmatprep.subr.bf16.mxu0 %v860_v50  ;;  %5299 = vmatprep.subr.bf16.mxu1 %v876_v51 }
 0x456   : > { %5278 = vmatpush3.bf16.msra.mxu0 %v852_v54  ;;  %5300 = vmatpush3.bf16.msra.mxu1 %v868_v55 }
 0x457   : > { %5279 = vmatprep.subr.bf16.mxu0 %v861_v57  ;;  %5301 = vmatprep.subr.bf16.mxu1 %v877_v60 }
 0x45a   : > { %5280 = vmatpush3.bf16.msra.mxu0 %v853_v61  ;;  %5302 = vmatpush3.bf16.msra.mxu1 %v869_v62 }
 0x45b   : > { %5281 = vmatprep.subr.bf16.mxu0 %v862_v1  ;;  %5303 = vmatprep.subr.bf16.mxu1 %v878_v3 }
 0x45e   : > { %5282 = vmatpush3.bf16.msra.mxu0 %v854_v7  ;;  %5304 = vmatpush3.bf16.msra.mxu1 %v870_v8 }
 0x45f   : > { %5283 = vmatprep.subr.bf16.mxu0 %v863_v9  ;;  %5305 = vmatprep.subr.bf16.mxu1 %v879_v10 }
 0x462   : > { %5284 = vmatpush3.bf16.msra.mxu0 %v855_v11  ;;  %5306 = vmatpush3.bf16.msra.mxu1 %v871_v12  ;;  %v968_v11 = vrot.slane %v6930_v35, %v6937_v56 }
 0x463   : > { %5796 = vmatprep.subr.bf16.mxu0 %v6527_v2  ;;  %5816 = vmatprep.subr.bf16.mxu1 %v6527_v2 }
 0x518   : > { %v736_v27 = vpop.f32.mrb[4].mxu0  ;;  %v777_v28 = vpop.f32.mrb[4].mxu1 }
 0x519   : > { %v800_v25 = vmul.f32 %v787_v19, %v736_v27  ;;  %v802_v37 = vmul.f32 %v795_v20, %v777_v28  ;;  %v738_v38 = vpop.f32.mrb[5].mxu0  ;;  %v779_v39 = vpop.f32.mrb[5].mxu1  ;;  %v1006_v19 = vunpack.c.h.s8.bf16 %v4917_v17  ;;  %v4919_v28 = vld [vmem:[%s6860_s14 + $0x60] sm:$0xff] }
 0x51a   : > { %v801_v40 = vmul.f32 %v791_v21, %v738_v38  ;;  %v803_v41 = vmul.f32 %v799_v23, %v779_v39  ;;  %v740_v42 = vpop.f32.mrb[6].mxu0  ;;  %v781_v43 = vpop.f32.mrb[6].mxu1 }
 0x51b   : > { %v820_v44 = vadd.f32 %v807_v24, %v800_v25  ;;  %v822_v45 = vadd.f32 %v815_v26, %v802_v37  ;;  %v741_v46 = vpop.f32.mrb[7].mxu0  ;;  %v782_v47 = vpop.f32.mrb[7].mxu1  ;;  %v4918_v26 = vld [vmem:[%s6860_s14 + $0x50] sm:$0xff]  ;;  %v7041_v42 = vsub.s32 7, %v6918_v31 }
 0x51c   : > { %v821_v48 = vadd.f32 %v811_v30, %v801_v40  ;;  %v823_v49 = vadd.f32 %v819_v36, %v803_v41  ;;  %v1007_v27 = vunpack.c.l.s8.bf16 %v4918_v26  ;;  %v1009_v30 = vunpack.c.l.s8.bf16 %v4919_v28  ;;  %v4920_v25 = vld [vmem:[%s6860_s14 + $0x70] sm:$0xff] }
 0x51d   : > { %v824_v50 = vmax.f32 %v820_v44, 0.0  ;;  %v826_v51 = vmax.f32 %v822_v45, 0.0  ;;  %v1010_v36 = vunpack.c.h.s8.bf16 %v4919_v28  ;;  %v1011_v37 = vunpack.c.l.s8.bf16 %v4920_v25 }
 0x51e   : > { %v825_v52 = vmax.f32 %v821_v48, 0.0  ;;  %v827_v53 = vmax.f32 %v823_v49, 0.0  ;;  %v1012_v38 = vunpack.c.h.s8.bf16 %v4920_v25  ;;  %v985_v43 = vrot.slane %v6930_v35, %v7041_v42  ;;  %v4922_v35 = vld [vmem:[%s6860_s14 + $0x58] sm:$0xff] }
 0x51f   : > { %v828_v57 = vpack.c.bf16 %v824_v50, %v824_v50  ;;  %v830_v60 = vpack.c.bf16 %v826_v51, %v826_v51  ;;  %v990_v45 = vrot.slane %v6924_v33, %v6927_v34  ;;  %v4921_v50 = vld [vmem:[%s6860_s14 + $0x48] sm:$0xff]  ;;  %v1093_v33 = vunpack.c.h.s8.bf16 %v4922_v35 }
 0x520   : > { %v829_v54 = vpack.c.bf16 %v825_v52, %v825_v52  ;;  %v831_v55 = vpack.c.bf16 %v827_v53, %v827_v53  ;;  %v1090_v51 = vunpack.c.l.s8.bf16 %v4921_v50  ;;  %v1091_v31 = vunpack.c.h.s8.bf16 %v4921_v50  ;;  %v4923_v53 = vld [vmem:[%s6860_s14 + $0x68] sm:$0xff] }
 0x521   : > { %v1092_v52 = vunpack.c.l.s8.bf16 %v4922_v35  ;;  %v4932_v35 = vld [vmem:[%s6866_s13 + $0xb8] sm:$0xff] }
 0x522   : > { %912 = vmatprep.mubr.bf16.mxu0 %v829_v54  ;;  %952 = vmatprep.mubr.bf16.mxu1 %v831_v55  ;;  %v1094_v54 = vunpack.c.l.s8.bf16 %v4923_v53  ;;  %v1095_v55 = vunpack.c.h.s8.bf16 %v4923_v53 }
 0x523   : > { %913 = vmatmul.mubr.bf16.vlgmr.msra.gmra.mrb[8].mxu0 %v828_v57  ;;  %953 = vmatmul.mubr.bf16.vlgmr.msra.gmra.mrb[8].mxu1 %v830_v60  ;;  %v4924_v57 = vld [vmem:[%s6860_s14 + $0x78] sm:$0xff] }
 0x524   : > { %5812 = vmatprep.mubr.msk.bf16.mxu0 %vm6528_vm0, %v6527_v2  ;;  %5832 = vmatprep.mubr.msk.bf16.mxu1 %vm6528_vm0, %v6527_v2  ;;  %v1096_v60 = vunpack.c.l.s8.bf16 %v4924_v57 }
 0x525   : > { %5797 = vmatpush3.bf16.msra.mxu0 %v1005_v18  ;;  %5817 = vmatpush3.bf16.msra.mxu1 %v1090_v51 }
 0x526   : > { %5798 = vmatprep.subr.bf16.mxu0 %v6527_v2  ;;  %5818 = vmatprep.subr.bf16.mxu1 %v6527_v2 }
 0x529   : > { %5799 = vmatpush3.bf16.msra.mxu0 %v1006_v19  ;;  %5819 = vmatpush3.bf16.msra.mxu1 %v1091_v31  ;;  %v4930_v31 = vld [vmem:[%s6866_s13 + $0xa8] sm:$0xff] }
 0x52a   : > { %5800 = vmatprep.subr.bf16.mxu0 %v6527_v2  ;;  %5820 = vmatprep.subr.bf16.mxu1 %v6527_v2  ;;  %v1197_v53 = vunpack.c.l.s8.bf16 %v4930_v31 }
 0x52d   : > { %5801 = vmatpush3.bf16.msra.mxu0 %v1007_v27  ;;  %5821 = vmatpush3.bf16.msra.mxu1 %v1092_v52 }
 0x52e   : > { %5802 = vmatprep.subr.bf16.mxu0 %v6527_v2  ;;  %5822 = vmatprep.subr.bf16.mxu1 %v6527_v2 }
 0x531   : > { %5823 = vmatpush3.bf16.msra.mxu1 %v1093_v33 }
 0x532   : > { %5824 = vmatprep.subr.bf16.mxu1 %v6527_v2 }
 0x535   : > { %5825 = vmatpush3.bf16.msra.mxu1 %v1094_v54  ;;  %v1199_v54 = vunpack.c.l.s8.bf16 %v4932_v35 }
 0x536   : > { %5826 = vmatprep.subr.bf16.mxu1 %v6527_v2 }
 0x539   : > { %5827 = vmatpush3.bf16.msra.mxu1 %v1095_v55 }
 0x53a   : > { %5828 = vmatprep.subr.bf16.mxu1 %v6527_v2 }
 0x53d   : > { %5829 = vmatpush3.bf16.msra.mxu1 %v1096_v60 }
 0x53e   : > { %5830 = vmatprep.subr.bf16.mxu1 %v6527_v2 }
 0x5f6   : > { %v5285_v61 = vpop.f32.mrb[8].mxu0  ;;  %v5307_v62 = vpop.f32.mrb[8].mxu1 }
 0x5f7   : > { %v5286_v63 = vpop.f32.mrb[9].mxu0  ;;  %v5308_v0 = vpop.f32.mrb[9].mxu1 }
 0x5f8   : > { %v5287_v1 = vadd.f32 %v5286_v63, %v5285_v61  ;;  %v5309_v3 = vadd.f32 %v5308_v0, %v5307_v62  ;;  %v5288_v6 = vpop.f32.mrb[10].mxu0  ;;  %v5310_v7 = vpop.f32.mrb[10].mxu1  ;;  %v1097_v61 = vunpack.c.h.s8.bf16 %v4924_v57  ;;  %v7062_v62 = vld [vmem:[%s6876_s30 + $0x18] sm:$0xff]  ;;  %v7065_v63 = vld [vmem:[%s6876_s30 + $0x10] sm:$0xff] }
 0x5f9   : > { %v5289_v8 = vpop.f32.mrb[11].mxu0  ;;  %v5311_v9 = vpop.f32.mrb[11].mxu1  ;;  %v1057_v0 = vrot.slane %v7062_v62, %v6921_v32  ;;  %v1079_v28 = vrot.slane %v7065_v63, %v6942_v58  ;;  %v1084_v25 = vrot.slane %v7065_v63, %v6945_v59 }
 0x5fa   : > { %v955_v10 = vadd.f32 %v5309_v3, %v5287_v1  ;;  %5831 = vmatpush3.bf16.msra.mxu1 %v1097_v61  ;;  %v1062_v1 = vrot.slane %v7065_v63, %v6927_v34 }
 0x5fc   : > { %v964_v12 = vmul.f32 %v963_v4, %v955_v10 }
 0x5fd   : > { %5833 = vmatmul.mubr.bf16.vlgmr.msra.gmra.mrb[12].mxu1 %v6915_v29 }
 0x5fe   : > { %v969_v15 = vadd.f32 %v968_v11, %v964_v12  ;;  %1293 = vmatprep.mubr.bf16.mxu1 %v6529_v5 }
 0x600   : > { %v970_v16 = vadd.f32 %v969_v15, %v6990_v22  ;;  %v1008_v22 = vunpack.c.h.s8.bf16 %v4918_v26  ;;  %v1141_v26 = vrot.slane %v7062_v62, %v6937_v56 }
 0x602   : > { %971 = vadd.xlane.f32.xlu0 %v970_v16  ;;  %5803 = vmatpush3.bf16.msra.mxu0 %v1008_v22  ;;  %v1146_v22 = vrot.slane %v7065_v63, %v6921_v32 }
 0x603   : > { %5804 = vmatprep.subr.bf16.mxu0 %v6527_v2 }
 0x606   : > { %5805 = vmatpush3.bf16.msra.mxu0 %v1009_v30 }
 0x607   : > { %5806 = vmatprep.subr.bf16.mxu0 %v6527_v2 }
 0x60a   : > { %5807 = vmatpush3.bf16.msra.mxu0 %v1010_v36 }
 0x60b   : > { %5808 = vmatprep.subr.bf16.mxu0 %v6527_v2 }
 0x60e   : > { %5809 = vmatpush3.bf16.msra.mxu0 %v1011_v37 }
 0x60f   : > { %5810 = vmatprep.subr.bf16.mxu0 %v6527_v2 }
 0x612   : > { %5811 = vmatpush3.bf16.msra.mxu0 %v1012_v38 }
 0x68f   : > { %v972_v20 = vpop.xlane.xlu0 %971 }
 0x690   : > { %v973_v21 = vmul.f32 0.0078125, %v972_v20 }
 0x692   : > { %v974_v23 = vsub.f32 %v970_v16, %v973_v21 }
 0x694   : > { %v975_v24 = vmul.f32 %v974_v23, %v974_v23 }
 0x696   : > { %976 = vadd.xlane.f32.xlu1 %v975_v24 }
 0x6d0   : > { %v1132_v17 = vpop.f32.mrb[12].mxu1 }
 0x6d1   : > { %v5834_v18 = vpop.f32.mrb[13].mxu1  ;;  %v1142_v27 = vmul.f32 %v1141_v26, %v1132_v17  ;;  %v4935_v17 = vld [vmem:[%s6866_s13 + $0xd0] sm:$0xff]  ;;  %v4938_v26 = vld [vmem:[%s6866_s13 + $0xe8] sm:$0xff] }
 0x6d2   : > { %v1135_v19 = vpop.f32.mrb[14].mxu1 }
 0x6d3   : > { %v5835_v20 = vpop.f32.mrb[15].mxu1  ;;  %v1147_v37 = vadd.f32 %v1146_v22, %v1142_v27  ;;  %v1206_v19 = vunpack.c.l.s8.bf16 %v4935_v17  ;;  %v4940_v27 = vld [vmem:[%s6866_s13 + $0xf8] sm:$0xff]  ;;  %v1213_v22 = vunpack.c.l.s8.bf16 %v4938_v26 }
 0x723   : > { %v977_v39 = vpop.xlane.xlu1 %976 }
 0x724   : > { %v978_v40 = vmul.f32 0.0078125, %v977_v39 }
 0x726   : > { %v979_v41 = vadd.f32 1e-05, %v978_v40 }
 0x728   : > { %6189 = vrsqrt.f32 %v979_v41  ;;  %v4926_v41 = vld [vmem:[%s6866_s13 + $0x88] sm:$0xff] }
 0x732   : > { %v6190_v44 = vpop.eup %6189 }
 0x733   : > { %v981_v46 = vmul.f32 %v6190_v44, %v974_v23  ;;  %v4925_v44 = vld [vmem:[%s6866_s13 + $0x80] sm:$0xff] }
 0x734   : > { %v1192_v52 = vunpack.c.h.s8.bf16 %v4925_v44 }
 0x735   : > { %v986_v47 = vmul.f32 %v985_v43, %v981_v46  ;;  %v4928_v43 = vld [vmem:[%s6866_s13 + $0x98] sm:$0xff] }
 0x736   : > { %v1191_v46 = vunpack.c.l.s8.bf16 %v4928_v43  ;;  %v1195_v51 = vunpack.c.h.s8.bf16 %v4928_v43  ;;  %v4945_v43 = vld [vmem:[%s6874_s9 + $0xa0] sm:$0xff] }
 0x737   : > { %v991_v48 = vadd.f32 %v990_v45, %v986_v47  ;;  %v1189_v45 = vunpack.c.l.s8.bf16 %v4926_v41  ;;  %v1188_v47 = vunpack.c.l.s8.bf16 %v4925_v44  ;;  %v4953_v44 = vld [vmem:[%s6874_s9 + $0xe0] sm:$0xff] }
 0x738   : > { %1261 = vmatprep.subr.bf16.mxu1 %v1191_v46  ;;  %v1391_v46 = vunpack.c.l.s8.bf16 %v4953_v44 }
 0x739   : > { %v1013_v49 = vpack.c.bf16 %v991_v48, %v991_v48  ;;  %1220 = vmatprep.subr.bf16.mxu0 %v1189_v45  ;;  %v1375_v45 = vunpack.c.l.s8.bf16 %v4945_v43 }
 0x73b   : > { %5813 = vmatmul.mubr.bf16.vlgmr.msra.gmra.mrb[12].mxu0 %v1013_v49  ;;  %v1193_v49 = vunpack.c.h.s8.bf16 %v4926_v41 }
 0x73c   : > { %1252 = vmatprep.mubr.bf16.mxu0 %v6529_v5  ;;  %1221 = vmatpush1.bf16.msra.mxu0 %v1188_v47 }
 0x73d   : > { %1222 = vmatprep.subr.bf16.mxu0 %v1193_v49 }
 0x740   : > { %1223 = vmatpush1.bf16.msra.mxu0 %v1192_v52 }
 0x741   : > { %1224 = vmatprep.subr.bf16.mxu0 %v1197_v53  ;;  %v4949_v53 = vld [vmem:[%s6874_s9 + $0xc0] sm:$0xff] }
 0x80e   : > { %v1048_v3 = vpop.f32.mrb[12].mxu0 }
 0x80f   : > { %v1058_v4 = vmul.f32 %v1057_v0, %v1048_v3  ;;  %v5814_v6 = vpop.f32.mrb[13].mxu0  ;;  %v4929_v0 = vld [vmem:[%s6866_s13 + $0xa0] sm:$0xff] }
 0x810   : > { %v1051_v7 = vpop.f32.mrb[14].mxu0  ;;  %v1196_v3 = vunpack.c.l.s8.bf16 %v4929_v0  ;;  %v1201_v6 = vunpack.c.h.s8.bf16 %v4930_v31 }
 0x811   : > { %v1063_v8 = vadd.f32 %v1062_v1, %v1058_v4  ;;  %v5815_v9 = vpop.f32.mrb[15].mxu0  ;;  %v4931_v1 = vld [vmem:[%s6866_s13 + $0xb0] sm:$0xff]  ;;  %v1203_v7 = vunpack.c.h.s8.bf16 %v4932_v35  ;;  %v1168_v35 = vrot.slane %v7065_v63, %v6981_v14 }
 0x812   : > { %v1198_v4 = vunpack.c.l.s8.bf16 %v4931_v1  ;;  %1225 = vmatpush1.bf16.msra.mxu0 %v1196_v3  ;;  %v1202_v9 = vunpack.c.h.s8.bf16 %v4931_v1  ;;  %v1392_v1 = vunpack.c.h.s8.bf16 %v4953_v44  ;;  %v4946_v3 = vld [vmem:[%s6874_s9 + $0xa8] sm:$0xff] }
 0x813   : > { %v1064_v10 = vadd.f32 %v1063_v8, %v991_v48  ;;  %v4927_v48 = vld [vmem:[%s6866_s13 + $0x90] sm:$0xff]  ;;  %v1200_v8 = vunpack.c.h.s8.bf16 %v4929_v0  ;;  %1226 = vmatprep.subr.bf16.mxu0 %v1201_v6  ;;  %v1376_v0 = vunpack.c.h.s8.bf16 %v4945_v43  ;;  %v1384_v6 = vunpack.c.h.s8.bf16 %v4949_v53  ;;  %v4952_v43 = vld [vmem:[%s6874_s9 + $0xd8] sm:$0xff] }
 0x814   : > { %v1190_v50 = vunpack.c.l.s8.bf16 %v4927_v48  ;;  %v1194_v33 = vunpack.c.h.s8.bf16 %v4927_v48 }
 0x815   : > { %1065 = vadd.xlane.f32.xlu0 %v1064_v10 }
 0x816   : > { %1262 = vmatpush1.bf16.msra.mxu1 %v1190_v50  ;;  %1227 = vmatpush1.bf16.msra.mxu0 %v1200_v8  ;;  %v1163_v50 = vrot.slane %v7065_v63, %v6978_v13 }
 0x817   : > { %1263 = vmatprep.subr.bf16.mxu1 %v1195_v51 }
 0x81a   : > { %1264 = vmatpush1.bf16.msra.mxu1 %v1194_v33  ;;  %v4941_v33 = vld [vmem:[%s6874_s9 + $0x80] sm:$0xff] }
 0x81b   : > { %1265 = vmatprep.subr.bf16.mxu1 %v1199_v54 }
 0x81e   : > { %1266 = vmatpush1.bf16.msra.mxu1 %v1198_v4  ;;  %v4954_v4 = vld [vmem:[%s6874_s9 + $0xe8] sm:$0xff] }
 0x81f   : > { %1267 = vmatprep.subr.bf16.mxu1 %v1203_v7  ;;  %v1377_v7 = vunpack.c.l.s8.bf16 %v4946_v3  ;;  %v1393_v8 = vunpack.c.l.s8.bf16 %v4954_v4 }
 0x822   : > { %1268 = vmatpush1.bf16.msra.mxu1 %v1202_v9  ;;  %v4942_v9 = vld [vmem:[%s6874_s9 + $0x88] sm:$0xff] }
 0x8a2   : > { %v1066_v11 = vpop.xlane.xlu0 %1065 }
 0x8a3   : > { %v1067_v12 = vmul.f32 0.0078125, %v1066_v11  ;;  %v4936_v11 = vld [vmem:[%s6866_s13 + $0xd8] sm:$0xff] }
 0x8a5   : > { %v1068_v15 = vsub.f32 %v1064_v10, %v1067_v12  ;;  %v4934_v10 = vld [vmem:[%s6866_s13 + $0xc8] sm:$0xff] }
 0x8a6   : > { %v1205_v12 = vunpack.c.l.s8.bf16 %v4934_v10  ;;  %v1209_v20 = vunpack.c.h.s8.bf16 %v4934_v10  ;;  %v4950_v10 = vld [vmem:[%s6874_s9 + $0xc8] sm:$0xff] }
 0x8a7   : > { %v1069_v16 = vmul.f32 %v1068_v15, %v1068_v15 }
 0x8a8   : > { %1228 = vmatprep.subr.bf16.mxu0 %v1205_v12  ;;  %v1385_v12 = vunpack.c.l.s8.bf16 %v4950_v10 }
 0x8a9   : > { %1070 = vadd.xlane.f32.xlu1 %v1069_v16  ;;  %v4933_v16 = vld [vmem:[%s6866_s13 + $0xc0] sm:$0xff] }
 0x8aa   : > { %v1204_v18 = vunpack.c.l.s8.bf16 %v4933_v16 }
 0x8ac   : > { %1229 = vmatpush1.bf16.msra.mxu0 %v1204_v18  ;;  %v4955_v18 = vld [vmem:[%s6874_s9 + $0xf0] sm:$0xff] }
 0x8ad   : > { %1230 = vmatprep.subr.bf16.mxu0 %v1209_v20  ;;  %v1386_v20 = vunpack.c.h.s8.bf16 %v4950_v10 }
 0x936   : > { %v1071_v21 = vpop.xlane.xlu1 %1070 }
 0x937   : > { %v1072_v23 = vmul.f32 0.0078125, %v1071_v21  ;;  %v1211_v21 = vunpack.c.h.s8.bf16 %v4936_v11 }
 0x939   : > { %v1073_v24 = vadd.f32 1e-05, %v1072_v23  ;;  %v1208_v23 = vunpack.c.h.s8.bf16 %v4933_v16  ;;  %v1394_v16 = vunpack.c.h.s8.bf16 %v4954_v4 }
 0x93b   : > { %6191 = vrsqrt.f32 %v1073_v24  ;;  %v1210_v24 = vunpack.c.h.s8.bf16 %v4935_v17  ;;  %1231 = vmatpush1.bf16.msra.mxu0 %v1208_v23  ;;  %v4947_v17 = vld [vmem:[%s6874_s9 + $0xb0] sm:$0xff]  ;;  %v1395_v23 = vunpack.c.l.s8.bf16 %v4955_v18 }
 0x93c   : > { %1232 = vmatprep.subr.bf16.mxu0 %v1213_v22 }
 0x945   : > { %v6192_v30 = vpop.eup %6191 }
 0x946   : > { %v1075_v36 = vmul.f32 %v6192_v30, %v1068_v15  ;;  %v1207_v15 = vunpack.c.l.s8.bf16 %v4936_v11  ;;  %v4937_v30 = vld [vmem:[%s6866_s13 + $0xe0] sm:$0xff]  ;;  %v1369_v11 = vunpack.c.l.s8.bf16 %v4942_v9 }
 0x948   : > { %v1080_v38 = vmul.f32 %v1079_v28, %v1075_v36  ;;  %1269 = vmatprep.subr.bf16.mxu1 %v1207_v15  ;;  %v1215_v28 = vunpack.c.l.s8.bf16 %v4940_v27  ;;  %v4939_v36 = vld [vmem:[%s6866_s13 + $0xf0] sm:$0xff]  ;;  %v1378_v15 = vunpack.c.h.s8.bf16 %v4946_v3 }
 0x949   : > { %1270 = vmatpush1.bf16.msra.mxu1 %v1206_v19  ;;  %v1218_v41 = vunpack.c.h.s8.bf16 %v4939_v36  ;;  %v1370_v19 = vunpack.c.h.s8.bf16 %v4942_v9 }
 0x94a   : > { %v1085_v39 = vadd.f32 %v1084_v25, %v1080_v38  ;;  %1271 = vmatprep.subr.bf16.mxu1 %v1211_v21  ;;  %v1212_v25 = vunpack.c.l.s8.bf16 %v4937_v30  ;;  %v1217_v38 = vunpack.c.h.s8.bf16 %v4938_v26  ;;  %v1379_v21 = vunpack.c.l.s8.bf16 %v4947_v17  ;;  %v4951_v26 = vld [vmem:[%s6874_s9 + $0xd0] sm:$0xff] }
 0x94b   : > { %v1387_v22 = vunpack.c.l.s8.bf16 %v4951_v26 }
 0x94c   : > { %v1148_v40 = vadd.f32 %v1147_v37, %v1085_v39  ;;  %v1214_v37 = vunpack.c.l.s8.bf16 %v4939_v36  ;;  %v1219_v39 = vunpack.c.h.s8.bf16 %v4940_v27  ;;  %1233 = vmatpush1.bf16.msra.mxu0 %v1212_v25  ;;  %v1388_v25 = vunpack.c.h.s8.bf16 %v4951_v26 }
 0x94d   : > { %1272 = vmatpush1.bf16.msra.mxu1 %v1210_v24  ;;  %1234 = vmatprep.subr.bf16.mxu0 %v1217_v38  ;;  %v4943_v24 = vld [vmem:[%s6874_s9 + $0x90] sm:$0xff]  ;;  %v4956_v38 = vld [vmem:[%s6874_s9 + $0xf8] sm:$0xff] }
 0x94e   : > { %1149 = vadd.xlane.f32.xlu0 %v1148_v40  ;;  %1273 = vmatprep.subr.bf16.mxu1 %v1215_v28  ;;  %v1371_v27 = vunpack.c.l.s8.bf16 %v4943_v24  ;;  %v1380_v28 = vunpack.c.h.s8.bf16 %v4947_v17  ;;  %v1372_v36 = vunpack.c.h.s8.bf16 %v4943_v24 }
 0x951   : > { %1274 = vmatpush1.bf16.msra.mxu1 %v1214_v37  ;;  %v4948_v37 = vld [vmem:[%s6874_s9 + $0xb8] sm:$0xff] }
 0x952   : > { %1275 = vmatprep.subr.bf16.mxu1 %v1219_v39  ;;  %v1381_v39 = vunpack.c.l.s8.bf16 %v4948_v37 }
 0x955   : > { %1276 = vmatpush1.bf16.msra.mxu1 %v1218_v41  ;;  %v4944_v41 = vld [vmem:[%s6874_s9 + $0x98] sm:$0xff] }
 0x956   : > { %5353 = vmatprep.subr.bf16.mxu1 %v1391_v46  ;;  %v1373_v44 = vunpack.c.l.s8.bf16 %v4944_v41  ;;  %v1382_v46 = vunpack.c.h.s8.bf16 %v4948_v37 }
 0x9db   : > { %v1150_v55 = vpop.xlane.xlu0 %1149 }
 0x9dc   : > { %v1151_v57 = vmul.f32 0.0078125, %v1150_v55  ;;  %v1367_v55 = vunpack.c.l.s8.bf16 %v4941_v33 }
 0x9de   : > { %v7085_v60 = vsub.f32 %v1148_v40, %v1151_v57  ;;  %v1216_v40 = vunpack.c.h.s8.bf16 %v4937_v30  ;;  %v1383_v57 = vunpack.c.l.s8.bf16 %v4949_v53  ;;  %v1396_v30 = vunpack.c.h.s8.bf16 %v4955_v18 }
 0x9e0   : > { %v1153_v61 = vmul.f32 %v7085_v60, %v7085_v60  ;;  %1235 = vmatpush1.bf16.msra.mxu0 %v1216_v40  ;;  %v1397_v40 = vunpack.c.l.s8.bf16 %v4956_v38 }
 0x9e1   : > { %5331 = vmatprep.subr.bf16.mxu0 %v1375_v45  ;;  %v1389_v45 = vunpack.c.l.s8.bf16 %v4952_v43 }
 0x9e2   : > { %1154 = vadd.xlane.f32.xlu1 %v1153_v61 }
 0xa6f   : > { %v1155_v47 = vpop.xlane.xlu1 %1154 }
 0xa70   : > { %v1156_v48 = vmul.f32 0.0078125, %v1155_v47  ;;  %v1398_v47 = vunpack.c.h.s8.bf16 %v4956_v38 }
 0xa72   : > { %v1157_v49 = vadd.f32 1e-05, %v1156_v48  ;;  %v1374_v48 = vunpack.c.h.s8.bf16 %v4944_v41  ;;  %v1482_v41 = vrot.slane %v7062_v62, %v6942_v58 }
 0xa74   : > { %6193 = vrsqrt.f32 %v1157_v49  ;;  %v1390_v49 = vunpack.c.h.s8.bf16 %v4952_v43 }
 0xa7e   : > { %v6194_v51 = vpop.eup %6193 }
 0xa7f   : > { %v1159_v31 = vmul.f32 %v6194_v51, %v7085_v60  ;;  %v1368_v60 = vunpack.c.h.s8.bf16 %v4941_v33  ;;  %v4915_v51 = vld [vmem:[%s6868_s29 + $0x30] sm:$0xff] }
 0xa80   : > { %v1313_v33 = vrot.slane %v4915_v51, %v6921_v32 }
 0xa81   : > { %v1164_v52 = vmul.f32 %v1163_v50, %v1159_v31  ;;  %v4913_v50 = vld [vmem:[%s6868_s29 + $0x20] sm:$0xff]  ;;  %v4914_v31 = vld [vmem:[%s6868_s29 + $0x28] sm:$0xff] }
 0xa82   : > { %v1309_v53 = vrot.slane %v4914_v31, %v6921_v32  ;;  %v1329_v3 = vrot.slane %v4914_v31, %v6927_v34  ;;  %v4963_v31 = vld [vmem:[%s6860_s14 + $0x80] sm:$0xff] }
 0xa83   : > { %v7108_v54 = vadd.f32 %v1168_v35, %v1164_v52  ;;  %v4916_v35 = vld [vmem:[%s6868_s29 + $0x38] sm:$0xff]  ;;  %v1305_v52 = vrot.slane %v4913_v50, %v6921_v32 }
 0xa84   : > { %v1337_v4 = vrot.slane %v4916_v35, %v6927_v34 }
 0xa85   : > { %v1170_v61 = vpack.c.bf16 %v7108_v54, %v7108_v54 }
 0xa87   : > { %1253 = vmatmul.mubr.bf16.vlgmr.msra.gmra.mrb[16].mxu0 %v1170_v61  ;;  %1294 = vmatmul.mubr.bf16.vlgmr.msra.gmra.mrb[16].mxu1 %v1170_v61  ;;  %v1333_v61 = vrot.slane %v4915_v51, %v6927_v34 }
 0xa88   : > { %5332 = vmatpush3.bf16.msra.mxu0 %v1367_v55  ;;  %5354 = vmatpush3.bf16.msra.mxu1 %v1383_v57  ;;  %v1317_v55 = vrot.slane %v4916_v35, %v6921_v32  ;;  %v1325_v57 = vrot.slane %v4913_v50, %v6927_v34  ;;  %v1524_v35 = vunpack.c.l.s8.bf16 %v4963_v31 }
 0xa89   : > { %5333 = vmatprep.subr.bf16.mxu0 %v1376_v0  ;;  %5355 = vmatprep.subr.bf16.mxu1 %v1392_v1 }
 0xa8c   : > { %5334 = vmatpush3.bf16.msra.mxu0 %v1368_v60  ;;  %5356 = vmatpush3.bf16.msra.mxu1 %v1384_v6 }
 0xa8d   : > { %5335 = vmatprep.subr.bf16.mxu0 %v1377_v7  ;;  %5357 = vmatprep.subr.bf16.mxu1 %v1393_v8 }
 0xa90   : > { %5336 = vmatpush3.bf16.msra.mxu0 %v1369_v11  ;;  %5358 = vmatpush3.bf16.msra.mxu1 %v1385_v12 }
 0xa91   : > { %5337 = vmatprep.subr.bf16.mxu0 %v1378_v15  ;;  %5359 = vmatprep.subr.bf16.mxu1 %v1394_v16 }
 0xa94   : > { %5338 = vmatpush3.bf16.msra.mxu0 %v1370_v19  ;;  %5360 = vmatpush3.bf16.msra.mxu1 %v1386_v20 }
 0xa95   : > { %5339 = vmatprep.subr.bf16.mxu0 %v1379_v21  ;;  %5361 = vmatprep.subr.bf16.mxu1 %v1395_v23 }
 0xa98   : > { %5340 = vmatpush3.bf16.msra.mxu0 %v1371_v27  ;;  %5362 = vmatpush3.bf16.msra.mxu1 %v1387_v22 }
 0xa99   : > { %5341 = vmatprep.subr.bf16.mxu0 %v1380_v28  ;;  %5363 = vmatprep.subr.bf16.mxu1 %v1396_v30 }
 0xa9c   : > { %5342 = vmatpush3.bf16.msra.mxu0 %v1372_v36  ;;  %5364 = vmatpush3.bf16.msra.mxu1 %v1388_v25 }
 0xa9d   : > { %5343 = vmatprep.subr.bf16.mxu0 %v1381_v39  ;;  %5365 = vmatprep.subr.bf16.mxu1 %v1397_v40 }
 0xaa0   : > { %5344 = vmatpush3.bf16.msra.mxu0 %v1373_v44  ;;  %5366 = vmatpush3.bf16.msra.mxu1 %v1389_v45 }
 0xaa1   : > { %5345 = vmatprep.subr.bf16.mxu0 %v1382_v46  ;;  %5367 = vmatprep.subr.bf16.mxu1 %v1398_v47 }
 0xaa4   : > { %5346 = vmatpush3.bf16.msra.mxu0 %v1374_v48  ;;  %5368 = vmatpush3.bf16.msra.mxu1 %v1390_v49  ;;  %v1487_v48 = vrot.slane %v7065_v63, %v6937_v56 }
 0xaa5   : > { %5836 = vmatprep.subr.bf16.mxu0 %v6527_v2  ;;  %5856 = vmatprep.subr.bf16.mxu1 %v6527_v2 }
 0xb5a   : > { %v1254_v0 = vpop.f32.mrb[16].mxu0  ;;  %v1295_v1 = vpop.f32.mrb[16].mxu1 }
 0xb5b   : > { %v1318_v60 = vmul.f32 %v1305_v52, %v1254_v0  ;;  %v1320_v6 = vmul.f32 %v1313_v33, %v1295_v1  ;;  %v1256_v7 = vpop.f32.mrb[17].mxu0  ;;  %v1297_v8 = vpop.f32.mrb[17].mxu1  ;;  %v1525_v52 = vunpack.c.h.s8.bf16 %v4963_v31  ;;  %v4965_v1 = vld [vmem:[%s6860_s14 + $0xa0] sm:$0xff] }
 0xb5c   : > { %v1319_v9 = vmul.f32 %v1309_v53, %v1256_v7  ;;  %v1321_v10 = vmul.f32 %v1317_v55, %v1297_v8  ;;  %v1258_v11 = vpop.f32.mrb[18].mxu0  ;;  %v1299_v12 = vpop.f32.mrb[18].mxu1 }
 0xb5d   : > { %v1338_v15 = vadd.f32 %v1325_v57, %v1318_v60  ;;  %v1340_v16 = vadd.f32 %v1333_v61, %v1320_v6  ;;  %v1259_v17 = vpop.f32.mrb[19].mxu0  ;;  %v1300_v18 = vpop.f32.mrb[19].mxu1  ;;  %v4964_v61 = vld [vmem:[%s6860_s14 + $0x90] sm:$0xff]  ;;  %v1504_v11 = vrot.slane %v7065_v63, %v7041_v42  ;;  %v4968_v63 = vld [vmem:[%s6860_s14 + $0x98] sm:$0xff] }
 0xb5e   : > { %v1339_v19 = vadd.f32 %v1329_v3, %v1319_v9  ;;  %v1341_v20 = vadd.f32 %v1337_v4, %v1321_v10  ;;  %v1526_v0 = vunpack.c.l.s8.bf16 %v4964_v61  ;;  %v1528_v3 = vunpack.c.l.s8.bf16 %v4965_v1  ;;  %v4966_v60 = vld [vmem:[%s6860_s14 + $0xb0] sm:$0xff] }
 0xb5f   : > { %v1342_v21 = vmax.f32 %v1338_v15, 0.0  ;;  %v1344_v23 = vmax.f32 %v1340_v16, 0.0  ;;  %v1529_v4 = vunpack.c.h.s8.bf16 %v4965_v1  ;;  %v1530_v6 = vunpack.c.l.s8.bf16 %v4966_v60 }
 0xb60   : > { %v1343_v24 = vmax.f32 %v1339_v19, 0.0  ;;  %v1345_v26 = vmax.f32 %v1341_v20, 0.0  ;;  %v1531_v7 = vunpack.c.h.s8.bf16 %v4966_v60  ;;  %v1509_v15 = vrot.slane %v7062_v62, %v6927_v34  ;;  %v4967_v20 = vld [vmem:[%s6860_s14 + $0x88] sm:$0xff] }
 0xb61   : > { %v1346_v28 = vpack.c.bf16 %v1342_v21, %v1342_v21  ;;  %v1348_v30 = vpack.c.bf16 %v1344_v23, %v1344_v23  ;;  %v1609_v21 = vunpack.c.l.s8.bf16 %v4967_v20  ;;  %v1610_v23 = vunpack.c.h.s8.bf16 %v4967_v20 }
 0xb62   : > { %v1347_v27 = vpack.c.bf16 %v1343_v24, %v1343_v24  ;;  %v1349_v22 = vpack.c.bf16 %v1345_v26, %v1345_v26  ;;  %v1611_v24 = vunpack.c.l.s8.bf16 %v4968_v63  ;;  %v1612_v62 = vunpack.c.h.s8.bf16 %v4968_v63  ;;  %v4969_v26 = vld [vmem:[%s6860_s14 + $0xa8] sm:$0xff]  ;;  %v4978_v63 = vld [vmem:[%s6866_s13 + $0x138] sm:$0xff] }
 0xb64   : > { %1431 = vmatprep.mubr.bf16.mxu0 %v1347_v27  ;;  %1471 = vmatprep.mubr.bf16.mxu1 %v1349_v22  ;;  %v1613_v27 = vunpack.c.l.s8.bf16 %v4969_v26  ;;  %v1614_v22 = vunpack.c.h.s8.bf16 %v4969_v26 }
 0xb65   : > { %1432 = vmatmul.mubr.bf16.vlgmr.msra.gmra.mrb[20].mxu0 %v1346_v28  ;;  %1472 = vmatmul.mubr.bf16.vlgmr.msra.gmra.mrb[20].mxu1 %v1348_v30  ;;  %v4970_v28 = vld [vmem:[%s6860_s14 + $0xb8] sm:$0xff] }
 0xb66   : > { %5852 = vmatprep.mubr.msk.bf16.mxu0 %vm6528_vm0, %v6527_v2  ;;  %5872 = vmatprep.mubr.msk.bf16.mxu1 %vm6528_vm0, %v6527_v2  ;;  %v1615_v30 = vunpack.c.l.s8.bf16 %v4970_v28 }
 0xb67   : > { %5837 = vmatpush3.bf16.msra.mxu0 %v1524_v35  ;;  %5857 = vmatpush3.bf16.msra.mxu1 %v1609_v21 }
 0xb68   : > { %5838 = vmatprep.subr.bf16.mxu0 %v6527_v2  ;;  %5858 = vmatprep.subr.bf16.mxu1 %v6527_v2 }
 0xb6b   : > { %5839 = vmatpush3.bf16.msra.mxu0 %v1525_v52  ;;  %5859 = vmatpush3.bf16.msra.mxu1 %v1610_v23  ;;  %v4976_v23 = vld [vmem:[%s6866_s13 + $0x128] sm:$0xff] }
 0xb6c   : > { %5840 = vmatprep.subr.bf16.mxu0 %v6527_v2  ;;  %5860 = vmatprep.subr.bf16.mxu1 %v6527_v2  ;;  %v1716_v26 = vunpack.c.l.s8.bf16 %v4976_v23 }
 0xb6f   : > { %5841 = vmatpush3.bf16.msra.mxu0 %v1526_v0  ;;  %5861 = vmatpush3.bf16.msra.mxu1 %v1611_v24 }
 0xb70   : > { %5842 = vmatprep.subr.bf16.mxu0 %v6527_v2  ;;  %5862 = vmatprep.subr.bf16.mxu1 %v6527_v2 }
 0xb73   : > { %5863 = vmatpush3.bf16.msra.mxu1 %v1612_v62 }
 0xb74   : > { %5864 = vmatprep.subr.bf16.mxu1 %v6527_v2 }
 0xb77   : > { %5865 = vmatpush3.bf16.msra.mxu1 %v1613_v27  ;;  %v1718_v27 = vunpack.c.l.s8.bf16 %v4978_v63 }
 0xb78   : > { %5866 = vmatprep.subr.bf16.mxu1 %v6527_v2 }
 0xb7b   : > { %5867 = vmatpush3.bf16.msra.mxu1 %v1614_v22 }
 0xb7c   : > { %5868 = vmatprep.subr.bf16.mxu1 %v6527_v2 }
 0xb7f   : > { %5869 = vmatpush3.bf16.msra.mxu1 %v1615_v30 }
 0xb80   : > { %5870 = vmatprep.subr.bf16.mxu1 %v6527_v2 }
 0xc38   : > { %v5347_v36 = vpop.f32.mrb[20].mxu0  ;;  %v5369_v25 = vpop.f32.mrb[20].mxu1 }
 0xc39   : > { %v5348_v37 = vpop.f32.mrb[21].mxu0  ;;  %v5370_v38 = vpop.f32.mrb[21].mxu1 }
 0xc3a   : > { %v5349_v39 = vadd.f32 %v5348_v37, %v5347_v36  ;;  %v5371_v40 = vadd.f32 %v5370_v38, %v5369_v25  ;;  %v5350_v43 = vpop.f32.mrb[22].mxu0  ;;  %v5372_v44 = vpop.f32.mrb[22].mxu1  ;;  %v1616_v36 = vunpack.c.h.s8.bf16 %v4970_v28  ;;  %v7177_v25 = vld [vmem:[%s6876_s30 + $0x28] sm:$0xff]  ;;  %v7180_v37 = vld [vmem:[%s6876_s30 + $0x20] sm:$0xff] }
 0xc3b   : > { %v5351_v45 = vpop.f32.mrb[23].mxu0  ;;  %v5373_v46 = vpop.f32.mrb[23].mxu1  ;;  %v1576_v38 = vrot.slane %v7177_v25, %v6921_v32  ;;  %v1598_v1 = vrot.slane %v7180_v37, %v6942_v58  ;;  %v1603_v60 = vrot.slane %v7180_v37, %v6945_v59 }
 0xc3c   : > { %v1474_v47 = vadd.f32 %v5371_v40, %v5349_v39  ;;  %5871 = vmatpush3.bf16.msra.mxu1 %v1616_v36  ;;  %v1581_v39 = vrot.slane %v7180_v37, %v6927_v34 }
 0xc3e   : > { %v1483_v49 = vmul.f32 %v1482_v41, %v1474_v47 }
 0xc3f   : > { %5873 = vmatmul.mubr.bf16.vlgmr.msra.gmra.mrb[24].mxu1 %v6915_v29 }
 0xc40   : > { %v1488_v50 = vadd.f32 %v1487_v48, %v1483_v49  ;;  %1812 = vmatprep.mubr.bf16.mxu1 %v6529_v5 }
 0xc42   : > { %v1489_v51 = vadd.f32 %v1488_v50, %v7108_v54  ;;  %v1527_v54 = vunpack.c.h.s8.bf16 %v4964_v61  ;;  %v1660_v61 = vrot.slane %v7177_v25, %v6937_v56 }
 0xc44   : > { %1490 = vadd.xlane.f32.xlu0 %v1489_v51  ;;  %5843 = vmatpush3.bf16.msra.mxu0 %v1527_v54  ;;  %v1665_v54 = vrot.slane %v7180_v37, %v6921_v32 }
 0xc45   : > { %5844 = vmatprep.subr.bf16.mxu0 %v6527_v2 }
 0xc48   : > { %5845 = vmatpush3.bf16.msra.mxu0 %v1528_v3 }
 0xc49   : > { %5846 = vmatprep.subr.bf16.mxu0 %v6527_v2 }
 0xc4c   : > { %5847 = vmatpush3.bf16.msra.mxu0 %v1529_v4 }
 0xc4d   : > { %5848 = vmatprep.subr.bf16.mxu0 %v6527_v2 }
 0xc50   : > { %5849 = vmatpush3.bf16.msra.mxu0 %v1530_v6 }
 0xc51   : > { %5850 = vmatprep.subr.bf16.mxu0 %v6527_v2 }
 0xc54   : > { %5851 = vmatpush3.bf16.msra.mxu0 %v1531_v7 }
 0xcd1   : > { %v1491_v33 = vpop.xlane.xlu0 %1490 }
 0xcd2   : > { %v1492_v53 = vmul.f32 0.0078125, %v1491_v33 }
 0xcd4   : > { %v1493_v55 = vsub.f32 %v1489_v51, %v1492_v53 }
 0xcd6   : > { %v1494_v57 = vmul.f32 %v1493_v55, %v1493_v55 }
 0xcd8   : > { %1495 = vadd.xlane.f32.xlu1 %v1494_v57 }
 0xd12   : > { %v1651_v31 = vpop.f32.mrb[24].mxu1 }
 0xd13   : > { %v5874_v35 = vpop.f32.mrb[25].mxu1  ;;  %v1661_v0 = vmul.f32 %v1660_v61, %v1651_v31  ;;  %v4981_v31 = vld [vmem:[%s6866_s13 + $0x150] sm:$0xff]  ;;  %v4984_v61 = vld [vmem:[%s6866_s13 + $0x168] sm:$0xff] }
 0xd14   : > { %v1654_v52 = vpop.f32.mrb[26].mxu1 }
 0xd15   : > { %v5875_v33 = vpop.f32.mrb[27].mxu1  ;;  %v1666_v6 = vadd.f32 %v1665_v54, %v1661_v0  ;;  %v1725_v52 = vunpack.c.l.s8.bf16 %v4981_v31  ;;  %v4986_v0 = vld [vmem:[%s6866_s13 + $0x178] sm:$0xff]  ;;  %v1732_v54 = vunpack.c.l.s8.bf16 %v4984_v61 }
 0xd65   : > { %v1496_v8 = vpop.xlane.xlu1 %1495 }
 0xd66   : > { %v1497_v9 = vmul.f32 0.0078125, %v1496_v8 }
 0xd68   : > { %v1498_v10 = vadd.f32 1e-05, %v1497_v9 }
 0xd6a   : > { %6195 = vrsqrt.f32 %v1498_v10  ;;  %v4972_v10 = vld [vmem:[%s6866_s13 + $0x108] sm:$0xff] }
 0xd74   : > { %v6196_v12 = vpop.eup %6195 }
 0xd75   : > { %v1500_v16 = vmul.f32 %v6196_v12, %v1493_v55  ;;  %v4971_v12 = vld [vmem:[%s6866_s13 + $0x100] sm:$0xff] }
 0xd76   : > { %v1711_v24 = vunpack.c.h.s8.bf16 %v4971_v12 }
 0xd77   : > { %v1505_v17 = vmul.f32 %v1504_v11, %v1500_v16  ;;  %v4974_v11 = vld [vmem:[%s6866_s13 + $0x118] sm:$0xff] }
 0xd78   : > { %v1710_v16 = vunpack.c.l.s8.bf16 %v4974_v11  ;;  %v1714_v21 = vunpack.c.h.s8.bf16 %v4974_v11  ;;  %v4991_v11 = vld [vmem:[%s6874_s9 + $0x120] sm:$0xff] }
 0xd79   : > { %v1510_v18 = vadd.f32 %v1509_v15, %v1505_v17  ;;  %v1708_v15 = vunpack.c.l.s8.bf16 %v4972_v10  ;;  %v1707_v17 = vunpack.c.l.s8.bf16 %v4971_v12  ;;  %v4999_v12 = vld [vmem:[%s6874_s9 + $0x160] sm:$0xff] }
 0xd7a   : > { %1780 = vmatprep.subr.bf16.mxu1 %v1710_v16  ;;  %v1910_v16 = vunpack.c.l.s8.bf16 %v4999_v12 }
 0xd7b   : > { %v1532_v19 = vpack.c.bf16 %v1510_v18, %v1510_v18  ;;  %1739 = vmatprep.subr.bf16.mxu0 %v1708_v15  ;;  %v1894_v15 = vunpack.c.l.s8.bf16 %v4991_v11 }
 0xd7d   : > { %5853 = vmatmul.mubr.bf16.vlgmr.msra.gmra.mrb[24].mxu0 %v1532_v19  ;;  %v1712_v19 = vunpack.c.h.s8.bf16 %v4972_v10 }
 0xd7e   : > { %1771 = vmatprep.mubr.bf16.mxu0 %v6529_v5  ;;  %1740 = vmatpush1.bf16.msra.mxu0 %v1707_v17 }
 0xd7f   : > { %1741 = vmatprep.subr.bf16.mxu0 %v1712_v19 }
 0xd82   : > { %1742 = vmatpush1.bf16.msra.mxu0 %v1711_v24 }
 0xd83   : > { %1743 = vmatprep.subr.bf16.mxu0 %v1716_v26  ;;  %v4995_v26 = vld [vmem:[%s6874_s9 + $0x140] sm:$0xff] }
 0xe50   : > { %v1567_v40 = vpop.f32.mrb[24].mxu0 }
 0xe51   : > { %v1577_v41 = vmul.f32 %v1576_v38, %v1567_v40  ;;  %v5854_v43 = vpop.f32.mrb[25].mxu0  ;;  %v4975_v38 = vld [vmem:[%s6866_s13 + $0x120] sm:$0xff] }
 0xe52   : > { %v1570_v44 = vpop.f32.mrb[26].mxu0  ;;  %v1715_v40 = vunpack.c.l.s8.bf16 %v4975_v38  ;;  %v1720_v43 = vunpack.c.h.s8.bf16 %v4976_v23 }
 0xe53   : > { %v1582_v45 = vadd.f32 %v1581_v39, %v1577_v41  ;;  %v5855_v46 = vpop.f32.mrb[27].mxu0  ;;  %v4977_v39 = vld [vmem:[%s6866_s13 + $0x130] sm:$0xff]  ;;  %v1722_v44 = vunpack.c.h.s8.bf16 %v4978_v63  ;;  %v1687_v63 = vrot.slane %v7180_v37, %v6981_v14 }
 0xe54   : > { %v1717_v41 = vunpack.c.l.s8.bf16 %v4977_v39  ;;  %1744 = vmatpush1.bf16.msra.mxu0 %v1715_v40  ;;  %v1721_v46 = vunpack.c.h.s8.bf16 %v4977_v39  ;;  %v1911_v39 = vunpack.c.h.s8.bf16 %v4999_v12  ;;  %v4992_v40 = vld [vmem:[%s6874_s9 + $0x128] sm:$0xff] }
 0xe55   : > { %v1583_v47 = vadd.f32 %v1582_v45, %v1510_v18  ;;  %v4973_v18 = vld [vmem:[%s6866_s13 + $0x110] sm:$0xff]  ;;  %v1719_v45 = vunpack.c.h.s8.bf16 %v4975_v38  ;;  %1745 = vmatprep.subr.bf16.mxu0 %v1720_v43  ;;  %v1895_v38 = vunpack.c.h.s8.bf16 %v4991_v11  ;;  %v1903_v43 = vunpack.c.h.s8.bf16 %v4995_v26  ;;  %v4998_v11 = vld [vmem:[%s6874_s9 + $0x158] sm:$0xff] }
 0xe56   : > { %v1709_v20 = vunpack.c.l.s8.bf16 %v4973_v18  ;;  %v1713_v62 = vunpack.c.h.s8.bf16 %v4973_v18 }
 0xe57   : > { %1584 = vadd.xlane.f32.xlu0 %v1583_v47 }
 0xe58   : > { %1781 = vmatpush1.bf16.msra.mxu1 %v1709_v20  ;;  %1746 = vmatpush1.bf16.msra.mxu0 %v1719_v45  ;;  %v1682_v20 = vrot.slane %v7180_v37, %v6978_v13 }
 0xe59   : > { %1782 = vmatprep.subr.bf16.mxu1 %v1714_v21 }
 0xe5c   : > { %1783 = vmatpush1.bf16.msra.mxu1 %v1713_v62  ;;  %v4987_v62 = vld [vmem:[%s6874_s9 + $0x100] sm:$0xff] }
 0xe5d   : > { %1784 = vmatprep.subr.bf16.mxu1 %v1718_v27 }
 0xe60   : > { %1785 = vmatpush1.bf16.msra.mxu1 %v1717_v41  ;;  %v5000_v41 = vld [vmem:[%s6874_s9 + $0x168] sm:$0xff] }
 0xe61   : > { %1786 = vmatprep.subr.bf16.mxu1 %v1722_v44  ;;  %v1896_v44 = vunpack.c.l.s8.bf16 %v4992_v40  ;;  %v1912_v45 = vunpack.c.l.s8.bf16 %v5000_v41 }
 0xe64   : > { %1787 = vmatpush1.bf16.msra.mxu1 %v1721_v46  ;;  %v4988_v46 = vld [vmem:[%s6874_s9 + $0x108] sm:$0xff] }
 0xee4   : > { %v1585_v48 = vpop.xlane.xlu0 %1584 }
 0xee5   : > { %v1586_v49 = vmul.f32 0.0078125, %v1585_v48  ;;  %v4982_v48 = vld [vmem:[%s6866_s13 + $0x158] sm:$0xff] }
 0xee7   : > { %v1587_v50 = vsub.f32 %v1583_v47, %v1586_v49  ;;  %v4980_v47 = vld [vmem:[%s6866_s13 + $0x148] sm:$0xff] }
 0xee8   : > { %v1724_v49 = vunpack.c.l.s8.bf16 %v4980_v47  ;;  %v1728_v33 = vunpack.c.h.s8.bf16 %v4980_v47  ;;  %v4996_v47 = vld [vmem:[%s6874_s9 + $0x148] sm:$0xff] }
 0xee9   : > { %v1588_v51 = vmul.f32 %v1587_v50, %v1587_v50 }
 0xeea   : > { %1747 = vmatprep.subr.bf16.mxu0 %v1724_v49  ;;  %v1904_v49 = vunpack.c.l.s8.bf16 %v4996_v47 }
 0xeeb   : > { %1589 = vadd.xlane.f32.xlu1 %v1588_v51  ;;  %v4979_v51 = vld [vmem:[%s6866_s13 + $0x140] sm:$0xff] }
 0xeec   : > { %v1723_v35 = vunpack.c.l.s8.bf16 %v4979_v51 }
 0xeee   : > { %1748 = vmatpush1.bf16.msra.mxu0 %v1723_v35  ;;  %v5001_v35 = vld [vmem:[%s6874_s9 + $0x170] sm:$0xff] }
 0xeef   : > { %1749 = vmatprep.subr.bf16.mxu0 %v1728_v33  ;;  %v1905_v33 = vunpack.c.h.s8.bf16 %v4996_v47 }
 0xf78   : > { %v1590_v53 = vpop.xlane.xlu1 %1589 }
 0xf79   : > { %v1591_v55 = vmul.f32 0.0078125, %v1590_v53  ;;  %v1730_v53 = vunpack.c.h.s8.bf16 %v4982_v48 }
 0xf7b   : > { %v1592_v57 = vadd.f32 1e-05, %v1591_v55  ;;  %v1727_v55 = vunpack.c.h.s8.bf16 %v4979_v51  ;;  %v1913_v51 = vunpack.c.h.s8.bf16 %v5000_v41 }
 0xf7d   : > { %6197 = vrsqrt.f32 %v1592_v57  ;;  %v1729_v57 = vunpack.c.h.s8.bf16 %v4981_v31  ;;  %1750 = vmatpush1.bf16.msra.mxu0 %v1727_v55  ;;  %v4993_v31 = vld [vmem:[%s6874_s9 + $0x130] sm:$0xff]  ;;  %v1914_v55 = vunpack.c.l.s8.bf16 %v5001_v35 }
 0xf7e   : > { %1751 = vmatprep.subr.bf16.mxu0 %v1732_v54 }
 0xf87   : > { %v6198_v3 = vpop.eup %6197 }
 0xf88   : > { %v1594_v4 = vmul.f32 %v6198_v3, %v1587_v50  ;;  %v1726_v50 = vunpack.c.l.s8.bf16 %v4982_v48  ;;  %v4983_v3 = vld [vmem:[%s6866_s13 + $0x160] sm:$0xff]  ;;  %v1888_v48 = vunpack.c.l.s8.bf16 %v4988_v46 }
 0xf8a   : > { %v1599_v7 = vmul.f32 %v1598_v1, %v1594_v4  ;;  %1788 = vmatprep.subr.bf16.mxu1 %v1726_v50  ;;  %v1734_v1 = vunpack.c.l.s8.bf16 %v4986_v0  ;;  %v4985_v4 = vld [vmem:[%s6866_s13 + $0x170] sm:$0xff]  ;;  %v1897_v50 = vunpack.c.h.s8.bf16 %v4992_v40 }
 0xf8b   : > { %1789 = vmatpush1.bf16.msra.mxu1 %v1725_v52  ;;  %v1737_v10 = vunpack.c.h.s8.bf16 %v4985_v4  ;;  %v1889_v52 = vunpack.c.h.s8.bf16 %v4988_v46 }
 0xf8c   : > { %v1604_v8 = vadd.f32 %v1603_v60, %v1599_v7  ;;  %1790 = vmatprep.subr.bf16.mxu1 %v1730_v53  ;;  %v1731_v60 = vunpack.c.l.s8.bf16 %v4983_v3  ;;  %v1736_v7 = vunpack.c.h.s8.bf16 %v4984_v61  ;;  %v1898_v53 = vunpack.c.l.s8.bf16 %v4993_v31  ;;  %v4997_v61 = vld [vmem:[%s6874_s9 + $0x150] sm:$0xff] }
 0xf8d   : > { %v1906_v54 = vunpack.c.l.s8.bf16 %v4997_v61 }
 0xf8e   : > { %v1667_v9 = vadd.f32 %v1666_v6, %v1604_v8  ;;  %v1733_v6 = vunpack.c.l.s8.bf16 %v4985_v4  ;;  %v1738_v8 = vunpack.c.h.s8.bf16 %v4986_v0  ;;  %1752 = vmatpush1.bf16.msra.mxu0 %v1731_v60  ;;  %v1907_v60 = vunpack.c.h.s8.bf16 %v4997_v61 }
 0xf8f   : > { %1791 = vmatpush1.bf16.msra.mxu1 %v1729_v57  ;;  %1753 = vmatprep.subr.bf16.mxu0 %v1736_v7  ;;  %v4989_v57 = vld [vmem:[%s6874_s9 + $0x110] sm:$0xff]  ;;  %v5002_v7 = vld [vmem:[%s6874_s9 + $0x178] sm:$0xff] }
 0xf90   : > { %1668 = vadd.xlane.f32.xlu0 %v1667_v9  ;;  %1792 = vmatprep.subr.bf16.mxu1 %v1734_v1  ;;  %v1890_v0 = vunpack.c.l.s8.bf16 %v4989_v57  ;;  %v1899_v1 = vunpack.c.h.s8.bf16 %v4993_v31  ;;  %v1891_v4 = vunpack.c.h.s8.bf16 %v4989_v57 }
 0xf93   : > { %1793 = vmatpush1.bf16.msra.mxu1 %v1733_v6  ;;  %v4994_v6 = vld [vmem:[%s6874_s9 + $0x138] sm:$0xff] }
 0xf94   : > { %1794 = vmatprep.subr.bf16.mxu1 %v1738_v8  ;;  %v1900_v8 = vunpack.c.l.s8.bf16 %v4994_v6 }
 0xf97   : > { %1795 = vmatpush1.bf16.msra.mxu1 %v1737_v10  ;;  %v4990_v10 = vld [vmem:[%s6874_s9 + $0x118] sm:$0xff] }
 0xf98   : > { %5415 = vmatprep.subr.bf16.mxu1 %v1910_v16  ;;  %v1892_v12 = vunpack.c.l.s8.bf16 %v4990_v10  ;;  %v1901_v16 = vunpack.c.h.s8.bf16 %v4994_v6 }
0x101d   : > { %v1669_v22 = vpop.xlane.xlu0 %1668 }
0x101e   : > { %v1670_v28 = vmul.f32 0.0078125, %v1669_v22  ;;  %v1886_v22 = vunpack.c.l.s8.bf16 %v4987_v62 }
0x1020   : > { %v7200_v30 = vsub.f32 %v1667_v9, %v1670_v28  ;;  %v1735_v9 = vunpack.c.h.s8.bf16 %v4983_v3  ;;  %v1902_v28 = vunpack.c.l.s8.bf16 %v4995_v26  ;;  %v1915_v3 = vunpack.c.h.s8.bf16 %v5001_v35 }
0x1022   : > { %v1672_v36 = vmul.f32 %v7200_v30, %v7200_v30  ;;  %1754 = vmatpush1.bf16.msra.mxu0 %v1735_v9  ;;  %v1916_v9 = vunpack.c.l.s8.bf16 %v5002_v7 }
0x1023   : > { %5393 = vmatprep.subr.bf16.mxu0 %v1894_v15  ;;  %v1908_v15 = vunpack.c.l.s8.bf16 %v4998_v11 }
0x1024   : > { %1673 = vadd.xlane.f32.xlu1 %v1672_v36 }
0x10b1   : > { %v1674_v17 = vpop.xlane.xlu1 %1673 }
0x10b2   : > { %v1675_v18 = vmul.f32 0.0078125, %v1674_v17  ;;  %v1917_v17 = vunpack.c.h.s8.bf16 %v5002_v7 }
0x10b4   : > { %v1676_v19 = vadd.f32 1e-05, %v1675_v18  ;;  %v1893_v18 = vunpack.c.h.s8.bf16 %v4990_v10  ;;  %v2001_v10 = vrot.slane %v7177_v25, %v6942_v58 }
0x10b6   : > { %6199 = vrsqrt.f32 %v1676_v19  ;;  %v1909_v19 = vunpack.c.h.s8.bf16 %v4998_v11 }
0x10c0   : > { %v6200_v21 = vpop.eup %6199 }
0x10c1   : > { %v1678_v23 = vmul.f32 %v6200_v21, %v7200_v30  ;;  %v1887_v30 = vunpack.c.h.s8.bf16 %v4987_v62  ;;  %v4961_v21 = vld [vmem:[%s6868_s29 + $0x50] sm:$0xff] }
0x10c2   : > { %v1832_v62 = vrot.slane %v4961_v21, %v6921_v32 }
0x10c3   : > { %v1683_v24 = vmul.f32 %v1682_v20, %v1678_v23  ;;  %v4959_v20 = vld [vmem:[%s6868_s29 + $0x40] sm:$0xff]  ;;  %v4960_v23 = vld [vmem:[%s6868_s29 + $0x48] sm:$0xff] }
0x10c4   : > { %v1828_v26 = vrot.slane %v4960_v23, %v6921_v32  ;;  %v1848_v40 = vrot.slane %v4960_v23, %v6927_v34  ;;  %v5009_v23 = vld [vmem:[%s6860_s14 + $0xc0] sm:$0xff] }
0x10c5   : > { %v7223_v27 = vadd.f32 %v1687_v63, %v1683_v24  ;;  %v4962_v63 = vld [vmem:[%s6868_s29 + $0x58] sm:$0xff]  ;;  %v1824_v24 = vrot.slane %v4959_v20, %v6921_v32 }
0x10c6   : > { %v1856_v41 = vrot.slane %v4962_v63, %v6927_v34 }
0x10c7   : > { %v1689_v36 = vpack.c.bf16 %v7223_v27, %v7223_v27 }
0x10c9   : > { %1772 = vmatmul.mubr.bf16.vlgmr.msra.gmra.mrb[28].mxu0 %v1689_v36  ;;  %1813 = vmatmul.mubr.bf16.vlgmr.msra.gmra.mrb[28].mxu1 %v1689_v36  ;;  %v1852_v36 = vrot.slane %v4961_v21, %v6927_v34 }
0x10ca   : > { %5394 = vmatpush3.bf16.msra.mxu0 %v1886_v22  ;;  %5416 = vmatpush3.bf16.msra.mxu1 %v1902_v28  ;;  %v1836_v22 = vrot.slane %v4962_v63, %v6921_v32  ;;  %v1844_v28 = vrot.slane %v4959_v20, %v6927_v34  ;;  %v2043_v63 = vunpack.c.l.s8.bf16 %v5009_v23 }
0x10cb   : > { %5395 = vmatprep.subr.bf16.mxu0 %v1895_v38  ;;  %5417 = vmatprep.subr.bf16.mxu1 %v1911_v39 }
0x10ce   : > { %5396 = vmatpush3.bf16.msra.mxu0 %v1887_v30  ;;  %5418 = vmatpush3.bf16.msra.mxu1 %v1903_v43 }
0x10cf   : > { %5397 = vmatprep.subr.bf16.mxu0 %v1896_v44  ;;  %5419 = vmatprep.subr.bf16.mxu1 %v1912_v45 }
0x10d2   : > { %5398 = vmatpush3.bf16.msra.mxu0 %v1888_v48  ;;  %5420 = vmatpush3.bf16.msra.mxu1 %v1904_v49 }
0x10d3   : > { %5399 = vmatprep.subr.bf16.mxu0 %v1897_v50  ;;  %5421 = vmatprep.subr.bf16.mxu1 %v1913_v51 }
0x10d6   : > { %5400 = vmatpush3.bf16.msra.mxu0 %v1889_v52  ;;  %5422 = vmatpush3.bf16.msra.mxu1 %v1905_v33 }
0x10d7   : > { %5401 = vmatprep.subr.bf16.mxu0 %v1898_v53  ;;  %5423 = vmatprep.subr.bf16.mxu1 %v1914_v55 }
0x10da   : > { %5402 = vmatpush3.bf16.msra.mxu0 %v1890_v0  ;;  %5424 = vmatpush3.bf16.msra.mxu1 %v1906_v54 }
0x10db   : > { %5403 = vmatprep.subr.bf16.mxu0 %v1899_v1  ;;  %5425 = vmatprep.subr.bf16.mxu1 %v1915_v3 }
0x10de   : > { %5404 = vmatpush3.bf16.msra.mxu0 %v1891_v4  ;;  %5426 = vmatpush3.bf16.msra.mxu1 %v1907_v60 }
0x10df   : > { %5405 = vmatprep.subr.bf16.mxu0 %v1900_v8  ;;  %5427 = vmatprep.subr.bf16.mxu1 %v1916_v9 }
0x10e2   : > { %5406 = vmatpush3.bf16.msra.mxu0 %v1892_v12  ;;  %5428 = vmatpush3.bf16.msra.mxu1 %v1908_v15 }
0x10e3   : > { %5407 = vmatprep.subr.bf16.mxu0 %v1901_v16  ;;  %5429 = vmatprep.subr.bf16.mxu1 %v1917_v17 }
0x10e6   : > { %5408 = vmatpush3.bf16.msra.mxu0 %v1893_v18  ;;  %5430 = vmatpush3.bf16.msra.mxu1 %v1909_v19  ;;  %v2006_v18 = vrot.slane %v7180_v37, %v6937_v56 }
0x10e7   : > { %5876 = vmatprep.subr.bf16.mxu0 %v6527_v2  ;;  %5896 = vmatprep.subr.bf16.mxu1 %v6527_v2 }
0x119c   : > { %v1773_v38 = vpop.f32.mrb[28].mxu0  ;;  %v1814_v39 = vpop.f32.mrb[28].mxu1 }
0x119d   : > { %v1837_v30 = vmul.f32 %v1824_v24, %v1773_v38  ;;  %v1839_v43 = vmul.f32 %v1832_v62, %v1814_v39  ;;  %v1775_v44 = vpop.f32.mrb[29].mxu0  ;;  %v1816_v45 = vpop.f32.mrb[29].mxu1  ;;  %v2044_v24 = vunpack.c.h.s8.bf16 %v5009_v23  ;;  %v5011_v39 = vld [vmem:[%s6860_s14 + $0xe0] sm:$0xff] }
0x119e   : > { %v1838_v46 = vmul.f32 %v1828_v26, %v1775_v44  ;;  %v1840_v47 = vmul.f32 %v1836_v22, %v1816_v45  ;;  %v1777_v48 = vpop.f32.mrb[30].mxu0  ;;  %v1818_v49 = vpop.f32.mrb[30].mxu1 }
0x119f   : > { %v1857_v50 = vadd.f32 %v1844_v28, %v1837_v30  ;;  %v1859_v51 = vadd.f32 %v1852_v36, %v1839_v43  ;;  %v1778_v31 = vpop.f32.mrb[31].mxu0  ;;  %v1819_v35 = vpop.f32.mrb[31].mxu1  ;;  %v5010_v36 = vld [vmem:[%s6860_s14 + $0xd0] sm:$0xff]  ;;  %v2023_v48 = vrot.slane %v7180_v37, %v7041_v42  ;;  %v5014_v37 = vld [vmem:[%s6860_s14 + $0xd8] sm:$0xff] }
0x11a0   : > { %v1858_v52 = vadd.f32 %v1848_v40, %v1838_v46  ;;  %v1860_v33 = vadd.f32 %v1856_v41, %v1840_v47  ;;  %v2045_v38 = vunpack.c.l.s8.bf16 %v5010_v36  ;;  %v2047_v40 = vunpack.c.l.s8.bf16 %v5011_v39  ;;  %v5012_v30 = vld [vmem:[%s6860_s14 + $0xf0] sm:$0xff] }
0x11a1   : > { %v1861_v53 = vmax.f32 %v1857_v50, 0.0  ;;  %v1863_v55 = vmax.f32 %v1859_v51, 0.0  ;;  %v2048_v41 = vunpack.c.h.s8.bf16 %v5011_v39  ;;  %v2049_v43 = vunpack.c.l.s8.bf16 %v5012_v30 }
0x11a2   : > { %v1862_v57 = vmax.f32 %v1858_v52, 0.0  ;;  %v1864_v61 = vmax.f32 %v1860_v33, 0.0  ;;  %v2050_v44 = vunpack.c.h.s8.bf16 %v5012_v30  ;;  %v2028_v50 = vrot.slane %v7177_v25, %v6927_v34  ;;  %v5013_v33 = vld [vmem:[%s6860_s14 + $0xc8] sm:$0xff] }
0x11a3   : > { %v1865_v1 = vpack.c.bf16 %v1861_v53, %v1861_v53  ;;  %v1867_v3 = vpack.c.bf16 %v1863_v55, %v1863_v55  ;;  %v2128_v53 = vunpack.c.l.s8.bf16 %v5013_v33  ;;  %v2129_v55 = vunpack.c.h.s8.bf16 %v5013_v33 }
0x11a4   : > { %v1866_v0 = vpack.c.bf16 %v1862_v57, %v1862_v57  ;;  %v1868_v54 = vpack.c.bf16 %v1864_v61, %v1864_v61  ;;  %v2130_v57 = vunpack.c.l.s8.bf16 %v5014_v37  ;;  %v2131_v25 = vunpack.c.h.s8.bf16 %v5014_v37  ;;  %v5015_v61 = vld [vmem:[%s6860_s14 + $0xe8] sm:$0xff]  ;;  %v5024_v37 = vld [vmem:[%s6866_s13 + $0x1b8] sm:$0xff] }
0x11a6   : > { %1950 = vmatprep.mubr.bf16.mxu0 %v1866_v0  ;;  %1990 = vmatprep.mubr.bf16.mxu1 %v1868_v54  ;;  %v2132_v0 = vunpack.c.l.s8.bf16 %v5015_v61  ;;  %v2133_v54 = vunpack.c.h.s8.bf16 %v5015_v61 }
0x11a7   : > { %1951 = vmatmul.mubr.bf16.vlgmr.msra.gmra.mrb[32].mxu0 %v1865_v1  ;;  %1991 = vmatmul.mubr.bf16.vlgmr.msra.gmra.mrb[32].mxu1 %v1867_v3  ;;  %v5016_v1 = vld [vmem:[%s6860_s14 + $0xf8] sm:$0xff] }
0x11a8   : > { %5892 = vmatprep.mubr.msk.bf16.mxu0 %vm6528_vm0, %v6527_v2  ;;  %5912 = vmatprep.mubr.msk.bf16.mxu1 %vm6528_vm0, %v6527_v2  ;;  %v2134_v3 = vunpack.c.l.s8.bf16 %v5016_v1 }
0x11a9   : > { %5877 = vmatpush3.bf16.msra.mxu0 %v2043_v63  ;;  %5897 = vmatpush3.bf16.msra.mxu1 %v2128_v53 }
0x11aa   : > { %5878 = vmatprep.subr.bf16.mxu0 %v6527_v2  ;;  %5898 = vmatprep.subr.bf16.mxu1 %v6527_v2 }
0x11ad   : > { %5879 = vmatpush3.bf16.msra.mxu0 %v2044_v24  ;;  %5899 = vmatpush3.bf16.msra.mxu1 %v2129_v55  ;;  %v5022_v55 = vld [vmem:[%s6866_s13 + $0x1a8] sm:$0xff] }
0x11ae   : > { %5880 = vmatprep.subr.bf16.mxu0 %v6527_v2  ;;  %5900 = vmatprep.subr.bf16.mxu1 %v6527_v2  ;;  %v2235_v61 = vunpack.c.l.s8.bf16 %v5022_v55 }
0x11b1   : > { %5881 = vmatpush3.bf16.msra.mxu0 %v2045_v38  ;;  %5901 = vmatpush3.bf16.msra.mxu1 %v2130_v57 }
0x11b2   : > { %5882 = vmatprep.subr.bf16.mxu0 %v6527_v2  ;;  %5902 = vmatprep.subr.bf16.mxu1 %v6527_v2 }
0x11b5   : > { %5903 = vmatpush3.bf16.msra.mxu1 %v2131_v25 }
0x11b6   : > { %5904 = vmatprep.subr.bf16.mxu1 %v6527_v2 }
0x11b9   : > { %5905 = vmatpush3.bf16.msra.mxu1 %v2132_v0  ;;  %v2237_v0 = vunpack.c.l.s8.bf16 %v5024_v37 }
0x11ba   : > { %5906 = vmatprep.subr.bf16.mxu1 %v6527_v2 }
0x11bd   : > { %5907 = vmatpush3.bf16.msra.mxu1 %v2133_v54 }
0x11be   : > { %5908 = vmatprep.subr.bf16.mxu1 %v6527_v2 }
0x11c1   : > { %5909 = vmatpush3.bf16.msra.mxu1 %v2134_v3 }
0x11c2   : > { %5910 = vmatprep.subr.bf16.mxu1 %v6527_v2 }
0x127a   : > { %v5409_v4 = vpop.f32.mrb[32].mxu0  ;;  %v5431_v60 = vpop.f32.mrb[32].mxu1 }
0x127b   : > { %v5410_v6 = vpop.f32.mrb[33].mxu0  ;;  %v5432_v7 = vpop.f32.mrb[33].mxu1 }
0x127c   : > { %v5411_v8 = vadd.f32 %v5410_v6, %v5409_v4  ;;  %v5433_v9 = vadd.f32 %v5432_v7, %v5431_v60  ;;  %v5412_v11 = vpop.f32.mrb[34].mxu0  ;;  %v5434_v12 = vpop.f32.mrb[34].mxu1  ;;  %v2135_v4 = vunpack.c.h.s8.bf16 %v5016_v1  ;;  %v7292_v60 = vld [vmem:[%s6876_s30 + $0x38] sm:$0xff]  ;;  %v7295_v6 = vld [vmem:[%s6876_s30 + $0x30] sm:$0xff] }
0x127d   : > { %v5413_v15 = vpop.f32.mrb[35].mxu0  ;;  %v5435_v16 = vpop.f32.mrb[35].mxu1  ;;  %v2095_v7 = vrot.slane %v7292_v60, %v6921_v32  ;;  %v2117_v39 = vrot.slane %v7295_v6, %v6942_v58  ;;  %v2122_v30 = vrot.slane %v7295_v6, %v6945_v59 }
0x127e   : > { %v1993_v17 = vadd.f32 %v5433_v9, %v5411_v8  ;;  %5911 = vmatpush3.bf16.msra.mxu1 %v2135_v4  ;;  %v2100_v8 = vrot.slane %v7295_v6, %v6927_v34 }
0x1280   : > { %v2002_v19 = vmul.f32 %v2001_v10, %v1993_v17 }
0x1281   : > { %5913 = vmatmul.mubr.bf16.vlgmr.msra.gmra.mrb[36].mxu1 %v6915_v29 }
0x1282   : > { %v2007_v20 = vadd.f32 %v2006_v18, %v2002_v19  ;;  %2331 = vmatprep.mubr.bf16.mxu1 %v6529_v5 }
0x1284   : > { %v2008_v21 = vadd.f32 %v2007_v20, %v7223_v27  ;;  %v2046_v27 = vunpack.c.h.s8.bf16 %v5010_v36  ;;  %v2179_v36 = vrot.slane %v7292_v60, %v6937_v56 }
0x1286   : > { %2009 = vadd.xlane.f32.xlu0 %v2008_v21  ;;  %5883 = vmatpush3.bf16.msra.mxu0 %v2046_v27  ;;  %v2184_v27 = vrot.slane %v7295_v6, %v6921_v32 }
0x1287   : > { %5884 = vmatprep.subr.bf16.mxu0 %v6527_v2 }
0x128a   : > { %5885 = vmatpush3.bf16.msra.mxu0 %v2047_v40 }
0x128b   : > { %5886 = vmatprep.subr.bf16.mxu0 %v6527_v2 }
0x128e   : > { %5887 = vmatpush3.bf16.msra.mxu0 %v2048_v41 }
0x128f   : > { %5888 = vmatprep.subr.bf16.mxu0 %v6527_v2 }
0x1292   : > { %5889 = vmatpush3.bf16.msra.mxu0 %v2049_v43 }
0x1293   : > { %5890 = vmatprep.subr.bf16.mxu0 %v6527_v2 }
0x1296   : > { %5891 = vmatpush3.bf16.msra.mxu0 %v2050_v44 }
0x1313   : > { %v2010_v62 = vpop.xlane.xlu0 %2009 }
0x1314   : > { %v2011_v26 = vmul.f32 0.0078125, %v2010_v62 }
0x1316   : > { %v2012_v22 = vsub.f32 %v2008_v21, %v2011_v26 }
0x1318   : > { %v2013_v28 = vmul.f32 %v2012_v22, %v2012_v22 }
0x131a   : > { %2014 = vadd.xlane.f32.xlu1 %v2013_v28 }
0x1354   : > { %v2170_v23 = vpop.f32.mrb[36].mxu1 }
0x1355   : > { %v5914_v63 = vpop.f32.mrb[37].mxu1  ;;  %v2180_v38 = vmul.f32 %v2179_v36, %v2170_v23  ;;  %v5027_v23 = vld [vmem:[%s6866_s13 + $0x1d0] sm:$0xff]  ;;  %v5030_v36 = vld [vmem:[%s6866_s13 + $0x1e8] sm:$0xff] }
0x1356   : > { %v2173_v24 = vpop.f32.mrb[38].mxu1 }
0x1357   : > { %v5915_v62 = vpop.f32.mrb[39].mxu1  ;;  %v2185_v43 = vadd.f32 %v2184_v27, %v2180_v38  ;;  %v2244_v24 = vunpack.c.l.s8.bf16 %v5027_v23  ;;  %v5032_v38 = vld [vmem:[%s6866_s13 + $0x1f8] sm:$0xff]  ;;  %v2251_v27 = vunpack.c.l.s8.bf16 %v5030_v36 }
0x13a7   : > { %v2015_v45 = vpop.xlane.xlu1 %2014 }
0x13a8   : > { %v2016_v46 = vmul.f32 0.0078125, %v2015_v45 }
0x13aa   : > { %v2017_v47 = vadd.f32 1e-05, %v2016_v46 }
0x13ac   : > { %6201 = vrsqrt.f32 %v2017_v47  ;;  %v5018_v47 = vld [vmem:[%s6866_s13 + $0x188] sm:$0xff] }
0x13b6   : > { %v6202_v49 = vpop.eup %6201 }
0x13b7   : > { %v2019_v51 = vmul.f32 %v6202_v49, %v2012_v22  ;;  %v5017_v49 = vld [vmem:[%s6866_s13 + $0x180] sm:$0xff] }
0x13b8   : > { %v2230_v57 = vunpack.c.h.s8.bf16 %v5017_v49 }
0x13b9   : > { %v2024_v31 = vmul.f32 %v2023_v48, %v2019_v51  ;;  %v5020_v48 = vld [vmem:[%s6866_s13 + $0x198] sm:$0xff] }
0x13ba   : > { %v2229_v51 = vunpack.c.l.s8.bf16 %v5020_v48  ;;  %v2233_v53 = vunpack.c.h.s8.bf16 %v5020_v48  ;;  %v5037_v48 = vld [vmem:[%s6874_s9 + $0x1a0] sm:$0xff] }
0x13bb   : > { %v2029_v35 = vadd.f32 %v2028_v50, %v2024_v31  ;;  %v2227_v50 = vunpack.c.l.s8.bf16 %v5018_v47  ;;  %v2226_v31 = vunpack.c.l.s8.bf16 %v5017_v49  ;;  %v5045_v49 = vld [vmem:[%s6874_s9 + $0x1e0] sm:$0xff] }
0x13bc   : > { %2299 = vmatprep.subr.bf16.mxu1 %v2229_v51  ;;  %v2429_v51 = vunpack.c.l.s8.bf16 %v5045_v49 }
0x13bd   : > { %v2051_v52 = vpack.c.bf16 %v2029_v35, %v2029_v35  ;;  %2258 = vmatprep.subr.bf16.mxu0 %v2227_v50  ;;  %v2413_v50 = vunpack.c.l.s8.bf16 %v5037_v48 }
0x13bf   : > { %5893 = vmatmul.mubr.bf16.vlgmr.msra.gmra.mrb[36].mxu0 %v2051_v52  ;;  %v2231_v52 = vunpack.c.h.s8.bf16 %v5018_v47 }
0x13c0   : > { %2290 = vmatprep.mubr.bf16.mxu0 %v6529_v5  ;;  %2259 = vmatpush1.bf16.msra.mxu0 %v2226_v31 }
0x13c1   : > { %2260 = vmatprep.subr.bf16.mxu0 %v2231_v52 }
0x13c4   : > { %2261 = vmatpush1.bf16.msra.mxu0 %v2230_v57 }
0x13c5   : > { %2262 = vmatprep.subr.bf16.mxu0 %v2235_v61  ;;  %v5041_v61 = vld [vmem:[%s6874_s9 + $0x1c0] sm:$0xff] }
0x1492   : > { %v2086_v9 = vpop.f32.mrb[36].mxu0 }
0x1493   : > { %v2096_v10 = vmul.f32 %v2095_v7, %v2086_v9  ;;  %v5894_v11 = vpop.f32.mrb[37].mxu0  ;;  %v5021_v7 = vld [vmem:[%s6866_s13 + $0x1a0] sm:$0xff] }
0x1494   : > { %v2089_v12 = vpop.f32.mrb[38].mxu0  ;;  %v2234_v9 = vunpack.c.l.s8.bf16 %v5021_v7  ;;  %v2239_v11 = vunpack.c.h.s8.bf16 %v5022_v55 }
0x1495   : > { %v2101_v15 = vadd.f32 %v2100_v8, %v2096_v10  ;;  %v5895_v16 = vpop.f32.mrb[39].mxu0  ;;  %v5023_v8 = vld [vmem:[%s6866_s13 + $0x1b0] sm:$0xff]  ;;  %v2241_v12 = vunpack.c.h.s8.bf16 %v5024_v37  ;;  %v2206_v37 = vrot.slane %v7295_v6, %v6981_v14 }
0x1496   : > { %v2236_v10 = vunpack.c.l.s8.bf16 %v5023_v8  ;;  %2263 = vmatpush1.bf16.msra.mxu0 %v2234_v9  ;;  %v2240_v16 = vunpack.c.h.s8.bf16 %v5023_v8  ;;  %v2430_v8 = vunpack.c.h.s8.bf16 %v5045_v49  ;;  %v5038_v9 = vld [vmem:[%s6874_s9 + $0x1a8] sm:$0xff] }
0x1497   : > { %v2102_v17 = vadd.f32 %v2101_v15, %v2029_v35  ;;  %v5019_v35 = vld [vmem:[%s6866_s13 + $0x190] sm:$0xff]  ;;  %v2238_v15 = vunpack.c.h.s8.bf16 %v5021_v7  ;;  %2264 = vmatprep.subr.bf16.mxu0 %v2239_v11  ;;  %v2414_v7 = vunpack.c.h.s8.bf16 %v5037_v48  ;;  %v2422_v11 = vunpack.c.h.s8.bf16 %v5041_v61  ;;  %v5044_v48 = vld [vmem:[%s6874_s9 + $0x1d8] sm:$0xff] }
0x1498   : > { %v2228_v33 = vunpack.c.l.s8.bf16 %v5019_v35  ;;  %v2232_v25 = vunpack.c.h.s8.bf16 %v5019_v35 }
0x1499   : > { %2103 = vadd.xlane.f32.xlu0 %v2102_v17 }
0x149a   : > { %2300 = vmatpush1.bf16.msra.mxu1 %v2228_v33  ;;  %2265 = vmatpush1.bf16.msra.mxu0 %v2238_v15  ;;  %v2201_v33 = vrot.slane %v7295_v6, %v6978_v13 }
0x149b   : > { %2301 = vmatprep.subr.bf16.mxu1 %v2233_v53 }
0x149e   : > { %2302 = vmatpush1.bf16.msra.mxu1 %v2232_v25  ;;  %v5033_v25 = vld [vmem:[%s6874_s9 + $0x180] sm:$0xff] }
0x149f   : > { %2303 = vmatprep.subr.bf16.mxu1 %v2237_v0 }
0x14a2   : > { %2304 = vmatpush1.bf16.msra.mxu1 %v2236_v10  ;;  %v5046_v10 = vld [vmem:[%s6874_s9 + $0x1e8] sm:$0xff] }
0x14a3   : > { %2305 = vmatprep.subr.bf16.mxu1 %v2241_v12  ;;  %v2415_v12 = vunpack.c.l.s8.bf16 %v5038_v9  ;;  %v2431_v15 = vunpack.c.l.s8.bf16 %v5046_v10 }
0x14a6   : > { %2306 = vmatpush1.bf16.msra.mxu1 %v2240_v16  ;;  %v5034_v16 = vld [vmem:[%s6874_s9 + $0x188] sm:$0xff] }
0x1526   : > { %v2104_v18 = vpop.xlane.xlu0 %2103 }
0x1527   : > { %v2105_v19 = vmul.f32 0.0078125, %v2104_v18  ;;  %v5028_v18 = vld [vmem:[%s6866_s13 + $0x1d8] sm:$0xff] }
0x1529   : > { %v2106_v20 = vsub.f32 %v2102_v17, %v2105_v19  ;;  %v5026_v17 = vld [vmem:[%s6866_s13 + $0x1c8] sm:$0xff] }
0x152a   : > { %v2243_v19 = vunpack.c.l.s8.bf16 %v5026_v17  ;;  %v2247_v62 = vunpack.c.h.s8.bf16 %v5026_v17  ;;  %v5042_v17 = vld [vmem:[%s6874_s9 + $0x1c8] sm:$0xff] }
0x152b   : > { %v2107_v21 = vmul.f32 %v2106_v20, %v2106_v20 }
0x152c   : > { %2266 = vmatprep.subr.bf16.mxu0 %v2243_v19  ;;  %v2423_v19 = vunpack.c.l.s8.bf16 %v5042_v17 }
0x152d   : > { %2108 = vadd.xlane.f32.xlu1 %v2107_v21  ;;  %v5025_v21 = vld [vmem:[%s6866_s13 + $0x1c0] sm:$0xff] }
0x152e   : > { %v2242_v63 = vunpack.c.l.s8.bf16 %v5025_v21 }
0x1530   : > { %2267 = vmatpush1.bf16.msra.mxu0 %v2242_v63  ;;  %v5047_v63 = vld [vmem:[%s6874_s9 + $0x1f0] sm:$0xff] }
0x1531   : > { %2268 = vmatprep.subr.bf16.mxu0 %v2247_v62  ;;  %v2424_v62 = vunpack.c.h.s8.bf16 %v5042_v17 }
0x15ba   : > { %v2109_v26 = vpop.xlane.xlu1 %2108 }
0x15bb   : > { %v2110_v22 = vmul.f32 0.0078125, %v2109_v26  ;;  %v2249_v26 = vunpack.c.h.s8.bf16 %v5028_v18 }
0x15bd   : > { %v2111_v28 = vadd.f32 1e-05, %v2110_v22  ;;  %v2246_v22 = vunpack.c.h.s8.bf16 %v5025_v21  ;;  %v2432_v21 = vunpack.c.h.s8.bf16 %v5046_v10 }
0x15bf   : > { %6203 = vrsqrt.f32 %v2111_v28  ;;  %v2248_v28 = vunpack.c.h.s8.bf16 %v5027_v23  ;;  %2269 = vmatpush1.bf16.msra.mxu0 %v2246_v22  ;;  %v5039_v23 = vld [vmem:[%s6874_s9 + $0x1b0] sm:$0xff]  ;;  %v2433_v22 = vunpack.c.l.s8.bf16 %v5047_v63 }
0x15c0   : > { %2270 = vmatprep.subr.bf16.mxu0 %v2251_v27 }
0x15c9   : > { %v6204_v40 = vpop.eup %6203 }
0x15ca   : > { %v2113_v41 = vmul.f32 %v6204_v40, %v2106_v20  ;;  %v2245_v20 = vunpack.c.l.s8.bf16 %v5028_v18  ;;  %v5029_v40 = vld [vmem:[%s6866_s13 + $0x1e0] sm:$0xff]  ;;  %v2407_v18 = vunpack.c.l.s8.bf16 %v5034_v16 }
0x15cc   : > { %v2118_v44 = vmul.f32 %v2117_v39, %v2113_v41  ;;  %2307 = vmatprep.subr.bf16.mxu1 %v2245_v20  ;;  %v2253_v39 = vunpack.c.l.s8.bf16 %v5032_v38  ;;  %v5031_v41 = vld [vmem:[%s6866_s13 + $0x1f0] sm:$0xff]  ;;  %v2416_v20 = vunpack.c.h.s8.bf16 %v5038_v9 }
0x15cd   : > { %2308 = vmatpush1.bf16.msra.mxu1 %v2244_v24  ;;  %v2256_v47 = vunpack.c.h.s8.bf16 %v5031_v41  ;;  %v2408_v24 = vunpack.c.h.s8.bf16 %v5034_v16 }
0x15ce   : > { %v2123_v45 = vadd.f32 %v2122_v30, %v2118_v44  ;;  %2309 = vmatprep.subr.bf16.mxu1 %v2249_v26  ;;  %v2250_v30 = vunpack.c.l.s8.bf16 %v5029_v40  ;;  %v2255_v44 = vunpack.c.h.s8.bf16 %v5030_v36  ;;  %v2417_v26 = vunpack.c.l.s8.bf16 %v5039_v23  ;;  %v5043_v36 = vld [vmem:[%s6874_s9 + $0x1d0] sm:$0xff] }
0x15cf   : > { %v2425_v27 = vunpack.c.l.s8.bf16 %v5043_v36 }
0x15d0   : > { %v2186_v46 = vadd.f32 %v2185_v43, %v2123_v45  ;;  %v2252_v43 = vunpack.c.l.s8.bf16 %v5031_v41  ;;  %v2257_v45 = vunpack.c.h.s8.bf16 %v5032_v38  ;;  %2271 = vmatpush1.bf16.msra.mxu0 %v2250_v30  ;;  %v2426_v30 = vunpack.c.h.s8.bf16 %v5043_v36 }
0x15d1   : > { %2310 = vmatpush1.bf16.msra.mxu1 %v2248_v28  ;;  %2272 = vmatprep.subr.bf16.mxu0 %v2255_v44  ;;  %v5035_v28 = vld [vmem:[%s6874_s9 + $0x190] sm:$0xff]  ;;  %v5048_v44 = vld [vmem:[%s6874_s9 + $0x1f8] sm:$0xff] }
0x15d2   : > { %2187 = vadd.xlane.f32.xlu0 %v2186_v46  ;;  %2311 = vmatprep.subr.bf16.mxu1 %v2253_v39  ;;  %v2409_v38 = vunpack.c.l.s8.bf16 %v5035_v28  ;;  %v2418_v39 = vunpack.c.h.s8.bf16 %v5039_v23  ;;  %v2410_v41 = vunpack.c.h.s8.bf16 %v5035_v28 }
0x15d5   : > { %2312 = vmatpush1.bf16.msra.mxu1 %v2252_v43  ;;  %v5040_v43 = vld [vmem:[%s6874_s9 + $0x1b8] sm:$0xff] }
0x15d6   : > { %2313 = vmatprep.subr.bf16.mxu1 %v2257_v45  ;;  %v2419_v45 = vunpack.c.l.s8.bf16 %v5040_v43 }
0x15d9   : > { %2314 = vmatpush1.bf16.msra.mxu1 %v2256_v47  ;;  %v5036_v47 = vld [vmem:[%s6874_s9 + $0x198] sm:$0xff] }
0x15da   : > { %5477 = vmatprep.subr.bf16.mxu1 %v2429_v51  ;;  %v2411_v49 = vunpack.c.l.s8.bf16 %v5036_v47  ;;  %v2420_v51 = vunpack.c.h.s8.bf16 %v5040_v43 }
0x165f   : > { %v2188_v54 = vpop.xlane.xlu0 %2187 }
0x1660   : > { %v2189_v1 = vmul.f32 0.0078125, %v2188_v54  ;;  %v2405_v54 = vunpack.c.l.s8.bf16 %v5033_v25 }
0x1662   : > { %v7315_v3 = vsub.f32 %v2186_v46, %v2189_v1  ;;  %v2254_v46 = vunpack.c.h.s8.bf16 %v5029_v40  ;;  %v2421_v1 = vunpack.c.l.s8.bf16 %v5041_v61  ;;  %v2434_v40 = vunpack.c.h.s8.bf16 %v5047_v63 }
0x1664   : > { %v2191_v4 = vmul.f32 %v7315_v3, %v7315_v3  ;;  %2273 = vmatpush1.bf16.msra.mxu0 %v2254_v46  ;;  %v2435_v46 = vunpack.c.l.s8.bf16 %v5048_v44 }
0x1665   : > { %5455 = vmatprep.subr.bf16.mxu0 %v2413_v50  ;;  %v2427_v50 = vunpack.c.l.s8.bf16 %v5044_v48 }
0x1666   : > { %2192 = vadd.xlane.f32.xlu1 %v2191_v4 }
0x16f3   : > { %v2193_v31 = vpop.xlane.xlu1 %2192 }
0x16f4   : > { %v2194_v35 = vmul.f32 0.0078125, %v2193_v31  ;;  %v2436_v31 = vunpack.c.h.s8.bf16 %v5048_v44 }
0x16f6   : > { %v2195_v52 = vadd.f32 1e-05, %v2194_v35  ;;  %v2412_v35 = vunpack.c.h.s8.bf16 %v5036_v47  ;;  %v2520_v47 = vrot.slane %v7292_v60, %v6942_v58 }
0x16f8   : > { %6205 = vrsqrt.f32 %v2195_v52  ;;  %v2428_v52 = vunpack.c.h.s8.bf16 %v5044_v48 }
0x1702   : > { %v6206_v53 = vpop.eup %6205 }
0x1703   : > { %v2197_v55 = vmul.f32 %v6206_v53, %v7315_v3  ;;  %v2406_v3 = vunpack.c.h.s8.bf16 %v5033_v25  ;;  %v5007_v53 = vld [vmem:[%s6868_s29 + $0x70] sm:$0xff] }
0x1704   : > { %v2351_v25 = vrot.slane %v5007_v53, %v6921_v32 }
0x1705   : > { %v2202_v57 = vmul.f32 %v2201_v33, %v2197_v55  ;;  %v5005_v33 = vld [vmem:[%s6868_s29 + $0x60] sm:$0xff]  ;;  %v5006_v55 = vld [vmem:[%s6868_s29 + $0x68] sm:$0xff] }
0x1706   : > { %v2347_v61 = vrot.slane %v5006_v55, %v6921_v32  ;;  %v2367_v9 = vrot.slane %v5006_v55, %v6927_v34  ;;  %v5055_v55 = vld [vmem:[%s6860_s14 + $0x100] sm:$0xff] }
0x1707   : > { %v7338_v0 = vadd.f32 %v2206_v37, %v2202_v57  ;;  %v5008_v37 = vld [vmem:[%s6868_s29 + $0x78] sm:$0xff]  ;;  %v2343_v57 = vrot.slane %v5005_v33, %v6921_v32 }
0x1708   : > { %v2375_v10 = vrot.slane %v5008_v37, %v6927_v34 }
0x1709   : > { %v2208_v4 = vpack.c.bf16 %v7338_v0, %v7338_v0 }
0x170b   : > { %2291 = vmatmul.mubr.bf16.vlgmr.msra.gmra.mrb[40].mxu0 %v2208_v4  ;;  %2332 = vmatmul.mubr.bf16.vlgmr.msra.gmra.mrb[40].mxu1 %v2208_v4  ;;  %v2371_v4 = vrot.slane %v5007_v53, %v6927_v34 }
0x170c   : > { %5456 = vmatpush3.bf16.msra.mxu0 %v2405_v54  ;;  %5478 = vmatpush3.bf16.msra.mxu1 %v2421_v1  ;;  %v2355_v54 = vrot.slane %v5008_v37, %v6921_v32  ;;  %v2363_v1 = vrot.slane %v5005_v33, %v6927_v34  ;;  %v2562_v37 = vunpack.c.l.s8.bf16 %v5055_v55 }
0x170d   : > { %5457 = vmatprep.subr.bf16.mxu0 %v2414_v7  ;;  %5479 = vmatprep.subr.bf16.mxu1 %v2430_v8 }
0x1710   : > { %5458 = vmatpush3.bf16.msra.mxu0 %v2406_v3  ;;  %5480 = vmatpush3.bf16.msra.mxu1 %v2422_v11 }
0x1711   : > { %5459 = vmatprep.subr.bf16.mxu0 %v2415_v12  ;;  %5481 = vmatprep.subr.bf16.mxu1 %v2431_v15 }
0x1714   : > { %5460 = vmatpush3.bf16.msra.mxu0 %v2407_v18  ;;  %5482 = vmatpush3.bf16.msra.mxu1 %v2423_v19 }
0x1715   : > { %5461 = vmatprep.subr.bf16.mxu0 %v2416_v20  ;;  %5483 = vmatprep.subr.bf16.mxu1 %v2432_v21 }
0x1718   : > { %5462 = vmatpush3.bf16.msra.mxu0 %v2408_v24  ;;  %5484 = vmatpush3.bf16.msra.mxu1 %v2424_v62 }
0x1719   : > { %5463 = vmatprep.subr.bf16.mxu0 %v2417_v26  ;;  %5485 = vmatprep.subr.bf16.mxu1 %v2433_v22 }
0x171c   : > { %5464 = vmatpush3.bf16.msra.mxu0 %v2409_v38  ;;  %5486 = vmatpush3.bf16.msra.mxu1 %v2425_v27 }
0x171d   : > { %5465 = vmatprep.subr.bf16.mxu0 %v2418_v39  ;;  %5487 = vmatprep.subr.bf16.mxu1 %v2434_v40 }
0x1720   : > { %5466 = vmatpush3.bf16.msra.mxu0 %v2410_v41  ;;  %5488 = vmatpush3.bf16.msra.mxu1 %v2426_v30 }
0x1721   : > { %5467 = vmatprep.subr.bf16.mxu0 %v2419_v45  ;;  %5489 = vmatprep.subr.bf16.mxu1 %v2435_v46 }
0x1724   : > { %5468 = vmatpush3.bf16.msra.mxu0 %v2411_v49  ;;  %5490 = vmatpush3.bf16.msra.mxu1 %v2427_v50 }
0x1725   : > { %5469 = vmatprep.subr.bf16.mxu0 %v2420_v51  ;;  %5491 = vmatprep.subr.bf16.mxu1 %v2436_v31 }
0x1728   : > { %5470 = vmatpush3.bf16.msra.mxu0 %v2412_v35  ;;  %5492 = vmatpush3.bf16.msra.mxu1 %v2428_v52  ;;  %v2525_v35 = vrot.slane %v7295_v6, %v6937_v56 }
0x1729   : > { %5916 = vmatprep.subr.bf16.mxu0 %v6527_v2  ;;  %5936 = vmatprep.subr.bf16.mxu1 %v6527_v2 }
0x17de   : > { %v2292_v7 = vpop.f32.mrb[40].mxu0  ;;  %v2333_v8 = vpop.f32.mrb[40].mxu1 }
0x17df   : > { %v2356_v3 = vmul.f32 %v2343_v57, %v2292_v7  ;;  %v2358_v11 = vmul.f32 %v2351_v25, %v2333_v8  ;;  %v2294_v12 = vpop.f32.mrb[41].mxu0  ;;  %v2335_v15 = vpop.f32.mrb[41].mxu1  ;;  %v2563_v57 = vunpack.c.h.s8.bf16 %v5055_v55  ;;  %v5057_v8 = vld [vmem:[%s6860_s14 + $0x120] sm:$0xff] }
0x17e0   : > { %v2357_v16 = vmul.f32 %v2347_v61, %v2294_v12  ;;  %v2359_v17 = vmul.f32 %v2355_v54, %v2335_v15  ;;  %v2296_v18 = vpop.f32.mrb[42].mxu0  ;;  %v2337_v19 = vpop.f32.mrb[42].mxu1 }
0x17e1   : > { %v2376_v20 = vadd.f32 %v2363_v1, %v2356_v3  ;;  %v2378_v21 = vadd.f32 %v2371_v4, %v2358_v11  ;;  %v2297_v23 = vpop.f32.mrb[43].mxu0  ;;  %v2338_v63 = vpop.f32.mrb[43].mxu1  ;;  %v5056_v4 = vld [vmem:[%s6860_s14 + $0x110] sm:$0xff]  ;;  %v2542_v18 = vrot.slane %v7295_v6, %v7041_v42  ;;  %v5060_v6 = vld [vmem:[%s6860_s14 + $0x118] sm:$0xff] }
0x17e2   : > { %v2377_v24 = vadd.f32 %v2367_v9, %v2357_v16  ;;  %v2379_v62 = vadd.f32 %v2375_v10, %v2359_v17  ;;  %v2564_v7 = vunpack.c.l.s8.bf16 %v5056_v4  ;;  %v2566_v9 = vunpack.c.l.s8.bf16 %v5057_v8  ;;  %v5058_v3 = vld [vmem:[%s6860_s14 + $0x130] sm:$0xff] }
0x17e3   : > { %v2380_v26 = vmax.f32 %v2376_v20, 0.0  ;;  %v2382_v22 = vmax.f32 %v2378_v21, 0.0  ;;  %v2567_v10 = vunpack.c.h.s8.bf16 %v5057_v8  ;;  %v2568_v11 = vunpack.c.l.s8.bf16 %v5058_v3 }
0x17e4   : > { %v2381_v28 = vmax.f32 %v2377_v24, 0.0  ;;  %v2383_v36 = vmax.f32 %v2379_v62, 0.0  ;;  %v2569_v12 = vunpack.c.h.s8.bf16 %v5058_v3  ;;  %v2547_v20 = vrot.slane %v7292_v60, %v6927_v34  ;;  %v5059_v62 = vld [vmem:[%s6860_s14 + $0x108] sm:$0xff] }
0x17e5   : > { %v2384_v39 = vpack.c.bf16 %v2380_v26, %v2380_v26  ;;  %v2386_v40 = vpack.c.bf16 %v2382_v22, %v2382_v22  ;;  %v2647_v26 = vunpack.c.l.s8.bf16 %v5059_v62  ;;  %v2648_v22 = vunpack.c.h.s8.bf16 %v5059_v62 }
0x17e6   : > { %v2385_v38 = vpack.c.bf16 %v2381_v28, %v2381_v28  ;;  %v2387_v27 = vpack.c.bf16 %v2383_v36, %v2383_v36  ;;  %v2649_v28 = vunpack.c.l.s8.bf16 %v5060_v6  ;;  %v2650_v60 = vunpack.c.h.s8.bf16 %v5060_v6  ;;  %v5061_v36 = vld [vmem:[%s6860_s14 + $0x128] sm:$0xff]  ;;  %v5070_v6 = vld [vmem:[%s6866_s13 + $0x238] sm:$0xff] }
0x17e8   : > { %2469 = vmatprep.mubr.bf16.mxu0 %v2385_v38  ;;  %2509 = vmatprep.mubr.bf16.mxu1 %v2387_v27  ;;  %v2651_v38 = vunpack.c.l.s8.bf16 %v5061_v36  ;;  %v2652_v27 = vunpack.c.h.s8.bf16 %v5061_v36 }
0x17e9   : > { %2470 = vmatmul.mubr.bf16.vlgmr.msra.gmra.mrb[44].mxu0 %v2384_v39  ;;  %2510 = vmatmul.mubr.bf16.vlgmr.msra.gmra.mrb[44].mxu1 %v2386_v40  ;;  %v5062_v39 = vld [vmem:[%s6860_s14 + $0x138] sm:$0xff] }
0x17ea   : > { %5932 = vmatprep.mubr.msk.bf16.mxu0 %vm6528_vm0, %v6527_v2  ;;  %5952 = vmatprep.mubr.msk.bf16.mxu1 %vm6528_vm0, %v6527_v2  ;;  %v2653_v40 = vunpack.c.l.s8.bf16 %v5062_v39 }
0x17eb   : > { %5917 = vmatpush3.bf16.msra.mxu0 %v2562_v37  ;;  %5937 = vmatpush3.bf16.msra.mxu1 %v2647_v26 }
0x17ec   : > { %5918 = vmatprep.subr.bf16.mxu0 %v6527_v2  ;;  %5938 = vmatprep.subr.bf16.mxu1 %v6527_v2 }
0x17ef   : > { %5919 = vmatpush3.bf16.msra.mxu0 %v2563_v57  ;;  %5939 = vmatpush3.bf16.msra.mxu1 %v2648_v22  ;;  %v5068_v22 = vld [vmem:[%s6866_s13 + $0x228] sm:$0xff] }
0x17f0   : > { %5920 = vmatprep.subr.bf16.mxu0 %v6527_v2  ;;  %5940 = vmatprep.subr.bf16.mxu1 %v6527_v2  ;;  %v2754_v36 = vunpack.c.l.s8.bf16 %v5068_v22 }
0x17f3   : > { %5921 = vmatpush3.bf16.msra.mxu0 %v2564_v7  ;;  %5941 = vmatpush3.bf16.msra.mxu1 %v2649_v28 }
0x17f4   : > { %5922 = vmatprep.subr.bf16.mxu0 %v6527_v2  ;;  %5942 = vmatprep.subr.bf16.mxu1 %v6527_v2 }
0x17f7   : > { %5943 = vmatpush3.bf16.msra.mxu1 %v2650_v60 }
0x17f8   : > { %5944 = vmatprep.subr.bf16.mxu1 %v6527_v2 }
0x17fb   : > { %5945 = vmatpush3.bf16.msra.mxu1 %v2651_v38  ;;  %v2756_v38 = vunpack.c.l.s8.bf16 %v5070_v6 }
0x17fc   : > { %5946 = vmatprep.subr.bf16.mxu1 %v6527_v2 }
0x17ff   : > { %5947 = vmatpush3.bf16.msra.mxu1 %v2652_v27 }
0x1800   : > { %5948 = vmatprep.subr.bf16.mxu1 %v6527_v2 }
0x1803   : > { %5949 = vmatpush3.bf16.msra.mxu1 %v2653_v40 }
0x1804   : > { %5950 = vmatprep.subr.bf16.mxu1 %v6527_v2 }
0x18bc   : > { %v5471_v41 = vpop.f32.mrb[44].mxu0  ;;  %v5493_v30 = vpop.f32.mrb[44].mxu1 }
0x18bd   : > { %v5472_v43 = vpop.f32.mrb[45].mxu0  ;;  %v5494_v44 = vpop.f32.mrb[45].mxu1 }
0x18be   : > { %v5473_v45 = vadd.f32 %v5472_v43, %v5471_v41  ;;  %v5495_v46 = vadd.f32 %v5494_v44, %v5493_v30  ;;  %v5474_v48 = vpop.f32.mrb[46].mxu0  ;;  %v5496_v49 = vpop.f32.mrb[46].mxu1  ;;  %v2654_v41 = vunpack.c.h.s8.bf16 %v5062_v39  ;;  %v7407_v30 = vld [vmem:[%s6876_s30 + $0x48] sm:$0xff]  ;;  %v7410_v43 = vld [vmem:[%s6876_s30 + $0x40] sm:$0xff] }
0x18bf   : > { %v5475_v50 = vpop.f32.mrb[47].mxu0  ;;  %v5497_v51 = vpop.f32.mrb[47].mxu1  ;;  %v2614_v44 = vrot.slane %v7407_v30, %v6921_v32  ;;  %v2636_v8 = vrot.slane %v7410_v43, %v6942_v58  ;;  %v2641_v3 = vrot.slane %v7410_v43, %v6945_v59 }
0x18c0   : > { %v2512_v31 = vadd.f32 %v5495_v46, %v5473_v45  ;;  %5951 = vmatpush3.bf16.msra.mxu1 %v2654_v41  ;;  %v2619_v45 = vrot.slane %v7410_v43, %v6927_v34 }
0x18c2   : > { %v2521_v52 = vmul.f32 %v2520_v47, %v2512_v31 }
0x18c3   : > { %5953 = vmatmul.mubr.bf16.vlgmr.msra.gmra.mrb[48].mxu1 %v6915_v29 }
0x18c4   : > { %v2526_v33 = vadd.f32 %v2525_v35, %v2521_v52  ;;  %2850 = vmatprep.mubr.bf16.mxu1 %v6529_v5 }
0x18c6   : > { %v2527_v53 = vadd.f32 %v2526_v33, %v7338_v0  ;;  %v2565_v0 = vunpack.c.h.s8.bf16 %v5056_v4  ;;  %v2698_v4 = vrot.slane %v7407_v30, %v6937_v56 }
0x18c8   : > { %2528 = vadd.xlane.f32.xlu0 %v2527_v53  ;;  %5923 = vmatpush3.bf16.msra.mxu0 %v2565_v0  ;;  %v2703_v0 = vrot.slane %v7410_v43, %v6921_v32 }
0x18c9   : > { %5924 = vmatprep.subr.bf16.mxu0 %v6527_v2 }
0x18cc   : > { %5925 = vmatpush3.bf16.msra.mxu0 %v2566_v9 }
0x18cd   : > { %5926 = vmatprep.subr.bf16.mxu0 %v6527_v2 }
0x18d0   : > { %5927 = vmatpush3.bf16.msra.mxu0 %v2567_v10 }
0x18d1   : > { %5928 = vmatprep.subr.bf16.mxu0 %v6527_v2 }
0x18d4   : > { %5929 = vmatpush3.bf16.msra.mxu0 %v2568_v11 }
0x18d5   : > { %5930 = vmatprep.subr.bf16.mxu0 %v6527_v2 }
0x18d8   : > { %5931 = vmatpush3.bf16.msra.mxu0 %v2569_v12 }
0x1955   : > { %v2529_v25 = vpop.xlane.xlu0 %2528 }
0x1956   : > { %v2530_v61 = vmul.f32 0.0078125, %v2529_v25 }
0x1958   : > { %v2531_v54 = vsub.f32 %v2527_v53, %v2530_v61 }
0x195a   : > { %v2532_v1 = vmul.f32 %v2531_v54, %v2531_v54 }
0x195c   : > { %2533 = vadd.xlane.f32.xlu1 %v2532_v1 }
0x1996   : > { %v2689_v55 = vpop.f32.mrb[48].mxu1 }
0x1997   : > { %v5954_v37 = vpop.f32.mrb[49].mxu1  ;;  %v2699_v7 = vmul.f32 %v2698_v4, %v2689_v55  ;;  %v5073_v55 = vld [vmem:[%s6866_s13 + $0x250] sm:$0xff]  ;;  %v5076_v4 = vld [vmem:[%s6866_s13 + $0x268] sm:$0xff] }
0x1998   : > { %v2692_v57 = vpop.f32.mrb[50].mxu1 }
0x1999   : > { %v5955_v25 = vpop.f32.mrb[51].mxu1  ;;  %v2704_v11 = vadd.f32 %v2703_v0, %v2699_v7  ;;  %v2763_v57 = vunpack.c.l.s8.bf16 %v5073_v55  ;;  %v5078_v7 = vld [vmem:[%s6866_s13 + $0x278] sm:$0xff]  ;;  %v2770_v0 = vunpack.c.l.s8.bf16 %v5076_v4 }
0x19e9   : > { %v2534_v15 = vpop.xlane.xlu1 %2533 }
0x19ea   : > { %v2535_v16 = vmul.f32 0.0078125, %v2534_v15 }
0x19ec   : > { %v2536_v17 = vadd.f32 1e-05, %v2535_v16 }
0x19ee   : > { %6207 = vrsqrt.f32 %v2536_v17  ;;  %v5064_v17 = vld [vmem:[%s6866_s13 + $0x208] sm:$0xff] }
0x19f8   : > { %v6208_v19 = vpop.eup %6207 }
0x19f9   : > { %v2538_v21 = vmul.f32 %v6208_v19, %v2531_v54  ;;  %v5063_v19 = vld [vmem:[%s6866_s13 + $0x200] sm:$0xff] }
0x19fa   : > { %v2749_v28 = vunpack.c.h.s8.bf16 %v5063_v19 }
0x19fb   : > { %v2543_v23 = vmul.f32 %v2542_v18, %v2538_v21  ;;  %v5066_v18 = vld [vmem:[%s6866_s13 + $0x218] sm:$0xff] }
0x19fc   : > { %v2748_v21 = vunpack.c.l.s8.bf16 %v5066_v18  ;;  %v2752_v26 = vunpack.c.h.s8.bf16 %v5066_v18  ;;  %v5083_v18 = vld [vmem:[%s6874_s9 + $0x220] sm:$0xff] }
0x19fd   : > { %v2548_v63 = vadd.f32 %v2547_v20, %v2543_v23  ;;  %v2746_v20 = vunpack.c.l.s8.bf16 %v5064_v17  ;;  %v2745_v23 = vunpack.c.l.s8.bf16 %v5063_v19  ;;  %v5091_v19 = vld [vmem:[%s6874_s9 + $0x260] sm:$0xff] }
0x19fe   : > { %2818 = vmatprep.subr.bf16.mxu1 %v2748_v21  ;;  %v2948_v21 = vunpack.c.l.s8.bf16 %v5091_v19 }
0x19ff   : > { %v2570_v24 = vpack.c.bf16 %v2548_v63, %v2548_v63  ;;  %2777 = vmatprep.subr.bf16.mxu0 %v2746_v20  ;;  %v2932_v20 = vunpack.c.l.s8.bf16 %v5083_v18 }
0x1a01   : > { %5933 = vmatmul.mubr.bf16.vlgmr.msra.gmra.mrb[48].mxu0 %v2570_v24  ;;  %v2750_v24 = vunpack.c.h.s8.bf16 %v5064_v17 }
0x1a02   : > { %2809 = vmatprep.mubr.bf16.mxu0 %v6529_v5  ;;  %2778 = vmatpush1.bf16.msra.mxu0 %v2745_v23 }
0x1a03   : > { %2779 = vmatprep.subr.bf16.mxu0 %v2750_v24 }
0x1a06   : > { %2780 = vmatpush1.bf16.msra.mxu0 %v2749_v28 }
0x1a07   : > { %2781 = vmatprep.subr.bf16.mxu0 %v2754_v36  ;;  %v5087_v36 = vld [vmem:[%s6874_s9 + $0x240] sm:$0xff] }
0x1ad4   : > { %v2605_v46 = vpop.f32.mrb[48].mxu0 }
0x1ad5   : > { %v2615_v47 = vmul.f32 %v2614_v44, %v2605_v46  ;;  %v5934_v48 = vpop.f32.mrb[49].mxu0  ;;  %v5067_v44 = vld [vmem:[%s6866_s13 + $0x220] sm:$0xff] }
0x1ad6   : > { %v2608_v49 = vpop.f32.mrb[50].mxu0  ;;  %v2753_v46 = vunpack.c.l.s8.bf16 %v5067_v44  ;;  %v2758_v48 = vunpack.c.h.s8.bf16 %v5068_v22 }
0x1ad7   : > { %v2620_v50 = vadd.f32 %v2619_v45, %v2615_v47  ;;  %v5935_v51 = vpop.f32.mrb[51].mxu0  ;;  %v5069_v45 = vld [vmem:[%s6866_s13 + $0x230] sm:$0xff]  ;;  %v2760_v49 = vunpack.c.h.s8.bf16 %v5070_v6  ;;  %v2725_v6 = vrot.slane %v7410_v43, %v6981_v14 }
0x1ad8   : > { %v2755_v47 = vunpack.c.l.s8.bf16 %v5069_v45  ;;  %2782 = vmatpush1.bf16.msra.mxu0 %v2753_v46  ;;  %v2759_v51 = vunpack.c.h.s8.bf16 %v5069_v45  ;;  %v2949_v45 = vunpack.c.h.s8.bf16 %v5091_v19  ;;  %v5084_v46 = vld [vmem:[%s6874_s9 + $0x228] sm:$0xff] }
0x1ad9   : > { %v2621_v31 = vadd.f32 %v2620_v50, %v2548_v63  ;;  %v5065_v63 = vld [vmem:[%s6866_s13 + $0x210] sm:$0xff]  ;;  %v2757_v50 = vunpack.c.h.s8.bf16 %v5067_v44  ;;  %2783 = vmatprep.subr.bf16.mxu0 %v2758_v48  ;;  %v2933_v44 = vunpack.c.h.s8.bf16 %v5083_v18  ;;  %v2941_v48 = vunpack.c.h.s8.bf16 %v5087_v36  ;;  %v5090_v18 = vld [vmem:[%s6874_s9 + $0x258] sm:$0xff] }
0x1ada   : > { %v2747_v62 = vunpack.c.l.s8.bf16 %v5065_v63  ;;  %v2751_v60 = vunpack.c.h.s8.bf16 %v5065_v63 }
0x1adb   : > { %2622 = vadd.xlane.f32.xlu0 %v2621_v31 }
0x1adc   : > { %2819 = vmatpush1.bf16.msra.mxu1 %v2747_v62  ;;  %2784 = vmatpush1.bf16.msra.mxu0 %v2757_v50  ;;  %v2720_v62 = vrot.slane %v7410_v43, %v6978_v13 }
0x1add   : > { %2820 = vmatprep.subr.bf16.mxu1 %v2752_v26 }
0x1ae0   : > { %2821 = vmatpush1.bf16.msra.mxu1 %v2751_v60  ;;  %v5079_v60 = vld [vmem:[%s6874_s9 + $0x200] sm:$0xff] }
0x1ae1   : > { %2822 = vmatprep.subr.bf16.mxu1 %v2756_v38 }
0x1ae4   : > { %2823 = vmatpush1.bf16.msra.mxu1 %v2755_v47  ;;  %v5092_v47 = vld [vmem:[%s6874_s9 + $0x268] sm:$0xff] }
0x1ae5   : > { %2824 = vmatprep.subr.bf16.mxu1 %v2760_v49  ;;  %v2934_v49 = vunpack.c.l.s8.bf16 %v5084_v46  ;;  %v2950_v50 = vunpack.c.l.s8.bf16 %v5092_v47 }
0x1ae8   : > { %2825 = vmatpush1.bf16.msra.mxu1 %v2759_v51  ;;  %v5080_v51 = vld [vmem:[%s6874_s9 + $0x208] sm:$0xff] }
0x1b68   : > { %v2623_v35 = vpop.xlane.xlu0 %2622 }
0x1b69   : > { %v2624_v52 = vmul.f32 0.0078125, %v2623_v35  ;;  %v5074_v35 = vld [vmem:[%s6866_s13 + $0x258] sm:$0xff] }
0x1b6b   : > { %v2625_v33 = vsub.f32 %v2621_v31, %v2624_v52  ;;  %v5072_v31 = vld [vmem:[%s6866_s13 + $0x248] sm:$0xff] }
0x1b6c   : > { %v2762_v52 = vunpack.c.l.s8.bf16 %v5072_v31  ;;  %v2766_v25 = vunpack.c.h.s8.bf16 %v5072_v31  ;;  %v5088_v31 = vld [vmem:[%s6874_s9 + $0x248] sm:$0xff] }
0x1b6d   : > { %v2626_v53 = vmul.f32 %v2625_v33, %v2625_v33 }
0x1b6e   : > { %2785 = vmatprep.subr.bf16.mxu0 %v2762_v52  ;;  %v2942_v52 = vunpack.c.l.s8.bf16 %v5088_v31 }
0x1b6f   : > { %2627 = vadd.xlane.f32.xlu1 %v2626_v53  ;;  %v5071_v53 = vld [vmem:[%s6866_s13 + $0x240] sm:$0xff] }
0x1b70   : > { %v2761_v37 = vunpack.c.l.s8.bf16 %v5071_v53 }
0x1b72   : > { %2786 = vmatpush1.bf16.msra.mxu0 %v2761_v37  ;;  %v5093_v37 = vld [vmem:[%s6874_s9 + $0x270] sm:$0xff] }
0x1b73   : > { %2787 = vmatprep.subr.bf16.mxu0 %v2766_v25  ;;  %v2943_v25 = vunpack.c.h.s8.bf16 %v5088_v31 }
0x1bfc   : > { %v2628_v61 = vpop.xlane.xlu1 %2627 }
0x1bfd   : > { %v2629_v54 = vmul.f32 0.0078125, %v2628_v61  ;;  %v2768_v61 = vunpack.c.h.s8.bf16 %v5074_v35 }
0x1bff   : > { %v2630_v1 = vadd.f32 1e-05, %v2629_v54  ;;  %v2765_v54 = vunpack.c.h.s8.bf16 %v5071_v53  ;;  %v2951_v53 = vunpack.c.h.s8.bf16 %v5092_v47 }
0x1c01   : > { %6209 = vrsqrt.f32 %v2630_v1  ;;  %v2767_v1 = vunpack.c.h.s8.bf16 %v5073_v55  ;;  %2788 = vmatpush1.bf16.msra.mxu0 %v2765_v54  ;;  %v5085_v55 = vld [vmem:[%s6874_s9 + $0x230] sm:$0xff]  ;;  %v2952_v54 = vunpack.c.l.s8.bf16 %v5093_v37 }
0x1c02   : > { %2789 = vmatprep.subr.bf16.mxu0 %v2770_v0 }
0x1c0b   : > { %v6210_v9 = vpop.eup %6209 }
0x1c0c   : > { %v2632_v10 = vmul.f32 %v6210_v9, %v2625_v33  ;;  %v2764_v33 = vunpack.c.l.s8.bf16 %v5074_v35  ;;  %v5075_v9 = vld [vmem:[%s6866_s13 + $0x260] sm:$0xff]  ;;  %v2926_v35 = vunpack.c.l.s8.bf16 %v5080_v51 }
0x1c0e   : > { %v2637_v12 = vmul.f32 %v2636_v8, %v2632_v10  ;;  %2826 = vmatprep.subr.bf16.mxu1 %v2764_v33  ;;  %v2772_v8 = vunpack.c.l.s8.bf16 %v5078_v7  ;;  %v5077_v10 = vld [vmem:[%s6866_s13 + $0x270] sm:$0xff]  ;;  %v2935_v33 = vunpack.c.h.s8.bf16 %v5084_v46 }
0x1c0f   : > { %2827 = vmatpush1.bf16.msra.mxu1 %v2763_v57  ;;  %v2775_v17 = vunpack.c.h.s8.bf16 %v5077_v10  ;;  %v2927_v57 = vunpack.c.h.s8.bf16 %v5080_v51 }
0x1c10   : > { %v2642_v15 = vadd.f32 %v2641_v3, %v2637_v12  ;;  %2828 = vmatprep.subr.bf16.mxu1 %v2768_v61  ;;  %v2769_v3 = vunpack.c.l.s8.bf16 %v5075_v9  ;;  %v2774_v12 = vunpack.c.h.s8.bf16 %v5076_v4  ;;  %v2936_v61 = vunpack.c.l.s8.bf16 %v5085_v55  ;;  %v5089_v4 = vld [vmem:[%s6874_s9 + $0x250] sm:$0xff] }
0x1c11   : > { %v2944_v0 = vunpack.c.l.s8.bf16 %v5089_v4 }
0x1c12   : > { %v2705_v16 = vadd.f32 %v2704_v11, %v2642_v15  ;;  %v2771_v11 = vunpack.c.l.s8.bf16 %v5077_v10  ;;  %v2776_v15 = vunpack.c.h.s8.bf16 %v5078_v7  ;;  %2790 = vmatpush1.bf16.msra.mxu0 %v2769_v3  ;;  %v2945_v3 = vunpack.c.h.s8.bf16 %v5089_v4 }
0x1c13   : > { %2829 = vmatpush1.bf16.msra.mxu1 %v2767_v1  ;;  %2791 = vmatprep.subr.bf16.mxu0 %v2774_v12  ;;  %v5081_v1 = vld [vmem:[%s6874_s9 + $0x210] sm:$0xff]  ;;  %v5094_v12 = vld [vmem:[%s6874_s9 + $0x278] sm:$0xff] }
0x1c14   : > { %2706 = vadd.xlane.f32.xlu0 %v2705_v16  ;;  %2830 = vmatprep.subr.bf16.mxu1 %v2772_v8  ;;  %v2928_v7 = vunpack.c.l.s8.bf16 %v5081_v1  ;;  %v2937_v8 = vunpack.c.h.s8.bf16 %v5085_v55  ;;  %v2929_v10 = vunpack.c.h.s8.bf16 %v5081_v1 }
0x1c17   : > { %2831 = vmatpush1.bf16.msra.mxu1 %v2771_v11  ;;  %v5086_v11 = vld [vmem:[%s6874_s9 + $0x238] sm:$0xff] }
0x1c18   : > { %2832 = vmatprep.subr.bf16.mxu1 %v2776_v15  ;;  %v2938_v15 = vunpack.c.l.s8.bf16 %v5086_v11 }
0x1c1b   : > { %2833 = vmatpush1.bf16.msra.mxu1 %v2775_v17  ;;  %v5082_v17 = vld [vmem:[%s6874_s9 + $0x218] sm:$0xff] }
0x1c1c   : > { %5539 = vmatprep.subr.bf16.mxu1 %v2948_v21  ;;  %v2930_v19 = vunpack.c.l.s8.bf16 %v5082_v17  ;;  %v2939_v21 = vunpack.c.h.s8.bf16 %v5086_v11 }
0x1ca1   : > { %v2707_v27 = vpop.xlane.xlu0 %2706 }
0x1ca2   : > { %v2708_v39 = vmul.f32 0.0078125, %v2707_v27  ;;  %v2924_v27 = vunpack.c.l.s8.bf16 %v5079_v60 }
0x1ca4   : > { %v7430_v40 = vsub.f32 %v2705_v16, %v2708_v39  ;;  %v2773_v16 = vunpack.c.h.s8.bf16 %v5075_v9  ;;  %v2940_v39 = vunpack.c.l.s8.bf16 %v5087_v36  ;;  %v2953_v9 = vunpack.c.h.s8.bf16 %v5093_v37 }
0x1ca6   : > { %v2710_v41 = vmul.f32 %v7430_v40, %v7430_v40  ;;  %2792 = vmatpush1.bf16.msra.mxu0 %v2773_v16  ;;  %v2954_v16 = vunpack.c.l.s8.bf16 %v5094_v12 }
0x1ca7   : > { %5517 = vmatprep.subr.bf16.mxu0 %v2932_v20  ;;  %v2946_v20 = vunpack.c.l.s8.bf16 %v5090_v18 }
0x1ca8   : > { %2711 = vadd.xlane.f32.xlu1 %v2710_v41 }
0x1d35   : > { %v2712_v23 = vpop.xlane.xlu1 %2711 }
0x1d36   : > { %v2713_v63 = vmul.f32 0.0078125, %v2712_v23  ;;  %v2955_v23 = vunpack.c.h.s8.bf16 %v5094_v12 }
0x1d38   : > { %v2714_v24 = vadd.f32 1e-05, %v2713_v63  ;;  %v2931_v63 = vunpack.c.h.s8.bf16 %v5082_v17  ;;  %v3039_v17 = vrot.slane %v7407_v30, %v6942_v58 }
0x1d3a   : > { %6211 = vrsqrt.f32 %v2714_v24  ;;  %v2947_v24 = vunpack.c.h.s8.bf16 %v5090_v18 }
0x1d44   : > { %v6212_v26 = vpop.eup %6211 }
0x1d45   : > { %v2716_v22 = vmul.f32 %v6212_v26, %v7430_v40  ;;  %v2925_v40 = vunpack.c.h.s8.bf16 %v5079_v60  ;;  %v5053_v26 = vld [vmem:[%s6868_s29 + $0x90] sm:$0xff] }
0x1d46   : > { %v2870_v60 = vrot.slane %v5053_v26, %v6921_v32 }
0x1d47   : > { %v2721_v28 = vmul.f32 %v2720_v62, %v2716_v22  ;;  %v5051_v62 = vld [vmem:[%s6868_s29 + $0x80] sm:$0xff]  ;;  %v5052_v22 = vld [vmem:[%s6868_s29 + $0x88] sm:$0xff] }
0x1d48   : > { %v2866_v36 = vrot.slane %v5052_v22, %v6921_v32  ;;  %v2886_v46 = vrot.slane %v5052_v22, %v6927_v34  ;;  %v5101_v22 = vld [vmem:[%s6860_s14 + $0x140] sm:$0xff] }
0x1d49   : > { %v7453_v38 = vadd.f32 %v2725_v6, %v2721_v28  ;;  %v5054_v6 = vld [vmem:[%s6868_s29 + $0x98] sm:$0xff]  ;;  %v2862_v28 = vrot.slane %v5051_v62, %v6921_v32 }
0x1d4a   : > { %v2894_v47 = vrot.slane %v5054_v6, %v6927_v34 }
0x1d4b   : > { %v2727_v41 = vpack.c.bf16 %v7453_v38, %v7453_v38 }
0x1d4d   : > { %2810 = vmatmul.mubr.bf16.vlgmr.msra.gmra.mrb[52].mxu0 %v2727_v41  ;;  %2851 = vmatmul.mubr.bf16.vlgmr.msra.gmra.mrb[52].mxu1 %v2727_v41  ;;  %v2890_v41 = vrot.slane %v5053_v26, %v6927_v34 }
0x1d4e   : > { %5518 = vmatpush3.bf16.msra.mxu0 %v2924_v27  ;;  %5540 = vmatpush3.bf16.msra.mxu1 %v2940_v39  ;;  %v2874_v27 = vrot.slane %v5054_v6, %v6921_v32  ;;  %v2882_v39 = vrot.slane %v5051_v62, %v6927_v34  ;;  %v3081_v6 = vunpack.c.l.s8.bf16 %v5101_v22 }
0x1d4f   : > { %5519 = vmatprep.subr.bf16.mxu0 %v2933_v44  ;;  %5541 = vmatprep.subr.bf16.mxu1 %v2949_v45 }
0x1d52   : > { %5520 = vmatpush3.bf16.msra.mxu0 %v2925_v40  ;;  %5542 = vmatpush3.bf16.msra.mxu1 %v2941_v48 }
0x1d53   : > { %5521 = vmatprep.subr.bf16.mxu0 %v2934_v49  ;;  %5543 = vmatprep.subr.bf16.mxu1 %v2950_v50 }
0x1d56   : > { %5522 = vmatpush3.bf16.msra.mxu0 %v2926_v35  ;;  %5544 = vmatpush3.bf16.msra.mxu1 %v2942_v52 }
0x1d57   : > { %5523 = vmatprep.subr.bf16.mxu0 %v2935_v33  ;;  %5545 = vmatprep.subr.bf16.mxu1 %v2951_v53 }
0x1d5a   : > { %5524 = vmatpush3.bf16.msra.mxu0 %v2927_v57  ;;  %5546 = vmatpush3.bf16.msra.mxu1 %v2943_v25 }
0x1d5b   : > { %5525 = vmatprep.subr.bf16.mxu0 %v2936_v61  ;;  %5547 = vmatprep.subr.bf16.mxu1 %v2952_v54 }
0x1d5e   : > { %5526 = vmatpush3.bf16.msra.mxu0 %v2928_v7  ;;  %5548 = vmatpush3.bf16.msra.mxu1 %v2944_v0 }
0x1d5f   : > { %5527 = vmatprep.subr.bf16.mxu0 %v2937_v8  ;;  %5549 = vmatprep.subr.bf16.mxu1 %v2953_v9 }
0x1d62   : > { %5528 = vmatpush3.bf16.msra.mxu0 %v2929_v10  ;;  %5550 = vmatpush3.bf16.msra.mxu1 %v2945_v3 }
0x1d63   : > { %5529 = vmatprep.subr.bf16.mxu0 %v2938_v15  ;;  %5551 = vmatprep.subr.bf16.mxu1 %v2954_v16 }
0x1d66   : > { %5530 = vmatpush3.bf16.msra.mxu0 %v2930_v19  ;;  %5552 = vmatpush3.bf16.msra.mxu1 %v2946_v20 }
0x1d67   : > { %5531 = vmatprep.subr.bf16.mxu0 %v2939_v21  ;;  %5553 = vmatprep.subr.bf16.mxu1 %v2955_v23 }
0x1d6a   : > { %5532 = vmatpush3.bf16.msra.mxu0 %v2931_v63  ;;  %5554 = vmatpush3.bf16.msra.mxu1 %v2947_v24  ;;  %v3044_v63 = vrot.slane %v7410_v43, %v6937_v56 }
0x1d6b   : > { %5956 = vmatprep.subr.bf16.mxu0 %v6527_v2  ;;  %5976 = vmatprep.subr.bf16.mxu1 %v6527_v2 }
0x1e20   : > { %v2811_v44 = vpop.f32.mrb[52].mxu0  ;;  %v2852_v45 = vpop.f32.mrb[52].mxu1 }
0x1e21   : > { %v2875_v40 = vmul.f32 %v2862_v28, %v2811_v44  ;;  %v2877_v48 = vmul.f32 %v2870_v60, %v2852_v45  ;;  %v2813_v49 = vpop.f32.mrb[53].mxu0  ;;  %v2854_v50 = vpop.f32.mrb[53].mxu1  ;;  %v3082_v28 = vunpack.c.h.s8.bf16 %v5101_v22  ;;  %v5103_v45 = vld [vmem:[%s6860_s14 + $0x160] sm:$0xff] }
0x1e22   : > { %v2876_v51 = vmul.f32 %v2866_v36, %v2813_v49  ;;  %v2878_v31 = vmul.f32 %v2874_v27, %v2854_v50  ;;  %v2815_v35 = vpop.f32.mrb[54].mxu0  ;;  %v2856_v52 = vpop.f32.mrb[54].mxu1 }
0x1e23   : > { %v2895_v33 = vadd.f32 %v2882_v39, %v2875_v40  ;;  %v2897_v53 = vadd.f32 %v2890_v41, %v2877_v48  ;;  %v2816_v55 = vpop.f32.mrb[55].mxu0  ;;  %v2857_v37 = vpop.f32.mrb[55].mxu1  ;;  %v5102_v41 = vld [vmem:[%s6860_s14 + $0x150] sm:$0xff]  ;;  %v3061_v35 = vrot.slane %v7410_v43, %v7041_v42  ;;  %v5106_v43 = vld [vmem:[%s6860_s14 + $0x158] sm:$0xff] }
0x1e24   : > { %v2896_v57 = vadd.f32 %v2886_v46, %v2876_v51  ;;  %v2898_v25 = vadd.f32 %v2894_v47, %v2878_v31  ;;  %v3083_v44 = vunpack.c.l.s8.bf16 %v5102_v41  ;;  %v3085_v46 = vunpack.c.l.s8.bf16 %v5103_v45  ;;  %v5104_v40 = vld [vmem:[%s6860_s14 + $0x170] sm:$0xff] }
0x1e25   : > { %v2899_v61 = vmax.f32 %v2895_v33, 0.0  ;;  %v2901_v54 = vmax.f32 %v2897_v53, 0.0  ;;  %v3086_v47 = vunpack.c.h.s8.bf16 %v5103_v45  ;;  %v3087_v48 = vunpack.c.l.s8.bf16 %v5104_v40 }
0x1e26   : > { %v2900_v1 = vmax.f32 %v2896_v57, 0.0  ;;  %v2902_v4 = vmax.f32 %v2898_v25, 0.0  ;;  %v3088_v49 = vunpack.c.h.s8.bf16 %v5104_v40  ;;  %v3066_v33 = vrot.slane %v7407_v30, %v6927_v34  ;;  %v5105_v25 = vld [vmem:[%s6860_s14 + $0x148] sm:$0xff] }
0x1e27   : > { %v2903_v8 = vpack.c.bf16 %v2899_v61, %v2899_v61  ;;  %v2905_v9 = vpack.c.bf16 %v2901_v54, %v2901_v54  ;;  %v3166_v61 = vunpack.c.l.s8.bf16 %v5105_v25  ;;  %v3167_v54 = vunpack.c.h.s8.bf16 %v5105_v25 }
0x1e28   : > { %v2904_v7 = vpack.c.bf16 %v2900_v1, %v2900_v1  ;;  %v2906_v0 = vpack.c.bf16 %v2902_v4, %v2902_v4  ;;  %v3168_v1 = vunpack.c.l.s8.bf16 %v5106_v43  ;;  %v3169_v30 = vunpack.c.h.s8.bf16 %v5106_v43  ;;  %v5107_v4 = vld [vmem:[%s6860_s14 + $0x168] sm:$0xff]  ;;  %v5116_v43 = vld [vmem:[%s6866_s13 + $0x2b8] sm:$0xff] }
0x1e2a   : > { %2988 = vmatprep.mubr.bf16.mxu0 %v2904_v7  ;;  %3028 = vmatprep.mubr.bf16.mxu1 %v2906_v0  ;;  %v3170_v7 = vunpack.c.l.s8.bf16 %v5107_v4  ;;  %v3171_v0 = vunpack.c.h.s8.bf16 %v5107_v4 }
0x1e2b   : > { %2989 = vmatmul.mubr.bf16.vlgmr.msra.gmra.mrb[56].mxu0 %v2903_v8  ;;  %3029 = vmatmul.mubr.bf16.vlgmr.msra.gmra.mrb[56].mxu1 %v2905_v9  ;;  %v5108_v8 = vld [vmem:[%s6860_s14 + $0x178] sm:$0xff] }
0x1e2c   : > { %5972 = vmatprep.mubr.msk.bf16.mxu0 %vm6528_vm0, %v6527_v2  ;;  %5992 = vmatprep.mubr.msk.bf16.mxu1 %vm6528_vm0, %v6527_v2  ;;  %v3172_v9 = vunpack.c.l.s8.bf16 %v5108_v8 }
0x1e2d   : > { %5957 = vmatpush3.bf16.msra.mxu0 %v3081_v6  ;;  %5977 = vmatpush3.bf16.msra.mxu1 %v3166_v61 }
0x1e2e   : > { %5958 = vmatprep.subr.bf16.mxu0 %v6527_v2  ;;  %5978 = vmatprep.subr.bf16.mxu1 %v6527_v2 }
0x1e31   : > { %5959 = vmatpush3.bf16.msra.mxu0 %v3082_v28  ;;  %5979 = vmatpush3.bf16.msra.mxu1 %v3167_v54  ;;  %v5114_v54 = vld [vmem:[%s6866_s13 + $0x2a8] sm:$0xff] }
0x1e32   : > { %5960 = vmatprep.subr.bf16.mxu0 %v6527_v2  ;;  %5980 = vmatprep.subr.bf16.mxu1 %v6527_v2  ;;  %v3273_v4 = vunpack.c.l.s8.bf16 %v5114_v54 }
0x1e35   : > { %5961 = vmatpush3.bf16.msra.mxu0 %v3083_v44  ;;  %5981 = vmatpush3.bf16.msra.mxu1 %v3168_v1 }
0x1e36   : > { %5962 = vmatprep.subr.bf16.mxu0 %v6527_v2  ;;  %5982 = vmatprep.subr.bf16.mxu1 %v6527_v2 }
0x1e39   : > { %5983 = vmatpush3.bf16.msra.mxu1 %v3169_v30 }
0x1e3a   : > { %5984 = vmatprep.subr.bf16.mxu1 %v6527_v2 }
0x1e3d   : > { %5985 = vmatpush3.bf16.msra.mxu1 %v3170_v7  ;;  %v3275_v7 = vunpack.c.l.s8.bf16 %v5116_v43 }
0x1e3e   : > { %5986 = vmatprep.subr.bf16.mxu1 %v6527_v2 }
0x1e41   : > { %5987 = vmatpush3.bf16.msra.mxu1 %v3171_v0 }
0x1e42   : > { %5988 = vmatprep.subr.bf16.mxu1 %v6527_v2 }
0x1e45   : > { %5989 = vmatpush3.bf16.msra.mxu1 %v3172_v9 }
0x1e46   : > { %5990 = vmatprep.subr.bf16.mxu1 %v6527_v2 }
0x1efe   : > { %v5533_v10 = vpop.f32.mrb[56].mxu0  ;;  %v5555_v3 = vpop.f32.mrb[56].mxu1 }
0x1eff   : > { %v5534_v11 = vpop.f32.mrb[57].mxu0  ;;  %v5556_v12 = vpop.f32.mrb[57].mxu1 }
0x1f00   : > { %v5535_v15 = vadd.f32 %v5534_v11, %v5533_v10  ;;  %v5557_v16 = vadd.f32 %v5556_v12, %v5555_v3  ;;  %v5536_v18 = vpop.f32.mrb[58].mxu0  ;;  %v5558_v19 = vpop.f32.mrb[58].mxu1  ;;  %v3173_v10 = vunpack.c.h.s8.bf16 %v5108_v8  ;;  %v7522_v3 = vld [vmem:[%s6876_s30 + $0x58] sm:$0xff]  ;;  %v7525_v11 = vld [vmem:[%s6876_s30 + $0x50] sm:$0xff] }
0x1f01   : > { %v5537_v20 = vpop.f32.mrb[59].mxu0  ;;  %v5559_v21 = vpop.f32.mrb[59].mxu1  ;;  %v3133_v12 = vrot.slane %v7522_v3, %v6921_v32  ;;  %v3155_v45 = vrot.slane %v7525_v11, %v6942_v58  ;;  %v3160_v40 = vrot.slane %v7525_v11, %v6945_v59 }
0x1f02   : > { %v3031_v23 = vadd.f32 %v5557_v16, %v5535_v15  ;;  %5991 = vmatpush3.bf16.msra.mxu1 %v3173_v10  ;;  %v3138_v15 = vrot.slane %v7525_v11, %v6927_v34 }
0x1f04   : > { %v3040_v24 = vmul.f32 %v3039_v17, %v3031_v23 }
0x1f05   : > { %5993 = vmatmul.mubr.bf16.vlgmr.msra.gmra.mrb[60].mxu1 %v6915_v29 }
0x1f06   : > { %v3045_v62 = vadd.f32 %v3044_v63, %v3040_v24  ;;  %3369 = vmatprep.mubr.bf16.mxu1 %v6529_v5 }
0x1f08   : > { %v3046_v26 = vadd.f32 %v3045_v62, %v7453_v38  ;;  %v3084_v38 = vunpack.c.h.s8.bf16 %v5102_v41  ;;  %v3217_v41 = vrot.slane %v7522_v3, %v6937_v56 }
0x1f0a   : > { %3047 = vadd.xlane.f32.xlu0 %v3046_v26  ;;  %5963 = vmatpush3.bf16.msra.mxu0 %v3084_v38  ;;  %v3222_v38 = vrot.slane %v7525_v11, %v6921_v32 }
0x1f0b   : > { %5964 = vmatprep.subr.bf16.mxu0 %v6527_v2 }
0x1f0e   : > { %5965 = vmatpush3.bf16.msra.mxu0 %v3085_v46 }
0x1f0f   : > { %5966 = vmatprep.subr.bf16.mxu0 %v6527_v2 }
0x1f12   : > { %5967 = vmatpush3.bf16.msra.mxu0 %v3086_v47 }
0x1f13   : > { %5968 = vmatprep.subr.bf16.mxu0 %v6527_v2 }
0x1f16   : > { %5969 = vmatpush3.bf16.msra.mxu0 %v3087_v48 }
0x1f17   : > { %5970 = vmatprep.subr.bf16.mxu0 %v6527_v2 }
0x1f1a   : > { %5971 = vmatpush3.bf16.msra.mxu0 %v3088_v49 }
0x1f97   : > { %v3048_v60 = vpop.xlane.xlu0 %3047 }
0x1f98   : > { %v3049_v36 = vmul.f32 0.0078125, %v3048_v60 }
0x1f9a   : > { %v3050_v27 = vsub.f32 %v3046_v26, %v3049_v36 }
0x1f9c   : > { %v3051_v39 = vmul.f32 %v3050_v27, %v3050_v27 }
0x1f9e   : > { %3052 = vadd.xlane.f32.xlu1 %v3051_v39 }
0x1fd8   : > { %v3208_v22 = vpop.f32.mrb[60].mxu1 }
0x1fd9   : > { %v5994_v6 = vpop.f32.mrb[61].mxu1  ;;  %v3218_v44 = vmul.f32 %v3217_v41, %v3208_v22  ;;  %v5119_v22 = vld [vmem:[%s6866_s13 + $0x2d0] sm:$0xff]  ;;  %v5122_v41 = vld [vmem:[%s6866_s13 + $0x2e8] sm:$0xff] }
0x1fda   : > { %v3211_v28 = vpop.f32.mrb[62].mxu1 }
0x1fdb   : > { %v5995_v60 = vpop.f32.mrb[63].mxu1  ;;  %v3223_v48 = vadd.f32 %v3222_v38, %v3218_v44  ;;  %v3282_v28 = vunpack.c.l.s8.bf16 %v5119_v22  ;;  %v5124_v44 = vld [vmem:[%s6866_s13 + $0x2f8] sm:$0xff]  ;;  %v3289_v38 = vunpack.c.l.s8.bf16 %v5122_v41 }
0x202b   : > { %v3053_v50 = vpop.xlane.xlu1 %3052 }
0x202c   : > { %v3054_v51 = vmul.f32 0.0078125, %v3053_v50 }
0x202e   : > { %v3055_v31 = vadd.f32 1e-05, %v3054_v51 }
0x2030   : > { %6213 = vrsqrt.f32 %v3055_v31  ;;  %v5110_v31 = vld [vmem:[%s6866_s13 + $0x288] sm:$0xff] }
0x203a   : > { %v6214_v52 = vpop.eup %6213 }
0x203b   : > { %v3057_v53 = vmul.f32 %v6214_v52, %v3050_v27  ;;  %v5109_v52 = vld [vmem:[%s6866_s13 + $0x280] sm:$0xff] }
0x203c   : > { %v3268_v1 = vunpack.c.h.s8.bf16 %v5109_v52 }
0x203d   : > { %v3062_v55 = vmul.f32 %v3061_v35, %v3057_v53  ;;  %v5112_v35 = vld [vmem:[%s6866_s13 + $0x298] sm:$0xff] }
0x203e   : > { %v3267_v53 = vunpack.c.l.s8.bf16 %v5112_v35  ;;  %v3271_v61 = vunpack.c.h.s8.bf16 %v5112_v35  ;;  %v5129_v35 = vld [vmem:[%s6874_s9 + $0x2a0] sm:$0xff] }
0x203f   : > { %v3067_v37 = vadd.f32 %v3066_v33, %v3062_v55  ;;  %v3265_v33 = vunpack.c.l.s8.bf16 %v5110_v31  ;;  %v3264_v55 = vunpack.c.l.s8.bf16 %v5109_v52  ;;  %v5137_v52 = vld [vmem:[%s6874_s9 + $0x2e0] sm:$0xff] }
0x2040   : > { %3337 = vmatprep.subr.bf16.mxu1 %v3267_v53  ;;  %v3467_v53 = vunpack.c.l.s8.bf16 %v5137_v52 }
0x2041   : > { %v3089_v57 = vpack.c.bf16 %v3067_v37, %v3067_v37  ;;  %3296 = vmatprep.subr.bf16.mxu0 %v3265_v33  ;;  %v3451_v33 = vunpack.c.l.s8.bf16 %v5129_v35 }
0x2043   : > { %5973 = vmatmul.mubr.bf16.vlgmr.msra.gmra.mrb[60].mxu0 %v3089_v57  ;;  %v3269_v57 = vunpack.c.h.s8.bf16 %v5110_v31 }
0x2044   : > { %3328 = vmatprep.mubr.bf16.mxu0 %v6529_v5  ;;  %3297 = vmatpush1.bf16.msra.mxu0 %v3264_v55 }
0x2045   : > { %3298 = vmatprep.subr.bf16.mxu0 %v3269_v57 }
0x2048   : > { %3299 = vmatpush1.bf16.msra.mxu0 %v3268_v1 }
0x2049   : > { %3300 = vmatprep.subr.bf16.mxu0 %v3273_v4  ;;  %v5133_v4 = vld [vmem:[%s6874_s9 + $0x2c0] sm:$0xff] }
0x2116   : > { %v3124_v16 = vpop.f32.mrb[60].mxu0 }
0x2117   : > { %v3134_v17 = vmul.f32 %v3133_v12, %v3124_v16  ;;  %v5974_v18 = vpop.f32.mrb[61].mxu0  ;;  %v5113_v12 = vld [vmem:[%s6866_s13 + $0x2a0] sm:$0xff] }
0x2118   : > { %v3127_v19 = vpop.f32.mrb[62].mxu0  ;;  %v3272_v16 = vunpack.c.l.s8.bf16 %v5113_v12  ;;  %v3277_v18 = vunpack.c.h.s8.bf16 %v5114_v54 }
0x2119   : > { %v3139_v20 = vadd.f32 %v3138_v15, %v3134_v17  ;;  %v5975_v21 = vpop.f32.mrb[63].mxu0  ;;  %v5115_v15 = vld [vmem:[%s6866_s13 + $0x2b0] sm:$0xff]  ;;  %v3279_v19 = vunpack.c.h.s8.bf16 %v5116_v43  ;;  %v3244_v43 = vrot.slane %v7525_v11, %v6981_v14 }
0x211a   : > { %v3274_v17 = vunpack.c.l.s8.bf16 %v5115_v15  ;;  %3301 = vmatpush1.bf16.msra.mxu0 %v3272_v16  ;;  %v3278_v21 = vunpack.c.h.s8.bf16 %v5115_v15  ;;  %v3468_v15 = vunpack.c.h.s8.bf16 %v5137_v52  ;;  %v5130_v16 = vld [vmem:[%s6874_s9 + $0x2a8] sm:$0xff] }
0x211b   : > { %v3140_v23 = vadd.f32 %v3139_v20, %v3067_v37  ;;  %v5111_v37 = vld [vmem:[%s6866_s13 + $0x290] sm:$0xff]  ;;  %v3276_v20 = vunpack.c.h.s8.bf16 %v5113_v12  ;;  %3302 = vmatprep.subr.bf16.mxu0 %v3277_v18  ;;  %v3452_v12 = vunpack.c.h.s8.bf16 %v5129_v35  ;;  %v3460_v18 = vunpack.c.h.s8.bf16 %v5133_v4  ;;  %v5136_v35 = vld [vmem:[%s6874_s9 + $0x2d8] sm:$0xff] }
0x211c   : > { %v3266_v25 = vunpack.c.l.s8.bf16 %v5111_v37  ;;  %v3270_v30 = vunpack.c.h.s8.bf16 %v5111_v37 }
0x211d   : > { %3141 = vadd.xlane.f32.xlu0 %v3140_v23 }
0x211e   : > { %3338 = vmatpush1.bf16.msra.mxu1 %v3266_v25  ;;  %3303 = vmatpush1.bf16.msra.mxu0 %v3276_v20  ;;  %v3239_v25 = vrot.slane %v7525_v11, %v6978_v13 }
0x211f   : > { %3339 = vmatprep.subr.bf16.mxu1 %v3271_v61 }
0x2122   : > { %3340 = vmatpush1.bf16.msra.mxu1 %v3270_v30  ;;  %v5125_v30 = vld [vmem:[%s6874_s9 + $0x280] sm:$0xff] }
0x2123   : > { %3341 = vmatprep.subr.bf16.mxu1 %v3275_v7 }
0x2126   : > { %3342 = vmatpush1.bf16.msra.mxu1 %v3274_v17  ;;  %v5138_v17 = vld [vmem:[%s6874_s9 + $0x2e8] sm:$0xff] }
0x2127   : > { %3343 = vmatprep.subr.bf16.mxu1 %v3279_v19  ;;  %v3453_v19 = vunpack.c.l.s8.bf16 %v5130_v16  ;;  %v3469_v20 = vunpack.c.l.s8.bf16 %v5138_v17 }
0x212a   : > { %3344 = vmatpush1.bf16.msra.mxu1 %v3278_v21  ;;  %v5126_v21 = vld [vmem:[%s6874_s9 + $0x288] sm:$0xff] }
0x21aa   : > { %v3142_v63 = vpop.xlane.xlu0 %3141 }
0x21ab   : > { %v3143_v24 = vmul.f32 0.0078125, %v3142_v63  ;;  %v5120_v63 = vld [vmem:[%s6866_s13 + $0x2d8] sm:$0xff] }
0x21ad   : > { %v3144_v62 = vsub.f32 %v3140_v23, %v3143_v24  ;;  %v5118_v23 = vld [vmem:[%s6866_s13 + $0x2c8] sm:$0xff] }
0x21ae   : > { %v3281_v24 = vunpack.c.l.s8.bf16 %v5118_v23  ;;  %v3285_v60 = vunpack.c.h.s8.bf16 %v5118_v23  ;;  %v5134_v23 = vld [vmem:[%s6874_s9 + $0x2c8] sm:$0xff] }
0x21af   : > { %v3145_v26 = vmul.f32 %v3144_v62, %v3144_v62 }
0x21b0   : > { %3304 = vmatprep.subr.bf16.mxu0 %v3281_v24  ;;  %v3461_v24 = vunpack.c.l.s8.bf16 %v5134_v23 }
0x21b1   : > { %3146 = vadd.xlane.f32.xlu1 %v3145_v26  ;;  %v5117_v26 = vld [vmem:[%s6866_s13 + $0x2c0] sm:$0xff] }
0x21b2   : > { %v3280_v6 = vunpack.c.l.s8.bf16 %v5117_v26 }
0x21b4   : > { %3305 = vmatpush1.bf16.msra.mxu0 %v3280_v6  ;;  %v5139_v6 = vld [vmem:[%s6874_s9 + $0x2f0] sm:$0xff] }
0x21b5   : > { %3306 = vmatprep.subr.bf16.mxu0 %v3285_v60  ;;  %v3462_v60 = vunpack.c.h.s8.bf16 %v5134_v23 }
0x223e   : > { %v3147_v36 = vpop.xlane.xlu1 %3146 }
0x223f   : > { %v3148_v27 = vmul.f32 0.0078125, %v3147_v36  ;;  %v3287_v36 = vunpack.c.h.s8.bf16 %v5120_v63 }
0x2241   : > { %v3149_v39 = vadd.f32 1e-05, %v3148_v27  ;;  %v3284_v27 = vunpack.c.h.s8.bf16 %v5117_v26  ;;  %v3470_v26 = vunpack.c.h.s8.bf16 %v5138_v17 }
0x2243   : > { %6215 = vrsqrt.f32 %v3149_v39  ;;  %v3286_v39 = vunpack.c.h.s8.bf16 %v5119_v22  ;;  %3307 = vmatpush1.bf16.msra.mxu0 %v3284_v27  ;;  %v5131_v22 = vld [vmem:[%s6874_s9 + $0x2b0] sm:$0xff]  ;;  %v3471_v27 = vunpack.c.l.s8.bf16 %v5139_v6 }
0x2244   : > { %3308 = vmatprep.subr.bf16.mxu0 %v3289_v38 }
0x224d   : > { %v6216_v46 = vpop.eup %6215 }
0x224e   : > { %v3151_v47 = vmul.f32 %v6216_v46, %v3144_v62  ;;  %v3283_v62 = vunpack.c.l.s8.bf16 %v5120_v63  ;;  %v5121_v46 = vld [vmem:[%s6866_s13 + $0x2e0] sm:$0xff]  ;;  %v3445_v63 = vunpack.c.l.s8.bf16 %v5126_v21 }
0x2250   : > { %v3156_v49 = vmul.f32 %v3155_v45, %v3151_v47  ;;  %3345 = vmatprep.subr.bf16.mxu1 %v3283_v62  ;;  %v3291_v45 = vunpack.c.l.s8.bf16 %v5124_v44  ;;  %v5123_v47 = vld [vmem:[%s6866_s13 + $0x2f0] sm:$0xff]  ;;  %v3454_v62 = vunpack.c.h.s8.bf16 %v5130_v16 }
0x2251   : > { %3346 = vmatpush1.bf16.msra.mxu1 %v3282_v28  ;;  %v3294_v31 = vunpack.c.h.s8.bf16 %v5123_v47  ;;  %v3446_v28 = vunpack.c.h.s8.bf16 %v5126_v21 }
0x2252   : > { %v3161_v50 = vadd.f32 %v3160_v40, %v3156_v49  ;;  %3347 = vmatprep.subr.bf16.mxu1 %v3287_v36  ;;  %v3288_v40 = vunpack.c.l.s8.bf16 %v5121_v46  ;;  %v3293_v49 = vunpack.c.h.s8.bf16 %v5122_v41  ;;  %v3455_v36 = vunpack.c.l.s8.bf16 %v5131_v22  ;;  %v5135_v41 = vld [vmem:[%s6874_s9 + $0x2d0] sm:$0xff] }
0x2253   : > { %v3463_v38 = vunpack.c.l.s8.bf16 %v5135_v41 }
0x2254   : > { %v3224_v51 = vadd.f32 %v3223_v48, %v3161_v50  ;;  %v3290_v48 = vunpack.c.l.s8.bf16 %v5123_v47  ;;  %v3295_v50 = vunpack.c.h.s8.bf16 %v5124_v44  ;;  %3309 = vmatpush1.bf16.msra.mxu0 %v3288_v40  ;;  %v3464_v40 = vunpack.c.h.s8.bf16 %v5135_v41 }
0x2255   : > { %3348 = vmatpush1.bf16.msra.mxu1 %v3286_v39  ;;  %3310 = vmatprep.subr.bf16.mxu0 %v3293_v49  ;;  %v5127_v39 = vld [vmem:[%s6874_s9 + $0x290] sm:$0xff]  ;;  %v5140_v49 = vld [vmem:[%s6874_s9 + $0x2f8] sm:$0xff] }
0x2256   : > { %3225 = vadd.xlane.f32.xlu0 %v3224_v51  ;;  %3349 = vmatprep.subr.bf16.mxu1 %v3291_v45  ;;  %v3447_v44 = vunpack.c.l.s8.bf16 %v5127_v39  ;;  %v3456_v45 = vunpack.c.h.s8.bf16 %v5131_v22  ;;  %v3448_v47 = vunpack.c.h.s8.bf16 %v5127_v39 }
0x2259   : > { %3350 = vmatpush1.bf16.msra.mxu1 %v3290_v48  ;;  %v5132_v48 = vld [vmem:[%s6874_s9 + $0x2b8] sm:$0xff] }
0x225a   : > { %3351 = vmatprep.subr.bf16.mxu1 %v3295_v50  ;;  %v3457_v50 = vunpack.c.l.s8.bf16 %v5132_v48 }
0x225d   : > { %3352 = vmatpush1.bf16.msra.mxu1 %v3294_v31  ;;  %v5128_v31 = vld [vmem:[%s6874_s9 + $0x298] sm:$0xff] }
0x225e   : > { %5601 = vmatprep.subr.bf16.mxu1 %v3467_v53  ;;  %v3449_v52 = vunpack.c.l.s8.bf16 %v5128_v31  ;;  %v3458_v53 = vunpack.c.h.s8.bf16 %v5132_v48 }
0x22e3   : > { %v3226_v0 = vpop.xlane.xlu0 %3225 }
0x22e4   : > { %v3227_v8 = vmul.f32 0.0078125, %v3226_v0  ;;  %v3443_v0 = vunpack.c.l.s8.bf16 %v5125_v30 }
0x22e6   : > { %v7545_v9 = vsub.f32 %v3224_v51, %v3227_v8  ;;  %v3292_v51 = vunpack.c.h.s8.bf16 %v5121_v46  ;;  %v3459_v8 = vunpack.c.l.s8.bf16 %v5133_v4  ;;  %v3472_v46 = vunpack.c.h.s8.bf16 %v5139_v6 }
0x22e8   : > { %v3229_v10 = vmul.f32 %v7545_v9, %v7545_v9  ;;  %3311 = vmatpush1.bf16.msra.mxu0 %v3292_v51  ;;  %v3473_v51 = vunpack.c.l.s8.bf16 %v5140_v49 }
0x22e9   : > { %5579 = vmatprep.subr.bf16.mxu0 %v3451_v33  ;;  %v3465_v33 = vunpack.c.l.s8.bf16 %v5136_v35 }
0x22ea   : > { %3230 = vadd.xlane.f32.xlu1 %v3229_v10 }
0x2377   : > { %v3231_v55 = vpop.xlane.xlu1 %3230 }
0x2378   : > { %v3232_v37 = vmul.f32 0.0078125, %v3231_v55  ;;  %v3474_v55 = vunpack.c.h.s8.bf16 %v5140_v49 }
0x237a   : > { %v3233_v57 = vadd.f32 1e-05, %v3232_v37  ;;  %v3450_v37 = vunpack.c.h.s8.bf16 %v5128_v31  ;;  %v3558_v31 = vrot.slane %v7522_v3, %v6942_v58 }
0x237c   : > { %6217 = vrsqrt.f32 %v3233_v57  ;;  %v3466_v57 = vunpack.c.h.s8.bf16 %v5136_v35 }
0x2386   : > { %v6218_v61 = vpop.eup %6217 }
0x2387   : > { %v3235_v54 = vmul.f32 %v6218_v61, %v7545_v9  ;;  %v3444_v9 = vunpack.c.h.s8.bf16 %v5125_v30  ;;  %v5099_v61 = vld [vmem:[%s6868_s29 + $0xb0] sm:$0xff] }
0x2388   : > { %v3389_v30 = vrot.slane %v5099_v61, %v6921_v32 }
0x2389   : > { %v3240_v1 = vmul.f32 %v3239_v25, %v3235_v54  ;;  %v5097_v25 = vld [vmem:[%s6868_s29 + $0xa0] sm:$0xff]  ;;  %v5098_v54 = vld [vmem:[%s6868_s29 + $0xa8] sm:$0xff] }
0x238a   : > { %v3385_v4 = vrot.slane %v5098_v54, %v6921_v32  ;;  %v3405_v16 = vrot.slane %v5098_v54, %v6927_v34  ;;  %v5147_v54 = vld [vmem:[%s6860_s14 + $0x180] sm:$0xff] }
0x238b   : > { %v7568_v7 = vadd.f32 %v3244_v43, %v3240_v1  ;;  %v5100_v43 = vld [vmem:[%s6868_s29 + $0xb8] sm:$0xff]  ;;  %v3381_v1 = vrot.slane %v5097_v25, %v6921_v32 }
0x238c   : > { %v3413_v17 = vrot.slane %v5100_v43, %v6927_v34 }
0x238d   : > { %v3246_v10 = vpack.c.bf16 %v7568_v7, %v7568_v7 }
0x238f   : > { %3329 = vmatmul.mubr.bf16.vlgmr.msra.gmra.mrb[64].mxu0 %v3246_v10  ;;  %3370 = vmatmul.mubr.bf16.vlgmr.msra.gmra.mrb[64].mxu1 %v3246_v10  ;;  %v3409_v10 = vrot.slane %v5099_v61, %v6927_v34 }
0x2390   : > { %5580 = vmatpush3.bf16.msra.mxu0 %v3443_v0  ;;  %5602 = vmatpush3.bf16.msra.mxu1 %v3459_v8  ;;  %v3393_v0 = vrot.slane %v5100_v43, %v6921_v32  ;;  %v3401_v8 = vrot.slane %v5097_v25, %v6927_v34  ;;  %v3600_v43 = vunpack.c.l.s8.bf16 %v5147_v54 }
0x2391   : > { %5581 = vmatprep.subr.bf16.mxu0 %v3452_v12  ;;  %5603 = vmatprep.subr.bf16.mxu1 %v3468_v15 }
0x2394   : > { %5582 = vmatpush3.bf16.msra.mxu0 %v3444_v9  ;;  %5604 = vmatpush3.bf16.msra.mxu1 %v3460_v18 }
0x2395   : > { %5583 = vmatprep.subr.bf16.mxu0 %v3453_v19  ;;  %5605 = vmatprep.subr.bf16.mxu1 %v3469_v20 }
0x2398   : > { %5584 = vmatpush3.bf16.msra.mxu0 %v3445_v63  ;;  %5606 = vmatpush3.bf16.msra.mxu1 %v3461_v24 }
0x2399   : > { %5585 = vmatprep.subr.bf16.mxu0 %v3454_v62  ;;  %5607 = vmatprep.subr.bf16.mxu1 %v3470_v26 }
0x239c   : > { %5586 = vmatpush3.bf16.msra.mxu0 %v3446_v28  ;;  %5608 = vmatpush3.bf16.msra.mxu1 %v3462_v60 }
0x239d   : > { %5587 = vmatprep.subr.bf16.mxu0 %v3455_v36  ;;  %5609 = vmatprep.subr.bf16.mxu1 %v3471_v27 }
0x23a0   : > { %5588 = vmatpush3.bf16.msra.mxu0 %v3447_v44  ;;  %5610 = vmatpush3.bf16.msra.mxu1 %v3463_v38 }
0x23a1   : > { %5589 = vmatprep.subr.bf16.mxu0 %v3456_v45  ;;  %5611 = vmatprep.subr.bf16.mxu1 %v3472_v46 }
0x23a4   : > { %5590 = vmatpush3.bf16.msra.mxu0 %v3448_v47  ;;  %5612 = vmatpush3.bf16.msra.mxu1 %v3464_v40 }
0x23a5   : > { %5591 = vmatprep.subr.bf16.mxu0 %v3457_v50  ;;  %5613 = vmatprep.subr.bf16.mxu1 %v3473_v51 }
0x23a8   : > { %5592 = vmatpush3.bf16.msra.mxu0 %v3449_v52  ;;  %5614 = vmatpush3.bf16.msra.mxu1 %v3465_v33 }
0x23a9   : > { %5593 = vmatprep.subr.bf16.mxu0 %v3458_v53  ;;  %5615 = vmatprep.subr.bf16.mxu1 %v3474_v55 }
0x23ac   : > { %5594 = vmatpush3.bf16.msra.mxu0 %v3450_v37  ;;  %5616 = vmatpush3.bf16.msra.mxu1 %v3466_v57  ;;  %v3563_v37 = vrot.slane %v7525_v11, %v6937_v56 }
0x23ad   : > { %5996 = vmatprep.subr.bf16.mxu0 %v6527_v2  ;;  %6016 = vmatprep.subr.bf16.mxu1 %v6527_v2 }
0x2462   : > { %v3330_v12 = vpop.f32.mrb[64].mxu0  ;;  %v3371_v15 = vpop.f32.mrb[64].mxu1 }
0x2463   : > { %v3394_v9 = vmul.f32 %v3381_v1, %v3330_v12  ;;  %v3396_v18 = vmul.f32 %v3389_v30, %v3371_v15  ;;  %v3332_v19 = vpop.f32.mrb[65].mxu0  ;;  %v3373_v20 = vpop.f32.mrb[65].mxu1  ;;  %v3601_v1 = vunpack.c.h.s8.bf16 %v5147_v54  ;;  %v5149_v15 = vld [vmem:[%s6860_s14 + $0x1a0] sm:$0xff] }
0x2464   : > { %v3395_v21 = vmul.f32 %v3385_v4, %v3332_v19  ;;  %v3397_v23 = vmul.f32 %v3393_v0, %v3373_v20  ;;  %v3334_v63 = vpop.f32.mrb[66].mxu0  ;;  %v3375_v24 = vpop.f32.mrb[66].mxu1 }
0x2465   : > { %v3414_v62 = vadd.f32 %v3401_v8, %v3394_v9  ;;  %v3416_v26 = vadd.f32 %v3409_v10, %v3396_v18  ;;  %v3335_v22 = vpop.f32.mrb[67].mxu0  ;;  %v3376_v6 = vpop.f32.mrb[67].mxu1  ;;  %v5148_v10 = vld [vmem:[%s6860_s14 + $0x190] sm:$0xff]  ;;  %v3580_v63 = vrot.slane %v7525_v11, %v7041_v42  ;;  %v5152_v11 = vld [vmem:[%s6860_s14 + $0x198] sm:$0xff] }
0x2466   : > { %v3415_v28 = vadd.f32 %v3405_v16, %v3395_v21  ;;  %v3417_v60 = vadd.f32 %v3413_v17, %v3397_v23  ;;  %v3602_v12 = vunpack.c.l.s8.bf16 %v5148_v10  ;;  %v3604_v16 = vunpack.c.l.s8.bf16 %v5149_v15  ;;  %v5150_v9 = vld [vmem:[%s6860_s14 + $0x1b0] sm:$0xff] }
0x2467   : > { %v3418_v36 = vmax.f32 %v3414_v62, 0.0  ;;  %v3420_v27 = vmax.f32 %v3416_v26, 0.0  ;;  %v3605_v17 = vunpack.c.h.s8.bf16 %v5149_v15  ;;  %v3606_v18 = vunpack.c.l.s8.bf16 %v5150_v9 }
0x2468   : > { %v3419_v39 = vmax.f32 %v3415_v28, 0.0  ;;  %v3421_v41 = vmax.f32 %v3417_v60, 0.0  ;;  %v3607_v19 = vunpack.c.h.s8.bf16 %v5150_v9  ;;  %v3585_v62 = vrot.slane %v7522_v3, %v6927_v34  ;;  %v5151_v60 = vld [vmem:[%s6860_s14 + $0x188] sm:$0xff] }
0x2469   : > { %v3422_v45 = vpack.c.bf16 %v3418_v36, %v3418_v36  ;;  %v3424_v46 = vpack.c.bf16 %v3420_v27, %v3420_v27  ;;  %v3685_v36 = vunpack.c.l.s8.bf16 %v5151_v60  ;;  %v3686_v27 = vunpack.c.h.s8.bf16 %v5151_v60 }
0x246a   : > { %v3423_v44 = vpack.c.bf16 %v3419_v39, %v3419_v39  ;;  %v3425_v38 = vpack.c.bf16 %v3421_v41, %v3421_v41  ;;  %v3687_v39 = vunpack.c.l.s8.bf16 %v5152_v11  ;;  %v3688_v3 = vunpack.c.h.s8.bf16 %v5152_v11  ;;  %v5153_v41 = vld [vmem:[%s6860_s14 + $0x1a8] sm:$0xff]  ;;  %v5162_v11 = vld [vmem:[%s6866_s13 + $0x338] sm:$0xff] }
0x246c   : > { %3507 = vmatprep.mubr.bf16.mxu0 %v3423_v44  ;;  %3547 = vmatprep.mubr.bf16.mxu1 %v3425_v38  ;;  %v3689_v44 = vunpack.c.l.s8.bf16 %v5153_v41  ;;  %v3690_v38 = vunpack.c.h.s8.bf16 %v5153_v41 }
0x246d   : > { %3508 = vmatmul.mubr.bf16.vlgmr.msra.gmra.mrb[68].mxu0 %v3422_v45  ;;  %3548 = vmatmul.mubr.bf16.vlgmr.msra.gmra.mrb[68].mxu1 %v3424_v46  ;;  %v5154_v45 = vld [vmem:[%s6860_s14 + $0x1b8] sm:$0xff] }
0x246e   : > { %6012 = vmatprep.mubr.msk.bf16.mxu0 %vm6528_vm0, %v6527_v2  ;;  %6032 = vmatprep.mubr.msk.bf16.mxu1 %vm6528_vm0, %v6527_v2  ;;  %v3691_v46 = vunpack.c.l.s8.bf16 %v5154_v45 }
0x246f   : > { %5997 = vmatpush3.bf16.msra.mxu0 %v3600_v43  ;;  %6017 = vmatpush3.bf16.msra.mxu1 %v3685_v36 }
0x2470   : > { %5998 = vmatprep.subr.bf16.mxu0 %v6527_v2  ;;  %6018 = vmatprep.subr.bf16.mxu1 %v6527_v2 }
0x2473   : > { %5999 = vmatpush3.bf16.msra.mxu0 %v3601_v1  ;;  %6019 = vmatpush3.bf16.msra.mxu1 %v3686_v27  ;;  %v5160_v27 = vld [vmem:[%s6866_s13 + $0x328] sm:$0xff] }
0x2474   : > { %6000 = vmatprep.subr.bf16.mxu0 %v6527_v2  ;;  %6020 = vmatprep.subr.bf16.mxu1 %v6527_v2  ;;  %v3792_v41 = vunpack.c.l.s8.bf16 %v5160_v27 }
0x2477   : > { %6001 = vmatpush3.bf16.msra.mxu0 %v3602_v12  ;;  %6021 = vmatpush3.bf16.msra.mxu1 %v3687_v39 }
0x2478   : > { %6002 = vmatprep.subr.bf16.mxu0 %v6527_v2  ;;  %6022 = vmatprep.subr.bf16.mxu1 %v6527_v2 }
0x247b   : > { %6023 = vmatpush3.bf16.msra.mxu1 %v3688_v3 }
0x247c   : > { %6024 = vmatprep.subr.bf16.mxu1 %v6527_v2 }
0x247f   : > { %6025 = vmatpush3.bf16.msra.mxu1 %v3689_v44  ;;  %v3794_v44 = vunpack.c.l.s8.bf16 %v5162_v11 }
0x2480   : > { %6026 = vmatprep.subr.bf16.mxu1 %v6527_v2 }
0x2483   : > { %6027 = vmatpush3.bf16.msra.mxu1 %v3690_v38 }
0x2484   : > { %6028 = vmatprep.subr.bf16.mxu1 %v6527_v2 }
0x2487   : > { %6029 = vmatpush3.bf16.msra.mxu1 %v3691_v46 }
0x2488   : > { %6030 = vmatprep.subr.bf16.mxu1 %v6527_v2 }
0x2540   : > { %v5595_v47 = vpop.f32.mrb[68].mxu0  ;;  %v5617_v40 = vpop.f32.mrb[68].mxu1 }
0x2541   : > { %v5596_v48 = vpop.f32.mrb[69].mxu0  ;;  %v5618_v49 = vpop.f32.mrb[69].mxu1 }
0x2542   : > { %v5597_v50 = vadd.f32 %v5596_v48, %v5595_v47  ;;  %v5619_v51 = vadd.f32 %v5618_v49, %v5617_v40  ;;  %v5598_v35 = vpop.f32.mrb[70].mxu0  ;;  %v5620_v52 = vpop.f32.mrb[70].mxu1  ;;  %v3692_v47 = vunpack.c.h.s8.bf16 %v5154_v45  ;;  %v7637_v40 = vld [vmem:[%s6876_s30 + $0x68] sm:$0xff]  ;;  %v7640_v48 = vld [vmem:[%s6876_s30 + $0x60] sm:$0xff] }
0x2543   : > { %v5599_v33 = vpop.f32.mrb[71].mxu0  ;;  %v5621_v53 = vpop.f32.mrb[71].mxu1  ;;  %v3652_v49 = vrot.slane %v7637_v40, %v6921_v32  ;;  %v3674_v15 = vrot.slane %v7640_v48, %v6942_v58  ;;  %v3679_v9 = vrot.slane %v7640_v48, %v6945_v59 }
0x2544   : > { %v3550_v55 = vadd.f32 %v5619_v51, %v5597_v50  ;;  %6031 = vmatpush3.bf16.msra.mxu1 %v3692_v47  ;;  %v3657_v50 = vrot.slane %v7640_v48, %v6927_v34 }
0x2546   : > { %v3559_v57 = vmul.f32 %v3558_v31, %v3550_v55 }
0x2547   : > { %6033 = vmatmul.mubr.bf16.vlgmr.msra.gmra.mrb[72].mxu1 %v6915_v29 }
0x2548   : > { %v3564_v25 = vadd.f32 %v3563_v37, %v3559_v57  ;;  %3888 = vmatprep.mubr.bf16.mxu1 %v6529_v5 }
0x254a   : > { %v3565_v61 = vadd.f32 %v3564_v25, %v7568_v7  ;;  %v3603_v7 = vunpack.c.h.s8.bf16 %v5148_v10  ;;  %v3736_v10 = vrot.slane %v7637_v40, %v6937_v56 }
0x254c   : > { %3566 = vadd.xlane.f32.xlu0 %v3565_v61  ;;  %6003 = vmatpush3.bf16.msra.mxu0 %v3603_v7  ;;  %v3741_v7 = vrot.slane %v7640_v48, %v6921_v32 }
0x254d   : > { %6004 = vmatprep.subr.bf16.mxu0 %v6527_v2 }
0x2550   : > { %6005 = vmatpush3.bf16.msra.mxu0 %v3604_v16 }
0x2551   : > { %6006 = vmatprep.subr.bf16.mxu0 %v6527_v2 }
0x2554   : > { %6007 = vmatpush3.bf16.msra.mxu0 %v3605_v17 }
0x2555   : > { %6008 = vmatprep.subr.bf16.mxu0 %v6527_v2 }
0x2558   : > { %6009 = vmatpush3.bf16.msra.mxu0 %v3606_v18 }
0x2559   : > { %6010 = vmatprep.subr.bf16.mxu0 %v6527_v2 }
0x255c   : > { %6011 = vmatpush3.bf16.msra.mxu0 %v3607_v19 }
0x25d9   : > { %v3567_v30 = vpop.xlane.xlu0 %3566 }
0x25da   : > { %v3568_v4 = vmul.f32 0.0078125, %v3567_v30 }
0x25dc   : > { %v3569_v0 = vsub.f32 %v3565_v61, %v3568_v4 }
0x25de   : > { %v3570_v8 = vmul.f32 %v3569_v0, %v3569_v0 }
0x25e0   : > { %3571 = vadd.xlane.f32.xlu1 %v3570_v8 }
0x261a   : > { %v3727_v54 = vpop.f32.mrb[72].mxu1 }
0x261b   : > { %v6034_v43 = vpop.f32.mrb[73].mxu1  ;;  %v3737_v12 = vmul.f32 %v3736_v10, %v3727_v54  ;;  %v5165_v54 = vld [vmem:[%s6866_s13 + $0x350] sm:$0xff]  ;;  %v5168_v10 = vld [vmem:[%s6866_s13 + $0x368] sm:$0xff] }
0x261c   : > { %v3730_v1 = vpop.f32.mrb[74].mxu1 }
0x261d   : > { %v6035_v30 = vpop.f32.mrb[75].mxu1  ;;  %v3742_v18 = vadd.f32 %v3741_v7, %v3737_v12  ;;  %v3801_v1 = vunpack.c.l.s8.bf16 %v5165_v54  ;;  %v5170_v12 = vld [vmem:[%s6866_s13 + $0x378] sm:$0xff]  ;;  %v3808_v7 = vunpack.c.l.s8.bf16 %v5168_v10 }
0x266d   : > { %v3572_v20 = vpop.xlane.xlu1 %3571 }
0x266e   : > { %v3573_v21 = vmul.f32 0.0078125, %v3572_v20 }
0x2670   : > { %v3574_v23 = vadd.f32 1e-05, %v3573_v21 }
0x2672   : > { %6219 = vrsqrt.f32 %v3574_v23  ;;  %v5156_v23 = vld [vmem:[%s6866_s13 + $0x308] sm:$0xff] }
0x267c   : > { %v6220_v24 = vpop.eup %6219 }
0x267d   : > { %v3576_v26 = vmul.f32 %v6220_v24, %v3569_v0  ;;  %v5155_v24 = vld [vmem:[%s6866_s13 + $0x300] sm:$0xff] }
0x267e   : > { %v3787_v39 = vunpack.c.h.s8.bf16 %v5155_v24 }
0x267f   : > { %v3581_v22 = vmul.f32 %v3580_v63, %v3576_v26  ;;  %v5158_v63 = vld [vmem:[%s6866_s13 + $0x318] sm:$0xff] }
0x2680   : > { %v3786_v26 = vunpack.c.l.s8.bf16 %v5158_v63  ;;  %v3790_v36 = vunpack.c.h.s8.bf16 %v5158_v63  ;;  %v5175_v63 = vld [vmem:[%s6874_s9 + $0x320] sm:$0xff] }
0x2681   : > { %v3586_v6 = vadd.f32 %v3585_v62, %v3581_v22  ;;  %v3784_v62 = vunpack.c.l.s8.bf16 %v5156_v23  ;;  %v3783_v22 = vunpack.c.l.s8.bf16 %v5155_v24  ;;  %v5183_v24 = vld [vmem:[%s6874_s9 + $0x360] sm:$0xff] }
0x2682   : > { %3856 = vmatprep.subr.bf16.mxu1 %v3786_v26  ;;  %v3986_v26 = vunpack.c.l.s8.bf16 %v5183_v24 }
0x2683   : > { %v3608_v28 = vpack.c.bf16 %v3586_v6, %v3586_v6  ;;  %3815 = vmatprep.subr.bf16.mxu0 %v3784_v62  ;;  %v3970_v62 = vunpack.c.l.s8.bf16 %v5175_v63 }
0x2685   : > { %6013 = vmatmul.mubr.bf16.vlgmr.msra.gmra.mrb[72].mxu0 %v3608_v28  ;;  %v3788_v28 = vunpack.c.h.s8.bf16 %v5156_v23 }
0x2686   : > { %3847 = vmatprep.mubr.bf16.mxu0 %v6529_v5  ;;  %3816 = vmatpush1.bf16.msra.mxu0 %v3783_v22 }
0x2687   : > { %3817 = vmatprep.subr.bf16.mxu0 %v3788_v28 }
0x268a   : > { %3818 = vmatpush1.bf16.msra.mxu0 %v3787_v39 }
0x268b   : > { %3819 = vmatprep.subr.bf16.mxu0 %v3792_v41  ;;  %v5179_v41 = vld [vmem:[%s6874_s9 + $0x340] sm:$0xff] }
0x2758   : > { %v3643_v51 = vpop.f32.mrb[72].mxu0 }
0x2759   : > { %v3653_v31 = vmul.f32 %v3652_v49, %v3643_v51  ;;  %v6014_v35 = vpop.f32.mrb[73].mxu0  ;;  %v5159_v49 = vld [vmem:[%s6866_s13 + $0x320] sm:$0xff] }
0x275a   : > { %v3646_v52 = vpop.f32.mrb[74].mxu0  ;;  %v3791_v51 = vunpack.c.l.s8.bf16 %v5159_v49  ;;  %v3796_v35 = vunpack.c.h.s8.bf16 %v5160_v27 }
0x275b   : > { %v3658_v33 = vadd.f32 %v3657_v50, %v3653_v31  ;;  %v6015_v53 = vpop.f32.mrb[75].mxu0  ;;  %v5161_v50 = vld [vmem:[%s6866_s13 + $0x330] sm:$0xff]  ;;  %v3798_v52 = vunpack.c.h.s8.bf16 %v5162_v11  ;;  %v3763_v11 = vrot.slane %v7640_v48, %v6981_v14 }
0x275c   : > { %v3793_v31 = vunpack.c.l.s8.bf16 %v5161_v50  ;;  %3820 = vmatpush1.bf16.msra.mxu0 %v3791_v51  ;;  %v3797_v53 = vunpack.c.h.s8.bf16 %v5161_v50  ;;  %v3987_v50 = vunpack.c.h.s8.bf16 %v5183_v24  ;;  %v5176_v51 = vld [vmem:[%s6874_s9 + $0x328] sm:$0xff] }
0x275d   : > { %v3659_v55 = vadd.f32 %v3658_v33, %v3586_v6  ;;  %v5157_v6 = vld [vmem:[%s6866_s13 + $0x310] sm:$0xff]  ;;  %v3795_v33 = vunpack.c.h.s8.bf16 %v5159_v49  ;;  %3821 = vmatprep.subr.bf16.mxu0 %v3796_v35  ;;  %v3971_v49 = vunpack.c.h.s8.bf16 %v5175_v63  ;;  %v3979_v35 = vunpack.c.h.s8.bf16 %v5179_v41  ;;  %v5182_v63 = vld [vmem:[%s6874_s9 + $0x358] sm:$0xff] }
0x275e   : > { %v3785_v60 = vunpack.c.l.s8.bf16 %v5157_v6  ;;  %v3789_v3 = vunpack.c.h.s8.bf16 %v5157_v6 }
0x275f   : > { %3660 = vadd.xlane.f32.xlu0 %v3659_v55 }
0x2760   : > { %3857 = vmatpush1.bf16.msra.mxu1 %v3785_v60  ;;  %3822 = vmatpush1.bf16.msra.mxu0 %v3795_v33  ;;  %v3758_v60 = vrot.slane %v7640_v48, %v6978_v13 }
0x2761   : > { %3858 = vmatprep.subr.bf16.mxu1 %v3790_v36 }
0x2764   : > { %3859 = vmatpush1.bf16.msra.mxu1 %v3789_v3  ;;  %v5171_v3 = vld [vmem:[%s6874_s9 + $0x300] sm:$0xff] }
0x2765   : > { %3860 = vmatprep.subr.bf16.mxu1 %v3794_v44 }
0x2768   : > { %3861 = vmatpush1.bf16.msra.mxu1 %v3793_v31  ;;  %v5184_v31 = vld [vmem:[%s6874_s9 + $0x368] sm:$0xff] }
0x2769   : > { %3862 = vmatprep.subr.bf16.mxu1 %v3798_v52  ;;  %v3972_v52 = vunpack.c.l.s8.bf16 %v5176_v51  ;;  %v3988_v33 = vunpack.c.l.s8.bf16 %v5184_v31 }
0x276c   : > { %3863 = vmatpush1.bf16.msra.mxu1 %v3797_v53  ;;  %v5172_v53 = vld [vmem:[%s6874_s9 + $0x308] sm:$0xff] }
0x27ec   : > { %v3661_v37 = vpop.xlane.xlu0 %3660 }
0x27ed   : > { %v3662_v57 = vmul.f32 0.0078125, %v3661_v37  ;;  %v5166_v37 = vld [vmem:[%s6866_s13 + $0x358] sm:$0xff] }
0x27ef   : > { %v3663_v25 = vsub.f32 %v3659_v55, %v3662_v57  ;;  %v5164_v55 = vld [vmem:[%s6866_s13 + $0x348] sm:$0xff] }
0x27f0   : > { %v3800_v57 = vunpack.c.l.s8.bf16 %v5164_v55  ;;  %v3804_v30 = vunpack.c.h.s8.bf16 %v5164_v55  ;;  %v5180_v55 = vld [vmem:[%s6874_s9 + $0x348] sm:$0xff] }
0x27f1   : > { %v3664_v61 = vmul.f32 %v3663_v25, %v3663_v25 }
0x27f2   : > { %3823 = vmatprep.subr.bf16.mxu0 %v3800_v57  ;;  %v3980_v57 = vunpack.c.l.s8.bf16 %v5180_v55 }
0x27f3   : > { %3665 = vadd.xlane.f32.xlu1 %v3664_v61  ;;  %v5163_v61 = vld [vmem:[%s6866_s13 + $0x340] sm:$0xff] }
0x27f4   : > { %v3799_v43 = vunpack.c.l.s8.bf16 %v5163_v61 }
0x27f6   : > { %3824 = vmatpush1.bf16.msra.mxu0 %v3799_v43  ;;  %v5185_v43 = vld [vmem:[%s6874_s9 + $0x370] sm:$0xff] }
0x27f7   : > { %3825 = vmatprep.subr.bf16.mxu0 %v3804_v30  ;;  %v3981_v30 = vunpack.c.h.s8.bf16 %v5180_v55 }
0x2880   : > { %v3666_v4 = vpop.xlane.xlu1 %3665 }
0x2881   : > { %v3667_v0 = vmul.f32 0.0078125, %v3666_v4  ;;  %v3806_v4 = vunpack.c.h.s8.bf16 %v5166_v37 }
0x2883   : > { %v3668_v8 = vadd.f32 1e-05, %v3667_v0  ;;  %v3803_v0 = vunpack.c.h.s8.bf16 %v5163_v61  ;;  %v3989_v61 = vunpack.c.h.s8.bf16 %v5184_v31 }
0x2885   : > { %6221 = vrsqrt.f32 %v3668_v8  ;;  %v3805_v8 = vunpack.c.h.s8.bf16 %v5165_v54  ;;  %3826 = vmatpush1.bf16.msra.mxu0 %v3803_v0  ;;  %v5177_v54 = vld [vmem:[%s6874_s9 + $0x330] sm:$0xff]  ;;  %v3990_v0 = vunpack.c.l.s8.bf16 %v5185_v43 }
0x2886   : > { %3827 = vmatprep.subr.bf16.mxu0 %v3808_v7 }
0x288f   : > { %v6222_v16 = vpop.eup %6221 }
0x2890   : > { %v3670_v17 = vmul.f32 %v6222_v16, %v3663_v25  ;;  %v3802_v25 = vunpack.c.l.s8.bf16 %v5166_v37  ;;  %v5167_v16 = vld [vmem:[%s6866_s13 + $0x360] sm:$0xff]  ;;  %v3964_v37 = vunpack.c.l.s8.bf16 %v5172_v53 }
0x2892   : > { %v3675_v19 = vmul.f32 %v3674_v15, %v3670_v17  ;;  %3864 = vmatprep.subr.bf16.mxu1 %v3802_v25  ;;  %v3810_v15 = vunpack.c.l.s8.bf16 %v5170_v12  ;;  %v5169_v17 = vld [vmem:[%s6866_s13 + $0x370] sm:$0xff]  ;;  %v3973_v25 = vunpack.c.h.s8.bf16 %v5176_v51 }
0x2893   : > { %3865 = vmatpush1.bf16.msra.mxu1 %v3801_v1  ;;  %v3813_v23 = vunpack.c.h.s8.bf16 %v5169_v17  ;;  %v3965_v1 = vunpack.c.h.s8.bf16 %v5172_v53 }
0x2894   : > { %v3680_v20 = vadd.f32 %v3679_v9, %v3675_v19  ;;  %3866 = vmatprep.subr.bf16.mxu1 %v3806_v4  ;;  %v3807_v9 = vunpack.c.l.s8.bf16 %v5167_v16  ;;  %v3812_v19 = vunpack.c.h.s8.bf16 %v5168_v10  ;;  %v3974_v4 = vunpack.c.l.s8.bf16 %v5177_v54  ;;  %v5181_v10 = vld [vmem:[%s6874_s9 + $0x350] sm:$0xff] }
0x2895   : > { %v3982_v7 = vunpack.c.l.s8.bf16 %v5181_v10 }
0x2896   : > { %v3743_v21 = vadd.f32 %v3742_v18, %v3680_v20  ;;  %v3809_v18 = vunpack.c.l.s8.bf16 %v5169_v17  ;;  %v3814_v20 = vunpack.c.h.s8.bf16 %v5170_v12  ;;  %3828 = vmatpush1.bf16.msra.mxu0 %v3807_v9  ;;  %v3983_v9 = vunpack.c.h.s8.bf16 %v5181_v10 }
0x2897   : > { %3867 = vmatpush1.bf16.msra.mxu1 %v3805_v8  ;;  %3829 = vmatprep.subr.bf16.mxu0 %v3812_v19  ;;  %v5173_v8 = vld [vmem:[%s6874_s9 + $0x310] sm:$0xff]  ;;  %v5186_v19 = vld [vmem:[%s6874_s9 + $0x378] sm:$0xff] }
0x2898   : > { %3744 = vadd.xlane.f32.xlu0 %v3743_v21  ;;  %3868 = vmatprep.subr.bf16.mxu1 %v3810_v15  ;;  %v3966_v12 = vunpack.c.l.s8.bf16 %v5173_v8  ;;  %v3975_v15 = vunpack.c.h.s8.bf16 %v5177_v54  ;;  %v3967_v17 = vunpack.c.h.s8.bf16 %v5173_v8 }
0x289b   : > { %3869 = vmatpush1.bf16.msra.mxu1 %v3809_v18  ;;  %v5178_v18 = vld [vmem:[%s6874_s9 + $0x338] sm:$0xff] }
0x289c   : > { %3870 = vmatprep.subr.bf16.mxu1 %v3814_v20  ;;  %v3976_v20 = vunpack.c.l.s8.bf16 %v5178_v18 }
0x289f   : > { %3871 = vmatpush1.bf16.msra.mxu1 %v3813_v23  ;;  %v5174_v23 = vld [vmem:[%s6874_s9 + $0x318] sm:$0xff] }
0x28a0   : > { %5663 = vmatprep.subr.bf16.mxu1 %v3986_v26  ;;  %v3968_v24 = vunpack.c.l.s8.bf16 %v5174_v23  ;;  %v3977_v26 = vunpack.c.h.s8.bf16 %v5178_v18 }
0x2925   : > { %v3745_v38 = vpop.xlane.xlu0 %3744 }
0x2926   : > { %v3746_v45 = vmul.f32 0.0078125, %v3745_v38  ;;  %v3962_v38 = vunpack.c.l.s8.bf16 %v5171_v3 }
0x2928   : > { %v7660_v46 = vsub.f32 %v3743_v21, %v3746_v45  ;;  %v3811_v21 = vunpack.c.h.s8.bf16 %v5167_v16  ;;  %v3978_v45 = vunpack.c.l.s8.bf16 %v5179_v41  ;;  %v3991_v16 = vunpack.c.h.s8.bf16 %v5185_v43 }
0x292a   : > { %v3748_v47 = vmul.f32 %v7660_v46, %v7660_v46  ;;  %3830 = vmatpush1.bf16.msra.mxu0 %v3811_v21  ;;  %v3992_v21 = vunpack.c.l.s8.bf16 %v5186_v19 }
0x292b   : > { %5641 = vmatprep.subr.bf16.mxu0 %v3970_v62  ;;  %v3984_v62 = vunpack.c.l.s8.bf16 %v5182_v63 }
0x292c   : > { %3749 = vadd.xlane.f32.xlu1 %v3748_v47 }
0x29b9   : > { %v3750_v22 = vpop.xlane.xlu1 %3749 }
0x29ba   : > { %v3751_v6 = vmul.f32 0.0078125, %v3750_v22  ;;  %v3993_v22 = vunpack.c.h.s8.bf16 %v5186_v19 }
0x29bc   : > { %v3752_v28 = vadd.f32 1e-05, %v3751_v6  ;;  %v3969_v6 = vunpack.c.h.s8.bf16 %v5174_v23  ;;  %v4077_v23 = vrot.slane %v7637_v40, %v6942_v58 }
0x29be   : > { %6223 = vrsqrt.f32 %v3752_v28  ;;  %v3985_v28 = vunpack.c.h.s8.bf16 %v5182_v63 }
0x29c8   : > { %v6224_v36 = vpop.eup %6223 }
0x29c9   : > { %v3754_v27 = vmul.f32 %v6224_v36, %v7660_v46  ;;  %v3963_v46 = vunpack.c.h.s8.bf16 %v5171_v3  ;;  %v5145_v36 = vld [vmem:[%s6868_s29 + $0xd0] sm:$0xff] }
0x29ca   : > { %v3908_v3 = vrot.slane %v5145_v36, %v6921_v32 }
0x29cb   : > { %v3759_v39 = vmul.f32 %v3758_v60, %v3754_v27  ;;  %v5143_v60 = vld [vmem:[%s6868_s29 + $0xc0] sm:$0xff]  ;;  %v5144_v27 = vld [vmem:[%s6868_s29 + $0xc8] sm:$0xff] }
0x29cc   : > { %v3904_v41 = vrot.slane %v5144_v27, %v6921_v32  ;;  %v3924_v51 = vrot.slane %v5144_v27, %v6927_v34  ;;  %v5193_v27 = vld [vmem:[%s6860_s14 + $0x1c0] sm:$0xff] }
0x29cd   : > { %v7683_v44 = vadd.f32 %v3763_v11, %v3759_v39  ;;  %v5146_v11 = vld [vmem:[%s6868_s29 + $0xd8] sm:$0xff]  ;;  %v3900_v39 = vrot.slane %v5143_v60, %v6921_v32 }
0x29ce   : > { %v3932_v31 = vrot.slane %v5146_v11, %v6927_v34 }
0x29cf   : > { %v3765_v47 = vpack.c.bf16 %v7683_v44, %v7683_v44 }
0x29d1   : > { %3848 = vmatmul.mubr.bf16.vlgmr.msra.gmra.mrb[76].mxu0 %v3765_v47  ;;  %3889 = vmatmul.mubr.bf16.vlgmr.msra.gmra.mrb[76].mxu1 %v3765_v47  ;;  %v3928_v47 = vrot.slane %v5145_v36, %v6927_v34 }
0x29d2   : > { %5642 = vmatpush3.bf16.msra.mxu0 %v3962_v38  ;;  %5664 = vmatpush3.bf16.msra.mxu1 %v3978_v45  ;;  %v3912_v38 = vrot.slane %v5146_v11, %v6921_v32  ;;  %v3920_v45 = vrot.slane %v5143_v60, %v6927_v34  ;;  %v4119_v11 = vunpack.c.l.s8.bf16 %v5193_v27 }
0x29d3   : > { %5643 = vmatprep.subr.bf16.mxu0 %v3971_v49  ;;  %5665 = vmatprep.subr.bf16.mxu1 %v3987_v50 }
0x29d6   : > { %5644 = vmatpush3.bf16.msra.mxu0 %v3963_v46  ;;  %5666 = vmatpush3.bf16.msra.mxu1 %v3979_v35 }
0x29d7   : > { %5645 = vmatprep.subr.bf16.mxu0 %v3972_v52  ;;  %5667 = vmatprep.subr.bf16.mxu1 %v3988_v33 }
0x29da   : > { %5646 = vmatpush3.bf16.msra.mxu0 %v3964_v37  ;;  %5668 = vmatpush3.bf16.msra.mxu1 %v3980_v57 }
0x29db   : > { %5647 = vmatprep.subr.bf16.mxu0 %v3973_v25  ;;  %5669 = vmatprep.subr.bf16.mxu1 %v3989_v61 }
0x29de   : > { %5648 = vmatpush3.bf16.msra.mxu0 %v3965_v1  ;;  %5670 = vmatpush3.bf16.msra.mxu1 %v3981_v30 }
0x29df   : > { %5649 = vmatprep.subr.bf16.mxu0 %v3974_v4  ;;  %5671 = vmatprep.subr.bf16.mxu1 %v3990_v0 }
0x29e2   : > { %5650 = vmatpush3.bf16.msra.mxu0 %v3966_v12  ;;  %5672 = vmatpush3.bf16.msra.mxu1 %v3982_v7 }
0x29e3   : > { %5651 = vmatprep.subr.bf16.mxu0 %v3975_v15  ;;  %5673 = vmatprep.subr.bf16.mxu1 %v3991_v16 }
0x29e6   : > { %5652 = vmatpush3.bf16.msra.mxu0 %v3967_v17  ;;  %5674 = vmatpush3.bf16.msra.mxu1 %v3983_v9 }
0x29e7   : > { %5653 = vmatprep.subr.bf16.mxu0 %v3976_v20  ;;  %5675 = vmatprep.subr.bf16.mxu1 %v3992_v21 }
0x29ea   : > { %5654 = vmatpush3.bf16.msra.mxu0 %v3968_v24  ;;  %5676 = vmatpush3.bf16.msra.mxu1 %v3984_v62 }
0x29eb   : > { %5655 = vmatprep.subr.bf16.mxu0 %v3977_v26  ;;  %5677 = vmatprep.subr.bf16.mxu1 %v3993_v22 }
0x29ee   : > { %5656 = vmatpush3.bf16.msra.mxu0 %v3969_v6  ;;  %5678 = vmatpush3.bf16.msra.mxu1 %v3985_v28  ;;  %v4082_v6 = vrot.slane %v7640_v48, %v6937_v56 }
0x29ef   : > { %6036 = vmatprep.subr.bf16.mxu0 %v6527_v2  ;;  %6056 = vmatprep.subr.bf16.mxu1 %v6527_v2 }
0x2aa4   : > { %v3849_v49 = vpop.f32.mrb[76].mxu0  ;;  %v3890_v50 = vpop.f32.mrb[76].mxu1 }
0x2aa5   : > { %v3913_v46 = vmul.f32 %v3900_v39, %v3849_v49  ;;  %v3915_v35 = vmul.f32 %v3908_v3, %v3890_v50  ;;  %v3851_v52 = vpop.f32.mrb[77].mxu0  ;;  %v3892_v33 = vpop.f32.mrb[77].mxu1  ;;  %v4120_v39 = vunpack.c.h.s8.bf16 %v5193_v27  ;;  %v5195_v50 = vld [vmem:[%s6860_s14 + $0x1e0] sm:$0xff] }
0x2aa6   : > { %v3914_v53 = vmul.f32 %v3904_v41, %v3851_v52  ;;  %v3916_v55 = vmul.f32 %v3912_v38, %v3892_v33  ;;  %v3853_v37 = vpop.f32.mrb[78].mxu0  ;;  %v3894_v57 = vpop.f32.mrb[78].mxu1 }
0x2aa7   : > { %v3933_v25 = vadd.f32 %v3920_v45, %v3913_v46  ;;  %v3935_v61 = vadd.f32 %v3928_v47, %v3915_v35  ;;  %v3854_v54 = vpop.f32.mrb[79].mxu0  ;;  %v3895_v43 = vpop.f32.mrb[79].mxu1  ;;  %v5194_v47 = vld [vmem:[%s6860_s14 + $0x1d0] sm:$0xff]  ;;  %v4099_v37 = vrot.slane %v7640_v48, %v7041_v42  ;;  %v5198_v48 = vld [vmem:[%s6860_s14 + $0x1d8] sm:$0xff] }
0x2aa8   : > { %v3934_v1 = vadd.f32 %v3924_v51, %v3914_v53  ;;  %v3936_v30 = vadd.f32 %v3932_v31, %v3916_v55  ;;  %v4121_v49 = vunpack.c.l.s8.bf16 %v5194_v47  ;;  %v4123_v51 = vunpack.c.l.s8.bf16 %v5195_v50  ;;  %v5196_v46 = vld [vmem:[%s6860_s14 + $0x1f0] sm:$0xff] }
0x2aa9   : > { %v3937_v4 = vmax.f32 %v3933_v25, 0.0  ;;  %v3939_v0 = vmax.f32 %v3935_v61, 0.0  ;;  %v4124_v31 = vunpack.c.h.s8.bf16 %v5195_v50  ;;  %v4125_v35 = vunpack.c.l.s8.bf16 %v5196_v46 }
0x2aaa   : > { %v3938_v8 = vmax.f32 %v3934_v1, 0.0  ;;  %v3940_v10 = vmax.f32 %v3936_v30, 0.0  ;;  %v4126_v52 = vunpack.c.h.s8.bf16 %v5196_v46  ;;  %v4104_v25 = vrot.slane %v7637_v40, %v6927_v34  ;;  %v5197_v30 = vld [vmem:[%s6860_s14 + $0x1c8] sm:$0xff] }
0x2aab   : > { %v3941_v15 = vpack.c.bf16 %v3937_v4, %v3937_v4  ;;  %v3943_v16 = vpack.c.bf16 %v3939_v0, %v3939_v0  ;;  %v4204_v4 = vunpack.c.l.s8.bf16 %v5197_v30  ;;  %v4205_v0 = vunpack.c.h.s8.bf16 %v5197_v30  ;;  %v5208_v30 = vld [vmem:[%s6866_s13 + $0x3b8] sm:$0xff] }
0x2aac   : > { %v3942_v12 = vpack.c.bf16 %v3938_v8, %v3938_v8  ;;  %v3944_v7 = vpack.c.bf16 %v3940_v10, %v3940_v10  ;;  %v4206_v8 = vunpack.c.l.s8.bf16 %v5198_v48  ;;  %v4207_v40 = vunpack.c.h.s8.bf16 %v5198_v48  ;;  %v5199_v10 = vld [vmem:[%s6860_s14 + $0x1e8] sm:$0xff] }
0x2aad   : > { %v4313_v48 = vunpack.c.l.s8.bf16 %v5208_v30 }
0x2aae   : > { %4026 = vmatprep.mubr.bf16.mxu0 %v3942_v12  ;;  %4066 = vmatprep.mubr.bf16.mxu1 %v3944_v7  ;;  %v4208_v12 = vunpack.c.l.s8.bf16 %v5199_v10  ;;  %v4209_v7 = vunpack.c.h.s8.bf16 %v5199_v10 }
0x2aaf   : > { %4027 = vmatmul.mubr.bf16.vlgmr.msra.gmra.mrb[80].mxu0 %v3941_v15  ;;  %4067 = vmatmul.mubr.bf16.vlgmr.msra.gmra.mrb[80].mxu1 %v3943_v16  ;;  %v5200_v15 = vld [vmem:[%s6860_s14 + $0x1f8] sm:$0xff] }
0x2ab0   : > { %6052 = vmatprep.mubr.msk.bf16.mxu0 %vm6528_vm0, %v6527_v2  ;;  %6072 = vmatprep.mubr.msk.bf16.mxu1 %vm6528_vm0, %v6527_v2  ;;  %v4210_v16 = vunpack.c.l.s8.bf16 %v5200_v15 }
0x2ab1   : > { %6037 = vmatpush3.bf16.msra.mxu0 %v4119_v11  ;;  %6057 = vmatpush3.bf16.msra.mxu1 %v4204_v4 }
0x2ab2   : > { %6038 = vmatprep.subr.bf16.mxu0 %v6527_v2  ;;  %6058 = vmatprep.subr.bf16.mxu1 %v6527_v2 }
0x2ab5   : > { %6039 = vmatpush3.bf16.msra.mxu0 %v4120_v39  ;;  %6059 = vmatpush3.bf16.msra.mxu1 %v4205_v0 }
0x2ab6   : > { %6040 = vmatprep.subr.bf16.mxu0 %v6527_v2  ;;  %6060 = vmatprep.subr.bf16.mxu1 %v6527_v2 }
0x2ab9   : > { %6041 = vmatpush3.bf16.msra.mxu0 %v4121_v49  ;;  %6061 = vmatpush3.bf16.msra.mxu1 %v4206_v8 }
0x2aba   : > { %6042 = vmatprep.subr.bf16.mxu0 %v6527_v2  ;;  %6062 = vmatprep.subr.bf16.mxu1 %v6527_v2 }
0x2abd   : > { %6063 = vmatpush3.bf16.msra.mxu1 %v4207_v40 }
0x2abe   : > { %6064 = vmatprep.subr.bf16.mxu1 %v6527_v2 }
0x2ac1   : > { %6065 = vmatpush3.bf16.msra.mxu1 %v4208_v12 }
0x2ac2   : > { %6066 = vmatprep.subr.bf16.mxu1 %v6527_v2 }
0x2ac5   : > { %6067 = vmatpush3.bf16.msra.mxu1 %v4209_v7  ;;  %v5205_v7 = vld [vmem:[%s6866_s13 + $0x3a0] sm:$0xff] }
0x2ac6   : > { %6068 = vmatprep.subr.bf16.mxu1 %v6527_v2 }
0x2ac9   : > { %6069 = vmatpush3.bf16.msra.mxu1 %v4210_v16  ;;  %v4310_v16 = vunpack.c.l.s8.bf16 %v5205_v7 }
0x2aca   : > { %6070 = vmatprep.subr.bf16.mxu1 %v6527_v2 }
0x2b82   : > { %v5657_v17 = vpop.f32.mrb[80].mxu0  ;;  %v5679_v9 = vpop.f32.mrb[80].mxu1 }
0x2b83   : > { %v5658_v18 = vpop.f32.mrb[81].mxu0  ;;  %v5680_v19 = vpop.f32.mrb[81].mxu1 }
0x2b84   : > { %v5659_v20 = vadd.f32 %v5658_v18, %v5657_v17  ;;  %v5681_v21 = vadd.f32 %v5680_v19, %v5679_v9  ;;  %v5660_v63 = vpop.f32.mrb[82].mxu0  ;;  %v5682_v24 = vpop.f32.mrb[82].mxu1  ;;  %v4211_v17 = vunpack.c.h.s8.bf16 %v5200_v15  ;;  %v7752_v9 = vld [vmem:[%s6876_s30 + $0x78] sm:$0xff]  ;;  %v7755_v18 = vld [vmem:[%s6876_s30 + $0x70] sm:$0xff] }
0x2b85   : > { %v5661_v62 = vpop.f32.mrb[83].mxu0  ;;  %v5683_v26 = vpop.f32.mrb[83].mxu1  ;;  %v4171_v19 = vrot.slane %v7752_v9, %v6921_v32  ;;  %v4198_v50 = vrot.slane %v7755_v18, %v6945_v59  ;;  %v5207_v15 = vld [vmem:[%s6866_s13 + $0x3b0] sm:$0xff] }
0x2b86   : > { %v4069_v22 = vadd.f32 %v5681_v21, %v5659_v20  ;;  %6071 = vmatpush3.bf16.msra.mxu1 %v4211_v17  ;;  %v4176_v20 = vrot.slane %v7755_v18, %v6927_v34  ;;  %v4312_v17 = vunpack.c.l.s8.bf16 %v5207_v15 }
0x2b88   : > { %v4078_v28 = vmul.f32 %v4077_v23, %v4069_v22 }
0x2b89   : > { %6073 = vmatmul.mubr.bf16.vlgmr.msra.gmra.mrb[84].mxu1 %v6915_v29 }
0x2b8a   : > { %v4083_v60 = vadd.f32 %v4082_v6, %v4078_v28  ;;  %4407 = vmatprep.mubr.bf16.mxu1 %v6529_v5 }
0x2b8c   : > { %v4084_v36 = vadd.f32 %v4083_v60, %v7683_v44  ;;  %v4122_v44 = vunpack.c.h.s8.bf16 %v5194_v47  ;;  %v4193_v47 = vrot.slane %v7755_v18, %v6942_v58 }
0x2b8e   : > { %4085 = vadd.xlane.f32.xlu0 %v4084_v36  ;;  %6043 = vmatpush3.bf16.msra.mxu0 %v4122_v44 }
0x2b8f   : > { %6044 = vmatprep.subr.bf16.mxu0 %v6527_v2 }
0x2b92   : > { %6045 = vmatpush3.bf16.msra.mxu0 %v4123_v51 }
0x2b93   : > { %6046 = vmatprep.subr.bf16.mxu0 %v6527_v2 }
0x2b96   : > { %6047 = vmatpush3.bf16.msra.mxu0 %v4124_v31 }
0x2b97   : > { %6048 = vmatprep.subr.bf16.mxu0 %v6527_v2 }
0x2b9a   : > { %6049 = vmatpush3.bf16.msra.mxu0 %v4125_v35 }
0x2b9b   : > { %6050 = vmatprep.subr.bf16.mxu0 %v6527_v2 }
0x2b9e   : > { %6051 = vmatpush3.bf16.msra.mxu0 %v4126_v52  ;;  %v5202_v52 = vld [vmem:[%s6866_s13 + $0x388] sm:$0xff] }
0x2c1b   : > { %v4086_v3 = vpop.xlane.xlu0 %4085 }
0x2c1c   : > { %v4087_v41 = vmul.f32 0.0078125, %v4086_v3 }
0x2c1e   : > { %v4088_v38 = vsub.f32 %v4084_v36, %v4087_v41  ;;  %v4255_v41 = vrot.slane %v7752_v9, %v6937_v56 }
0x2c20   : > { %v4089_v45 = vmul.f32 %v4088_v38, %v4088_v38 }
0x2c22   : > { %4090 = vadd.xlane.f32.xlu1 %v4089_v45  ;;  %v4260_v45 = vrot.slane %v7755_v18, %v6921_v32 }
0x2c5c   : > { %v4246_v28 = vpop.f32.mrb[84].mxu1 }
0x2c5d   : > { %v6074_v60 = vpop.f32.mrb[85].mxu1 }
0x2c5e   : > { %v4249_v36 = vpop.f32.mrb[86].mxu1 }
0x2c5f   : > { %v6075_v27 = vpop.f32.mrb[87].mxu1 }
0x2c60   : > { %v5214_v27 = vld [vmem:[%s6866_s13 + $0x3e8] sm:$0xff] }
0x2caf   : > { %v4091_v33 = vpop.xlane.xlu1 %4090 }
0x2cb0   : > { %v4092_v53 = vmul.f32 0.0078125, %v4091_v33  ;;  %v5204_v33 = vld [vmem:[%s6866_s13 + $0x398] sm:$0xff] }
0x2cb2   : > { %v4093_v55 = vadd.f32 1e-05, %v4092_v53  ;;  %v5201_v53 = vld [vmem:[%s6866_s13 + $0x380] sm:$0xff] }
0x2cb3   : > { %v4306_v59 = vunpack.c.h.s8.bf16 %v5201_v53 }
0x2cb4   : > { %6225 = vrsqrt.f32 %v4093_v55  ;;  %v4303_v55 = vunpack.c.l.s8.bf16 %v5202_v52 }
0x2cb6   : > { %4334 = vmatprep.subr.bf16.mxu0 %v4303_v55 }
0x2cbe   : > { %v6226_v57 = vpop.eup %6225 }
0x2cbf   : > { %v4095_v61 = vmul.f32 %v6226_v57, %v4088_v38  ;;  %v4256_v38 = vmul.f32 %v4255_v41, %v4246_v28  ;;  %v4302_v57 = vunpack.c.l.s8.bf16 %v5201_v53  ;;  %v5213_v41 = vld [vmem:[%s6866_s13 + $0x3e0] sm:$0xff] }
0x2cc1   : > { %v4100_v54 = vmul.f32 %v4099_v37, %v4095_v61  ;;  %v4261_v51 = vadd.f32 %v4260_v45, %v4256_v38  ;;  %v4305_v37 = vunpack.c.l.s8.bf16 %v5204_v33  ;;  %v4307_v61 = vunpack.c.h.s8.bf16 %v5202_v52  ;;  %v5215_v38 = vld [vmem:[%s6866_s13 + $0x3f0] sm:$0xff] }
0x2cc2   : > { %v4326_v45 = vunpack.c.l.s8.bf16 %v5213_v41 }
0x2cc3   : > { %v4105_v43 = vadd.f32 %v4104_v25, %v4100_v54  ;;  %v5203_v25 = vld [vmem:[%s6866_s13 + $0x390] sm:$0xff]  ;;  %4375 = vmatprep.subr.bf16.mxu1 %v4305_v37  ;;  %v4277_v37 = vrot.slane %v7755_v18, %v6978_v13 }
0x2cc4   : > { %v4304_v54 = vunpack.c.l.s8.bf16 %v5203_v25  ;;  %v4308_v4 = vunpack.c.h.s8.bf16 %v5203_v25 }
0x2cc5   : > { %v4127_v1 = vpack.c.bf16 %v4105_v43, %v4105_v43 }
0x2cc6   : > { %4376 = vmatpush1.bf16.msra.mxu1 %v4304_v54 }
0x2cc7   : > { %6053 = vmatmul.mubr.bf16.vlgmr.msra.gmra.mrb[84].mxu0 %v4127_v1  ;;  %v5206_v1 = vld [vmem:[%s6866_s13 + $0x3a8] sm:$0xff] }
0x2cc8   : > { %4366 = vmatprep.mubr.bf16.mxu0 %v6529_v5  ;;  %4335 = vmatpush1.bf16.msra.mxu0 %v4302_v57  ;;  %v4311_v0 = vunpack.c.l.s8.bf16 %v5206_v1 }
0x2cc9   : > { %4336 = vmatprep.subr.bf16.mxu0 %v4307_v61  ;;  %v4282_v61 = vrot.slane %v7755_v18, %v6981_v14 }
0x2ccc   : > { %4337 = vmatpush1.bf16.msra.mxu0 %v4306_v59 }
0x2ccd   : > { %4338 = vmatprep.subr.bf16.mxu0 %v4311_v0 }
0x2cd0   : > { %4339 = vmatpush1.bf16.msra.mxu0 %v4310_v16  ;;  %v5226_v16 = vld [vmem:[%s6874_s9 + $0x3c8] sm:$0xff] }
0x2d9a   : > { %v4162_v21 = vpop.f32.mrb[84].mxu0 }
0x2d9b   : > { %v4172_v23 = vmul.f32 %v4171_v19, %v4162_v21  ;;  %v6054_v63 = vpop.f32.mrb[85].mxu0  ;;  %v4315_v19 = vunpack.c.h.s8.bf16 %v5206_v1  ;;  %v4314_v21 = vunpack.c.h.s8.bf16 %v5205_v7  ;;  %v5225_v1 = vld [vmem:[%s6874_s9 + $0x3c0] sm:$0xff] }
0x2d9c   : > { %v4165_v24 = vpop.f32.mrb[86].mxu0  ;;  %v5210_v63 = vld [vmem:[%s6866_s13 + $0x3c8] sm:$0xff] }
0x2d9d   : > { %v4177_v2 = vadd.f32 %v4176_v20, %v4172_v23  ;;  %v6055_v62 = vpop.f32.mrb[87].mxu0  ;;  %v4317_v20 = vunpack.c.h.s8.bf16 %v5208_v30  ;;  %v4316_v23 = vunpack.c.h.s8.bf16 %v5207_v15  ;;  %4340 = vmatprep.subr.bf16.mxu0 %v4315_v19  ;;  %v5212_v24 = vld [vmem:[%s6866_s13 + $0x3d8] sm:$0xff]  ;;  %v5218_v15 = vld [vmem:[%s6874_s9 + $0x388] sm:$0xff]  ;;  %v4499_v19 = vunpack.c.l.s8.bf16 %v5226_v16 }
0x2d9e   : > { %4341 = vmatpush1.bf16.msra.mxu0 %v4314_v21  ;;  %v4321_v62 = vunpack.c.l.s8.bf16 %v5212_v24  ;;  %v4325_v28 = vunpack.c.h.s8.bf16 %v5212_v24  ;;  %v4484_v24 = vunpack.c.h.s8.bf16 %v5218_v15 }
0x2d9f   : > { %v4178_v26 = vadd.f32 %v4177_v2, %v4105_v43  ;;  %v4309_v43 = vunpack.c.h.s8.bf16 %v5204_v33  ;;  %v4319_v2 = vunpack.c.l.s8.bf16 %v5210_v63 }
0x2da1   : > { %4179 = vadd.xlane.f32.xlu0 %v4178_v26  ;;  %4377 = vmatprep.subr.bf16.mxu1 %v4309_v43  ;;  %v5217_v43 = vld [vmem:[%s6874_s9 + $0x380] sm:$0xff] }
0x2da2   : > { %4378 = vmatpush1.bf16.msra.mxu1 %v4308_v4  ;;  %4342 = vmatprep.subr.bf16.mxu0 %v4319_v2  ;;  %v4481_v59 = vunpack.c.l.s8.bf16 %v5217_v43  ;;  %v4497_v4 = vunpack.c.l.s8.bf16 %v5225_v1  ;;  %v4482_v14 = vunpack.c.h.s8.bf16 %v5217_v43  ;;  %v4500_v2 = vunpack.c.h.s8.bf16 %v5226_v16 }
0x2da3   : > { %4379 = vmatprep.subr.bf16.mxu1 %v4313_v48 }
0x2da6   : > { %4380 = vmatpush1.bf16.msra.mxu1 %v4312_v17  ;;  %v4483_v17 = vunpack.c.l.s8.bf16 %v5218_v15 }
0x2da7   : > { %4381 = vmatprep.subr.bf16.mxu1 %v4317_v20 }
0x2daa   : > { %4382 = vmatpush1.bf16.msra.mxu1 %v4316_v23  ;;  %v5223_v23 = vld [vmem:[%s6874_s9 + $0x3b0] sm:$0xff] }
0x2dab   : > { %4383 = vmatprep.subr.bf16.mxu1 %v4321_v62  ;;  %v4493_v62 = vunpack.c.l.s8.bf16 %v5223_v23 }
0x2e2e   : > { %v4180_v29 = vpop.xlane.xlu0 %4179 }
0x2e2f   : > { %v4181_v5 = vmul.f32 0.0078125, %v4180_v29  ;;  %v5211_v29 = vld [vmem:[%s6866_s13 + $0x3d0] sm:$0xff] }
0x2e30   : > { %v4324_v36 = vunpack.c.h.s8.bf16 %v5211_v29 }
0x2e31   : > { %v4182_v22 = vsub.f32 %v4178_v26, %v4181_v5  ;;  %v5209_v26 = vld [vmem:[%s6866_s13 + $0x3c0] sm:$0xff] }
0x2e32   : > { %v4318_v5 = vunpack.c.l.s8.bf16 %v5209_v26  ;;  %v4322_v60 = vunpack.c.h.s8.bf16 %v5209_v26 }
0x2e33   : > { %v4183_v6 = vmul.f32 %v4182_v22, %v4182_v22 }
0x2e34   : > { %4343 = vmatpush1.bf16.msra.mxu0 %v4318_v5  ;;  %v5227_v5 = vld [vmem:[%s6874_s9 + $0x3d0] sm:$0xff] }
0x2e35   : > { %4184 = vadd.xlane.f32.xlu1 %v4183_v6  ;;  %v4323_v6 = vunpack.c.h.s8.bf16 %v5210_v63  ;;  %v5231_v63 = vld [vmem:[%s6874_s9 + $0x3f0] sm:$0xff] }
0x2e36   : > { %v4509_v26 = vunpack.c.l.s8.bf16 %v5231_v63 }
0x2e37   : > { %4344 = vmatprep.subr.bf16.mxu0 %v4323_v6  ;;  %v4501_v6 = vunpack.c.l.s8.bf16 %v5227_v5 }
0x2e38   : > { %4345 = vmatpush1.bf16.msra.mxu0 %v4322_v60  ;;  %v4510_v60 = vunpack.c.h.s8.bf16 %v5231_v63 }
0x2ec2   : > { %v4185_v11 = vpop.xlane.xlu1 %4184 }
0x2ec3   : > { %v4186_v39 = vmul.f32 0.0078125, %v4185_v11  ;;  %v5216_v11 = vld [vmem:[%s6866_s13 + $0x3f8] sm:$0xff] }
0x2ec5   : > { %v4187_v3 = vadd.f32 1e-05, %v4186_v39  ;;  %v4327_v39 = vunpack.c.l.s8.bf16 %v5214_v27 }
0x2ec7   : > { %6227 = vrsqrt.f32 %v4187_v3  ;;  %v4329_v3 = vunpack.c.l.s8.bf16 %v5216_v11  ;;  %4346 = vmatprep.subr.bf16.mxu0 %v4327_v39  ;;  %v5232_v39 = vld [vmem:[%s6874_s9 + $0x3f8] sm:$0xff] }
0x2ec8   : > { %4347 = vmatpush1.bf16.msra.mxu0 %v4326_v45  ;;  %v5228_v45 = vld [vmem:[%s6874_s9 + $0x3d8] sm:$0xff] }
0x2ed1   : > { %v6228_v49 = vpop.eup %6227 }
0x2ed2   : > { %v4189_v44 = vmul.f32 %v6228_v49, %v4182_v22  ;;  %v4320_v22 = vunpack.c.l.s8.bf16 %v5211_v29  ;;  %v4331_v49 = vunpack.c.h.s8.bf16 %v5214_v27  ;;  %v5219_v29 = vld [vmem:[%s6874_s9 + $0x390] sm:$0xff]  ;;  %v4502_v27 = vunpack.c.h.s8.bf16 %v5227_v5 }
0x2ed4   : > { %v4194_v31 = vmul.f32 %v4193_v47, %v4189_v44  ;;  %4384 = vmatpush1.bf16.msra.mxu1 %v4320_v22  ;;  %v4328_v47 = vunpack.c.l.s8.bf16 %v5215_v38  ;;  %v4333_v44 = vunpack.c.h.s8.bf16 %v5216_v11  ;;  %4348 = vmatprep.subr.bf16.mxu0 %v4331_v49  ;;  %v4485_v22 = vunpack.c.l.s8.bf16 %v5219_v29  ;;  %v5224_v11 = vld [vmem:[%s6874_s9 + $0x3b8] sm:$0xff] }
0x2ed5   : > { %4385 = vmatprep.subr.bf16.mxu1 %v4325_v28  ;;  %v4494_v28 = vunpack.c.h.s8.bf16 %v5223_v23  ;;  %v4503_v49 = vunpack.c.l.s8.bf16 %v5228_v45 }
0x2ed6   : > { %v4199_v46 = vadd.f32 %v4198_v50, %v4194_v31  ;;  %v4330_v50 = vunpack.c.h.s8.bf16 %v5213_v41  ;;  %v5221_v31 = vld [vmem:[%s6874_s9 + $0x3a0] sm:$0xff]  ;;  %v4511_v41 = vunpack.c.l.s8.bf16 %v5232_v39 }
0x2ed7   : > { %v4490_v48 = vunpack.c.h.s8.bf16 %v5221_v31 }
0x2ed8   : > { %v4262_v35 = vadd.f32 %v4261_v51, %v4199_v46  ;;  %4386 = vmatpush1.bf16.msra.mxu1 %v4324_v36  ;;  %v4332_v51 = vunpack.c.h.s8.bf16 %v5215_v38  ;;  %4349 = vmatpush1.bf16.msra.mxu0 %v4330_v50  ;;  %v5229_v46 = vld [vmem:[%s6874_s9 + $0x3e0] sm:$0xff]  ;;  %v4486_v36 = vunpack.c.h.s8.bf16 %v5219_v29  ;;  %v5220_v38 = vld [vmem:[%s6874_s9 + $0x398] sm:$0xff]  ;;  %v4512_v50 = vunpack.c.h.s8.bf16 %v5232_v39 }
0x2ed9   : > { %4387 = vmatprep.subr.bf16.mxu1 %v4329_v3  ;;  %v4505_v52 = vunpack.c.l.s8.bf16 %v5229_v46  ;;  %v4506_v13 = vunpack.c.h.s8.bf16 %v5229_v46  ;;  %v4495_v3 = vunpack.c.l.s8.bf16 %v5224_v11  ;;  %v5189_v46 = vld [vmem:[%s6868_s29 + $0xe0] sm:$0xff] }
0x2eda   : > { %4263 = vadd.xlane.f32.xlu0 %v4262_v35 }
0x2edc   : > { %4388 = vmatpush1.bf16.msra.mxu1 %v4328_v47  ;;  %v4487_v47 = vunpack.c.l.s8.bf16 %v5220_v38 }
0x2edd   : > { %4389 = vmatprep.subr.bf16.mxu1 %v4333_v44  ;;  %v4496_v44 = vunpack.c.h.s8.bf16 %v5224_v11 }
0x2ee0   : > { %4390 = vmatpush1.bf16.msra.mxu1 %v4332_v51  ;;  %v4488_v51 = vunpack.c.h.s8.bf16 %v5220_v38 }
0x2ee1   : > { %5725 = vmatprep.subr.bf16.mxu1 %v4505_v52  ;;  %v5190_v52 = vld [vmem:[%s6868_s29 + $0xe8] sm:$0xff] }
0x2f67   : > { %v4264_v8 = vpop.xlane.xlu0 %4263 }
0x2f68   : > { %v4265_v40 = vmul.f32 0.0078125, %v4264_v8  ;;  %v5222_v8 = vld [vmem:[%s6874_s9 + $0x3a8] sm:$0xff] }
0x2f69   : > { %v4492_v20 = vunpack.c.h.s8.bf16 %v5222_v8 }
0x2f6a   : > { %v7775_v10 = vsub.f32 %v4262_v35, %v4265_v40  ;;  %v4489_v35 = vunpack.c.l.s8.bf16 %v5221_v31  ;;  %v5230_v40 = vld [vmem:[%s6874_s9 + $0x3e8] sm:$0xff]  ;;  %v4504_v31 = vunpack.c.h.s8.bf16 %v5228_v45 }
0x2f6b   : > { %v4507_v7 = vunpack.c.l.s8.bf16 %v5230_v40  ;;  %v4508_v21 = vunpack.c.h.s8.bf16 %v5230_v40 }
0x2f6c   : > { %v4267_v12 = vmul.f32 %v7775_v10, %v7775_v10  ;;  %5703 = vmatprep.subr.bf16.mxu0 %v4489_v35  ;;  %v5191_v35 = vld [vmem:[%s6868_s29 + $0xf0] sm:$0xff] }
0x2f6e   : > { %4268 = vadd.xlane.f32.xlu1 %v4267_v12  ;;  %v4491_v12 = vunpack.c.l.s8.bf16 %v5222_v8 }
0x2ffb   : > { %v4269_v33 = vpop.xlane.xlu1 %4268 }
0x2ffc   : > { %v4270_v53 = vmul.f32 0.0078125, %v4269_v33  ;;  %v5192_v33 = vld [vmem:[%s6868_s29 + $0xf8] sm:$0xff] }
0x2ffe   : > { %v4271_v55 = vadd.f32 1e-05, %v4270_v53  ;;  %v4419_v53 = vrot.slane %v5189_v46, %v6921_v32 }
0x3000   : > { %6229 = vrsqrt.f32 %v4271_v55  ;;  %v4427_v55 = vrot.slane %v5191_v35, %v6921_v32 }
0x300a   : > { %v6230_v57 = vpop.eup %6229 }
0x300b   : > { %v4273_v25 = vmul.f32 %v6230_v57, %v7775_v10  ;;  %v4498_v10 = vunpack.c.h.s8.bf16 %v5225_v1  ;;  %v4431_v57 = vrot.slane %v5192_v33, %v6921_v32  ;;  %v4443_v1 = vrot.slane %v5190_v52, %v6927_v34 }
0x300d   : > { %v4278_v54 = vmul.f32 %v4277_v37, %v4273_v25  ;;  %v4423_v37 = vrot.slane %v5190_v52, %v6921_v32  ;;  %v4439_v25 = vrot.slane %v5189_v46, %v6927_v34 }
0x300f   : > { %v7798_v30 = vadd.f32 %v4282_v61, %v4278_v54  ;;  %v4447_v61 = vrot.slane %v5191_v35, %v6927_v34  ;;  %v4618_v35 = vrot.slane %v7755_v18, %v7041_v42 }
0x3011   : > { %v4284_v0 = vpack.c.bf16 %v7798_v30, %v7798_v30 }
0x3013   : > { %4367 = vmatmul.mubr.bf16.vlgmr.msra.gmra.mrb[88].mxu0 %v4284_v0  ;;  %4408 = vmatmul.mubr.bf16.vlgmr.msra.gmra.mrb[88].mxu1 %v4284_v0 }
0x3014   : > { %5704 = vmatpush3.bf16.msra.mxu0 %v4481_v59  ;;  %5726 = vmatpush3.bf16.msra.mxu1 %v4497_v4  ;;  %v4451_v59 = vrot.slane %v5192_v33, %v6927_v34 }
0x3015   : > { %5705 = vmatprep.subr.bf16.mxu0 %v4490_v48  ;;  %5727 = vmatprep.subr.bf16.mxu1 %v4506_v13 }
0x3018   : > { %5706 = vmatpush3.bf16.msra.mxu0 %v4482_v14  ;;  %5728 = vmatpush3.bf16.msra.mxu1 %v4498_v10 }
0x3019   : > { %5707 = vmatprep.subr.bf16.mxu0 %v4491_v12  ;;  %5729 = vmatprep.subr.bf16.mxu1 %v4507_v7 }
0x301c   : > { %5708 = vmatpush3.bf16.msra.mxu0 %v4483_v17  ;;  %5730 = vmatpush3.bf16.msra.mxu1 %v4499_v19 }
0x301d   : > { %5709 = vmatprep.subr.bf16.mxu0 %v4492_v20  ;;  %5731 = vmatprep.subr.bf16.mxu1 %v4508_v21 }
0x3020   : > { %5710 = vmatpush3.bf16.msra.mxu0 %v4484_v24  ;;  %5732 = vmatpush3.bf16.msra.mxu1 %v4500_v2 }
0x3021   : > { %5711 = vmatprep.subr.bf16.mxu0 %v4493_v62  ;;  %5733 = vmatprep.subr.bf16.mxu1 %v4509_v26 }
0x3024   : > { %5712 = vmatpush3.bf16.msra.mxu0 %v4485_v22  ;;  %5734 = vmatpush3.bf16.msra.mxu1 %v4501_v6 }
0x3025   : > { %5713 = vmatprep.subr.bf16.mxu0 %v4494_v28  ;;  %5735 = vmatprep.subr.bf16.mxu1 %v4510_v60  ;;  %v4596_v60 = vrot.slane %v7752_v9, %v6942_v58 }
0x3028   : > { %5714 = vmatpush3.bf16.msra.mxu0 %v4486_v36  ;;  %5736 = vmatpush3.bf16.msra.mxu1 %v4502_v27 }
0x3029   : > { %5715 = vmatprep.subr.bf16.mxu0 %v4495_v3  ;;  %5737 = vmatprep.subr.bf16.mxu1 %v4511_v41  ;;  %v4601_v41 = vrot.slane %v7755_v18, %v6937_v56  ;;  %v4623_v56 = vrot.slane %v7752_v9, %v6927_v34 }
0x302c   : > { %5716 = vmatpush3.bf16.msra.mxu0 %v4487_v47  ;;  %5738 = vmatpush3.bf16.msra.mxu1 %v4503_v49 }
0x302d   : > { %5717 = vmatprep.subr.bf16.mxu0 %v4496_v44  ;;  %5739 = vmatprep.subr.bf16.mxu1 %v4512_v50 }
0x3030   : > { %5718 = vmatpush3.bf16.msra.mxu0 %v4488_v51  ;;  %5740 = vmatpush3.bf16.msra.mxu1 %v4504_v31 }
0x30e6   : > { %v4368_v54 = vpop.f32.mrb[88].mxu0  ;;  %v4409_v43 = vpop.f32.mrb[88].mxu1 }
0x30e7   : > { %v4432_v4 = vmul.f32 %v4419_v53, %v4368_v54  ;;  %v4434_v0 = vmul.f32 %v4427_v55, %v4409_v43  ;;  %v4370_v48 = vpop.f32.mrb[89].mxu0  ;;  %v4411_v13 = vpop.f32.mrb[89].mxu1 }
0x30e8   : > { %v4433_v8 = vmul.f32 %v4423_v37, %v4370_v48  ;;  %v4435_v40 = vmul.f32 %v4431_v57, %v4411_v13  ;;  %v4372_v14 = vpop.f32.mrb[90].mxu0  ;;  %v4413_v10 = vpop.f32.mrb[90].mxu1 }
0x30e9   : > { %v4452_v12 = vadd.f32 %v4439_v25, %v4432_v4  ;;  %v4454_v32 = vadd.f32 %v4447_v61, %v4434_v0  ;;  %v4373_v7 = vpop.f32.mrb[91].mxu0  ;;  %v4414_v15 = vpop.f32.mrb[91].mxu1 }
0x30ea   : > { %v4453_v16 = vadd.f32 %v4443_v1, %v4433_v8  ;;  %v4455_v17 = vadd.f32 %v4451_v59, %v4435_v40 }
0x30eb   : > { %v4456_v19 = vmax.f32 %v4452_v12, 0.0  ;;  %v4458_v20 = vmax.f32 %v4454_v32, 0.0 }
0x30ec   : > { %v4457_v21 = vmax.f32 %v4453_v16, 0.0  ;;  %v4459_v23 = vmax.f32 %v4455_v17, 0.0 }
0x30ed   : > { %v4460_v2 = vpack.c.bf16 %v4456_v19, %v4456_v19  ;;  %v4462_v62 = vpack.c.bf16 %v4458_v20, %v4458_v20 }
0x30ee   : > { %v4461_v63 = vpack.c.bf16 %v4457_v21, %v4457_v21  ;;  %v4463_v24 = vpack.c.bf16 %v4459_v23, %v4459_v23 }
0x30f0   : > { %4545 = vmatprep.mubr.bf16.mxu0 %v4461_v63  ;;  %4585 = vmatprep.mubr.bf16.mxu1 %v4463_v24 }
0x30f1   : > { %4546 = vmatmul.mubr.bf16.vlgmr.msra.gmra.mrb[92].mxu0 %v4460_v2  ;;  %4586 = vmatmul.mubr.bf16.vlgmr.msra.gmra.mrb[92].mxu1 %v4462_v62 }
0x31c4   : > { %v5719_v26 = vpop.f32.mrb[92].mxu0  ;;  %v5741_v29 = vpop.f32.mrb[92].mxu1 }
0x31c5   : > { %v5720_v5 = vpop.f32.mrb[93].mxu0  ;;  %v5742_v22 = vpop.f32.mrb[93].mxu1 }
0x31c6   : > { %v5721_v6 = vadd.f32 %v5720_v5, %v5719_v26  ;;  %v5743_v28 = vadd.f32 %v5742_v22, %v5741_v29  ;;  %v5722_v36 = vpop.f32.mrb[94].mxu0  ;;  %v5744_v27 = vpop.f32.mrb[94].mxu1 }
0x31c7   : > { %v5723_v11 = vpop.f32.mrb[95].mxu0  ;;  %v5745_v39 = vpop.f32.mrb[95].mxu1 }
0x31c8   : > { %v4588_v3 = vadd.f32 %v5743_v28, %v5721_v6 }
0x31ca   : > { %v4597_v38 = vmul.f32 %v4596_v60, %v4588_v3 }
0x31cc   : > { %v4602_v45 = vadd.f32 %v4601_v41, %v4597_v38 }
0x31ce   : > { %v4603_v47 = vadd.f32 %v4602_v45, %v7798_v30 }
0x31d0   : > { %4604 = vadd.xlane.f32.xlu0 %v4603_v47 }
0x325d   : > { %v4605_v49 = vpop.xlane.xlu0 %4604 }
0x325e   : > { %v4606_v44 = vmul.f32 0.0078125, %v4605_v49 }
0x3260   : > { %v4607_v50 = vsub.f32 %v4603_v47, %v4606_v44 }
0x3262   : > { %v4608_v51 = vmul.f32 %v4607_v50, %v4607_v50 }
0x3264   : > { %4609 = vadd.xlane.f32.xlu1 %v4608_v51 }
0x32f1   : > { %v4610_v31 = vpop.xlane.xlu1 %4609 }
0x32f2   : > { %v4611_v58 = vmul.f32 0.0078125, %v4610_v31 }
0x32f4   : > { %v4612_v46 = vadd.f32 1e-05, %v4611_v58 }
0x32f6   : > { %6231 = vrsqrt.f32 %v4612_v46 }
0x3300   : > { %v6232_v52 = vpop.eup %6231 }
0x3301   : > { %v4614_v33 = vmul.f32 %v6232_v52, %v4607_v50  ;;  %4629 = sbr.rel (%p5233_p5) target bundleno = 13623 (0x3537), region = 80 }
0x3303   : > { %v4619_v53 = vmul.f32 %v4618_v35, %v4614_v33 }
0x3305   : > { %v4624_v30 = vadd.f32 %v4623_v56, %v4619_v53 }
0x3307   : > { %4625 = vst [vmem:[#allocation13] sm:$0xff] %v4624_v30 }
0x3308   : > { %4643 = vadd.xlane.f32.xlu0 %v4624_v30  ;;  %s6530_s21 = smov [#allocation14]   ;;  %s6413_s18 = scalar_lea.hbm %s7900_s7, 1024 }
0x3309   : > { %s4637_s3 = sshll.u32 %s6530_s21, 4  ;;  %p6414_p7 = scmp.ne.s32.totalorder %s7900_s7, %s6413_s18  ;;  %s4638_s3 = int_to_ptr.vmem [resolvable:$true] %s4637_s3 }
0x330a   : > { %p6417_p2 = scmp.lt.u32.totalorder %s6413_s18, %s7900_s7 }
0x330c   : > { %p6419_p10 = pnand %p6417_p2, %p6414_p7 }
0x3395   : > { %v4644_v55 = vpop.xlane.xlu0 %4643 }
0x3396   : > { %v4645_v37 = vmul.f32 0.0078125, %v4644_v55 }
0x3398   : > { %v4646_v57 = vsub.f32 %v4624_v30, %v4645_v37 }
0x339a   : > { %v4647_v25 = vmul.f32 %v4646_v57, %v4646_v57 }
0x339c   : > { %4648 = vadd.xlane.f32.xlu0 %v4647_v25 }
0x339d   : > { %6422 = shalt.err (!%p6419_p10)  }
0x339e   : > { %s6423_s27 = scalar_lea.vmem %s4638_s3, 1024  ;;  %p6428_p6 = scmp.lt.s32.totalorder %s4638_s3, %s4638_s3 }
0x339f   : > { %p6424_p13 = scmp.ne.s32.totalorder %s4638_s3, %s6423_s27  ;;  %p6429_p9 = scmp.lt.s32.totalorder %s6423_s27, %s6423_s27 }
0x33a1   : > { %p6430_p4 = por %p6429_p9, %p6428_p6 }
0x33a3   : > { %p6431_p11 = pnand %p6430_p4, %p6424_p13 }
0x33a5   : > { %6434 = shalt.err (!%p6431_p11)  }
0x33a6   : > { %4640 = dma.hbm_to_vmem [thread:$0]  %s7900_s7, 1024, %s4638_s3, [#allocation15]  ;;  %v5234_v61 = vld [vmem:[%s7899_s6 + $0x1] ss:$0 sm:$0xff]  ;;  %v5235_v43 = vld [vmem:[%s7899_s6 + $0x2] ss:$0 sm:$0xff] }
0x3429   : > { %v4649_v34 = vpop.xlane.xlu0 %4648 }
0x342a   : > { %v4650_v42 = vmul.f32 0.0078125, %v4649_v34 }
0x342c   : > { %v4651_v9 = vadd.f32 1e-05, %v4650_v42 }
0x342e   : > { %6233 = vrsqrt.f32 %v4651_v9 }
0x3438   : > { %v6234_v18 = vpop.eup %6233 }
0x3439   : > { %v4653_v54 = vmul.f32 %v6234_v18, %v4646_v57 }
0x343b   : > { %v4658_v1 = vmul.f32 %v5234_v61, %v4653_v54 }
0x343d   : > { %v4663_v59 = vadd.f32 %v5235_v43, %v4658_v1 }
0x343e   : > { %6493 = dma.done.wait [#allocation15], 1024 }
0x343f   : > { %6494 = vsyncadd [#allocation15], 4294966272  ;;  %v6531_v4 = vmov 0.0   ;;  %vm6532_vm1 = vmmov 0   ;;  %v4669_v0 = vld [vmem:[#allocation14] sm:$0xff]  ;;  %v4670_v48 = vld [vmem:[#allocation14 + $0x8] sm:$0xff]  ;;  %v4668_v32 = vpack.c.bf16 %v4663_v59, %v4663_v59 }
0x3440   : > { %6076 = vmatprep.subr.bf16.mxu0 %v6531_v4  ;;  %6092 = vmatprep.mubr.msk.bf16.mxu0 %vm6532_vm1, %v6531_v4  ;;  %v4671_v13 = vld [vmem:[#allocation14 + $0x10] sm:$0xff]  ;;  %v4672_v8 = vld [vmem:[#allocation14 + $0x18] sm:$0xff]  ;;  %v4673_v40 = vld [vmem:[#allocation14 + $0x20] sm:$0xff] }
0x3441   : > { %6077 = vmatpush3.bf16.msra.mxu0 %v4669_v0  ;;  %v4674_v14 = vld [vmem:[#allocation14 + $0x28] sm:$0xff]  ;;  %v4675_v10 = vld [vmem:[#allocation14 + $0x30] sm:$0xff]  ;;  %v4676_v12 = vld [vmem:[#allocation14 + $0x38] sm:$0xff] }
0x3442   : > { %6078 = vmatprep.subr.bf16.mxu0 %v6531_v4  ;;  %v5236_v7 = vld [vmem:[%s7899_s6 + $0x3] ss:$0 sm:$0xff] }
0x3445   : > { %6079 = vmatpush3.bf16.msra.mxu0 %v4670_v48 }
0x3446   : > { %6080 = vmatprep.subr.bf16.mxu0 %v6531_v4 }
0x3449   : > { %6081 = vmatpush3.bf16.msra.mxu0 %v4671_v13 }
0x344a   : > { %6082 = vmatprep.subr.bf16.mxu0 %v6531_v4 }
0x344d   : > { %6083 = vmatpush3.bf16.msra.mxu0 %v4672_v8 }
0x344e   : > { %6084 = vmatprep.subr.bf16.mxu0 %v6531_v4 }
0x3451   : > { %6085 = vmatpush3.bf16.msra.mxu0 %v4673_v40 }
0x3452   : > { %6086 = vmatprep.subr.bf16.mxu0 %v6531_v4 }
0x3455   : > { %6087 = vmatpush3.bf16.msra.mxu0 %v4674_v14 }
0x3456   : > { %6088 = vmatprep.subr.bf16.mxu0 %v6531_v4 }
0x3459   : > { %6089 = vmatpush3.bf16.msra.mxu0 %v4675_v10 }
0x345a   : > { %6090 = vmatprep.subr.bf16.mxu0 %v6531_v4 }
0x345d   : > { %6091 = vmatpush3.bf16.msra.mxu0 %v4676_v12 }
0x3460   : > { %6093 = vmatmul.mubr.bf16.vlgmr.msra.gmra.mrb[0].mxu0 %v4668_v32 }
0x3533   : > { %v4716_v15 = vpop.f32.mrb[0].mxu0 }
0x3534   : > { %v4717_v16 = vadd.f32 %v5236_v7, %v4716_v15  ;;  %v6094_v17 = vpop.f32.mrb[1].mxu0 }
0x3535   : > { %v4719_v19 = vpop.f32.mrb[2].mxu0 }
0x3536   : > { %4722 = vst [vmem:[#allocation13] sm:$0xff] %v4717_v16  ;;  %v6095_v20 = vpop.f32.mrb[3].mxu0 }
0x3537 PF: > { %p6137_p0 = scmp.eq.s32.totalorder %s6700_s19, 1  ;;  %s6533_s1 = smov [#allocation13]  }
0x3538   : > { %s4730_s30 = sshll.u32 %s6533_s1, 4  ;;  %s4731_s30 = int_to_ptr.vmem [resolvable:$true] %s4730_s30 }
0x3539   : > { %s6435_s11 = scalar_lea.vmem %s4731_s30, 128  ;;  %p6442_p1 = scmp.lt.s32.totalorder %s4731_s30, %s4731_s30 }
0x353a   : > { %p6436_p3 = scmp.ne.s32.totalorder %s4731_s30, %s6435_s11  ;;  %p6443_p5 = scmp.lt.s32.totalorder %s6435_s11, %s6435_s11 }
0x353c   : > { %p6437_p12 = pnand %p6436_p3, %p6137_p0  ;;  %p6444_p7 = por %p6443_p5, %p6442_p1 }
0x353e   : > { %p6438_p8 = pneg %p6437_p12 }
0x3540   : > { %p6445_p2 = pnand %p6444_p7, %p6438_p8 }
0x3542   : > { %6448 = shalt.err (!%p6445_p2)
}
0x3543   : > { %s6449_s3 = scalar_lea.hbm %s7901_s8, 128 }
0x3544   : > { %p6450_p10 = scmp.ne.s32.totalorder %s7901_s8, %s6449_s3  ;;  %p6455_p9 = scmp.lt.u32.totalorder %s6449_s3, %s7901_s8 }
0x3546   : > { %p6451_p13 = pnand %p6450_p10, %p6137_p0 }
0x3548   : > { %p6452_p6 = pneg %p6451_p13 }
0x354a   : > { %p6457_p4 = pnand %p6455_p9, %p6452_p6 }
0x354c   : > { %6460 = shalt.err (!%p6457_p4)
}
0x354d   : > { %6111 = dma.vmem_to_hbm [thread:$0]  (%p6137_p0), %s4731_s30, 128, %s7901_s8, [#allocation4]  }
0x354e   : > { %6496 = dma.done.wait (%p6137_p0), [#allocation4], 128  }
0x354f   : > { %6498 = vsyncadd (%p6137_p0), [#allocation4], 4294967168 }
0x3550 PF: > { %s7935_s30 = sld [smem:[#allocation27_spill]]  ;;  %s7936_s16 = sld [smem:[#allocation26_spill]] }
0x3551   : > { %s7937_s29 = sld [smem:[#allocation28_spill]]  ;;  %s7938_s27 = smov %s6505_s28 }
0x3556   : > { %p26_p11 = scmp.ge.s32.totalorder %s7935_s30, 4   ;;  %s7939_s28 = smov %s7936_s16 }
0x3558   :  { %28 = sbr.rel (!%p26_p11) target bundleno = 12 (0xc), region = 186 }
0x355f   :  { %4743 = vsyncpa [#allocation3], 1 }
0x3560   :  { %4745 = vsyncpa [#allocation3 + $0x1], 1 }
0x3561   :  { %4746 = vsyncpa [#allocation6], 1 }
0x3562   :  { %4748 = vsyncpa [#allocation6 + $0x1], 1 }
0x3563   :  { %4749 = vsyncpa [#allocation9], 1 }
0x3564   :  { %4751 = vsyncpa [#allocation9 + $0x1], 1 }
0x3565   :  { %4752 = vsyncpa [#allocation12], 1 }
0x3566   :  { %4754 = vsyncpa [#allocation12 + $0x1], 1 }
0x3567   :  { %4755 = vsyncpa [#allocation4], 1 }
0x3568   :  { %4757 = vsyncpa [#allocation4 + $0x1], 1 }

</bundles_post_ra>
